<compile_context>
chip_gen: v7x
topology: tpu7x:2x2x1
jax: 0.10.0
libtpu: 0.0.40
codegen_flags: <defaults>
</compile_context>

<pallas_src>
import functools

import jax
import jax.numpy as jnp
import numpy as np
from jax import lax
from jax.experimental import pallas as pl
from jax.experimental.pallas import tpu as pltpu

EPS = 1e-5  # nn.GroupNorm default eps


def _round_up(v, m):
    return (v + m - 1) // m * m


def _geom(D, H, W):
    """Geometry of the 'centered' layout: rows = (d, h) over the (D+2, H+2) grid,
    lanes = (w, c) over (W+2)*C.  HEADR zero rows in front / behind keep every
    (kd, kh) tap slice in bounds; HEADR is 16-aligned so the center tap is
    bf16-sublane aligned."""
    Dp, Hp, Wp = D + 2, H + 2, W + 2
    R = Dp * Hp
    HEADR = _round_up(Hp + 1, 16)
    return Dp, Hp, Wp, R, HEADR, R + 2 * HEADR


def _band_conv3(w, Wp):
    """w: (3,3,3,cin,cout) f32 -> (9, Wp*cin, Wp*cout).

    Folds the kw dimension of the 3x3x3 conv into a block-banded lane-mixing
    matrix (output lane group w0 gathers input lane groups w0-1, w0, w0+1), so
    the whole W axis plus channels ride the MXU K/N dims in one matmul per
    (kd, kh) tap."""
    KD, KH, KW, cin, cout = w.shape
    band = np.zeros((KD * KH, Wp, cin, Wp, cout), np.float32)
    for kd in range(KD):
        for kh in range(KH):
            t = kd * KH + kh
            for kw in range(KW):
                for w0 in range(Wp):
                    w_in = w0 + kw - (KW // 2)
                    if 0 <= w_in < Wp:
                        band[t, w_in, :, w0, :] = w[kd, kh, kw]
    return band.reshape(KD * KH, Wp * cin, Wp * cout)


def _pick_vmem_limit():
    """Generation-aware VMEM limit (fallback: 32 MiB default scoped limit)."""
    try:
        info = pltpu.get_tpu_info()
        cap = getattr(info, "vmem_capacity_bytes", None)
        if cap:
            return int(min(cap * 3 // 4, 100 * 1024 * 1024))
    except Exception:
        pass
    return 32 * 1024 * 1024


# ---------------------------------------------------------------- kernel ----

def _resblock_kernel(x_ref, w1_ref, b1_ref, g1_ref, bt1_ref,
                     w2_ref, b2_ref, g2_ref, bt2_ref,
                     ws_ref, bs_ref, gs_ref, bts_ref,
                     out_ref, y1_ref, *, dims, cout):
    # x_ref  : (1, LROWS, Wp*cin) bf16  centered layout, zero halo/head/tail
    # w1_ref : (9, Wp*cin, Wp*cout) bf16   banded 3x3x3 weights (kw folded)
    # w2_ref : (9, Wp*cout, Wp*cout) bf16
    # ws_ref : (Wp*cin, Wp*cout) bf16      block-diagonal 1x1x1 shortcut weights
    # vectors: (1, Wp*cout) f32            bias / GN gamma / GN beta, tiled over w
    # out_ref: (1, R, Wp*cout) f32
    # y1_ref : (LROWS, Wp*cout) bf16 VMEM scratch (sandwich1 output, zero halo)
    D, H, W = dims
    _, Hp, Wp, R, HEADR, LROWS = _geom(D, H, W)
    WpC = Wp * cout
    n_valid = float(D * H * W * cout)

    # Valid-voxel mask generated in-kernel (row r -> (d, h), lane l -> (w, c)).
    # Uses float arithmetic for the `mod Hp` part (exact for these small ints).
    rf = lax.broadcasted_iota(jnp.int32, (R, WpC), 0).astype(jnp.float32)
    lf = lax.broadcasted_iota(jnp.int32, (R, WpC), 1).astype(jnp.float32)
    h0 = rf - jnp.floor(rf / Hp) * Hp
    mask = ((rf < D * Hp) & (h0 < H) & (lf < W * cout)).astype(jnp.float32)

    def relu_gn(acc, b_ref, g_ref, bt_ref):
        # ReLU then GroupNorm(1, C): stats over the valid (masked) voxels only.
        y = jnp.maximum(acc + b_ref[...], 0.0)
        ym = y * mask
        s1 = jnp.sum(ym)
        s2 = jnp.sum(ym * ym)
        mean = s1 / n_valid
        var = jnp.maximum(s2 / n_valid - mean * mean, 0.0)
        # TODO(synk): switch to per-channel / two-pass partial sums when spatial
        # tiling is added (one-pass E[x^2]-E[x]^2 loses precision on big volumes).
        y = (y - mean) * lax.rsqrt(var + EPS)
        return y * g_ref[...] + bt_ref[...]

    def conv9(load, w_ref):
        # 9 (kd, kh) taps; kw is folded into the banded weights.  Accumulate in
        # a jnp value (single materialization), bf16 MXU / f32 accumulation.
        acc = None
        t = 0
        for kd in range(3):
            for kh in range(3):
                off = HEADR + (kd - 1) * Hp + (kh - 1)
                p = jnp.dot(load(off), w_ref[t],
                            preferred_element_type=jnp.float32)
                acc = p if acc is None else acc + p
                t += 1
        return acc

    # ---- sandwich1: 3x3x3 conv -> ReLU -> GroupNorm(1, C) --------------------
    acc1 = conv9(lambda off: x_ref[0, pl.ds(off, R), :], w1_ref)
    y1 = relu_gn(acc1, b1_ref, g1_ref, bt1_ref) * mask

    # Stash sandwich1 output in VMEM (bf16, centered layout, zero halo) so the
    # second conv can consume it without any HBM round trip.
    y1_ref[pl.ds(0, HEADR), :] = jnp.zeros((HEADR, WpC), jnp.bfloat16)
    y1_ref[pl.ds(HEADR, R), :] = y1.astype(jnp.bfloat16)
    y1_ref[pl.ds(HEADR + R, HEADR), :] = jnp.zeros((HEADR, WpC), jnp.bfloat16)

    # ---- shortcut sandwich: 1x1x1 conv -> ReLU -> GroupNorm ------------------
    xs = jnp.dot(x_ref[0, pl.ds(HEADR, R), :], ws_ref[...],
                 preferred_element_type=jnp.float32)
    xs = relu_gn(xs, bs_ref, gs_ref, bts_ref)

    # ---- sandwich2 + fused residual add --------------------------------------
    acc2 = conv9(lambda off: y1_ref[pl.ds(off, R), :], w2_ref)
    y2 = relu_gn(acc2, b2_ref, g2_ref, bt2_ref)
    out_ref[0] = ((y2 + xs) * mask).astype(out_ref.dtype)


# ---------------------------------------------------------------- wrapper ---

class ResBlockPallas:
    """Pallas port of resblock(input_channels, output_channels, norm='gn')."""

    def __init__(self, input_channels, output_channels, norm='gn',
                 doTransform_on_short=True, key=None):
        if norm != 'gn':
            raise NotImplementedError("only norm='gn' (GroupNorm(1, C)) is implemented")
        if not doTransform_on_short:
            raise NotImplementedError("only doTransform_on_short=True is implemented")
        key = jax.random.PRNGKey(0) if key is None else key
        ks = jax.random.split(key, 12)
        cin, cout = input_channels, output_channels
        self.cin, self.cout = cin, cout

        def uni(k, shape, fan):
            b = 1.0 / np.sqrt(fan)
            return np.asarray(jax.random.uniform(k, shape, jnp.float32, -b, b))

        # Raw PyTorch-style parameters (numpy, f32); packed/bf16 forms are cached.
        self.w1 = uni(ks[0], (3, 3, 3, cin, cout), 27 * cin)
        self.b1 = uni(ks[1], (cout,), 27 * cin)
        self.w2 = uni(ks[2], (3, 3, 3, cout, cout), 27 * cout)
        self.b2 = uni(ks[3], (cout,), 27 * cout)
        self.ws = uni(ks[4], (cin, cout), cin)          # 1x1x1 shortcut conv
        self.bs = uni(ks[5], (cout,), cin)
        nrm = lambda k: np.asarray(jax.random.normal(k, (cout,), jnp.float32))
        # GroupNorm affine params (perturbed from 1/0 so the affine path is tested).
        self.g1, self.bt1 = 1.0 + 0.1 * nrm(ks[6]), 0.1 * nrm(ks[7])
        self.g2, self.bt2 = 1.0 + 0.1 * nrm(ks[8]), 0.1 * nrm(ks[9])
        self.gs, self.bts = 1.0 + 0.1 * nrm(ks[10]), 0.1 * nrm(ks[11])
        self._cache = {}

    def _pack(self, Wp):
        """Banded/tiled bf16 parameter pack, cached per spatial width Wp."""
        if Wp not in self._cache:
            tile = lambda v: jnp.asarray(np.tile(v, Wp)[None, :], jnp.float32)
            self._cache[Wp] = dict(
                w1=jnp.asarray(_band_conv3(self.w1, Wp), jnp.bfloat16),
                w2=jnp.asarray(_band_conv3(self.w2, Wp), jnp.bfloat16),
                ws=jnp.asarray(np.kron(np.eye(Wp, dtype=np.float32), self.ws),
                               jnp.bfloat16),
                b1=tile(self.b1), g1=tile(self.g1), bt1=tile(self.bt1),
                b2=tile(self.b2), g2=tile(self.g2), bt2=tile(self.bt2),
                bs=tile(self.bs), gs=tile(self.gs), bts=tile(self.bts))
        return self._cache[Wp]

    def __call__(self, x_ncdhw):
        N, cin, D, H, W = x_ncdhw.shape
        assert cin == self.cin
        cout = self.cout
        Dp, Hp, Wp, R, HEADR, LROWS = _geom(D, H, W)
        WpCi, WpCo = Wp * cin, Wp * cout

        # Centered lane-dense layout: rows = (d, h) over (Dp, Hp), lanes = (w, c)
        # over Wp*C; halo/head/tail entries are zero.  Cast to bf16 once here.
        x = jnp.transpose(x_ncdhw, (0, 2, 3, 4, 1)).astype(jnp.float32)  # NDHWC
        xp = jnp.pad(x, ((0, 0), (0, 2), (0, 2), (0, 2), (0, 0)))
        x_rows = xp.reshape(N, R, WpCi)
        x_l = jnp.pad(x_rows, ((0, 0), (HEADR, HEADR), (0, 0))).astype(jnp.bfloat16)

        p = self._pack(Wp)
        vec = pl.BlockSpec((1, WpCo), lambda n: (0, 0))

        out_rows = pl.pallas_call(
            functools.partial(_resblock_kernel, dims=(D, H, W), cout=cout),
            out_shape=jax.ShapeDtypeStruct((N, R, WpCo), jnp.float32),
            grid=(N,),
            in_specs=[
                pl.BlockSpec((1, LROWS, WpCi), lambda n: (n, 0, 0)),
                pl.BlockSpec((9, WpCi, WpCo), lambda n: (0, 0, 0)),
                vec, vec, vec,
                pl.BlockSpec((9, WpCo, WpCo), lambda n: (0, 0, 0)),
                vec, vec, vec,
                pl.BlockSpec((WpCi, WpCo), lambda n: (0, 0)),
                vec, vec, vec,
            ],
            out_specs=pl.BlockSpec((1, R, WpCo), lambda n: (n, 0, 0)),
            scratch_shapes=[pltpu.VMEM((LROWS, WpCo), jnp.bfloat16)],
            compiler_params=pltpu.CompilerParams(
                dimension_semantics=("parallel",),
                vmem_limit_bytes=_pick_vmem_limit()),
        )(x_l, p['w1'], p['b1'], p['g1'], p['bt1'],
          p['w2'], p['b2'], p['g2'], p['bt2'],
          p['ws'], p['bs'], p['gs'], p['bts'])

        out = out_rows.reshape(N, Dp, Hp, Wp, cout)[:, :D, :H, :W, :]
        return jnp.transpose(out, (0, 4, 1, 2, 3))          # back to NCDHW


# --------------------------------------------------------------- reference --

def _reference(x_ncdhw, m):
    # Pure-JAX reference; conv inputs/weights quantized to bf16 (f32 accumulate)
    # to mirror the kernel's bf16 MXU path.
    q = lambda a: jnp.asarray(a).astype(jnp.bfloat16).astype(jnp.float32)
    dn = ('NDHWC', 'DHWIO', 'NDHWC')
    x = jnp.transpose(x_ncdhw, (0, 2, 3, 4, 1)).astype(jnp.float32)

    def gn(y, g, b):
        mu = jnp.mean(y, axis=(1, 2, 3, 4), keepdims=True)
        var = jnp.mean((y - mu) ** 2, axis=(1, 2, 3, 4), keepdims=True)
        return (y - mu) * lax.rsqrt(var + EPS) * jnp.asarray(g) + jnp.asarray(b)

    def sandwich3(z, w, b, g, bt):
        y = lax.conv_general_dilated(q(z), q(w), (1, 1, 1), 'SAME',
                                     dimension_numbers=dn,
                                     precision=lax.Precision.HIGHEST)
        return gn(jnp.maximum(y + jnp.asarray(b), 0.0), g, bt)

    s = jnp.einsum('ndhwc,co->ndhwo', q(x), q(m.ws),
                   precision=lax.Precision.HIGHEST)
    x_short = gn(jnp.maximum(s + jnp.asarray(m.bs), 0.0), m.gs, m.bts)
    y = sandwich3(x, m.w1, m.b1, m.g1, m.bt1)
    y = sandwich3(y, m.w2, m.b2, m.g2, m.bt2)
    return jnp.transpose(y + x_short, (0, 4, 1, 2, 3))


if __name__ == "__main__":
    key = jax.random.PRNGKey(0)
    kx, kp = jax.random.split(key)
    N, Cin, Cout, D, H, W = 2, 4, 16, 8, 8, 8
    x = jax.random.normal(kx, (N, Cin, D, H, W), jnp.float32)

    model = ResBlockPallas(Cin, Cout, norm='gn', key=kp)
    out = model(x)
    out = jax.block_until_ready(out)
    assert out.shape == (N, Cout, D, H, W)

    ref = _reference(x, model)
    np.testing.assert_allclose(np.asarray(out), np.asarray(ref),
                               atol=5e-3, rtol=5e-3)

    print("KERNEL_OK")
</pallas_src>

<mosaic_0001>
module attributes {stable_mosaic.version = 11 : i64} {
  func.func @_resblock_kernel(%arg0: i32, %arg1: memref<1x132x40xbf16, #tpu.memory_space<vmem>>, %arg2: memref<9x40x160xbf16, #tpu.memory_space<vmem>>, %arg3: memref<1x160xf32, #tpu.memory_space<vmem>>, %arg4: memref<1x160xf32, #tpu.memory_space<vmem>>, %arg5: memref<1x160xf32, #tpu.memory_space<vmem>>, %arg6: memref<9x160x160xbf16, #tpu.memory_space<vmem>>, %arg7: memref<1x160xf32, #tpu.memory_space<vmem>>, %arg8: memref<1x160xf32, #tpu.memory_space<vmem>>, %arg9: memref<1x160xf32, #tpu.memory_space<vmem>>, %arg10: memref<40x160xbf16, #tpu.memory_space<vmem>>, %arg11: memref<1x160xf32, #tpu.memory_space<vmem>>, %arg12: memref<1x160xf32, #tpu.memory_space<vmem>>, %arg13: memref<1x160xf32, #tpu.memory_space<vmem>>, %arg14: memref<1x100x160xf32, #tpu.memory_space<vmem>>, %arg15: memref<132x160xbf16, #tpu.memory_space<vmem>>) attributes {dimension_semantics = [#tpu.dimension_semantics<parallel>], iteration_bounds = array<i64: 2>, scalar_prefetch = 0 : i64, scratch_operands = 1 : i64, tpu.core_type = #tpu.core_type<tc>, window_params = [{transform_indices = @transform_0, window_bounds = array<i64: 1, 132, 40>}, {pipeline_mode = #tpu.pipeline_mode<synchronous>, transform_indices = @transform_1, window_bounds = array<i64: 9, 40, 160>}, {pipeline_mode = #tpu.pipeline_mode<synchronous>, transform_indices = @transform_2, window_bounds = array<i64: 1, 160>}, {pipeline_mode = #tpu.pipeline_mode<synchronous>, transform_indices = @transform_3, window_bounds = array<i64: 1, 160>}, {pipeline_mode = #tpu.pipeline_mode<synchronous>, transform_indices = @transform_4, window_bounds = array<i64: 1, 160>}, {pipeline_mode = #tpu.pipeline_mode<synchronous>, transform_indices = @transform_5, window_bounds = array<i64: 9, 160, 160>}, {pipeline_mode = #tpu.pipeline_mode<synchronous>, transform_indices = @transform_6, window_bounds = array<i64: 1, 160>}, {pipeline_mode = #tpu.pipeline_mode<synchronous>, transform_indices = @transform_7, window_bounds = array<i64: 1, 160>}, {pipeline_mode = #tpu.pipeline_mode<synchronous>, transform_indices = @transform_8, window_bounds = array<i64: 1, 160>}, {pipeline_mode = #tpu.pipeline_mode<synchronous>, transform_indices = @transform_9, window_bounds = array<i64: 40, 160>}, {pipeline_mode = #tpu.pipeline_mode<synchronous>, transform_indices = @transform_10, window_bounds = array<i64: 1, 160>}, {pipeline_mode = #tpu.pipeline_mode<synchronous>, transform_indices = @transform_11, window_bounds = array<i64: 1, 160>}, {pipeline_mode = #tpu.pipeline_mode<synchronous>, transform_indices = @transform_12, window_bounds = array<i64: 1, 160>}, {transform_indices = @transform_13, window_bounds = array<i64: 1, 100, 160>}]} {
    %0 = tpu.iota {dimensions = array<i32: 0>} : vector<100x160xi32>
    %1 = arith.sitofp %0 : vector<100x160xi32> to vector<100x160xf32>
    %2 = tpu.iota {dimensions = array<i32: 1>} : vector<100x160xi32>
    %3 = arith.sitofp %2 : vector<100x160xi32> to vector<100x160xf32>
    %cst = arith.constant 1.000000e+01 : f32
    %4 = vector.broadcast %cst : f32 to vector<100x160xf32>
    %5 = arith.divf %1, %4 : vector<100x160xf32>
    %6 = math.floor %5 : vector<100x160xf32>
    %cst_0 = arith.constant 1.000000e+01 : f32
    %7 = vector.broadcast %cst_0 : f32 to vector<100x160xf32>
    %8 = arith.mulf %6, %7 : vector<100x160xf32>
    %9 = arith.subf %1, %8 : vector<100x160xf32>
    %cst_1 = arith.constant 8.000000e+01 : f32
    %10 = vector.broadcast %cst_1 : f32 to vector<100x160xf32>
    %11 = arith.cmpf olt, %1, %10 : vector<100x160xf32>
    %cst_2 = arith.constant 8.000000e+00 : f32
    %12 = vector.broadcast %cst_2 : f32 to vector<100x160xf32>
    %13 = arith.cmpf olt, %9, %12 : vector<100x160xf32>
    %14 = arith.andi %11, %13 : vector<100x160xi1>
    %cst_3 = arith.constant 1.280000e+02 : f32
    %15 = vector.broadcast %cst_3 : f32 to vector<100x160xf32>
    %16 = arith.cmpf olt, %3, %15 : vector<100x160xf32>
    %17 = arith.andi %14, %16 : vector<100x160xi1>
    %18 = arith.extui %17 : vector<100x160xi1> to vector<100x160xi32>
    %19 = arith.sitofp %18 : vector<100x160xi32> to vector<100x160xf32>
    %c0 = arith.constant 0 : index
    %c5 = arith.constant 5 : index
    %c0_4 = arith.constant 0 : index
    %20 = vector.load %arg1[%c0, %c5, %c0_4] : memref<1x132x40xbf16, #tpu.memory_space<vmem>>, vector<1x100x40xbf16>
    %21 = vector.shape_cast %20 : vector<1x100x40xbf16> to vector<100x40xbf16>
    %c0_5 = arith.constant 0 : index
    %c0_6 = arith.constant 0 : index
    %c0_7 = arith.constant 0 : index
    %22 = vector.load %arg2[%c0_5, %c0_6, %c0_7] : memref<9x40x160xbf16, #tpu.memory_space<vmem>>, vector<1x40x160xbf16>
    %23 = vector.shape_cast %22 : vector<1x40x160xbf16> to vector<40x160xbf16>
    %cst_8 = arith.constant dense<0.000000e+00> : vector<100x160xf32>
    %24 = tpu.matmul %21, %23, %cst_8 {dimension_numbers = #tpu.dot_dimension_numbers<[1], [0], [0], [1], [0, 0, 1, 1], [], []>} : vector<100x40xbf16>, vector<40x160xbf16>, vector<100x160xf32> -> vector<100x160xf32>
    %c0_9 = arith.constant 0 : index
    %c6 = arith.constant 6 : index
    %c0_10 = arith.constant 0 : index
    %25 = vector.load %arg1[%c0_9, %c6, %c0_10] : memref<1x132x40xbf16, #tpu.memory_space<vmem>>, vector<1x100x40xbf16>
    %26 = vector.shape_cast %25 : vector<1x100x40xbf16> to vector<100x40xbf16>
    %c1 = arith.constant 1 : index
    %c0_11 = arith.constant 0 : index
    %c0_12 = arith.constant 0 : index
    %27 = vector.load %arg2[%c1, %c0_11, %c0_12] : memref<9x40x160xbf16, #tpu.memory_space<vmem>>, vector<1x40x160xbf16>
    %28 = vector.shape_cast %27 : vector<1x40x160xbf16> to vector<40x160xbf16>
    %cst_13 = arith.constant dense<0.000000e+00> : vector<100x160xf32>
    %29 = tpu.matmul %26, %28, %cst_13 {dimension_numbers = #tpu.dot_dimension_numbers<[1], [0], [0], [1], [0, 0, 1, 1], [], []>} : vector<100x40xbf16>, vector<40x160xbf16>, vector<100x160xf32> -> vector<100x160xf32>
    %30 = arith.addf %24, %29 : vector<100x160xf32>
    %c0_14 = arith.constant 0 : index
    %c7 = arith.constant 7 : index
    %c0_15 = arith.constant 0 : index
    %31 = vector.load %arg1[%c0_14, %c7, %c0_15] : memref<1x132x40xbf16, #tpu.memory_space<vmem>>, vector<1x100x40xbf16>
    %32 = vector.shape_cast %31 : vector<1x100x40xbf16> to vector<100x40xbf16>
    %c2 = arith.constant 2 : index
    %c0_16 = arith.constant 0 : index
    %c0_17 = arith.constant 0 : index
    %33 = vector.load %arg2[%c2, %c0_16, %c0_17] : memref<9x40x160xbf16, #tpu.memory_space<vmem>>, vector<1x40x160xbf16>
    %34 = vector.shape_cast %33 : vector<1x40x160xbf16> to vector<40x160xbf16>
    %cst_18 = arith.constant dense<0.000000e+00> : vector<100x160xf32>
    %35 = tpu.matmul %32, %34, %cst_18 {dimension_numbers = #tpu.dot_dimension_numbers<[1], [0], [0], [1], [0, 0, 1, 1], [], []>} : vector<100x40xbf16>, vector<40x160xbf16>, vector<100x160xf32> -> vector<100x160xf32>
    %36 = arith.addf %30, %35 : vector<100x160xf32>
    %c0_19 = arith.constant 0 : index
    %c15 = arith.constant 15 : index
    %c0_20 = arith.constant 0 : index
    %37 = vector.load %arg1[%c0_19, %c15, %c0_20] : memref<1x132x40xbf16, #tpu.memory_space<vmem>>, vector<1x100x40xbf16>
    %38 = vector.shape_cast %37 : vector<1x100x40xbf16> to vector<100x40xbf16>
    %c3 = arith.constant 3 : index
    %c0_21 = arith.constant 0 : index
    %c0_22 = arith.constant 0 : index
    %39 = vector.load %arg2[%c3, %c0_21, %c0_22] : memref<9x40x160xbf16, #tpu.memory_space<vmem>>, vector<1x40x160xbf16>
    %40 = vector.shape_cast %39 : vector<1x40x160xbf16> to vector<40x160xbf16>
    %cst_23 = arith.constant dense<0.000000e+00> : vector<100x160xf32>
    %41 = tpu.matmul %38, %40, %cst_23 {dimension_numbers = #tpu.dot_dimension_numbers<[1], [0], [0], [1], [0, 0, 1, 1], [], []>} : vector<100x40xbf16>, vector<40x160xbf16>, vector<100x160xf32> -> vector<100x160xf32>
    %42 = arith.addf %36, %41 : vector<100x160xf32>
    %c0_24 = arith.constant 0 : index
    %c16 = arith.constant 16 : index
    %c0_25 = arith.constant 0 : index
    %43 = vector.load %arg1[%c0_24, %c16, %c0_25] : memref<1x132x40xbf16, #tpu.memory_space<vmem>>, vector<1x100x40xbf16>
    %44 = vector.shape_cast %43 : vector<1x100x40xbf16> to vector<100x40xbf16>
    %c4 = arith.constant 4 : index
    %c0_26 = arith.constant 0 : index
    %c0_27 = arith.constant 0 : index
    %45 = vector.load %arg2[%c4, %c0_26, %c0_27] : memref<9x40x160xbf16, #tpu.memory_space<vmem>>, vector<1x40x160xbf16>
    %46 = vector.shape_cast %45 : vector<1x40x160xbf16> to vector<40x160xbf16>
    %cst_28 = arith.constant dense<0.000000e+00> : vector<100x160xf32>
    %47 = tpu.matmul %44, %46, %cst_28 {dimension_numbers = #tpu.dot_dimension_numbers<[1], [0], [0], [1], [0, 0, 1, 1], [], []>} : vector<100x40xbf16>, vector<40x160xbf16>, vector<100x160xf32> -> vector<100x160xf32>
    %48 = arith.addf %42, %47 : vector<100x160xf32>
    %c0_29 = arith.constant 0 : index
    %c17 = arith.constant 17 : index
    %c0_30 = arith.constant 0 : index
    %49 = vector.load %arg1[%c0_29, %c17, %c0_30] : memref<1x132x40xbf16, #tpu.memory_space<vmem>>, vector<1x100x40xbf16>
    %50 = vector.shape_cast %49 : vector<1x100x40xbf16> to vector<100x40xbf16>
    %c5_31 = arith.constant 5 : index
    %c0_32 = arith.constant 0 : index
    %c0_33 = arith.constant 0 : index
    %51 = vector.load %arg2[%c5_31, %c0_32, %c0_33] : memref<9x40x160xbf16, #tpu.memory_space<vmem>>, vector<1x40x160xbf16>
    %52 = vector.shape_cast %51 : vector<1x40x160xbf16> to vector<40x160xbf16>
    %cst_34 = arith.constant dense<0.000000e+00> : vector<100x160xf32>
    %53 = tpu.matmul %50, %52, %cst_34 {dimension_numbers = #tpu.dot_dimension_numbers<[1], [0], [0], [1], [0, 0, 1, 1], [], []>} : vector<100x40xbf16>, vector<40x160xbf16>, vector<100x160xf32> -> vector<100x160xf32>
    %54 = arith.addf %48, %53 : vector<100x160xf32>
    %c0_35 = arith.constant 0 : index
    %c25 = arith.constant 25 : index
    %c0_36 = arith.constant 0 : index
    %55 = vector.load %arg1[%c0_35, %c25, %c0_36] : memref<1x132x40xbf16, #tpu.memory_space<vmem>>, vector<1x100x40xbf16>
    %56 = vector.shape_cast %55 : vector<1x100x40xbf16> to vector<100x40xbf16>
    %c6_37 = arith.constant 6 : index
    %c0_38 = arith.constant 0 : index
    %c0_39 = arith.constant 0 : index
    %57 = vector.load %arg2[%c6_37, %c0_38, %c0_39] : memref<9x40x160xbf16, #tpu.memory_space<vmem>>, vector<1x40x160xbf16>
    %58 = vector.shape_cast %57 : vector<1x40x160xbf16> to vector<40x160xbf16>
    %cst_40 = arith.constant dense<0.000000e+00> : vector<100x160xf32>
    %59 = tpu.matmul %56, %58, %cst_40 {dimension_numbers = #tpu.dot_dimension_numbers<[1], [0], [0], [1], [0, 0, 1, 1], [], []>} : vector<100x40xbf16>, vector<40x160xbf16>, vector<100x160xf32> -> vector<100x160xf32>
    %60 = arith.addf %54, %59 : vector<100x160xf32>
    %c0_41 = arith.constant 0 : index
    %c26 = arith.constant 26 : index
    %c0_42 = arith.constant 0 : index
    %61 = vector.load %arg1[%c0_41, %c26, %c0_42] : memref<1x132x40xbf16, #tpu.memory_space<vmem>>, vector<1x100x40xbf16>
    %62 = vector.shape_cast %61 : vector<1x100x40xbf16> to vector<100x40xbf16>
    %c7_43 = arith.constant 7 : index
    %c0_44 = arith.constant 0 : index
    %c0_45 = arith.constant 0 : index
    %63 = vector.load %arg2[%c7_43, %c0_44, %c0_45] : memref<9x40x160xbf16, #tpu.memory_space<vmem>>, vector<1x40x160xbf16>
    %64 = vector.shape_cast %63 : vector<1x40x160xbf16> to vector<40x160xbf16>
    %cst_46 = arith.constant dense<0.000000e+00> : vector<100x160xf32>
    %65 = tpu.matmul %62, %64, %cst_46 {dimension_numbers = #tpu.dot_dimension_numbers<[1], [0], [0], [1], [0, 0, 1, 1], [], []>} : vector<100x40xbf16>, vector<40x160xbf16>, vector<100x160xf32> -> vector<100x160xf32>
    %66 = arith.addf %60, %65 : vector<100x160xf32>
    %c0_47 = arith.constant 0 : index
    %c27 = arith.constant 27 : index
    %c0_48 = arith.constant 0 : index
    %67 = vector.load %arg1[%c0_47, %c27, %c0_48] : memref<1x132x40xbf16, #tpu.memory_space<vmem>>, vector<1x100x40xbf16>
    %68 = vector.shape_cast %67 : vector<1x100x40xbf16> to vector<100x40xbf16>
    %c8 = arith.constant 8 : index
    %c0_49 = arith.constant 0 : index
    %c0_50 = arith.constant 0 : index
    %69 = vector.load %arg2[%c8, %c0_49, %c0_50] : memref<9x40x160xbf16, #tpu.memory_space<vmem>>, vector<1x40x160xbf16>
    %70 = vector.shape_cast %69 : vector<1x40x160xbf16> to vector<40x160xbf16>
    %cst_51 = arith.constant dense<0.000000e+00> : vector<100x160xf32>
    %71 = tpu.matmul %68, %70, %cst_51 {dimension_numbers = #tpu.dot_dimension_numbers<[1], [0], [0], [1], [0, 0, 1, 1], [], []>} : vector<100x40xbf16>, vector<40x160xbf16>, vector<100x160xf32> -> vector<100x160xf32>
    %72 = arith.addf %66, %71 : vector<100x160xf32>
    %c0_52 = arith.constant 0 : index
    %c0_53 = arith.constant 0 : index
    %73 = vector.load %arg3[%c0_52, %c0_53] : memref<1x160xf32, #tpu.memory_space<vmem>>, vector<1x160xf32>
    %74 = vector.broadcast %73 : vector<1x160xf32> to vector<100x160xf32>
    %75 = arith.addf %72, %74 : vector<100x160xf32>
    %cst_54 = arith.constant 0.000000e+00 : f32
    %76 = vector.broadcast %cst_54 : f32 to vector<100x160xf32>
    %77 = arith.maximumf %75, %76 : vector<100x160xf32>
    %78 = arith.mulf %77, %19 : vector<100x160xf32>
    %79 = vector.shape_cast %78 : vector<100x160xf32> to vector<1x100x160xf32>
    %cst_55 = arith.constant dense<0.000000e+00> : vector<1xf32>
    %80 = vector.multi_reduction <add>, %79, %cst_55 [1, 2] : vector<1x100x160xf32> to vector<1xf32>
    %81 = vector.shape_cast %80 : vector<1xf32> to vector<1x1x1xf32>
    %82 = vector.extract %81[0, 0, 0] : f32 from vector<1x1x1xf32>
    %83 = arith.mulf %78, %78 : vector<100x160xf32>
    %84 = vector.shape_cast %83 : vector<100x160xf32> to vector<1x100x160xf32>
    %cst_56 = arith.constant dense<0.000000e+00> : vector<1xf32>
    %85 = vector.multi_reduction <add>, %84, %cst_56 [1, 2] : vector<1x100x160xf32> to vector<1xf32>
    %86 = vector.shape_cast %85 : vector<1xf32> to vector<1x1x1xf32>
    %87 = vector.extract %86[0, 0, 0] : f32 from vector<1x1x1xf32>
    %cst_57 = arith.constant 8.192000e+03 : f32
    %88 = arith.divf %82, %cst_57 : f32
    %cst_58 = arith.constant 8.192000e+03 : f32
    %89 = arith.divf %87, %cst_58 : f32
    %90 = arith.mulf %88, %88 : f32
    %91 = arith.subf %89, %90 : f32
    %cst_59 = arith.constant 0.000000e+00 : f32
    %92 = arith.maximumf %91, %cst_59 : f32
    %93 = vector.broadcast %88 : f32 to vector<100x160xf32>
    %94 = arith.subf %77, %93 : vector<100x160xf32>
    %cst_60 = arith.constant 9.99999974E-6 : f32
    %95 = arith.addf %92, %cst_60 : f32
    %96 = math.rsqrt %95 : f32
    %97 = vector.broadcast %96 : f32 to vector<100x160xf32>
    %98 = arith.mulf %94, %97 : vector<100x160xf32>
    %c0_61 = arith.constant 0 : index
    %c0_62 = arith.constant 0 : index
    %99 = vector.load %arg4[%c0_61, %c0_62] : memref<1x160xf32, #tpu.memory_space<vmem>>, vector<1x160xf32>
    %100 = vector.broadcast %99 : vector<1x160xf32> to vector<100x160xf32>
    %101 = arith.mulf %98, %100 : vector<100x160xf32>
    %c0_63 = arith.constant 0 : index
    %c0_64 = arith.constant 0 : index
    %102 = vector.load %arg5[%c0_63, %c0_64] : memref<1x160xf32, #tpu.memory_space<vmem>>, vector<1x160xf32>
    %103 = vector.broadcast %102 : vector<1x160xf32> to vector<100x160xf32>
    %104 = arith.addf %101, %103 : vector<100x160xf32>
    %105 = arith.mulf %104, %19 : vector<100x160xf32>
    %cst_65 = arith.constant 0.000000e+00 : bf16
    %106 = vector.broadcast %cst_65 : bf16 to vector<16x160xbf16>
    %c0_66 = arith.constant 0 : index
    %c0_67 = arith.constant 0 : index
    %107 = vector.load %arg15[%c0_66, %c0_67] : memref<132x160xbf16, #tpu.memory_space<vmem>>, vector<16x160xbf16>
    tpu.vector_store %arg15[%c0_66, %c0_67], %106 {strides = array<i32>} : memref<132x160xbf16, #tpu.memory_space<vmem>>, vector<16x160xbf16>,
    %108 = arith.truncf %105 : vector<100x160xf32> to vector<100x160xbf16>
    %c16_68 = arith.constant 16 : index
    %c0_69 = arith.constant 0 : index
    %109 = vector.load %arg15[%c16_68, %c0_69] : memref<132x160xbf16, #tpu.memory_space<vmem>>, vector<100x160xbf16>
    tpu.vector_store %arg15[%c16_68, %c0_69], %108 {strides = array<i32>} : memref<132x160xbf16, #tpu.memory_space<vmem>>, vector<100x160xbf16>,
    %cst_70 = arith.constant 0.000000e+00 : bf16
    %110 = vector.broadcast %cst_70 : bf16 to vector<16x160xbf16>
    %c116 = arith.constant 116 : index
    %c0_71 = arith.constant 0 : index
    %111 = vector.load %arg15[%c116, %c0_71] : memref<132x160xbf16, #tpu.memory_space<vmem>>, vector<16x160xbf16>
    tpu.vector_store %arg15[%c116, %c0_71], %110 {strides = array<i32>} : memref<132x160xbf16, #tpu.memory_space<vmem>>, vector<16x160xbf16>,
    %c0_72 = arith.constant 0 : index
    %c16_73 = arith.constant 16 : index
    %c0_74 = arith.constant 0 : index
    %112 = vector.load %arg1[%c0_72, %c16_73, %c0_74] : memref<1x132x40xbf16, #tpu.memory_space<vmem>>, vector<1x100x40xbf16>
    %113 = vector.shape_cast %112 : vector<1x100x40xbf16> to vector<100x40xbf16>
    %c0_75 = arith.constant 0 : index
    %c0_76 = arith.constant 0 : index
    %114 = vector.load %arg10[%c0_75, %c0_76] : memref<40x160xbf16, #tpu.memory_space<vmem>>, vector<40x160xbf16>
    %cst_77 = arith.constant dense<0.000000e+00> : vector<100x160xf32>
    %115 = tpu.matmul %113, %114, %cst_77 {dimension_numbers = #tpu.dot_dimension_numbers<[1], [0], [0], [1], [0, 0, 1, 1], [], []>} : vector<100x40xbf16>, vector<40x160xbf16>, vector<100x160xf32> -> vector<100x160xf32>
    %c0_78 = arith.constant 0 : index
    %c0_79 = arith.constant 0 : index
    %116 = vector.load %arg11[%c0_78, %c0_79] : memref<1x160xf32, #tpu.memory_space<vmem>>, vector<1x160xf32>
    %117 = vector.broadcast %116 : vector<1x160xf32> to vector<100x160xf32>
    %118 = arith.addf %115, %117 : vector<100x160xf32>
    %cst_80 = arith.constant 0.000000e+00 : f32
    %119 = vector.broadcast %cst_80 : f32 to vector<100x160xf32>
    %120 = arith.maximumf %118, %119 : vector<100x160xf32>
    %121 = arith.mulf %120, %19 : vector<100x160xf32>
    %122 = vector.shape_cast %121 : vector<100x160xf32> to vector<1x100x160xf32>
    %cst_81 = arith.constant dense<0.000000e+00> : vector<1xf32>
    %123 = vector.multi_reduction <add>, %122, %cst_81 [1, 2] : vector<1x100x160xf32> to vector<1xf32>
    %124 = vector.shape_cast %123 : vector<1xf32> to vector<1x1x1xf32>
    %125 = vector.extract %124[0, 0, 0] : f32 from vector<1x1x1xf32>
    %126 = arith.mulf %121, %121 : vector<100x160xf32>
    %127 = vector.shape_cast %126 : vector<100x160xf32> to vector<1x100x160xf32>
    %cst_82 = arith.constant dense<0.000000e+00> : vector<1xf32>
    %128 = vector.multi_reduction <add>, %127, %cst_82 [1, 2] : vector<1x100x160xf32> to vector<1xf32>
    %129 = vector.shape_cast %128 : vector<1xf32> to vector<1x1x1xf32>
    %130 = vector.extract %129[0, 0, 0] : f32 from vector<1x1x1xf32>
    %cst_83 = arith.constant 8.192000e+03 : f32
    %131 = arith.divf %125, %cst_83 : f32
    %cst_84 = arith.constant 8.192000e+03 : f32
    %132 = arith.divf %130, %cst_84 : f32
    %133 = arith.mulf %131, %131 : f32
    %134 = arith.subf %132, %133 : f32
    %cst_85 = arith.constant 0.000000e+00 : f32
    %135 = arith.maximumf %134, %cst_85 : f32
    %136 = vector.broadcast %131 : f32 to vector<100x160xf32>
    %137 = arith.subf %120, %136 : vector<100x160xf32>
    %cst_86 = arith.constant 9.99999974E-6 : f32
    %138 = arith.addf %135, %cst_86 : f32
    %139 = math.rsqrt %138 : f32
    %140 = vector.broadcast %139 : f32 to vector<100x160xf32>
    %141 = arith.mulf %137, %140 : vector<100x160xf32>
    %c0_87 = arith.constant 0 : index
    %c0_88 = arith.constant 0 : index
    %142 = vector.load %arg12[%c0_87, %c0_88] : memref<1x160xf32, #tpu.memory_space<vmem>>, vector<1x160xf32>
    %143 = vector.broadcast %142 : vector<1x160xf32> to vector<100x160xf32>
    %144 = arith.mulf %141, %143 : vector<100x160xf32>
    %c0_89 = arith.constant 0 : index
    %c0_90 = arith.constant 0 : index
    %145 = vector.load %arg13[%c0_89, %c0_90] : memref<1x160xf32, #tpu.memory_space<vmem>>, vector<1x160xf32>
    %146 = vector.broadcast %145 : vector<1x160xf32> to vector<100x160xf32>
    %147 = arith.addf %144, %146 : vector<100x160xf32>
    %c5_91 = arith.constant 5 : index
    %c0_92 = arith.constant 0 : index
    %148 = vector.load %arg15[%c5_91, %c0_92] : memref<132x160xbf16, #tpu.memory_space<vmem>>, vector<100x160xbf16>
    %c0_93 = arith.constant 0 : index
    %c0_94 = arith.constant 0 : index
    %c0_95 = arith.constant 0 : index
    %149 = vector.load %arg6[%c0_93, %c0_94, %c0_95] : memref<9x160x160xbf16, #tpu.memory_space<vmem>>, vector<1x160x160xbf16>
    %150 = vector.shape_cast %149 : vector<1x160x160xbf16> to vector<160x160xbf16>
    %cst_96 = arith.constant dense<0.000000e+00> : vector<100x160xf32>
    %151 = tpu.matmul %148, %150, %cst_96 {dimension_numbers = #tpu.dot_dimension_numbers<[1], [0], [0], [1], [0, 0, 1, 1], [], []>} : vector<100x160xbf16>, vector<160x160xbf16>, vector<100x160xf32> -> vector<100x160xf32>
    %c6_97 = arith.constant 6 : index
    %c0_98 = arith.constant 0 : index
    %152 = vector.load %arg15[%c6_97, %c0_98] : memref<132x160xbf16, #tpu.memory_space<vmem>>, vector<100x160xbf16>
    %c1_99 = arith.constant 1 : index
    %c0_100 = arith.constant 0 : index
    %c0_101 = arith.constant 0 : index
    %153 = vector.load %arg6[%c1_99, %c0_100, %c0_101] : memref<9x160x160xbf16, #tpu.memory_space<vmem>>, vector<1x160x160xbf16>
    %154 = vector.shape_cast %153 : vector<1x160x160xbf16> to vector<160x160xbf16>
    %cst_102 = arith.constant dense<0.000000e+00> : vector<100x160xf32>
    %155 = tpu.matmul %152, %154, %cst_102 {dimension_numbers = #tpu.dot_dimension_numbers<[1], [0], [0], [1], [0, 0, 1, 1], [], []>} : vector<100x160xbf16>, vector<160x160xbf16>, vector<100x160xf32> -> vector<100x160xf32>
    %156 = arith.addf %151, %155 : vector<100x160xf32>
    %c7_103 = arith.constant 7 : index
    %c0_104 = arith.constant 0 : index
    %157 = vector.load %arg15[%c7_103, %c0_104] : memref<132x160xbf16, #tpu.memory_space<vmem>>, vector<100x160xbf16>
    %c2_105 = arith.constant 2 : index
    %c0_106 = arith.constant 0 : index
    %c0_107 = arith.constant 0 : index
    %158 = vector.load %arg6[%c2_105, %c0_106, %c0_107] : memref<9x160x160xbf16, #tpu.memory_space<vmem>>, vector<1x160x160xbf16>
    %159 = vector.shape_cast %158 : vector<1x160x160xbf16> to vector<160x160xbf16>
    %cst_108 = arith.constant dense<0.000000e+00> : vector<100x160xf32>
    %160 = tpu.matmul %157, %159, %cst_108 {dimension_numbers = #tpu.dot_dimension_numbers<[1], [0], [0], [1], [0, 0, 1, 1], [], []>} : vector<100x160xbf16>, vector<160x160xbf16>, vector<100x160xf32> -> vector<100x160xf32>
    %161 = arith.addf %156, %160 : vector<100x160xf32>
    %c15_109 = arith.constant 15 : index
    %c0_110 = arith.constant 0 : index
    %162 = vector.load %arg15[%c15_109, %c0_110] : memref<132x160xbf16, #tpu.memory_space<vmem>>, vector<100x160xbf16>
    %c3_111 = arith.constant 3 : index
    %c0_112 = arith.constant 0 : index
    %c0_113 = arith.constant 0 : index
    %163 = vector.load %arg6[%c3_111, %c0_112, %c0_113] : memref<9x160x160xbf16, #tpu.memory_space<vmem>>, vector<1x160x160xbf16>
    %164 = vector.shape_cast %163 : vector<1x160x160xbf16> to vector<160x160xbf16>
    %cst_114 = arith.constant dense<0.000000e+00> : vector<100x160xf32>
    %165 = tpu.matmul %162, %164, %cst_114 {dimension_numbers = #tpu.dot_dimension_numbers<[1], [0], [0], [1], [0, 0, 1, 1], [], []>} : vector<100x160xbf16>, vector<160x160xbf16>, vector<100x160xf32> -> vector<100x160xf32>
    %166 = arith.addf %161, %165 : vector<100x160xf32>
    %c16_115 = arith.constant 16 : index
    %c0_116 = arith.constant 0 : index
    %167 = vector.load %arg15[%c16_115, %c0_116] : memref<132x160xbf16, #tpu.memory_space<vmem>>, vector<100x160xbf16>
    %c4_117 = arith.constant 4 : index
    %c0_118 = arith.constant 0 : index
    %c0_119 = arith.constant 0 : index
    %168 = vector.load %arg6[%c4_117, %c0_118, %c0_119] : memref<9x160x160xbf16, #tpu.memory_space<vmem>>, vector<1x160x160xbf16>
    %169 = vector.shape_cast %168 : vector<1x160x160xbf16> to vector<160x160xbf16>
    %cst_120 = arith.constant dense<0.000000e+00> : vector<100x160xf32>
    %170 = tpu.matmul %167, %169, %cst_120 {dimension_numbers = #tpu.dot_dimension_numbers<[1], [0], [0], [1], [0, 0, 1, 1], [], []>} : vector<100x160xbf16>, vector<160x160xbf16>, vector<100x160xf32> -> vector<100x160xf32>
    %171 = arith.addf %166, %170 : vector<100x160xf32>
    %c17_121 = arith.constant 17 : index
    %c0_122 = arith.constant 0 : index
    %172 = vector.load %arg15[%c17_121, %c0_122] : memref<132x160xbf16, #tpu.memory_space<vmem>>, vector<100x160xbf16>
    %c5_123 = arith.constant 5 : index
    %c0_124 = arith.constant 0 : index
    %c0_125 = arith.constant 0 : index
    %173 = vector.load %arg6[%c5_123, %c0_124, %c0_125] : memref<9x160x160xbf16, #tpu.memory_space<vmem>>, vector<1x160x160xbf16>
    %174 = vector.shape_cast %173 : vector<1x160x160xbf16> to vector<160x160xbf16>
    %cst_126 = arith.constant dense<0.000000e+00> : vector<100x160xf32>
    %175 = tpu.matmul %172, %174, %cst_126 {dimension_numbers = #tpu.dot_dimension_numbers<[1], [0], [0], [1], [0, 0, 1, 1], [], []>} : vector<100x160xbf16>, vector<160x160xbf16>, vector<100x160xf32> -> vector<100x160xf32>
    %176 = arith.addf %171, %175 : vector<100x160xf32>
    %c25_127 = arith.constant 25 : index
    %c0_128 = arith.constant 0 : index
    %177 = vector.load %arg15[%c25_127, %c0_128] : memref<132x160xbf16, #tpu.memory_space<vmem>>, vector<100x160xbf16>
    %c6_129 = arith.constant 6 : index
    %c0_130 = arith.constant 0 : index
    %c0_131 = arith.constant 0 : index
    %178 = vector.load %arg6[%c6_129, %c0_130, %c0_131] : memref<9x160x160xbf16, #tpu.memory_space<vmem>>, vector<1x160x160xbf16>
    %179 = vector.shape_cast %178 : vector<1x160x160xbf16> to vector<160x160xbf16>
    %cst_132 = arith.constant dense<0.000000e+00> : vector<100x160xf32>
    %180 = tpu.matmul %177, %179, %cst_132 {dimension_numbers = #tpu.dot_dimension_numbers<[1], [0], [0], [1], [0, 0, 1, 1], [], []>} : vector<100x160xbf16>, vector<160x160xbf16>, vector<100x160xf32> -> vector<100x160xf32>
    %181 = arith.addf %176, %180 : vector<100x160xf32>
    %c26_133 = arith.constant 26 : index
    %c0_134 = arith.constant 0 : index
    %182 = vector.load %arg15[%c26_133, %c0_134] : memref<132x160xbf16, #tpu.memory_space<vmem>>, vector<100x160xbf16>
    %c7_135 = arith.constant 7 : index
    %c0_136 = arith.constant 0 : index
    %c0_137 = arith.constant 0 : index
    %183 = vector.load %arg6[%c7_135, %c0_136, %c0_137] : memref<9x160x160xbf16, #tpu.memory_space<vmem>>, vector<1x160x160xbf16>
    %184 = vector.shape_cast %183 : vector<1x160x160xbf16> to vector<160x160xbf16>
    %cst_138 = arith.constant dense<0.000000e+00> : vector<100x160xf32>
    %185 = tpu.matmul %182, %184, %cst_138 {dimension_numbers = #tpu.dot_dimension_numbers<[1], [0], [0], [1], [0, 0, 1, 1], [], []>} : vector<100x160xbf16>, vector<160x160xbf16>, vector<100x160xf32> -> vector<100x160xf32>
    %186 = arith.addf %181, %185 : vector<100x160xf32>
    %c27_139 = arith.constant 27 : index
    %c0_140 = arith.constant 0 : index
    %187 = vector.load %arg15[%c27_139, %c0_140] : memref<132x160xbf16, #tpu.memory_space<vmem>>, vector<100x160xbf16>
    %c8_141 = arith.constant 8 : index
    %c0_142 = arith.constant 0 : index
    %c0_143 = arith.constant 0 : index
    %188 = vector.load %arg6[%c8_141, %c0_142, %c0_143] : memref<9x160x160xbf16, #tpu.memory_space<vmem>>, vector<1x160x160xbf16>
    %189 = vector.shape_cast %188 : vector<1x160x160xbf16> to vector<160x160xbf16>
    %cst_144 = arith.constant dense<0.000000e+00> : vector<100x160xf32>
    %190 = tpu.matmul %187, %189, %cst_144 {dimension_numbers = #tpu.dot_dimension_numbers<[1], [0], [0], [1], [0, 0, 1, 1], [], []>} : vector<100x160xbf16>, vector<160x160xbf16>, vector<100x160xf32> -> vector<100x160xf32>
    %191 = arith.addf %186, %190 : vector<100x160xf32>
    %c0_145 = arith.constant 0 : index
    %c0_146 = arith.constant 0 : index
    %192 = vector.load %arg7[%c0_145, %c0_146] : memref<1x160xf32, #tpu.memory_space<vmem>>, vector<1x160xf32>
    %193 = vector.broadcast %192 : vector<1x160xf32> to vector<100x160xf32>
    %194 = arith.addf %191, %193 : vector<100x160xf32>
    %cst_147 = arith.constant 0.000000e+00 : f32
    %195 = vector.broadcast %cst_147 : f32 to vector<100x160xf32>
    %196 = arith.maximumf %194, %195 : vector<100x160xf32>
    %197 = arith.mulf %196, %19 : vector<100x160xf32>
    %198 = vector.shape_cast %197 : vector<100x160xf32> to vector<1x100x160xf32>
    %cst_148 = arith.constant dense<0.000000e+00> : vector<1xf32>
    %199 = vector.multi_reduction <add>, %198, %cst_148 [1, 2] : vector<1x100x160xf32> to vector<1xf32>
    %200 = vector.shape_cast %199 : vector<1xf32> to vector<1x1x1xf32>
    %201 = vector.extract %200[0, 0, 0] : f32 from vector<1x1x1xf32>
    %202 = arith.mulf %197, %197 : vector<100x160xf32>
    %203 = vector.shape_cast %202 : vector<100x160xf32> to vector<1x100x160xf32>
    %cst_149 = arith.constant dense<0.000000e+00> : vector<1xf32>
    %204 = vector.multi_reduction <add>, %203, %cst_149 [1, 2] : vector<1x100x160xf32> to vector<1xf32>
    %205 = vector.shape_cast %204 : vector<1xf32> to vector<1x1x1xf32>
    %206 = vector.extract %205[0, 0, 0] : f32 from vector<1x1x1xf32>
    %cst_150 = arith.constant 8.192000e+03 : f32
    %207 = arith.divf %201, %cst_150 : f32
    %cst_151 = arith.constant 8.192000e+03 : f32
    %208 = arith.divf %206, %cst_151 : f32
    %209 = arith.mulf %207, %207 : f32
    %210 = arith.subf %208, %209 : f32
    %cst_152 = arith.constant 0.000000e+00 : f32
    %211 = arith.maximumf %210, %cst_152 : f32
    %212 = vector.broadcast %207 : f32 to vector<100x160xf32>
    %213 = arith.subf %196, %212 : vector<100x160xf32>
    %cst_153 = arith.constant 9.99999974E-6 : f32
    %214 = arith.addf %211, %cst_153 : f32
    %215 = math.rsqrt %214 : f32
    %216 = vector.broadcast %215 : f32 to vector<100x160xf32>
    %217 = arith.mulf %213, %216 : vector<100x160xf32>
    %c0_154 = arith.constant 0 : index
    %c0_155 = arith.constant 0 : index
    %218 = vector.load %arg8[%c0_154, %c0_155] : memref<1x160xf32, #tpu.memory_space<vmem>>, vector<1x160xf32>
    %219 = vector.broadcast %218 : vector<1x160xf32> to vector<100x160xf32>
    %220 = arith.mulf %217, %219 : vector<100x160xf32>
    %c0_156 = arith.constant 0 : index
    %c0_157 = arith.constant 0 : index
    %221 = vector.load %arg9[%c0_156, %c0_157] : memref<1x160xf32, #tpu.memory_space<vmem>>, vector<1x160xf32>
    %222 = vector.broadcast %221 : vector<1x160xf32> to vector<100x160xf32>
    %223 = arith.addf %220, %222 : vector<100x160xf32>
    %224 = arith.addf %223, %147 : vector<100x160xf32>
    %225 = arith.mulf %224, %19 : vector<100x160xf32>
    %c0_158 = arith.constant 0 : index
    %c0_159 = arith.constant 0 : index
    %c0_160 = arith.constant 0 : index
    %226 = vector.load %arg14[%c0_158, %c0_159, %c0_160] : memref<1x100x160xf32, #tpu.memory_space<vmem>>, vector<1x100x160xf32>
    %227 = vector.shape_cast %226 : vector<1x100x160xf32> to vector<100x160xf32>
    %228 = vector.shape_cast %225 : vector<100x160xf32> to vector<1x100x160xf32>
    tpu.vector_store %arg14[%c0_158, %c0_159, %c0_160], %228 {strides = array<i32>} : memref<1x100x160xf32, #tpu.memory_space<vmem>>, vector<1x100x160xf32>,
    return
  }
  func.func @transform_0(%arg0: i32) -> (i32, i32, i32) {
    %c0_i32 = arith.constant 0 : i32
    %c0_i32_0 = arith.constant 0 : i32
    %c0_i32_1 = arith.constant 0 : i32
    return %arg0, %c0_i32, %c0_i32_0 : i32, i32, i32
  }
  func.func @transform_1(%arg0: i32) -> (i32, i32, i32) {
    %c0_i32 = arith.constant 0 : i32
    %c0_i32_0 = arith.constant 0 : i32
    %c0_i32_1 = arith.constant 0 : i32
    %c0_i32_2 = arith.constant 0 : i32
    return %c0_i32, %c0_i32_0, %c0_i32_1 : i32, i32, i32
  }
  func.func @transform_2(%arg0: i32) -> (i32, i32) {
    %c0_i32 = arith.constant 0 : i32
    %c0_i32_0 = arith.constant 0 : i32
    %c0_i32_1 = arith.constant 0 : i32
    return %c0_i32, %c0_i32_0 : i32, i32
  }
  func.func @transform_3(%arg0: i32) -> (i32, i32) {
    %c0_i32 = arith.constant 0 : i32
    %c0_i32_0 = arith.constant 0 : i32
    %c0_i32_1 = arith.constant 0 : i32
    return %c0_i32, %c0_i32_0 : i32, i32
  }
  func.func @transform_4(%arg0: i32) -> (i32, i32) {
    %c0_i32 = arith.constant 0 : i32
    %c0_i32_0 = arith.constant 0 : i32
    %c0_i32_1 = arith.constant 0 : i32
    return %c0_i32, %c0_i32_0 : i32, i32
  }
  func.func @transform_5(%arg0: i32) -> (i32, i32, i32) {
    %c0_i32 = arith.constant 0 : i32
    %c0_i32_0 = arith.constant 0 : i32
    %c0_i32_1 = arith.constant 0 : i32
    %c0_i32_2 = arith.constant 0 : i32
    return %c0_i32, %c0_i32_0, %c0_i32_1 : i32, i32, i32
  }
  func.func @transform_6(%arg0: i32) -> (i32, i32) {
    %c0_i32 = arith.constant 0 : i32
    %c0_i32_0 = arith.constant 0 : i32
    %c0_i32_1 = arith.constant 0 : i32
    return %c0_i32, %c0_i32_0 : i32, i32
  }
  func.func @transform_7(%arg0: i32) -> (i32, i32) {
    %c0_i32 = arith.constant 0 : i32
    %c0_i32_0 = arith.constant 0 : i32
    %c0_i32_1 = arith.constant 0 : i32
    return %c0_i32, %c0_i32_0 : i32, i32
  }
  func.func @transform_8(%arg0: i32) -> (i32, i32) {
    %c0_i32 = arith.constant 0 : i32
    %c0_i32_0 = arith.constant 0 : i32
    %c0_i32_1 = arith.constant 0 : i32
    return %c0_i32, %c0_i32_0 : i32, i32
  }
  func.func @transform_9(%arg0: i32) -> (i32, i32) {
    %c0_i32 = arith.constant 0 : i32
    %c0_i32_0 = arith.constant 0 : i32
    %c0_i32_1 = arith.constant 0 : i32
    return %c0_i32, %c0_i32_0 : i32, i32
  }
  func.func @transform_10(%arg0: i32) -> (i32, i32) {
    %c0_i32 = arith.constant 0 : i32
    %c0_i32_0 = arith.constant 0 : i32
    %c0_i32_1 = arith.constant 0 : i32
    return %c0_i32, %c0_i32_0 : i32, i32
  }
  func.func @transform_11(%arg0: i32) -> (i32, i32) {
    %c0_i32 = arith.constant 0 : i32
    %c0_i32_0 = arith.constant 0 : i32
    %c0_i32_1 = arith.constant 0 : i32
    return %c0_i32, %c0_i32_0 : i32, i32
  }
  func.func @transform_12(%arg0: i32) -> (i32, i32) {
    %c0_i32 = arith.constant 0 : i32
    %c0_i32_0 = arith.constant 0 : i32
    %c0_i32_1 = arith.constant 0 : i32
    return %c0_i32, %c0_i32_0 : i32, i32
  }
  func.func @transform_13(%arg0: i32) -> (i32, i32, i32) {
    %c0_i32 = arith.constant 0 : i32
    %c0_i32_0 = arith.constant 0 : i32
    %c0_i32_1 = arith.constant 0 : i32
    return %arg0, %c0_i32, %c0_i32_0 : i32, i32, i32
  }
}

</mosaic_0001>

<bundles_post_ra>
// kernel: tpu_custom_call.1
= control target key start
LH: loop header
LB: loop body
LE: loop exit
PB: predicated region body
PF: predicated region fallthrough
CT: control target
= control target key end

     0   :  { %18 = vsyncpa [#allocation4], 0  ;;  %s12468_s0 = inlined_call_operand.vmem [shape: bf16[2,132,40], index: 0, kind: input, shape index: {}]   ;;  %s12469_s1 = inlined_call_operand.hbm [shape: bf16[9,40,160], index: 1, kind: input, shape index: {}]   ;;  %s12470_s2 = inlined_call_operand.vmem [shape: f32[1,160], index: 2, kind: input, shape index: {}]   ;;  %s12471_s3 = inlined_call_operand.vmem [shape: f32[1,160], index: 3, kind: input, shape index: {}]   ;;  %s12472_s4 = inlined_call_operand.vmem [shape: f32[1,160], index: 4, kind: input, shape index: {}]   ;;  %s12473_s5 = inlined_call_operand.hbm [shape: bf16[9,160,160], index: 5, kind: input, shape index: {}]   ;;  %s12474_s6 = inlined_call_operand.vmem [shape: f32[1,160], index: 6, kind: input, shape index: {}]   ;;  %s12475_s7 = inlined_call_operand.vmem [shape: f32[1,160], index: 7, kind: input, shape index: {}]   ;;  %s12476_s8 = inlined_call_operand.vmem [shape: f32[1,160], index: 8, kind: input, shape index: {}]   ;;  %s12477_s9 = inlined_call_operand.vmem [shape: bf16[40,160], index: 9, kind: input, shape index: {}]   ;;  %s12478_s10 = inlined_call_operand.vmem [shape: f32[1,160], index: 10, kind: input, shape index: {}]   ;;  %s12479_s11 = inlined_call_operand.vmem [shape: f32[1,160], index: 11, kind: input, shape index: {}]   ;;  %s12480_s12 = inlined_call_operand.vmem [shape: f32[1,160], index: 12, kind: input, shape index: {}]   ;;  %s12481_s13 = inlined_call_operand.vmem [shape: f32[2,100,160], index: 13, kind: output, shape index: {}]  }
   0x1   :  { %19 = vsyncpa [#allocation6], 0  ;;  %s9285_s25 = smov 0  }
   0x2 LB: > { %s9291_s26 = sadd.s32 4294967295, %s9206_s25   ;;  %p7672_p0 = scmp.ge.s32.totalorder %s9206_s25, 1  ;;  %s9206_s25 = sphi %s9285_s25, %s25_s25  }
   0x3   : > { %p334_p1 = scmp.lt.s32.totalorder %s9206_s25, 3  ;;  %s9208_s27 = smov [#allocation3]  }
   0x4   : > { %s346_s28 = sshll.u32 %s9208_s27, 4  ;;  %p12482_p3 = scmp.eq.s32.totalorder %s9291_s26, 0  ;;  %s347_s28 = int_to_ptr.vmem [resolvable:$true] %s346_s28 }
   0x5   : > { %p9295_p2 = pnand %p7672_p0, %p334_p1  ;;  %s9209_s30 = smov [#allocation5]  }
   0x6   : > { %s368_s14 = sshll.u32 %s9209_s30, 4  ;;  %s9136_s18 = scalar_lea.hbm %s12469_s1, 5760  ;;  %s9308_s14 = int_to_ptr.vmem [resolvable:$true] %s368_s14 }
   0x7   : > { %s12752_s29 = scalar_select %p9295_p2, 1, 0 }
   0x8   : > { %p8656_p4 = pneg %p9295_p2  ;;  %p9137_p6 = scmp.ne.s32.totalorder %s12469_s1, %s9136_s18 }
   0x9   : > { %p9143_p10 = scmp.lt.u32.totalorder %s9136_s18, %s12469_s1 }
   0xa   : > { %p9304_p5 = pnand %p12482_p3, %p8656_p4 }
   0xc   : > { %p9138_p7 = pneg %p9304_p5 }
   0xe   : > { %p9139_p8 = pnand %p9138_p7, %p9137_p6 }
  0x10   : > { %p9140_p9 = pneg %p9139_p8 }
  0x12   : > { %p9145_p11 = pnand %p9143_p10, %p9140_p9 }
  0x14   : > { %9148 = shalt.err (!%p9145_p11)
}
  0x15   : > { %s9149_s23 = scalar_lea.vmem %s347_s28, 5760  ;;  %p9157_p1 = scmp.lt.s32.totalorder %s347_s28, %s347_s28 }
  0x16   : > { %p9150_p12 = scmp.ne.s32.totalorder %s347_s28, %s9149_s23  ;;  %p9158_p4 = scmp.lt.s32.totalorder %s9149_s23, %s9149_s23 }
  0x18   : > { %p9152_p13 = pnand %p9150_p12, %p9138_p7  ;;  %p9159_p3 = por %p9158_p4, %p9157_p1 }
  0x1a   : > { %p9153_p0 = pneg %p9152_p13 }
  0x1c   : > { %p9160_p2 = pnand %p9159_p3, %p9153_p0 }
  0x1e   : > { %9163 = shalt.err (!%p9160_p2)
}
  0x1f   : > { %s9210_s24 = smov 128   ;;  %s9211_s27 = smov 8  }
  0x20   : > { %8659 = dma.hbm_to_vmem [thread:$0]  (!%p9304_p5), %s12469_s1, 5760, %s347_s28, [#allocation4], %s9210_s24, %s9210_s24, %s9211_s27  }
  0x21   : > { %s9164_s19 = scalar_lea.hbm %s12473_s5, 23040 }
  0x22   : > { %p9165_p6 = scmp.ne.s32.totalorder %s12473_s5, %s9164_s19  ;;  %p9171_p8 = scmp.lt.u32.totalorder %s9164_s19, %s12473_s5 }
  0x24   : > { %p9167_p2 = pnand %p9165_p6, %p9138_p7 }
  0x26   : > { %p9168_p3 = pneg %p9167_p2 }
  0x28   : > { %p9173_p9 = pnand %p9171_p8, %p9168_p3 }
  0x2a   : > { %9176 = shalt.err (!%p9173_p9)
}
  0x2b   : > { %s9177_s28 = scalar_lea.vmem %s9308_s14, 23040  ;;  %p9185_p13 = scmp.lt.s32.totalorder %s9308_s14, %s9308_s14 }
  0x2c   : > { %p9178_p10 = scmp.ne.s32.totalorder %s9308_s14, %s9177_s28  ;;  %p9186_p0 = scmp.lt.s32.totalorder %s9177_s28, %s9177_s28 }
  0x2e   : > { %p9180_p11 = pnand %p9178_p10, %p9138_p7  ;;  %p9187_p1 = por %p9186_p0, %p9185_p13 }
  0x30   : > { %p9181_p12 = pneg %p9180_p11 }
  0x32   : > { %p9188_p4 = pnand %p9187_p1, %p9181_p12 }
  0x34   : > { %9191 = shalt.err (!%p9188_p4)
}
  0x35   : > { %8662 = dma.hbm_to_vmem [thread:$0]  (!%p9304_p5), %s12473_s5, 23040, %s9308_s14, [#allocation6], %s9210_s24, %s9210_s24, %s9211_s27  }
  0x36   : > { %p12754_p6 = scmp.ne.s32.totalorder %s12752_s29, 0 }
  0x38   : > { %413 = sbr.rel (%p12754_p6) target bundleno = 2127 (0x84f), region = 72 }
  0x3f   : > { %p12755_p2 = scmp.eq.s32.totalorder %s9291_s26, 0 }
  0x41   : > { %9197 = dma.done.wait (%p12755_p2), [#allocation4], 5760   ;;  %p12756_p7 = pmov %p12755_p2 }
  0x42   : > { %p12757_p3 = pmov %p12755_p2 }
  0x43   : > { %9199 = vsyncadd (%p12756_p7), [#allocation4], 4294961536 }
  0x44   : > { %9201 = dma.done.wait (%p12757_p3), [#allocation6], 23040   ;;  %p12758_p8 = pmov %p12755_p2 }
  0x45   : > { %p461_p9 = scmp.lt.s32.totalorder %s9291_s26, 1  ;;  %v12506_v0 = vmov 0   ;;  %v8682_v1 = vld [vmem:[#allocation3 + $0x2c] ss:$8 sps:$4 sm:$0xff]   ;;  %v8684_v2 = vld [vmem:[#allocation3 + $0x28] ss:$8 sps:$4 sm:$0xff]  }
  0x46   : > { %9203 = vsyncadd (%p12758_p8), [#allocation6], 4294944256  ;;  %837 = vmatprep.mubr.bf16.mxu0 %v12506_v0  ;;  %3431 = vmatprep.mubr.bf16.mxu1 %v12506_v0  ;;  %v8685_v3 = vld [vmem:[#allocation3 + $0x3c] ss:$8 sps:$4 sm:$0xff]   ;;  %v701_v4 = vld [vmem:[#allocation3 + $0x48] sm:$0xff]  ;;  %vm12490_vm0 = vcmask 1043456  }
  0x47   : > { %s13334_s26 = smov (!%p461_p9, %s9291_s26), 1  ;;  %805 = vmatprep.subr.bf16.mxu0 %v8682_v1  ;;  %v8687_v5 = vld [vmem:[#allocation3 + $0x38] ss:$8 sps:$4 sm:$0xff]   ;;  %v7719_v7 = vcombine.high %v701_v4, %v701_v4  ;;  %v7718_v8 = vcombine.low %v701_v4, %v701_v4  ;;  %v8695_v12 = vld [vmem:[#allocation3 + $0x4] ss:$8 sps:$4 sm:$0xff]   ;;  %vm12489_vm1 = vcmask 1044480  }
  0x48   : > { %s8628_s29 = smul.u32 68, %s13334_s26  ;;  %806 = vmatpush1.bf16.msra.mxu0 %v8684_v2  ;;  %vm776_vm2 = vcmask 326656   ;;  %v8693_v17 = vld [vmem:[#allocation3] ss:$8 sps:$4 sm:$0xff]   ;;  %v8700_v19 = vld [vmem:[#allocation3 + $0x14] ss:$8 sps:$4 sm:$0xff]  }
  0x49   : > { %807 = vmatprep.subr.bf16.mxu0 %v8685_v3  ;;  %v800_v15 = vsel %vm12490_vm0, %v7718_v8, 0  ;;  %v694_v20 = vld [vmem:[#allocation3 + $0x20] sm:$0xff]  ;;  %v8698_v22 = vld [vmem:[#allocation3 + $0x10] ss:$8 sps:$4 sm:$0xff]   ;;  %v8708_v28 = vld [vmem:[#allocation3 + $0x54] ss:$8 sps:$4 sm:$0xff]  }
  0x4a   : > { %s9377_s24 = scalar_lea.vmem %s12468_s0, %s8628_s29  ;;  %v7734_v23 = vcombine.high %v694_v20, %v694_v20  ;;  %v7733_v24 = vcombine.low %v694_v20, %v694_v20  ;;  %vm12487_vm3 = vsmask.f32 5376  ;;  %v8706_v56 = vld [vmem:[#allocation3 + $0x50] ss:$8 sps:$4 sm:$0xff]   ;;  %v8711_v60 = vld [vmem:[#allocation3 + $0x64] ss:$8 sps:$4 sm:$0xff]  }
  0x4b   : > { %v677_v6 = vld [vmem:[%s9377_s24 + $0x4] sm:$0xf]  ;;  %v695_v9 = vld [vmem:[%s9377_s24] sm:$0x8]  ;;  %v9382_v10 = vld [vmem:[%s9377_s24 + $0x8] sm:$0xff]   ;;  %vm12484_vm6 = vcmask 1046528  }
  0x4c   : > { %v9384_v11 = vcombine.low %v695_v9, %v677_v6  ;;  %808 = vmatpush1.bf16.msra.mxu0 %v8687_v5  ;;  %v739_v14 = vrot.slane %v9382_v10, 3  ;;  %v9392_v18 = vld [vmem:[%s9377_s24 + $0x10] sm:$0xff]   ;;  %v9399_v26 = vld [vmem:[%s9377_s24 + $0x18] sm:$0xff]   ;;  %v1019_v27 = vsel %vm12490_vm0, %v7733_v24, 0  ;;  %v9407_v30 = vld [vmem:[%s9377_s24 + $0x20] sm:$0xff]   ;;  %v919_v46 = vshrl.u32 %v9382_v10, 16 }
  0x4d   : > { %7720 = vmatprep.subr.msk.bf16.mxu0 %vm12490_vm0, %v7719_v7  ;;  %v741_v21 = vrot.slane %v9392_v18, 3  ;;  %v743_v29 = vrot.slane %v9399_v26, 3  ;;  %v745_v32 = vrot.slane %v9407_v30, 3  ;;  %v9414_v33 = vld [vmem:[%s9377_s24 + $0x28] sm:$0xff]   ;;  %v9419_v35 = vld [vmem:[%s9377_s24 + $0x30] sm:$0xf] }
  0x4e   : > { %v738_v13 = vrot.slane %v9384_v11, 3  ;;  %v689_v36 = vld [vmem:[%s9377_s24 + $0x34] sm:$0x1]  ;;  %v747_v37 = vrot.slane %v9414_v33, 3  ;;  %v676_v40 = vld [vmem:[%s9377_s24] sm:$0xc] }
  0x4f   : > { %v742_v25 = vsel %vm12489_vm1, %v739_v14, %v741_v21  ;;  %v744_v31 = vsel %vm12489_vm1, %v741_v21, %v743_v29  ;;  %v746_v34 = vsel %vm12489_vm1, %v743_v29, %v745_v32  ;;  %v9426_v39 = vcombine.low %v9419_v35, %v689_v36  ;;  %v1131_v61 = vld [vmem:[#allocation3 + $0x70] sm:$0xff]  ;;  %v8709_v62 = vld [vmem:[#allocation3 + $0x60] ss:$8 sps:$4 sm:$0xff]   ;;  %v8716_v9 = vld [vmem:[#allocation3 + $0x7c] ss:$8 sps:$4 sm:$0xff]   ;;  %s9214_s21 = smov 0.0  }
  0x50   : > { %810 = vmatpush1.bf16.msra.mxu0 %v800_v15  ;;  %v740_v16 = vsel %vm12489_vm1, %v738_v13, %v739_v14  ;;  %v748_v38 = vsel %vm12489_vm1, %v745_v32, %v747_v37  ;;  %v7728_v42 = vcombine.low %v676_v40, %v677_v6  ;;  %v922_v47 = vshll.u32 %v9382_v10, 16 }
  0x51   : > { %1024 = vmatprep.subr.bf16.mxu0 %v8695_v12  ;;  %v749_v41 = vrot.slane %v9426_v39, 3  ;;  %v921_v50 = vrot.slane %v919_v46, 2  ;;  %v928_v54 = vshrl.u32 %v9392_v18, 16  ;;  %v931_v55 = vshll.u32 %v9392_v18, 16 }
  0x52   : > { %v911_v44 = vshrl.u32 %v7728_v42, 16  ;;  %v914_v45 = vshll.u32 %v7728_v42, 16  ;;  %v924_v51 = vrot.slane %v922_v47, 3  ;;  %v937_v1 = vshrl.u32 %v9399_v26, 16 }
  0x53   : > { %7721 = vmatmul.mubr.msk.bf16.vlgmr.msra.gmra.mrb[0].mxu0 %vm776_vm2, %v740_v16  ;;  %v750_v43 = vsel %vm12489_vm1, %v747_v37, %v749_v41  ;;  %v930_v58 = vrot.slane %v928_v54, 2  ;;  %v933_v59 = vrot.slane %v931_v55, 3  ;;  %v940_v2 = vshll.u32 %v9399_v26, 16 }
  0x54   : > { %1025 = vmatpush1.bf16.msra.mxu0 %v8693_v17  ;;  %847 = vmatprep.mubr.bf16.mxu0 %v12506_v0  ;;  %v913_v48 = vrot.slane %v911_v44, 2  ;;  %v916_v49 = vrot.slane %v914_v45, 3  ;;  %v925_v53 = vor.u32 %v924_v51, %v921_v50  ;;  %v7749_v3 = vcombine.high %v1131_v61, %v1131_v61  ;;  %v1371_v50 = vld [vmem:[#allocation3 + $0x98] sm:$0xff] }
  0x55   : > { %1026 = vmatprep.subr.bf16.mxu0 %v8700_v19  ;;  %v934_v63 = vor.u32 %v933_v59, %v930_v58  ;;  %v7748_v4 = vcombine.low %v1131_v61, %v1131_v61  ;;  %v939_v6 = vrot.slane %v937_v1, 2  ;;  %v942_v7 = vrot.slane %v940_v2, 3  ;;  %v1125_v61 = vld [vmem:[%s9377_s24 + $0x34] sm:$0x3] }
  0x56   : > { %v917_v52 = vor.u32 %v916_v49, %v913_v48  ;;  %v946_v13 = vshrl.u32 %v9407_v30, 16  ;;  %v949_v14 = vshll.u32 %v9407_v30, 16  ;;  %v955_v20 = vshrl.u32 %v9414_v33, 16  ;;  %v8714_v48 = vld [vmem:[#allocation3 + $0x78] ss:$8 sps:$4 sm:$0xff]  }
  0x57   : > { %v935_v5 = vsel %vm12487_vm3, %v925_v53, %v934_v63  ;;  %v1220_v8 = vsel %vm12490_vm0, %v7748_v4, 0  ;;  %v943_v12 = vor.u32 %v942_v7, %v939_v6  ;;  %v958_v21 = vshll.u32 %v9414_v33, 16 }
  0x58   : > { %1027 = vmatpush1.bf16.msra.mxu0 %v8698_v22  ;;  %v926_v57 = vsel %vm12487_vm3, %v917_v52, %v925_v53  ;;  %v948_v16 = vrot.slane %v946_v13, 2  ;;  %v951_v17 = vrot.slane %v949_v14, 3  ;;  %v1137_v37 = vshrl.u32 %v9384_v11, 16 }
  0x59   : > { %7735 = vmatprep.subr.msk.bf16.mxu0 %vm12490_vm0, %v7734_v23  ;;  %v944_v15 = vsel %vm12487_vm3, %v934_v63, %v943_v12  ;;  %v957_v23 = vrot.slane %v955_v20, 2  ;;  %v960_v24 = vrot.slane %v958_v21, 3  ;;  %v1145_v42 = vrot.slane %v922_v47, 4  ;;  %v8717_v47 = vld [vmem:[#allocation3 + $0x88] ss:$8 sps:$4 sm:$0xff]  }
  0x5a   : > { %v952_v19 = vor.u32 %v951_v17, %v948_v16  ;;  %vm12485_vm4 = vsmask.f32 4352  ;;  %v1149_v49 = vrot.slane %v931_v55, 4  ;;  %v7770_v51 = vcombine.high %v1371_v50, %v1371_v50 }
  0x5b   : > { %7722 = vmatmul.mubr.msk.bf16.gmra.mrb[4].mxu0 %vm776_vm2, %v742_v25  ;;  %v961_v25 = vor.u32 %v960_v24, %v957_v23  ;;  %v7769_v52 = vcombine.low %v1371_v50, %v1371_v50  ;;  %v1153_v18 = vrot.slane %v940_v2, 4  ;;  %v1156_v26 = vrot.slane %v946_v13, 3  ;;  %v9573_v50 = vld [vmem:[%s9377_s24 + $0x28] sm:$0xf] }
  0x5c   : > { %857 = vmatprep.mubr.bf16.mxu0 %v12506_v0  ;;  %1029 = vmatpush1.bf16.msra.mxu0 %v1019_v27  ;;  %v953_v22 = vsel %vm12487_vm3, %v943_v12, %v952_v19  ;;  %v964_v27 = vshrl.u32 %v9426_v39, 16  ;;  %v1157_v59 = vrot.slane %v949_v14, 4  ;;  %v1160_v63 = vrot.slane %v955_v20, 3  ;;  %v9540_v12 = vld [vmem:[%s9377_s24 + $0x10] sm:$0xf] }
  0x5d   : > { %1225 = vmatprep.subr.bf16.mxu0 %v8708_v28  ;;  %v967_v28 = vshll.u32 %v9426_v39, 16  ;;  %v962_v29 = vsel %vm12487_vm3, %v952_v19, %v961_v25  ;;  %v1139_v39 = vrot.slane %v1137_v37, 3  ;;  %v1516_v55 = vsel %vm12490_vm0, %v7769_v52, 0  ;;  %v9562_v37 = vld [vmem:[%s9377_s24 + $0x20] sm:$0xf] }
  0x5e   : > { %v7743_v30 = vcombine.low %v9419_v35, %v1125_v61  ;;  %v9534_v35 = vld [vmem:[%s9377_s24 + $0x8] sm:$0xf]  ;;  %vm12486_vm5 = vsmask.f32 7424  ;;  %vm12488_vm7 = vsmask.f32 6400 }
  0x5f   : > { %v969_v32 = vrot.slane %v967_v28, 3 }
  0x60   : > { %v1168_v4 = vshll.u32 %v7743_v30, 16 }
  0x62   : > { %v1170_v7 = vrot.slane %v1168_v4, 4  ;;  %v9592_v4 = vld [vmem:[%s9377_s24 + $0x38] sm:$0x3] }
  0x63   : > { %7723 = vmatmul.mubr.msk.bf16.gmra.mrb[8].mxu0 %vm776_vm2, %v744_v31  ;;  %v966_v31 = vrot.slane %v964_v27, 2 }
  0x64   : > { %867 = vmatprep.mubr.bf16.mxu0 %v12506_v0 }
  0x6b   : > { %7724 = vmatmul.mubr.msk.bf16.gmra.mrb[12].mxu0 %vm776_vm2, %v746_v34  ;;  %v970_v34 = vor.u32 %v969_v32, %v966_v31 }
  0x6c   : > { %877 = vmatprep.mubr.bf16.mxu0 %v12506_v0 }
  0x6d   : > { %v971_v36 = vsel %vm12487_vm3, %v961_v25, %v970_v34 }
  0x73   : > { %7725 = vmatmul.mubr.msk.bf16.gmra.mrb[16].mxu0 %vm776_vm2, %v748_v38  ;;  %v1140_v38 = vshll.u32 %v9384_v11, 16  ;;  %v1148_v11 = vrot.slane %v928_v54, 3  ;;  %v1152_v54 = vrot.slane %v937_v1, 3  ;;  %v1161_v1 = vrot.slane %v958_v21, 4  ;;  %v9549_v21 = vld [vmem:[%s9377_s24 + $0x14] sm:$0xf] }
  0x74   : > { %887 = vmatprep.mubr.bf16.mxu0 %v12506_v0 }
  0x75   : > { %v1142_v40 = vrot.slane %v1140_v38, 4  ;;  %v1150_v10 = vor.u32 %v1149_v49, %v1148_v11  ;;  %v1162_v2 = vor.u32 %v1161_v1, %v1160_v63  ;;  %v8730_v49 = vld [vmem:[#allocation3 + $0xb0] ss:$8 sps:$4 sm:$0xff]  }
  0x7b   : > { %7726 = vmatmul.mubr.msk.bf16.gmra.mrb[20].mxu0 %vm776_vm2, %v750_v43  ;;  %v1143_v43 = vor.u32 %v1142_v40, %v1139_v39  ;;  %v8725_v39 = vld [vmem:[#allocation3 + $0xa0] ss:$8 sps:$4 sm:$0xff]  }
  0x7c   : > { %897 = vmatprep.mubr.bf16.mxu0 %v12506_v0 }
  0x83   : > { %7727 = vmatmul.mubr.msk.bf16.gmra.mrb[24].mxu0 %vm776_vm2, %v749_v41  ;;  %v1144_v41 = vrot.slane %v919_v46, 3  ;;  %v8719_v46 = vld [vmem:[#allocation3 + $0x8c] ss:$8 sps:$4 sm:$0xff]  }
  0x84   : > { %1056 = vmatprep.mubr.bf16.mxu0 %v12506_v0 }
  0x85   : > { %v1146_v44 = vor.u32 %v1145_v42, %v1144_v41 }
  0x87   : > { %v1147_v45 = vsel %vm12485_vm4, %v1143_v43, %v1146_v44  ;;  %v1151_v53 = vsel %vm12485_vm4, %v1146_v44, %v1150_v10  ;;  %v8732_v43 = vld [vmem:[#allocation3 + $0xb4] ss:$8 sps:$4 sm:$0xff]   ;;  %v1653_v44 = vld [vmem:[#allocation3 + $0xc0] sm:$0xff] }
  0x8b   : > { %7736 = vmatmul.mubr.msk.bf16.vlgmr.msra.gmra.mrb[0].mxu0 %vm776_vm2, %v926_v57  ;;  %v1154_v57 = vor.u32 %v1153_v18, %v1152_v54 }
  0x8c   : > { %1226 = vmatpush1.bf16.msra.mxu0 %v8706_v56  ;;  %1066 = vmatprep.mubr.bf16.mxu0 %v12506_v0  ;;  %v8727_v56 = vld [vmem:[#allocation3 + $0xa4] ss:$8 sps:$4 sm:$0xff]  }
  0x8d   : > { %1227 = vmatprep.subr.bf16.mxu0 %v8711_v60  ;;  %v1155_v58 = vsel %vm12485_vm4, %v1150_v10, %v1154_v57  ;;  %v1158_v60 = vor.u32 %v1157_v59, %v1156_v26  ;;  %v7791_v10 = vcombine.high %v1653_v44, %v1653_v44  ;;  %v1362_v26 = vld [vmem:[%s9377_s24 + $0x2c] sm:$0xf]  ;;  %v9584_v59 = vld [vmem:[%s9377_s24 + $0x30] sm:$0xf] }
  0x8e   : > { %v7763_v63 = vcombine.low %v1362_v26, %v9584_v59 }
  0x90   : > { %1228 = vmatpush1.bf16.msra.mxu0 %v8709_v62  ;;  %v1159_v62 = vsel %vm12485_vm4, %v1154_v57, %v1158_v60 }
  0x91   : > { %7750 = vmatprep.subr.msk.bf16.mxu0 %vm12490_vm0, %v7749_v3  ;;  %v1165_v3 = vshrl.u32 %v7743_v30, 16  ;;  %v1452_v30 = vshrl.u32 %v7763_v63, 16 }
  0x93   : > { %7737 = vmatmul.mubr.msk.bf16.gmra.mrb[4].mxu0 %vm776_vm2, %v935_v5  ;;  %v1163_v5 = vsel %vm12485_vm4, %v1158_v60, %v1162_v2  ;;  %v1167_v6 = vrot.slane %v1165_v3, 3  ;;  %v1364_v3 = vld [vmem:[%s9377_s24 + $0x34] sm:$0xf] }
  0x94   : > { %1076 = vmatprep.mubr.bf16.mxu0 %v12506_v0  ;;  %1230 = vmatpush1.bf16.msra.mxu0 %v1220_v8  ;;  %v1352_v8 = vld [vmem:[%s9377_s24 + $0x4] sm:$0x8] }
  0x95   : > { %1521 = vmatprep.subr.bf16.mxu0 %v8716_v9  ;;  %v1171_v33 = vor.u32 %v1170_v7, %v1167_v6  ;;  %v9537_v9 = vld [vmem:[%s9377_s24 + $0xc] sm:$0xf]  ;;  %v7758_v13 = vcombine.low %v1352_v8, %v9534_v35  ;;  %v1454_v6 = vrot.slane %v1452_v30, 3 }
  0x97   : > { %v1172_v14 = vsel %vm12485_vm4, %v1162_v2, %v1171_v33  ;;  %v1408_v16 = vshrl.u32 %v7758_v13, 16  ;;  %v1411_v17 = vshll.u32 %v7758_v13, 16  ;;  %v1455_v2 = vshll.u32 %v7763_v63, 16 }
  0x99   : > { %v1410_v23 = vrot.slane %v1408_v16, 3  ;;  %v1413_v24 = vrot.slane %v1411_v17, 4  ;;  %v1457_v7 = vrot.slane %v1455_v2, 4 }
  0x9b   : > { %7738 = vmatmul.mubr.msk.bf16.gmra.mrb[8].mxu0 %vm776_vm2, %v944_v15  ;;  %v7759_v15 = vcombine.low %v9537_v9, %v9540_v12  ;;  %v1458_v8 = vor.u32 %v1457_v7, %v1454_v6  ;;  %v8761_v7 = vld [vmem:[%s9377_s24 + $0x38] ss:$0 sps:$4 sm:$0x77]  }
  0x9c   : > { %1086 = vmatprep.mubr.bf16.mxu0 %v12506_v0 }
  0x9d   : > { %v1416_v19 = vshrl.u32 %v7759_v15, 16  ;;  %v1419_v20 = vshll.u32 %v7759_v15, 16 }
  0x9f   : > { %v1418_v25 = vrot.slane %v1416_v19, 3  ;;  %v1421_v27 = vrot.slane %v1419_v20, 4 }
  0xa1   : > { %v1422_v31 = vor.u32 %v1421_v27, %v1418_v25  ;;  %v8746_v25 = vld [vmem:[#allocation3 + $0xdc] ss:$8 sps:$4 sm:$0xff]   ;;  %v1846_v27 = vld [vmem:[#allocation3 + $0xe8] sm:$0xff] }
  0xa3   : > { %7739 = vmatmul.mubr.msk.bf16.gmra.mrb[12].mxu0 %vm776_vm2, %v953_v22  ;;  %v9552_v22 = vld [vmem:[%s9377_s24 + $0x18] sm:$0xf] }
  0xa4   : > { %1096 = vmatprep.mubr.bf16.mxu0 %v12506_v0  ;;  %v7760_v28 = vcombine.low %v9549_v21, %v9552_v22 }
  0xa6   : > { %v1425_v32 = vshrl.u32 %v7760_v28, 16 }
  0xa8   : > { %v1427_v40 = vrot.slane %v1425_v32, 3  ;;  %v7780_v32 = vcombine.low %v9540_v12, %v9549_v21  ;;  %v7783_v21 = vcombine.low %v9573_v50, %v1362_v26  ;;  %v8766_v26 = vld [vmem:[#allocation3 + $0x11c] ss:$8 sps:$4 sm:$0xff]  }
  0xaa   : > { %v1878_v63 = vshll.u32 %v7783_v21, 16 }
  0xab   : > { %7740 = vmatmul.mubr.msk.bf16.gmra.mrb[16].mxu0 %vm776_vm2, %v962_v29  ;;  %v1414_v29 = vor.u32 %v1413_v24, %v1410_v23  ;;  %v7779_v23 = vcombine.low %v9534_v35, %v9537_v9  ;;  %v8739_v24 = vld [vmem:[#allocation3 + $0xc8] ss:$8 sps:$4 sm:$0xff]   ;;  %v8755_v9 = vld [vmem:[#allocation3 + $0xf4] ss:$8 sps:$4 sm:$0xff]  }
  0xac   : > { %1106 = vmatprep.mubr.bf16.mxu0 %v12506_v0  ;;  %v1880_v30 = vrot.slane %v1878_v63, 1 }
  0xad   : > { %v1423_v38 = vsel %vm12485_vm4, %v1414_v29, %v1422_v31  ;;  %v7806_v29 = vcombine.high %v1846_v27, %v1846_v27 }
  0xb3   : > { %7741 = vmatmul.mubr.msk.bf16.gmra.mrb[20].mxu0 %vm776_vm2, %v971_v36  ;;  %v9559_v36 = vld [vmem:[%s9377_s24 + $0x1c] sm:$0xf] }
  0xb4   : > { %1116 = vmatprep.mubr.bf16.mxu0 %v12506_v0  ;;  %v7761_v42 = vcombine.low %v9559_v36, %v9562_v37 }
  0xb6   : > { %v1437_v11 = vshll.u32 %v7761_v42, 16 }
  0xbb   : > { %7742 = vmatmul.mubr.msk.bf16.gmra.mrb[28].mxu0 %vm776_vm2, %v970_v34  ;;  %v1428_v34 = vshll.u32 %v7760_v28, 16  ;;  %v8744_v28 = vld [vmem:[#allocation3 + $0xd8] ss:$8 sps:$4 sm:$0xff]  }
  0xbc   : > { %1257 = vmatprep.mubr.bf16.mxu0 %v12506_v0 }
  0xbd   : > { %v1430_v41 = vrot.slane %v1428_v34, 4  ;;  %v7781_v34 = vcombine.low %v9552_v22, %v9559_v36  ;;  %v9632_v36 = vcombine.low %v9584_v59, %v1364_v3 }
  0xc3   : > { %7751 = vmatmul.mubr.msk.bf16.vlgmr.msra.gmra.mrb[0].mxu0 %vm776_vm2, %v1147_v45  ;;  %v1431_v45 = vor.u32 %v1430_v41, %v1427_v40  ;;  %v7785_v41 = vcombine.low %v9592_v4, %v9592_v4 }
  0xc4   : > { %1522 = vmatpush1.bf16.msra.mxu0 %v8714_v48  ;;  %1267 = vmatprep.mubr.bf16.mxu0 %v12506_v0  ;;  %v1434_v48 = vshrl.u32 %v7761_v42, 16  ;;  %v1857_v42 = vshll.u32 %v7780_v32, 16 }
  0xc5   : > { %1523 = vmatprep.subr.bf16.mxu0 %v8719_v46  ;;  %v9570_v46 = vld [vmem:[%s9377_s24 + $0x24] sm:$0xf] }
  0xc6   : > { %v1436_v52 = vrot.slane %v1434_v48, 3  ;;  %v7762_v54 = vcombine.low %v9570_v46, %v9573_v50  ;;  %v7782_v12 = vcombine.low %v9562_v37, %v9570_v46  ;;  %v1853_v37 = vshll.u32 %v7779_v23, 16 }
  0xc7   : > { %v1861_v46 = vshrl.u32 %v7780_v32, 16  ;;  %v1864_v50 = vshll.u32 %v7781_v34, 16 }
  0xc8   : > { %1524 = vmatpush1.bf16.msra.mxu0 %v8717_v47  ;;  %v7790_v47 = vcombine.low %v1653_v44, %v1653_v44  ;;  %v1443_v57 = vshrl.u32 %v7762_v54, 16  ;;  %v1855_v44 = vrot.slane %v1853_v37, 1 }
  0xc9   : > { %7771 = vmatprep.subr.msk.bf16.mxu0 %vm12490_vm0, %v7770_v51  ;;  %v1432_v51 = vsel %vm12485_vm4, %v1422_v31, %v1431_v45  ;;  %v7805_v31 = vcombine.low %v1846_v27, %v1846_v27 }
  0xca   : > { %v1708_v18 = vsel %vm12490_vm0, %v7790_v47, 0  ;;  %v1445_v61 = vrot.slane %v1443_v57, 3  ;;  %v2097_v47 = vld [vmem:[#allocation3 + $0x110] sm:$0xff]  ;;  %v1871_v57 = vshll.u32 %v7782_v12, 16 }
  0xcb   : > { %7752 = vmatmul.mubr.msk.bf16.gmra.mrb[4].mxu0 %vm776_vm2, %v1151_v53  ;;  %v1439_v53 = vrot.slane %v1437_v11, 4  ;;  %v1947_v35 = vsel %vm12490_vm0, %v7805_v31, 0  ;;  %v1897_v31 = vshrl.u32 %v8761_v7, 16 }
  0xcc   : > { %1277 = vmatprep.mubr.bf16.mxu0 %v12506_v0  ;;  %1526 = vmatpush1.bf16.msra.mxu0 %v1516_v55  ;;  %v8741_v55 = vld [vmem:[#allocation3 + $0xcc] ss:$8 sps:$4 sm:$0xff]  }
  0xcd   : > { %1713 = vmatprep.subr.bf16.mxu0 %v8727_v56  ;;  %v1440_v56 = vor.u32 %v1439_v53, %v1436_v52  ;;  %v1866_v52 = vrot.slane %v1864_v50, 1  ;;  %v8756_v53 = vld [vmem:[#allocation3 + $0x100] ss:$8 sps:$4 sm:$0xff]  }
  0xcf   : > { %v1441_v60 = vsel %vm12485_vm4, %v1431_v45, %v1440_v56  ;;  %v1859_v45 = vrot.slane %v1857_v42, 1  ;;  %v8771_v42 = vld [vmem:[#allocation3 + $0x12c] ss:$8 sps:$4 sm:$0xff]  }
  0xd3   : > { %7753 = vmatmul.mubr.msk.bf16.gmra.mrb[8].mxu0 %vm776_vm2, %v1155_v58  ;;  %v1446_v58 = vshll.u32 %v7762_v54, 16  ;;  %v7827_v54 = vcombine.high %v2097_v47, %v2097_v47 }
  0xd4   : > { %1287 = vmatprep.mubr.bf16.mxu0 %v12506_v0 }
  0xdb   : > { %7754 = vmatmul.mubr.msk.bf16.gmra.mrb[12].mxu0 %vm776_vm2, %v1159_v62  ;;  %v1448_v62 = vrot.slane %v1446_v58, 4 }
  0xdc   : > { %1297 = vmatprep.mubr.bf16.mxu0 %v12506_v0 }
  0xdd   : > { %v1449_v1 = vor.u32 %v1448_v62, %v1445_v61  ;;  %v1875_v62 = vshrl.u32 %v7782_v12, 16 }
  0xdf   : > { %v1459_v15 = vsel %vm12485_vm4, %v1449_v1, %v1458_v8 }
  0xe3   : > { %7755 = vmatmul.mubr.msk.bf16.gmra.mrb[16].mxu0 %vm776_vm2, %v1163_v5  ;;  %v1450_v5 = vsel %vm12485_vm4, %v1440_v56, %v1449_v1  ;;  %v1868_v56 = vshrl.u32 %v7781_v34, 16 }
  0xe4   : > { %1307 = vmatprep.mubr.bf16.mxu0 %v12506_v0 }
  0xe5   : > { %v1870_v59 = vor.u32 %v1868_v56, %v1866_v52 }
  0xeb   : > { %7756 = vmatmul.mubr.msk.bf16.gmra.mrb[20].mxu0 %vm776_vm2, %v1172_v14 }
  0xec   : > { %1317 = vmatprep.mubr.bf16.mxu0 %v12506_v0 }
  0xf3   : > { %7757 = vmatmul.mubr.msk.bf16.gmra.mrb[32].mxu0 %vm776_vm2, %v1171_v33  ;;  %v7764_v33 = vcombine.low %v1364_v3, %v9592_v4  ;;  %v1882_v3 = vshrl.u32 %v7783_v21, 16  ;;  %v1885_v4 = vshll.u32 %v9632_v36, 16 }
  0xf4   : > { %1553 = vmatprep.mubr.bf16.mxu0 %v12506_v0 }
  0xf5   : > { %v1461_v13 = vshrl.u32 %v7764_v33, 16  ;;  %v1464_v14 = vshll.u32 %v7764_v33, 16  ;;  %v1887_v6 = vrot.slane %v1885_v4, 1 }
  0xf7   : > { %v1463_v16 = vrot.slane %v1461_v13, 3  ;;  %v1466_v17 = vrot.slane %v1464_v14, 4  ;;  %v1893_v13 = vshll.u32 %v8761_v7, 16 }
  0xf9   : > { %v1467_v19 = vor.u32 %v1466_v17, %v1463_v16  ;;  %v2079_v16 = vld [vmem:[%s9377_s24 + $0xc] sm:$0xf]  ;;  %v9663_v17 = vld [vmem:[%s9377_s24 + $0x10] sm:$0xf] }
  0xfb   : > { %7772 = vmatmul.mubr.msk.bf16.vlgmr.msra.gmra.mrb[0].mxu0 %vm776_vm2, %v1423_v38  ;;  %v1468_v20 = vsel %vm12485_vm4, %v1458_v8, %v1467_v19  ;;  %v1889_v8 = vshrl.u32 %v9632_v36, 16 }
  0xfc   : > { %1714 = vmatpush1.bf16.msra.mxu0 %v8725_v39  ;;  %1563 = vmatprep.mubr.bf16.mxu0 %v12506_v0 }
  0xfd   : > { %1715 = vmatprep.subr.bf16.mxu0 %v8732_v43  ;;  %v1851_v43 = vshrl.u32 %v7779_v23, 16  ;;  %v1891_v14 = vor.u32 %v1889_v8, %v1887_v6 }
  0xff   : > { %v1856_v48 = vor.u32 %v1855_v44, %v1851_v43  ;;  %v2371_v43 = vld [vmem:[#allocation3 + $0x138] sm:$0xff] }
 0x100   : > { %1716 = vmatpush1.bf16.msra.mxu0 %v8730_v49  ;;  %v8753_v49 = vld [vmem:[#allocation3 + $0xf0] ss:$8 sps:$4 sm:$0xff]  }
 0x101   : > { %7792 = vmatprep.subr.msk.bf16.mxu0 %vm12490_vm0, %v7791_v10  ;;  %v1860_v11 = vsel %vm12486_vm5, %v1856_v48, %v1859_v45  ;;  %v8758_v10 = vld [vmem:[#allocation3 + $0x104] ss:$8 sps:$4 sm:$0xff]   ;;  %v9696_v48 = vld [vmem:[%s9377_s24 + $0x24] sm:$0xff]  }
 0x102   : > { %v2159_v56 = vshrl.u32 %v9696_v48, 16 }
 0x103   : > { %7773 = vmatmul.mubr.msk.bf16.gmra.mrb[4].mxu0 %vm776_vm2, %v1432_v51  ;;  %v1863_v51 = vor.u32 %v1861_v46, %v1859_v45  ;;  %v7841_v46 = vcombine.low %v2371_v43, %v2371_v43 }
 0x104   : > { %1573 = vmatprep.mubr.bf16.mxu0 %v12506_v0  ;;  %1718 = vmatpush1.bf16.msra.mxu0 %v1708_v18  ;;  %v7826_v18 = vcombine.low %v2097_v47, %v2097_v47  ;;  %v2155_v47 = vshll.u32 %v9696_v48, 16 }
 0x105   : > { %1952 = vmatprep.subr.bf16.mxu0 %v8741_v55  ;;  %v1867_v55 = vsel %vm12486_vm5, %v1863_v51, %v1866_v52  ;;  %v2436_v51 = vsel %vm12490_vm0, %v7841_v46, 0  ;;  %v8780_v52 = vld [vmem:[#allocation3 + $0x144] ss:$8 sps:$4 sm:$0xff]  }
 0x106   : > { %v2233_v58 = vsel %vm12490_vm0, %v7826_v18, 0  ;;  %v9710_v18 = vld [vmem:[%s9377_s24 + $0x2c] sm:$0xff]  }
 0x10b   : > { %7774 = vmatmul.mubr.msk.bf16.gmra.mrb[8].mxu0 %vm776_vm2, %v1441_v60  ;;  %v1873_v60 = vrot.slane %v1871_v57, 1  ;;  %v2163_v57 = vshll.u32 %v9710_v18, 16 }
 0x10c   : > { %1583 = vmatprep.mubr.bf16.mxu0 %v12506_v0 }
 0x10d   : > { %v1874_v61 = vsel %vm12486_vm5, %v1870_v59, %v1873_v60  ;;  %v1877_v1 = vor.u32 %v1875_v62, %v1873_v60  ;;  %v9722_v59 = vld [vmem:[%s9377_s24 + $0x34] sm:$0xff]  }
 0x10e   : > { %v2171_v62 = vshll.u32 %v9722_v59, 16 }
 0x10f   : > { %v1881_v2 = vsel %vm12486_vm5, %v1877_v1, %v1880_v30 }
 0x110   : > { %v2173_v1 = vrot.slane %v2171_v62, 1 }
 0x113   : > { %7775 = vmatmul.mubr.msk.bf16.gmra.mrb[12].mxu0 %vm776_vm2, %v1450_v5  ;;  %v1884_v5 = vor.u32 %v1882_v3, %v1880_v30  ;;  %v9734_v30 = vld [vmem:[%s9377_s24 + $0x3c] ss:$0 sps:$4 sm:$0x77]   ;;  %v2175_v3 = vshrl.u32 %v9722_v59, 16 }
 0x114   : > { %1593 = vmatprep.mubr.bf16.mxu0 %v12506_v0  ;;  %v2179_v4 = vshll.u32 %v9734_v30, 16 }
 0x115   : > { %v1888_v33 = vsel %vm12486_vm5, %v1884_v5, %v1887_v6  ;;  %v2177_v5 = vor.u32 %v2175_v3, %v2173_v1 }
 0x116   : > { %v2181_v6 = vrot.slane %v2179_v4, 1 }
 0x11b   : > { %7776 = vmatmul.mubr.msk.bf16.gmra.mrb[16].mxu0 %vm776_vm2, %v1459_v15  ;;  %v1895_v15 = vrot.slane %v1893_v13, 1 }
 0x11c   : > { %1603 = vmatprep.mubr.bf16.mxu0 %v12506_v0 }
 0x11d   : > { %v1896_v27 = vsel %vm12486_vm5, %v1891_v14, %v1895_v15 }
 0x123   : > { %7777 = vmatmul.mubr.msk.bf16.gmra.mrb[20].mxu0 %vm776_vm2, %v1468_v20 }
 0x124   : > { %1613 = vmatprep.mubr.bf16.mxu0 %v12506_v0 }
 0x12b   : > { %7778 = vmatmul.mubr.msk.bf16.gmra.mrb[36].mxu0 %vm776_vm2, %v1467_v19 }
 0x12c   : > { %1745 = vmatprep.mubr.bf16.mxu0 %v12506_v0 }
 0x133   : > { %7793 = vmatmul.mubr.msk.bf16.vlgmr.msra.gmra.mrb[0].mxu0 %vm776_vm2, %v7779_v23 }
 0x134   : > { %1953 = vmatpush1.bf16.msra.mxu0 %v8739_v24  ;;  %1755 = vmatprep.mubr.bf16.mxu0 %v12506_v0 }
 0x135   : > { %1954 = vmatprep.subr.bf16.mxu0 %v8746_v25 }
 0x138   : > { %1955 = vmatpush1.bf16.msra.mxu0 %v8744_v28  ;;  %v7815_v28 = vcombine.low %v2079_v16, %v9663_v17 }
 0x139   : > { %7807 = vmatprep.subr.msk.bf16.mxu0 %vm12490_vm0, %v7806_v29 }
 0x13b   : > { %7794 = vmatmul.mubr.msk.bf16.gmra.mrb[4].mxu0 %vm776_vm2, %v7780_v32  ;;  %v9676_v32 = vld [vmem:[%s9377_s24 + $0x14] sm:$0xff]  }
 0x13c   : > { %1765 = vmatprep.mubr.bf16.mxu0 %v12506_v0  ;;  %1957 = vmatpush1.bf16.msra.mxu0 %v1947_v35  ;;  %v2134_v35 = vshll.u32 %v7815_v28, 16  ;;  %v2143_v37 = vshrl.u32 %v9676_v32, 16 }
 0x13d   : > { %2238 = vmatprep.subr.bf16.mxu0 %v8755_v9  ;;  %v1899_v9 = vor.u32 %v1897_v31, %v1895_v15  ;;  %v2182_v15 = vsel %vm12486_vm5, %v2177_v5, %v2181_v6  ;;  %v8783_v31 = vld [vmem:[#allocation3 + $0x154] ss:$8 sps:$4 sm:$0xff]  }
 0x143   : > { %7795 = vmatmul.mubr.msk.bf16.gmra.mrb[8].mxu0 %vm776_vm2, %v7781_v34  ;;  %v2132_v34 = vshrl.u32 %v7815_v28, 16 }
 0x144   : > { %1775 = vmatprep.mubr.bf16.mxu0 %v12506_v0 }
 0x14b   : > { %7796 = vmatmul.mubr.msk.bf16.gmra.mrb[12].mxu0 %vm776_vm2, %v7782_v12  ;;  %v2136_v12 = vrot.slane %v2134_v35, 1  ;;  %v2574_v35 = vld [vmem:[#allocation3 + $0x160] sm:$0xff] }
 0x14c   : > { %1785 = vmatprep.mubr.bf16.mxu0 %v12506_v0 }
 0x153   : > { %7797 = vmatmul.mubr.msk.bf16.gmra.mrb[16].mxu0 %vm776_vm2, %v7783_v21  ;;  %v2139_v21 = vshll.u32 %v9676_v32, 16 }
 0x154   : > { %1795 = vmatprep.mubr.bf16.mxu0 %v12506_v0 }
 0x156   : > { %v9627_v38 = vpop.f32.mrb[24].mxu0 }
 0x157   : > { %v9629_v22 = vpop.f32.mrb[25].mxu0 }
 0x158   : > { %v903_v39 = vpop.f32.mrb[26].mxu0 }
 0x159   : > { %v904_v40 = vpop.f32.mrb[27].mxu0 }
 0x15a   : > { %v8764_v40 = vld [vmem:[#allocation3 + $0x118] ss:$8 sps:$4 sm:$0xff]  }
 0x15b   : > { %7798 = vmatmul.mubr.msk.bf16.gmra.mrb[20].mxu0 %vm776_vm2, %v9632_v36  ;;  %v9684_v36 = vld [vmem:[%s9377_s24 + $0x1c] sm:$0xff]  }
 0x15c   : > { %1805 = vmatprep.mubr.bf16.mxu0 %v12506_v0 }
 0x163   : > { %7799 = vmatmul.mubr.msk.bf16.gmra.mrb[40].mxu0 %vm776_vm2, %v7785_v41  ;;  %v2147_v41 = vshll.u32 %v9684_v36, 16 }
 0x164   : > { %1984 = vmatprep.mubr.bf16.mxu0 %v12506_v0 }
 0x165   : > { %v2149_v45 = vrot.slane %v2147_v41, 1 }
 0x16b   : > { %7808 = vmatmul.mubr.msk.bf16.vlgmr.msra.gmra.mrb[0].mxu0 %vm776_vm2, %v1860_v11  ;;  %v8769_v11 = vld [vmem:[#allocation3 + $0x128] ss:$8 sps:$4 sm:$0xff]  }
 0x16c   : > { %2239 = vmatpush1.bf16.msra.mxu0 %v8753_v49  ;;  %1994 = vmatprep.mubr.bf16.mxu0 %v12506_v0  ;;  %v7842_v49 = vcombine.high %v2371_v43, %v2371_v43 }
 0x16d   : > { %2240 = vmatprep.subr.bf16.mxu0 %v8758_v10  ;;  %v2151_v10 = vshrl.u32 %v9684_v36, 16 }
 0x16f   : > { %v2591_v5 = vrot.slane %v2151_v10, 1 }
 0x170   : > { %2241 = vmatpush1.bf16.msra.mxu0 %v8756_v53  ;;  %v2153_v53 = vor.u32 %v2151_v10, %v2149_v45 }
 0x171   : > { %7828 = vmatprep.subr.msk.bf16.mxu0 %vm12490_vm0, %v7827_v54  ;;  %v2157_v54 = vrot.slane %v2155_v47, 1 }
 0x173   : > { %7809 = vmatmul.mubr.msk.bf16.gmra.mrb[4].mxu0 %vm776_vm2, %v1867_v55  ;;  %v2158_v55 = vsel %vm12486_vm5, %v2153_v53, %v2157_v54 }
 0x174   : > { %2004 = vmatprep.mubr.bf16.mxu0 %v12506_v0  ;;  %2243 = vmatpush1.bf16.msra.mxu0 %v2233_v58  ;;  %v2161_v58 = vor.u32 %v2159_v56, %v2157_v54 }
 0x175   : > { %2441 = vmatprep.subr.bf16.mxu0 %v8766_v26  ;;  %v2165_v26 = vrot.slane %v2163_v57, 1 }
 0x177   : > { %v2166_v60 = vsel %vm12486_vm5, %v2161_v58, %v2165_v26 }
 0x17b   : > { %7810 = vmatmul.mubr.msk.bf16.gmra.mrb[8].mxu0 %vm776_vm2, %v1874_v61  ;;  %v2167_v61 = vshrl.u32 %v9710_v18, 16 }
 0x17c   : > { %2014 = vmatprep.mubr.bf16.mxu0 %v12506_v0 }
 0x17d   : > { %v2169_v63 = vor.u32 %v2167_v61, %v2165_v26  ;;  %v2587_v26 = vrot.slane %v2143_v37, 1  ;;  %v2599_v10 = vrot.slane %v2167_v61, 1  ;;  %v8787_v61 = vld [vmem:[%s12477_s9 + $0x4] ss:$8 sps:$4 sm:$0xff]  }
 0x17e   : > { %3399 = vmatprep.subr.bf16.mxu1 %v8787_v61 }
 0x183   : > { %7811 = vmatmul.mubr.msk.bf16.gmra.mrb[12].mxu0 %vm776_vm2, %v1881_v2  ;;  %v2174_v2 = vsel %vm12486_vm5, %v2169_v63, %v2173_v1  ;;  %v2588_v1 = vrot.slane %v2139_v21, 2 }
 0x184   : > { %2024 = vmatprep.mubr.bf16.mxu0 %v12506_v0 }
 0x18b   : > { %7812 = vmatmul.mubr.msk.bf16.gmra.mrb[16].mxu0 %vm776_vm2, %v1888_v33 }
 0x18c   : > { %2034 = vmatprep.mubr.bf16.mxu0 %v12506_v0 }
 0x18e   : > { %v1118_v19 = vpop.f32.mrb[28].mxu0 }
 0x18f   : > { %v9666_v20 = vadd.f32 %v1118_v19, %v9627_v38  ;;  %v1120_v23 = vpop.f32.mrb[29].mxu0  ;;  %v2137_v38 = vor.u32 %v2136_v12, %v2132_v34  ;;  %v2183_v19 = vshrl.u32 %v9734_v30, 16  ;;  %v7857_v34 = vcombine.high %v2574_v35, %v2574_v35 }
 0x190   : > { %v9669_v24 = vadd.f32 %v1120_v23, %v9629_v22  ;;  %v1122_v25 = vpop.f32.mrb[30].mxu0  ;;  %v2141_v22 = vrot.slane %v2139_v21, 1  ;;  %v2365_v23 = vld [vmem:[%s9377_s24 + $0xc] sm:$0xe]  ;;  %v7856_v12 = vcombine.low %v2574_v35, %v2574_v35 }
 0x191   : > { %v1123_v29 = vpop.f32.mrb[31].mxu0  ;;  %v2185_v25 = vor.u32 %v2183_v19, %v2181_v6  ;;  %v2595_v6 = vrot.slane %v2159_v56, 1 }
 0x192   : > { %v2142_v39 = vsel %vm12486_vm5, %v2137_v38, %v2141_v22  ;;  %v2145_v44 = vor.u32 %v2143_v37, %v2141_v22  ;;  %v8778_v29 = vld [vmem:[#allocation3 + $0x140] ss:$8 sps:$4 sm:$0xff]   ;;  %v2663_v22 = vsel %vm12490_vm0, %v7856_v12, 0  ;;  %v2592_v37 = vrot.slane %v2147_v41, 2 }
 0x193   : > { %7813 = vmatmul.mubr.msk.bf16.gmra.mrb[20].mxu0 %vm776_vm2, %v1896_v27  ;;  %v7836_v27 = vcombine.low %v2365_v23, %v9663_v17  ;;  %v2379_v17 = vrot.slane %v9684_v36, 1 }
 0x194   : > { %2044 = vmatprep.mubr.bf16.mxu0 %v12506_v0  ;;  %v2150_v50 = vsel %vm12486_vm5, %v2145_v44, %v2149_v45  ;;  %v2385_v44 = vrot.slane %v9722_v59, 1 }
 0x195   : > { %v2583_v58 = vshll.u32 %v7836_v27, 16 }
 0x197   : > { %v2585_v63 = vrot.slane %v2583_v58, 2 }
 0x19b   : > { %7814 = vmatmul.mubr.msk.bf16.gmra.mrb[44].mxu0 %vm776_vm2, %v1899_v9  ;;  %v8781_v9 = vld [vmem:[#allocation3 + $0x150] ss:$8 sps:$4 sm:$0xff]  }
 0x19c   : > { %2270 = vmatprep.mubr.bf16.mxu0 %v12506_v0 }
 0x1a3   : > { %7829 = vmatmul.mubr.msk.bf16.vlgmr.msra.gmra.mrb[0].mxu0 %vm776_vm2, %v2142_v39  ;;  %v2381_v39 = vrot.slane %v9696_v48, 1 }
 0x1a4   : > { %2442 = vmatpush1.bf16.msra.mxu0 %v8764_v40  ;;  %2280 = vmatprep.mubr.bf16.mxu0 %v12506_v0 }
 0x1a5   : > { %2443 = vmatprep.subr.bf16.mxu0 %v8771_v42  ;;  %v2382_v40 = vsel %vm12484_vm6, %v2379_v17, %v2381_v39  ;;  %v2383_v42 = vrot.slane %v9710_v18, 1  ;;  %v8789_v18 = vld [vmem:[%s12477_s9] ss:$8 sps:$4 sm:$0xff]  }
 0x1a6   : > { %3400 = vmatpush1.bf16.msra.mxu1 %v8789_v18 }
 0x1a7   : > { %v2384_v43 = vsel %vm12484_vm6, %v2381_v39, %v2383_v42  ;;  %v2386_v45 = vsel %vm12484_vm6, %v2383_v42, %v2385_v44  ;;  %v8798_v39 = vld [vmem:[%s9377_s24 + $0x20] sm:$0xff]  }
 0x1a8   : > { %2444 = vmatpush1.bf16.msra.mxu0 %v8769_v11  ;;  %v2387_v11 = vrot.slane %v9734_v30, 1 }
 0x1a9   : > { %7843 = vmatprep.subr.msk.bf16.mxu0 %vm12490_vm0, %v7842_v49 }
 0x1aa   : > { %v2388_v53 = vsel %vm12484_vm6, %v2385_v44, %v2387_v11 }
 0x1ab   : > { %7830 = vmatmul.mubr.msk.bf16.gmra.mrb[4].mxu0 %vm776_vm2, %v2150_v50 }
 0x1ac   : > { %2290 = vmatprep.mubr.bf16.mxu0 %v12506_v0  ;;  %2446 = vmatpush1.bf16.msra.mxu0 %v2436_v51 }
 0x1ad   : > { %2668 = vmatprep.subr.bf16.mxu0 %v8780_v52 }
 0x1b3   : > { %7831 = vmatmul.mubr.msk.bf16.gmra.mrb[8].mxu0 %vm776_vm2, %v2158_v55  ;;  %v2580_v55 = vshrl.u32 %v7836_v27, 16 }
 0x1b4   : > { %2300 = vmatprep.mubr.bf16.mxu0 %v12506_v0 }
 0x1bb   : > { %7832 = vmatmul.mubr.msk.bf16.gmra.mrb[12].mxu0 %vm776_vm2, %v2166_v60  ;;  %v2582_v60 = vrot.slane %v2580_v55, 1 }
 0x1bc   : > { %2310 = vmatprep.mubr.bf16.mxu0 %v12506_v0 }
 0x1bd   : > { %v2586_v30 = vor.u32 %v2585_v63, %v2582_v60 }
 0x1c3   : > { %7833 = vmatmul.mubr.msk.bf16.gmra.mrb[16].mxu0 %vm776_vm2, %v2174_v2  ;;  %v2589_v2 = vor.u32 %v2588_v1, %v2587_v26  ;;  %v472_v26 = vlaneseq }
 0x1c4   : > { %2320 = vmatprep.mubr.bf16.mxu0 %v12506_v0 }
 0x1c5   : > { %v2590_v4 = vsel %vm12488_vm7, %v2586_v30, %v2589_v2  ;;  %v9868_v60 = vshrl.u32 %v472_v26, 7 }
 0x1c6   : > { %v1319_v7 = vpop.f32.mrb[32].mxu0 }
 0x1c7   : > { %v1350_v33 = vadd.f32 %v1319_v7, %v9666_v20  ;;  %v1321_v8 = vpop.f32.mrb[33].mxu0  ;;  %v2376_v20 = vrot.slane %v7836_v27, 1  ;;  %v2596_v7 = vrot.slane %v2155_v47, 2  ;;  %v2603_v47 = vrot.slane %v2175_v3, 1  ;;  %v3301_v3 = vld [vmem:[%s12477_s9 + $0x20] sm:$0xff] }
 0x1c8   : > { %v1351_v13 = vadd.f32 %v1321_v8, %v9669_v24  ;;  %v1323_v14 = vpop.f32.mrb[34].mxu0  ;;  %v2377_v24 = vrot.slane %v9676_v32, 1  ;;  %v2593_v32 = vor.u32 %v2592_v37, %v2591_v5  ;;  %v2604_v8 = vrot.slane %v2171_v62, 2 }
 0x1c9   : > { %v1324_v16 = vpop.f32.mrb[35].mxu0  ;;  %v2597_v36 = vor.u32 %v2596_v7, %v2595_v6  ;;  %v7890_v19 = vcombine.low %v3301_v3, %v3301_v3  ;;  %v474_v63 = vadd.s32 8, %v9868_v60  ;;  %v475_v1 = vadd.s32 16, %v9868_v60 }
 0x1ca   : > { %v2378_v28 = vsel %vm12484_vm6, %v2376_v20, %v2377_v24  ;;  %v2380_v38 = vsel %vm12484_vm6, %v2377_v24, %v2379_v17  ;;  %v2594_v21 = vsel %vm12488_vm7, %v2589_v2, %v2593_v32  ;;  %v2605_v59 = vor.u32 %v2604_v8, %v2603_v47  ;;  %v8795_v24 = vld [vmem:[%s9377_s24 + $0x8] sm:$0xff]  }
 0x1cb   : > { %7834 = vmatmul.mubr.msk.bf16.gmra.mrb[20].mxu0 %vm776_vm2, %v2182_v15  ;;  %v2598_v41 = vsel %vm12488_vm7, %v2593_v32, %v2597_v36  ;;  %v8792_v15 = vld [vmem:[%s12477_s9 + $0x10] ss:$8 sps:$4 sm:$0xff]   ;;  %v7891_v16 = vcombine.high %v3301_v3, %v3301_v3  ;;  %v3394_v20 = vsel %vm12490_vm0, %v7890_v19, 0  ;;  %v476_v30 = vadd.s32 24, %v9868_v60 }
 0x1cc   : > { %2330 = vmatprep.mubr.bf16.mxu0 %v12506_v0  ;;  %v486_v2 = vcvt.s32.f32 %v9868_v60  ;;  %v487_v5 = vcvt.s32.f32 %v474_v63  ;;  %v9875_v37 = vcvt.s32.f32 %v475_v1  ;;  %v478_v32 = vadd.s32 40, %v9868_v60 }
 0x1cd   : > { %v480_v8 = vadd.s32 56, %v9868_v60 }
 0x1ce   : > { %v505_v6 = vmul.f32 0.1, %v486_v2  ;;  %vm557_vm8 = vcmp.lt.f32.partialorder %v486_v2, 80.0  ;;  %vm558_vm10 = vcmp.lt.f32.partialorder %v487_v5, 80.0  ;;  %vm559_vm12 = vcmp.lt.f32.partialorder %v9875_v37, 80.0 }
 0x1d3   : > { %7835 = vmatmul.mubr.msk.bf16.gmra.mrb[48].mxu0 %vm776_vm2, %v2185_v25 }
 0x1d4   : > { %2473 = vmatprep.mubr.bf16.mxu0 %v12506_v0 }
 0x1db   : > { %7844 = vmatmul.mubr.msk.bf16.vlgmr.msra.gmra.mrb[0].mxu0 %vm776_vm2, %v2378_v28 }
 0x1dc   : > { %2669 = vmatpush1.bf16.msra.mxu0 %v8778_v29  ;;  %2483 = vmatprep.mubr.bf16.mxu0 %v12506_v0 }
 0x1dd   : > { %2670 = vmatprep.subr.bf16.mxu0 %v8783_v31 }
 0x1e0   : > { %2671 = vmatpush1.bf16.msra.mxu0 %v8781_v9 }
 0x1e1   : > { %7858 = vmatprep.subr.msk.bf16.mxu0 %vm12490_vm0, %v7857_v34 }
 0x1e3   : > { %7845 = vmatmul.mubr.msk.bf16.gmra.mrb[4].mxu0 %vm776_vm2, %v2380_v38  ;;  %v8796_v38 = vld [vmem:[%s9377_s24 + $0x10] sm:$0xff]  }
 0x1e4   : > { %2493 = vmatprep.mubr.bf16.mxu0 %v12506_v0  ;;  %2673 = vmatpush1.bf16.msra.mxu0 %v2663_v22  ;;  %v8797_v22 = vld [vmem:[%s9377_s24 + $0x18] sm:$0xff]  }
 0x1eb   : > { %7846 = vmatmul.mubr.msk.bf16.gmra.mrb[8].mxu0 %vm776_vm2, %v2382_v40  ;;  %v8799_v40 = vld [vmem:[%s9377_s24 + $0x28] sm:$0xff]  }
 0x1ec   : > { %2503 = vmatprep.mubr.bf16.mxu0 %v12506_v0 }
 0x1f3   : > { %7847 = vmatmul.mubr.msk.bf16.gmra.mrb[12].mxu0 %vm776_vm2, %v2384_v43 }
 0x1f4   : > { %2513 = vmatprep.mubr.bf16.mxu0 %v12506_v0 }
 0x1fb   : > { %7848 = vmatmul.mubr.msk.bf16.gmra.mrb[16].mxu0 %vm776_vm2, %v2386_v45 }
 0x1fc   : > { %2523 = vmatprep.mubr.bf16.mxu0 %v12506_v0 }
 0x1fe   : > { %v1615_v49 = vpop.f32.mrb[36].mxu0 }
 0x1ff   : > { %v9776_v46 = vadd.f32 %v1615_v49, %v1350_v33  ;;  %v1617_v50 = vpop.f32.mrb[37].mxu0  ;;  %v2600_v33 = vrot.slane %v2163_v57, 2  ;;  %v8790_v57 = vld [vmem:[%s12477_s9 + $0x14] ss:$8 sps:$4 sm:$0xff]  }
 0x200   : > { %v9778_v51 = vadd.f32 %v1617_v50, %v1351_v13  ;;  %v1619_v52 = vpop.f32.mrb[38].mxu0  ;;  %v8786_v13 = vld [vmem:[%s9377_s24 + $0x3c] ss:$0 sps:$4 sm:$0xff]   ;;  %3401 = vmatprep.subr.bf16.mxu1 %v8790_v57  ;;  %v8801_v50 = vld [vmem:[%s9377_s24 + $0x38] ss:$0 sps:$4 sm:$0x33]  }
 0x201   : > { %v1620_v54 = vpop.f32.mrb[39].mxu0  ;;  %v2601_v56 = vor.u32 %v2600_v33, %v2599_v10  ;;  %v2608_v62 = vshrl.u32 %v8786_v13, 16  ;;  %v2611_v14 = vshll.u32 %v8786_v13, 16  ;;  %3402 = vmatpush1.bf16.msra.mxu1 %v8792_v15  ;;  %v9883_v10 = vcvt.s32.f32 %v478_v32 }
 0x202   : > { %7892 = vmatprep.subr.msk.bf16.mxu1 %vm12490_vm0, %v7891_v16  ;;  %v479_v33 = vadd.s32 48, %v9868_v60  ;;  %v481_v15 = vadd.s32 64, %v9868_v60  ;;  %v500_v16 = vand.u32 127, %v472_v26  ;;  %v483_v26 = vadd.s32 80, %v9868_v60 }
 0x203   : > { %7849 = vmatmul.mubr.msk.bf16.gmra.mrb[20].mxu0 %vm776_vm2, %v2388_v53  ;;  %v2602_v48 = vsel %vm12488_vm7, %v2597_v36, %v2601_v56  ;;  %v2606_v23 = vsel %vm12488_vm7, %v2601_v56, %v2605_v59  ;;  %v2610_v25 = vrot.slane %v2608_v62, 1  ;;  %v2613_v27 = vrot.slane %v2611_v14, 2 }
 0x204   : > { %2533 = vmatprep.mubr.bf16.mxu0 %v12506_v0  ;;  %v506_v36 = vmul.f32 0.1, %v487_v5  ;;  %v510_v18 = vmul.f32 0.1, %v9883_v10  ;;  %v9890_v57 = vcvt.s32.f32 %v479_v33  ;;  %v9892_v14 = vcvt.s32.f32 %v480_v8 }
 0x205   : > { %v2614_v28 = vor.u32 %v2613_v27, %v2610_v25  ;;  %3404 = vmatpush1.bf16.msra.mxu1 %v3394_v20  ;;  %v482_v20 = vadd.s32 72, %v9868_v60  ;;  %v12780_v8 = vmov 0 }
 0x206   : > { %v519_v13 = vfloor.f32 %v506_v36  ;;  %v523_v25 = vfloor.f32 %v510_v18  ;;  %v511_v27 = vmul.f32 0.1, %v9890_v57  ;;  %v2795_v18 = vld [vmem:[%s12470_s2] sm:$0x3] }
 0x207   : > { %v2615_v34 = vsel %vm12488_vm7, %v2605_v59, %v2614_v28 }
 0x208   : > { %7893 = vmatmul.mubr.msk.bf16.vlgmr.msra.gmra.mrb[0].mxu1 %vm776_vm2, %v8795_v24  ;;  %v532_v19 = vmul.f32 10.0, %v519_v13 }
 0x209   : > { %3441 = vmatprep.mubr.bf16.mxu1 %v12506_v0 }
 0x20b   : > { %7850 = vmatmul.mubr.msk.bf16.gmra.mrb[52].mxu0 %vm776_vm2, %v2387_v11 }
 0x20c   : > { %2700 = vmatprep.mubr.bf16.mxu0 %v12506_v0 }
 0x210   : > { %7894 = vmatmul.mubr.msk.bf16.gmra.mrb[4].mxu1 %vm776_vm2, %v8796_v38  ;;  %v524_v38 = vfloor.f32 %v511_v27 }
 0x211   : > { %3451 = vmatprep.mubr.bf16.mxu1 %v12506_v0 }
 0x213   : > { %7859 = vmatmul.mubr.msk.bf16.vlgmr.msra.gmra.mrb[0].mxu0 %vm776_vm2, %v2590_v4  ;;  %v477_v4 = vadd.s32 32, %v9868_v60 }
 0x214   : > { %2710 = vmatprep.mubr.bf16.mxu0 %v12506_v0 }
 0x215   : > { %v9880_v7 = vcvt.s32.f32 %v477_v4 }
 0x217   : > { %v509_v47 = vmul.f32 0.1, %v9880_v7  ;;  %vm561_vm6 = vcmp.lt.f32.partialorder %v9880_v7, 80.0 }
 0x218   : > { %7895 = vmatmul.mubr.msk.bf16.gmra.mrb[8].mxu1 %vm776_vm2, %v8797_v22  ;;  %v9901_v22 = vcvt.s32.f32 %v482_v20 }
 0x219   : > { %3461 = vmatprep.mubr.bf16.mxu1 %v12506_v0  ;;  %v522_v62 = vfloor.f32 %v509_v47  ;;  %v10011_v47 = vsub.s32 0, %v9868_v60 }
 0x21b   : > { %7860 = vmatmul.mubr.msk.bf16.gmra.mrb[4].mxu0 %vm776_vm2, %v2594_v21  ;;  %v9878_v21 = vcvt.s32.f32 %v476_v30  ;;  %12779 = vst [vmem:[#allocation9_spill] sm:$0xff] %v10011_v47 }
 0x21c   : > { %2720 = vmatprep.mubr.bf16.mxu0 %v12506_v0 }
 0x21d   : > { %v508_v56 = vmul.f32 0.1, %v9878_v21  ;;  %vm560_vm15 = vcmp.lt.f32.partialorder %v9878_v21, 80.0 }
 0x21f   : > { %v521_v3 = vfloor.f32 %v508_v56 }
 0x220   : > { %7896 = vmatmul.mubr.msk.bf16.gmra.mrb[12].mxu1 %vm776_vm2, %v8798_v39  ;;  %v502_v39 = vcvt.s32.f32 %v500_v16 }
 0x221   : > { %3471 = vmatprep.mubr.bf16.mxu1 %v12506_v0  ;;  %v534_v24 = vmul.f32 10.0, %v521_v3 }
 0x222   : > { %vm9924_vm3 = vcmp.lt.f32.partialorder %v502_v39, 128.0 }
 0x223   : > { %7861 = vmatmul.mubr.msk.bf16.gmra.mrb[8].mxu0 %vm776_vm2, %v2598_v41  ;;  %v507_v41 = vmul.f32 0.1, %v9875_v37 }
 0x224   : > { %2730 = vmatprep.mubr.bf16.mxu0 %v12506_v0 }
 0x225   : > { %v520_v61 = vfloor.f32 %v507_v41  ;;  %v484_v41 = vadd.s32 88, %v9868_v60 }
 0x228   : > { %7897 = vmatmul.mubr.msk.bf16.gmra.mrb[16].mxu1 %vm776_vm2, %v8799_v40  ;;  %v547_v40 = vsub.f32 %v9878_v21, %v534_v24  ;;  %v12509_v24 = vmov 0.0  }
 0x229   : > { %3481 = vmatprep.mubr.bf16.mxu1 %v12506_v0 }
 0x22b   : > { %7862 = vmatmul.mubr.msk.bf16.gmra.mrb[12].mxu0 %vm776_vm2, %v2602_v48  ;;  %v518_v48 = vfloor.f32 %v505_v6  ;;  %v9963_v6 = vcvt.s32.f32 %v483_v26 }
 0x22c   : > { %2740 = vmatprep.mubr.bf16.mxu0 %v12506_v0 }
 0x22d   : > { %v531_v59 = vmul.f32 10.0, %v518_v48  ;;  %v515_v56 = vmul.f32 0.1, %v9963_v6 }
 0x233   : > { %7863 = vmatmul.mubr.msk.bf16.gmra.mrb[16].mxu0 %vm776_vm2, %v2606_v23  ;;  %v533_v23 = vmul.f32 10.0, %v520_v61 }
 0x234   : > { %2750 = vmatprep.mubr.bf16.mxu0 %v12506_v0 }
 0x236   : > { %v1807_v29 = vpop.f32.mrb[40].mxu0 }
 0x237   : > { %v1838_v31 = vadd.f32 %v1807_v29, %v9776_v46  ;;  %v1809_v35 = vpop.f32.mrb[41].mxu0  ;;  %v8800_v46 = vld [vmem:[%s9377_s24 + $0x30] sm:$0xff]   ;;  %v535_v29 = vmul.f32 10.0, %v522_v62 }
 0x238   : > { %v1839_v17 = vadd.f32 %v1809_v35, %v9778_v51  ;;  %v1811_v9 = vpop.f32.mrb[42].mxu0  ;;  %7898 = vmatmul.mubr.msk.bf16.gmra.mrb[20].mxu1 %vm776_vm2, %v8800_v46  ;;  %v9898_v35 = vcvt.s32.f32 %v481_v15  ;;  %v537_v46 = vmul.f32 10.0, %v524_v38 }
 0x239   : > { %v1812_v12 = vpop.f32.mrb[43].mxu0  ;;  %3491 = vmatprep.mubr.bf16.mxu1 %v12506_v0  ;;  %v545_v9 = vsub.f32 %v487_v5, %v532_v19  ;;  %v528_v19 = vfloor.f32 %v515_v56 }
 0x23a   : > { %v536_v12 = vmul.f32 10.0, %v523_v25  ;;  %v550_v4 = vsub.f32 %v9890_v57, %v537_v46 }
 0x23b   : > { %7864 = vmatmul.mubr.msk.bf16.gmra.mrb[20].mxu0 %vm776_vm2, %v2615_v34  ;;  %v546_v34 = vsub.f32 %v9875_v37, %v533_v23  ;;  %vm571_vm11 = vcmp.lt.f32.partialorder %v545_v9, 8.0  ;;  %v10054_v23 = vrot.slane %v2795_v18, %v10011_v47 }
 0x23c   : > { %2760 = vmatprep.mubr.bf16.mxu0 %v12506_v0  ;;  %vm9919_vm4 = vmand %vm558_vm10, %vm571_vm11  ;;  %vm562_vm11 = vcmp.lt.f32.partialorder %v9883_v10, 80.0 }
 0x23d   : > { %vm9907_vm13 = vcmp.lt.f32.partialorder %v546_v34, 8.0  ;;  %v541_v34 = vmul.f32 10.0, %v528_v19 }
 0x240   : > { %7899 = vmatmul.mubr.msk.bf16.gmra.mrb[24].mxu1 %vm776_vm2, %v8801_v50  ;;  %v514_v50 = vmul.f32 0.1, %v9901_v22 }
 0x242   : > { %v527_v5 = vfloor.f32 %v514_v50 }
 0x243   : > { %7865 = vmatmul.mubr.msk.bf16.gmra.mrb[56].mxu0 %vm776_vm2, %v2614_v28  ;;  %v544_v28 = vsub.f32 %v486_v2, %v531_v59  ;;  %vm573_vm2 = vcmp.lt.f32.partialorder %v547_v40, 8.0  ;;  %v10031_v59 = vcvt.s32.f32 %v484_v41 }
 0x244   : > { %vm9940_vm10 = vmand %vm560_vm15, %vm573_vm2  ;;  %v540_v36 = vmul.f32 10.0, %v527_v5  ;;  %vm564_vm2 = vcmp.lt.f32.partialorder %v9892_v14, 80.0 }
 0x245   : > { %vm570_vm9 = vcmp.lt.f32.partialorder %v544_v28, 8.0  ;;  %v516_v20 = vmul.f32 0.1, %v10031_v59 }
 0x246   : > { %vm9913_vm14 = vmand %vm557_vm8, %vm570_vm9  ;;  %v553_v3 = vsub.f32 %v9901_v22, %v540_v36 }
 0x247   : > { %vm9936_vm9 = vmand %vm559_vm12, %vm9907_vm13 }
 0x248   : > { %vm598_vm12 = vmand %vm9913_vm14, %vm9924_vm3 }
 0x26e   : > { %v2046_v42 = vpop.f32.mrb[44].mxu0 }
 0x26f   : > { %v2077_v43 = vadd.f32 %v2046_v42, %v1838_v31  ;;  %v2048_v44 = vpop.f32.mrb[45].mxu0  ;;  %v512_v31 = vmul.f32 0.1, %v9892_v14  ;;  %v548_v42 = vsub.f32 %v9880_v7, %v535_v29 }
 0x270   : > { %v2078_v45 = vadd.f32 %v2048_v44, %v1839_v17  ;;  %v2050_v11 = vpop.f32.mrb[46].mxu0  ;;  %v501_v17 = vadd.s32 128, %v500_v16  ;;  %v513_v44 = vmul.f32 0.1, %v9898_v35 }
 0x271   : > { %v2051_v49 = vpop.f32.mrb[47].mxu0  ;;  %vm574_vm5 = vcmp.lt.f32.partialorder %v548_v42, 8.0 }
 0x272   : > { %v549_v49 = vsub.f32 %v9883_v10, %v536_v12  ;;  %vm9946_vm1 = vmand %vm561_vm6, %vm574_vm5  ;;  %vm10069_vm5 = vcmp.lt.f32.partialorder %v553_v3, 8.0 }
 0x274   : > { %vm575_vm7 = vcmp.lt.f32.partialorder %v549_v49, 8.0  ;;  %v529_v49 = vfloor.f32 %v516_v20 }
 0x275   : > { %vm9977_vm0 = vmand %vm562_vm11, %vm575_vm7  ;;  %vm563_vm7 = vcmp.lt.f32.partialorder %v9890_v57, 80.0  ;;  %vm576_vm11 = vcmp.lt.f32.partialorder %v550_v4, 8.0  ;;  %v10024_v57 = vsub.s32 1, %v9868_v60  ;;  %v554_v4 = vsub.f32 %v9963_v6, %v541_v34 }
 0x276   : > { %vm10013_vm15 = vmand %vm563_vm7, %vm576_vm11  ;;  %v542_v10 = vmul.f32 10.0, %v529_v49 }
 0x277   : > { %v12781_v8 = vsel %vm10013_vm15, 4294967295, %v12780_v8  ;;  %12782 = vst [vmem:[#allocation10_spill] sm:$0xff] %v10024_v57  ;;  %v10062_v25 = vrot.slane %v2795_v18, %v10024_v57  ;;  %vm12792_vm11 = vmand %vm9919_vm4, %vm9924_vm3 }
 0x278   : > { %v10096_v29 = vsel %vm12792_vm11, 1.0, %v12509_v24  ;;  %vm12799_vm11 = vmand %vm9936_vm9, %vm9924_vm3  ;;  %v555_v34 = vsub.f32 %v10031_v59, %v542_v10 }
 0x279   : > { %12793 = vst [vmem:[#allocation13_spill] sm:$0xff] %v10096_v29  ;;  %v10120_v9 = vsel %vm12799_vm11, 1.0, %v12509_v24 }
 0x27a   : > { %12800 = vst [vmem:[#allocation15_spill] sm:$0xff] %v10120_v9 }
 0x2a6   : > { %v2332_v51 = vpop.f32.mrb[48].mxu0 }
 0x2a7   : > { %v9864_v52 = vadd.f32 %v2332_v51, %v2077_v43  ;;  %v2334_v53 = vpop.f32.mrb[49].mxu0  ;;  %v525_v43 = vfloor.f32 %v512_v31 }
 0x2a8   : > { %v9866_v54 = vadd.f32 %v2334_v53, %v2078_v45  ;;  %v2336_v55 = vpop.f32.mrb[50].mxu0  ;;  %v503_v45 = vcvt.s32.f32 %v501_v17 }
 0x2a9   : > { %v2337_v58 = vpop.f32.mrb[51].mxu0  ;;  %v538_v55 = vmul.f32 10.0, %v525_v43 }
 0x2aa   : > { %v526_v58 = vfloor.f32 %v513_v44  ;;  %vm9928_vm8 = vcmp.lt.f32.partialorder %v503_v45, 128.0 }
 0x2ab   : > { %v551_v37 = vsub.f32 %v9892_v14, %v538_v55  ;;  %v485_v14 = vadd.s32 96, %v9868_v60  ;;  %v10080_v60 = vsel %vm598_vm12, 1.0, %v12509_v24  ;;  %vm12794_vm12 = vcmp.lt.f32.partialorder %v9898_v35, 80.0 }
 0x2ac   : > { %v539_v21 = vmul.f32 10.0, %v526_v58  ;;  %12789 = vst [vmem:[#allocation11_spill] sm:$0xff] %v10080_v60 }
 0x2ad   : > { %vm10004_vm13 = vcmp.lt.f32.partialorder %v551_v37, 8.0  ;;  %v10166_v43 = vcvt.s32.f32 %v485_v14 }
 0x2ae   : > { %v552_v33 = vsub.f32 %v9898_v35, %v539_v21  ;;  %vm10040_vm7 = vmand %vm564_vm2, %vm10004_vm13  ;;  %vm2885_vm13 = vcmask 261120  }
 0x2af   : > { %vm12790_vm2 = vmand %vm9913_vm14, %vm9928_vm8  ;;  %v517_v21 = vmul.f32 0.1, %v10166_v43 }
 0x2b0   : > { %vm10049_vm6 = vcmp.lt.f32.partialorder %v552_v33, 8.0  ;;  %v10088_v28 = vsel %vm12790_vm2, 1.0, %v12509_v24  ;;  %vm12797_vm14 = vmand %vm9919_vm4, %vm9928_vm8 }
 0x2b1   : > { %12791 = vst [vmem:[#allocation12_spill] sm:$0xff] %v10088_v28  ;;  %vm10102_vm15 = vmand %vm12794_vm12, %vm10049_vm6  ;;  %v10112_v17 = vsel %vm12797_vm14, 1.0, %v12509_v24  ;;  %vm12809_vm14 = vcmp.lt.f32.partialorder %v9901_v22, 80.0  ;;  %v530_v19 = vfloor.f32 %v517_v21 }
 0x2b2   : > { %12798 = vst [vmem:[#allocation14_spill] sm:$0xff] %v10112_v17  ;;  %vm12801_vm6 = vmand %vm9936_vm9, %vm9928_vm8 }
 0x2b3   : > { %v10128_v35 = vsel %vm12801_vm6, 1.0, %v12509_v24  ;;  %vm613_vm4 = vmand %vm10040_vm7, %vm9928_vm8 }
 0x2b4   : > { %12802 = vst [vmem:[#allocation16_spill] sm:$0xff] %v10128_v35  ;;  %vm12803_vm2 = vmand %vm9940_vm10, %vm9924_vm3  ;;  %v10249_v37 = vsel %vm613_vm4, 1.0, %v12509_v24  ;;  %vm10290_vm4 = vcmp.lt.f32.partialorder %v554_v4, 8.0 }
 0x2b5   : > { %v10140_v38 = vsel %vm12803_vm2, 1.0, %v12509_v24  ;;  %vm12805_vm9 = vmand %vm9940_vm10, %vm9928_vm8  ;;  %vm12820_vm2 = vnez %v12781_v8  ;;  %12829 = vst [vmem:[#allocation30_spill] sm:$0xff] %v10249_v37 }
 0x2b6   : > { %12804 = vst [vmem:[#allocation17_spill] sm:$0xff] %v10140_v38  ;;  %v10148_v39 = vsel %vm12805_vm9, 1.0, %v12509_v24  ;;  %vm12807_vm12 = vmand %vm9946_vm1, %vm9924_vm3 }
 0x2b7   : > { %12806 = vst [vmem:[#allocation18_spill] sm:$0xff] %v10148_v39  ;;  %v10156_v40 = vsel %vm12807_vm12, 1.0, %v12509_v24  ;;  %vm10162_vm11 = vmand %vm12809_vm14, %vm10069_vm5 }
 0x2b8   : > { %12808 = vst [vmem:[#allocation19_spill] sm:$0xff] %v10156_v40  ;;  %vm12813_vm10 = vmand %vm9946_vm1, %vm9928_vm8 }
 0x2b9   : > { %v10177_v11 = vsel %vm12813_vm10, 1.0, %v12509_v24  ;;  %vm12815_vm5 = vmand %vm9977_vm0, %vm9924_vm3 }
 0x2ba   : > { %12814 = vst [vmem:[#allocation21_spill] sm:$0xff] %v10177_v11  ;;  %v10185_v22 = vsel %vm12815_vm5, 1.0, %v12509_v24  ;;  %vm614_vm6 = vmand %vm10102_vm15, %vm9924_vm3 }
 0x2bb   : > { %12816 = vst [vmem:[#allocation22_spill] sm:$0xff] %v10185_v22  ;;  %vm12818_vm1 = vmand %vm9977_vm0, %vm9928_vm8  ;;  %v10266_v41 = vsel %vm614_vm6, 1.0, %v12509_v24 }
 0x2bc   : > { %v10200_v51 = vsel %vm12818_vm1, 1.0, %v12509_v24  ;;  %vm12821_vm9 = vmand %vm12820_vm2, %vm9924_vm3  ;;  %12830 = vst [vmem:[#allocation31_spill] sm:$0xff] %v10266_v41 }
 0x2bd   : > { %12819 = vst [vmem:[#allocation24_spill] sm:$0xff] %v10200_v51  ;;  %v10208_v53 = vsel %vm12821_vm9, 1.0, %v12509_v24  ;;  %vm12823_vm12 = vmand %vm12820_vm2, %vm9928_vm8  ;;  %vm569_vm2 = vcmp.lt.f32.partialorder %v10166_v43, 80.0 }
 0x2be   : > { %12822 = vst [vmem:[#allocation25_spill] sm:$0xff] %v10208_v53  ;;  %v10216_v55 = vsel %vm12823_vm12, 1.0, %v12509_v24  ;;  %vm615_vm0 = vmand %vm10102_vm15, %vm9928_vm8  ;;  %vm568_vm15 = vcmp.lt.f32.partialorder %v10031_v59, 80.0 }
 0x2bf   : > { %12824 = vst [vmem:[#allocation26_spill] sm:$0xff] %v10216_v55  ;;  %vm12826_vm14 = vmand %vm10040_vm7, %vm9924_vm3  ;;  %vm567_vm7 = vcmp.lt.f32.partialorder %v9963_v6, 80.0 }
 0x2c0   : > { %v10232_v2 = vsel %vm12826_vm14, 1.0, %v12509_v24  ;;  %vm616_vm10 = vmand %vm10162_vm11, %vm9924_vm3 }
 0x2c1   : > { %12827 = vst [vmem:[#allocation28_spill] sm:$0xff] %v10232_v2  ;;  %vm617_vm5 = vmand %vm10162_vm11, %vm9928_vm8  ;;  %v10281_v8 = vsel %vm616_vm10, 1.0, %v12509_v24  ;;  %vm10332_vm11 = vcmp.lt.f32.partialorder %v555_v34, 8.0 }
 0x2c2   : > { %12832 = vst [vmem:[#allocation33_spill] sm:$0xff] %v10281_v8  ;;  %v10287_v18 = vsel %vm617_vm5, 1.0, %v12509_v24  ;;  %vm10343_vm6 = vmand %vm567_vm7, %vm10290_vm4  ;;  %vm12882_vm4 = vcmask 1043456  }
 0x2c3   : > { %12833 = vst [vmem:[#allocation34_spill] sm:$0xff] %v10287_v18  ;;  %vm618_vm1 = vmand %vm10343_vm6, %vm9924_vm3 }
 0x2c4   : > { %vm619_vm9 = vmand %vm10343_vm6, %vm9928_vm8 }
 0x2c5   : > { %vm10383_vm12 = vmand %vm568_vm15, %vm10332_vm11 }
 0x2c6   : > { %vm620_vm14 = vmand %vm10383_vm12, %vm9924_vm3 }
 0x2c7   : > { %vm621_vm5 = vmand %vm10383_vm12, %vm9928_vm8  ;;  %vm3274_vm12 = vcmask 1041408  }
 0x2c8   : > { %vm12884_vm15 = vmmov %vm12882_vm4 }
 0x2c9   : > { %vm12905_vm11 = vmmov %vm12882_vm4 }
 0x2ca   : > { %vm12906_vm6 = vmmov %vm12882_vm4 }
 0x2de   : > { %v2535_v48 = vpop.f32.mrb[52].mxu0 }
 0x2df   : > { %v10018_v13 = vadd.f32 %v2535_v48, %v9864_v52  ;;  %v2537_v61 = vpop.f32.mrb[53].mxu0  ;;  %v10278_v48 = vsel %vm615_vm0, 1.0, %v12509_v24 }
 0x2e0   : > { %v10034_v52 = vadd.f32 %v2537_v61, %v9866_v54  ;;  %v2539_v62 = vpop.f32.mrb[54].mxu0  ;;  %12831 = vst [vmem:[#allocation32_spill] sm:$0xff] %v10278_v48 }
 0x2e1   : > { %v2540_v16 = vpop.f32.mrb[55].mxu0 }
 0x2e6   : > { %v2702_v12 = vpop.f32.mrb[0].mxu0 }
 0x2e7   : > { %v10169_v44 = vadd.f32 %v10054_v23, %v2702_v12  ;;  %v2704_v45 = vpop.f32.mrb[1].mxu0 }
 0x2e8   : > { %v10192_v46 = vadd.f32 %v10062_v25, %v2704_v45  ;;  %v2706_v50 = vpop.f32.mrb[2].mxu0 }
 0x2e9   : > { %12812 = vst [vmem:[#allocation20_spill] sm:$0xff] %v10169_v44  ;;  %v12504_v58 = vmax.f32 %v10169_v44, 0.0  ;;  %v10224_v26 = vadd.f32 %v10054_v23, %v2706_v50  ;;  %v2708_v30 = vpop.f32.mrb[3].mxu0 }
 0x2ea   : > { %12817 = vst [vmem:[#allocation23_spill] sm:$0xff] %v10192_v46  ;;  %v12503_v5 = vmax.f32 %v10192_v46, 0.0  ;;  %v10241_v32 = vadd.f32 %v10062_v25, %v2708_v30 }
 0x2eb   : > { %12825 = vst [vmem:[#allocation27_spill] sm:$0xff] %v10224_v26  ;;  %v2859_v7 = vmul.f32 %v10080_v60, %v12504_v58  ;;  %v12498_v36 = vmax.f32 %v10224_v26, 0.0 }
 0x2ec   : > { %12828 = vst [vmem:[#allocation29_spill] sm:$0xff] %v10241_v32  ;;  %v2860_v33 = vmul.f32 %v10088_v28, %v12503_v5  ;;  %v12493_v56 = vmax.f32 %v10241_v32, 0.0 }
 0x2ed   : > { %v2861_v61 = vmul.f32 %v10096_v29, %v12498_v36  ;;  %v2935_v14 = vmul.f32 %v2859_v7, %v2859_v7 }
 0x2ee   : > { %v2886_v62 = vsel %vm2885_vm13, %v2860_v33, 0.0  ;;  %v2936_v15 = vmul.f32 %v2860_v33, %v2860_v33  ;;  %v2862_v16 = vmul.f32 %v10112_v17, %v12493_v56  ;;  %v2712_v54 = vpop.f32.mrb[4].mxu0 }
 0x2ef   : > { %v2887_v27 = vadd.f32 %v2886_v62, %v2859_v7  ;;  %v10299_v20 = vadd.f32 %v10054_v23, %v2712_v54  ;;  %v2714_v31 = vpop.f32.mrb[5].mxu0  ;;  %v2937_v42 = vmul.f32 %v2861_v61, %v2861_v61  ;;  %v543_v54 = vmul.f32 10.0, %v530_v19 }
 0x2f0   : > { %v2961_v12 = vsel %vm2885_vm13, %v2936_v15, 0.0  ;;  %v2938_v45 = vmul.f32 %v2862_v16, %v2862_v16  ;;  %v10304_v49 = vadd.f32 %v10062_v25, %v2714_v31  ;;  %v2716_v50 = vpop.f32.mrb[6].mxu0  ;;  %v2889_v62 = vsel %vm2885_vm13, %v2862_v16, 0.0 }
 0x2f1   : > { %12836 = vst [vmem:[#allocation35_spill] sm:$0xff] %v10299_v20  ;;  %v2962_v30 = vadd.f32 %v2961_v12, %v2935_v14  ;;  %v2888_v4 = vadd.f32 %v2887_v27, %v2861_v61  ;;  %v12495_v21 = vmax.f32 %v10299_v20, 0.0  ;;  %v10308_v7 = vadd.f32 %v10054_v23, %v2716_v50  ;;  %v2718_v33 = vpop.f32.mrb[7].mxu0 }
 0x2f2   : > { %12837 = vst [vmem:[#allocation36_spill] sm:$0xff] %v10304_v49  ;;  %v12494_v10 = vmax.f32 %v10304_v49, 0.0  ;;  %v10313_v15 = vadd.f32 %v10062_v25, %v2718_v33  ;;  %v2964_v27 = vsel %vm2885_vm13, %v2938_v45, 0.0 }
 0x2f3   : > { %12838 = vst [vmem:[#allocation37_spill] sm:$0xff] %v10308_v7  ;;  %v2963_v56 = vadd.f32 %v2962_v30, %v2937_v42  ;;  %v2890_v31 = vadd.f32 %v2889_v62, %v2888_v4  ;;  %v2863_v61 = vmul.f32 %v10120_v9, %v12495_v21  ;;  %v12497_v14 = vmax.f32 %v10308_v7, 0.0 }
 0x2f4   : > { %12839 = vst [vmem:[#allocation38_spill] sm:$0xff] %v10313_v15  ;;  %v2864_v16 = vmul.f32 %v10128_v35, %v12494_v10  ;;  %v12496_v12 = vmax.f32 %v10313_v15, 0.0 }
 0x2f5   : > { %v2965_v50 = vadd.f32 %v2964_v27, %v2963_v56  ;;  %v2891_v19 = vadd.f32 %v2890_v31, %v2863_v61  ;;  %v2939_v42 = vmul.f32 %v2863_v61, %v2863_v61  ;;  %v2865_v30 = vmul.f32 %v10140_v38, %v12497_v14 }
 0x2f6   : > { %v2892_v4 = vsel %vm2885_vm13, %v2864_v16, 0.0  ;;  %v2940_v33 = vmul.f32 %v2864_v16, %v2864_v16  ;;  %v2866_v45 = vmul.f32 %v10148_v39, %v12496_v12  ;;  %v2722_v62 = vpop.f32.mrb[8].mxu0  ;;  %v556_v16 = vsub.f32 %v10166_v43, %v543_v54 }
 0x2f7   : > { %v2966_v21 = vadd.f32 %v2965_v50, %v2939_v42  ;;  %v2893_v56 = vadd.f32 %v2892_v4, %v2891_v19  ;;  %v10337_v31 = vadd.f32 %v10054_v23, %v2722_v62  ;;  %v2724_v61 = vpop.f32.mrb[9].mxu0  ;;  %v2941_v12 = vmul.f32 %v2865_v30, %v2865_v30 }
 0x2f8   : > { %v2967_v34 = vsel %vm2885_vm13, %v2940_v33, 0.0  ;;  %v2942_v14 = vmul.f32 %v2866_v45, %v2866_v45  ;;  %v10350_v50 = vadd.f32 %v10062_v25, %v2724_v61  ;;  %v2726_v19 = vpop.f32.mrb[10].mxu0  ;;  %v2895_v36 = vsel %vm2885_vm13, %v2866_v45, 0.0 }
 0x2f9   : > { %12842 = vst [vmem:[#allocation39_spill] sm:$0xff] %v10337_v31  ;;  %v2968_v42 = vadd.f32 %v2967_v34, %v2966_v21  ;;  %v2894_v4 = vadd.f32 %v2893_v56, %v2865_v30  ;;  %v12500_v3 = vmax.f32 %v10337_v31, 0.0  ;;  %v10354_v6 = vadd.f32 %v10054_v23, %v2726_v19  ;;  %v2728_v62 = vpop.f32.mrb[11].mxu0 }
 0x2fa   : > { %12845 = vst [vmem:[#allocation40_spill] sm:$0xff] %v10350_v50  ;;  %v12499_v54 = vmax.f32 %v10350_v50, 0.0  ;;  %v10359_v33 = vadd.f32 %v10062_v25, %v2728_v62  ;;  %v2970_v61 = vsel %vm2885_vm13, %v2942_v14, 0.0  ;;  %vm10387_vm0 = vcmp.lt.f32.partialorder %v556_v16, 8.0 }
 0x2fb   : > { %12846 = vst [vmem:[#allocation41_spill] sm:$0xff] %v10354_v6  ;;  %v2969_v21 = vadd.f32 %v2968_v42, %v2941_v12  ;;  %v2896_v30 = vadd.f32 %v2895_v36, %v2894_v4  ;;  %v2867_v56 = vmul.f32 %v10156_v40, %v12500_v3  ;;  %v12502_v45 = vmax.f32 %v10354_v6, 0.0  ;;  %vm10429_vm10 = vmand %vm569_vm2, %vm10387_vm0 }
 0x2fc   : > { %12847 = vst [vmem:[#allocation42_spill] sm:$0xff] %v10359_v33  ;;  %v2868_v34 = vmul.f32 %v10177_v11, %v12499_v54  ;;  %v12501_v12 = vmax.f32 %v10359_v33, 0.0  ;;  %v10404_v16 = vsel %vm618_vm1, 1.0, %v12509_v24  ;;  %vm622_vm7 = vmand %vm10429_vm10, %vm9924_vm3  ;;  %vm3178_vm1 = vcmask 261124  }
 0x2fd   : > { %v2971_v42 = vadd.f32 %v2970_v61, %v2969_v21  ;;  %v2897_v14 = vadd.f32 %v2896_v30, %v2867_v56  ;;  %v2943_v4 = vmul.f32 %v2867_v56, %v2867_v56  ;;  %v2869_v62 = vmul.f32 %v10185_v22, %v12502_v45  ;;  %12852 = vst [vmem:[#allocation43_spill] sm:$0xff] %v10404_v16  ;;  %vm623_vm3 = vmand %vm10429_vm10, %vm9928_vm8 }
 0x2fe   : > { %v2898_v54 = vsel %vm2885_vm13, %v2868_v34, 0.0  ;;  %v2944_v10 = vmul.f32 %v2868_v34, %v2868_v34  ;;  %v2870_v59 = vmul.f32 %v10200_v51, %v12501_v12  ;;  %v2732_v3 = vpop.f32.mrb[12].mxu0  ;;  %v10415_v34 = vsel %vm619_vm9, 1.0, %v12509_v24  ;;  %vm12907_vm2 = vmmov %vm12882_vm4 }
 0x2ff   : > { %v2972_v21 = vadd.f32 %v2971_v42, %v2943_v4  ;;  %v2899_v30 = vadd.f32 %v2898_v54, %v2897_v14  ;;  %v10407_v56 = vadd.f32 %v10054_v23, %v2732_v3  ;;  %v2734_v61 = vpop.f32.mrb[13].mxu0  ;;  %12854 = vst [vmem:[#allocation45_spill] sm:$0xff] %v10415_v34  ;;  %v2945_v54 = vmul.f32 %v2869_v62, %v2869_v62  ;;  %vm10806_vm9 = vmor %vm3178_vm1, %vm12907_vm2 }
 0x300   : > { %v2973_v42 = vsel %vm2885_vm13, %v2944_v10, 0.0  ;;  %v2946_v14 = vmul.f32 %v2870_v59, %v2870_v59  ;;  %v10423_v3 = vadd.f32 %v10062_v25, %v2734_v61  ;;  %v2736_v4 = vpop.f32.mrb[14].mxu0  ;;  %v2901_v19 = vsel %vm2885_vm13, %v2870_v59, 0.0 }
 0x301   : > { %12853 = vst [vmem:[#allocation44_spill] sm:$0xff] %v10407_v56  ;;  %v2974_v12 = vadd.f32 %v2973_v42, %v2972_v21  ;;  %v2900_v45 = vadd.f32 %v2899_v30, %v2869_v62  ;;  %v12505_v5 = vmax.f32 %v10407_v56, 0.0  ;;  %v10435_v10 = vadd.f32 %v10054_v23, %v2736_v4  ;;  %v2738_v58 = vpop.f32.mrb[15].mxu0 }
 0x302   : > { %12855 = vst [vmem:[#allocation46_spill] sm:$0xff] %v10423_v3  ;;  %v12508_v43 = vmax.f32 %v10423_v3, 0.0  ;;  %v10444_v61 = vadd.f32 %v10062_v25, %v2738_v58  ;;  %v10452_v62 = vsel %vm620_vm14, 1.0, %v12509_v24  ;;  %v2976_v58 = vsel %vm2885_vm13, %v2946_v14, 0.0 }
 0x303   : > { %12858 = vst [vmem:[#allocation47_spill] sm:$0xff] %v10435_v10  ;;  %12860 = vst [vmem:[#allocation49_spill] sm:$0xff] %v10452_v62  ;;  %v2975_v21 = vadd.f32 %v2974_v12, %v2945_v54  ;;  %v2902_v30 = vadd.f32 %v2901_v19, %v2900_v45  ;;  %v2871_v42 = vmul.f32 %v10208_v53, %v12505_v5  ;;  %v12515_v59 = vmax.f32 %v10435_v10, 0.0  ;;  %v3302_v54 = vld [vmem:[%s12478_s10] sm:$0x3] }
 0x304   : > { %12859 = vst [vmem:[#allocation48_spill] sm:$0xff] %v10444_v61  ;;  %v2872_v36 = vmul.f32 %v10216_v55, %v12508_v43  ;;  %v12517_v12 = vmax.f32 %v10444_v61, 0.0  ;;  %v10468_v45 = vsel %vm621_vm5, 1.0, %v12509_v24  ;;  %v12862_v3 = vmov 0.0  }
 0x305   : > { %12861 = vst [vmem:[#allocation50_spill] sm:$0xff] %v10468_v45  ;;  %v2977_v4 = vadd.f32 %v2976_v58, %v2975_v21  ;;  %v2903_v63 = vadd.f32 %v2902_v30, %v2871_v42  ;;  %v2947_v19 = vmul.f32 %v2871_v42, %v2871_v42  ;;  %v2873_v14 = vmul.f32 %v10232_v2, %v12515_v59 }
 0x306   : > { %v2904_v5 = vsel %vm2885_vm13, %v2872_v36, 0.0  ;;  %v2948_v0 = vmul.f32 %v2872_v36, %v2872_v36  ;;  %v2874_v43 = vmul.f32 %v10249_v37, %v12517_v12  ;;  %v2742_v24 = vpop.f32.mrb[16].mxu0  ;;  %v10481_v56 = vsel %vm622_vm7, 1.0, %v12862_v3 }
 0x307   : > { %12863 = vst [vmem:[#allocation51_spill] sm:$0xff] %v10481_v56  ;;  %v2978_v33 = vadd.f32 %v2977_v4, %v2947_v19  ;;  %v2905_v6 = vadd.f32 %v2904_v5, %v2903_v63  ;;  %v10484_v21 = vadd.f32 %v10054_v23, %v2742_v24  ;;  %v2744_v30 = vpop.f32.mrb[17].mxu0  ;;  %v10487_v42 = vrot.slane %v3302_v54, %v10011_v47 }
 0x308   : > { %v2979_v58 = vsel %vm2885_vm13, %v2948_v0, 0.0  ;;  %v2949_v36 = vmul.f32 %v2873_v14, %v2873_v14  ;;  %v2950_v59 = vmul.f32 %v2874_v43, %v2874_v43  ;;  %v10491_v61 = vadd.f32 %v10062_v25, %v2744_v30  ;;  %v2746_v12 = vpop.f32.mrb[18].mxu0 }
 0x309   : > { %12864 = vst [vmem:[#allocation52_spill] sm:$0xff] %v10484_v21  ;;  %v2980_v10 = vadd.f32 %v2979_v58, %v2978_v33  ;;  %v2906_v50 = vadd.f32 %v2905_v6, %v2873_v14  ;;  %v12520_v4 = vmax.f32 %v10484_v21, 0.0  ;;  %v10495_v5 = vadd.f32 %v10054_v23, %v2746_v12  ;;  %v2748_v24 = vpop.f32.mrb[19].mxu0  ;;  %v3433_v33 = vpop.f32.mrb[0].mxu1 }
 0x30a   : > { %12865 = vst [vmem:[#allocation53_spill] sm:$0xff] %v10491_v61  ;;  %v2907_v0 = vsel %vm2885_vm13, %v2874_v43, 0.0  ;;  %v12523_v63 = vmax.f32 %v10491_v61, 0.0  ;;  %v10504_v19 = vadd.f32 %v10062_v25, %v2748_v24  ;;  %v10507_v6 = vrot.slane %v3302_v54, %v10024_v57  ;;  %v3435_v30 = vpop.f32.mrb[1].mxu1 }
 0x30b   : > { %12866 = vst [vmem:[#allocation54_spill] sm:$0xff] %v10495_v5  ;;  %v2981_v14 = vadd.f32 %v2980_v10, %v2949_v36  ;;  %v2908_v12 = vadd.f32 %v2907_v0, %v2906_v50  ;;  %v2875_v1 = vmul.f32 %v10266_v41, %v12520_v4  ;;  %v12525_v27 = vmax.f32 %v10495_v5, 0.0  ;;  %v10521_v10 = vpop.f32.mrb[2].mxu1 }
 0x30c   : > { %12867 = vst [vmem:[#allocation55_spill] sm:$0xff] %v10504_v19  ;;  %v2982_v43 = vsel %vm2885_vm13, %v2950_v59, 0.0  ;;  %v2876_v58 = vmul.f32 %v10278_v48, %v12523_v63  ;;  %v12529_v24 = vmax.f32 %v10504_v19, 0.0  ;;  %v10519_v54 = vsel %vm623_vm3, 1.0, %v12862_v3  ;;  %v10526_v21 = vpop.f32.mrb[3].mxu1 }
 0x30d   : > { %12868 = vst [vmem:[#allocation56_spill] sm:$0xff] %v10519_v54  ;;  %v2983_v50 = vadd.f32 %v2982_v43, %v2981_v14  ;;  %v2909_v36 = vadd.f32 %v2908_v12, %v2875_v1  ;;  %v2951_v0 = vmul.f32 %v2875_v1, %v2875_v1  ;;  %v2877_v4 = vmul.f32 %v10281_v8, %v12525_v27 }
 0x30e   : > { %v2910_v59 = vsel %vm2885_vm13, %v2876_v58, 0.0  ;;  %v2952_v61 = vmul.f32 %v2876_v58, %v2876_v58  ;;  %v2878_v63 = vmul.f32 %v10287_v18, %v12529_v24  ;;  %v2752_v3 = vpop.f32.mrb[20].mxu0  ;;  %v10533_v31 = vadd.f32 %v3433_v33, %v10487_v42 }
 0x30f   : > { %v2984_v14 = vadd.f32 %v2983_v50, %v2951_v0  ;;  %v2911_v12 = vadd.f32 %v2910_v59, %v2909_v36  ;;  %v10536_v1 = vadd.f32 %v10054_v23, %v2752_v3  ;;  %v2754_v43 = vpop.f32.mrb[21].mxu0  ;;  %v10539_v27 = vadd.f32 %v3435_v30, %v10507_v6 }
 0x310   : > { %12869 = vst [vmem:[#allocation57_spill] sm:$0xff] %v10533_v31  ;;  %v2985_v5 = vsel %vm2885_vm13, %v2952_v61, 0.0  ;;  %v2953_v58 = vmul.f32 %v2877_v4, %v2877_v4  ;;  %v2954_v15 = vmul.f32 %v2878_v63, %v2878_v63  ;;  %v10543_v19 = vadd.f32 %v10062_v25, %v2754_v43  ;;  %v2756_v24 = vpop.f32.mrb[22].mxu0  ;;  %v3443_v43 = vpop.f32.mrb[4].mxu1 }
 0x311   : > { %12870 = vst [vmem:[#allocation58_spill] sm:$0xff] %v10536_v1  ;;  %12871 = vst [vmem:[#allocation59_spill] sm:$0xff] %v10539_v27  ;;  %v2986_v7 = vadd.f32 %v2985_v5, %v2984_v14  ;;  %v2912_v33 = vadd.f32 %v2911_v12, %v2877_v4  ;;  %v12533_v50 = vmax.f32 %v10536_v1, 0.0  ;;  %v10547_v36 = vadd.f32 %v10054_v23, %v2756_v24  ;;  %v2758_v0 = vpop.f32.mrb[23].mxu0  ;;  %v3445_v24 = vpop.f32.mrb[5].mxu1 }
 0x312   : > { %12872 = vst [vmem:[#allocation60_spill] sm:$0xff] %v10543_v19  ;;  %v2913_v59 = vsel %vm2885_vm13, %v2878_v63, 0.0  ;;  %v12535_v30 = vmax.f32 %v10543_v19, 0.0  ;;  %v10552_v61 = vadd.f32 %v10062_v25, %v2758_v0  ;;  %v2988_v14 = vsel %vm2885_vm13, %v2954_v15, 0.0  ;;  %v10565_v3 = vpop.f32.mrb[6].mxu1 }
 0x313   : > { %12873 = vst [vmem:[#allocation61_spill] sm:$0xff] %v10547_v36  ;;  %v2987_v49 = vadd.f32 %v2986_v7, %v2953_v58  ;;  %v2914_v20 = vadd.f32 %v2913_v59, %v2912_v33  ;;  %v2879_v4 = vmul.f32 %v10404_v16, %v12533_v50  ;;  %v12537_v5 = vmax.f32 %v10547_v36, 0.0  ;;  %v10570_v50 = vpop.f32.mrb[7].mxu1 }
 0x314   : > { %12874 = vst [vmem:[#allocation62_spill] sm:$0xff] %v10552_v61  ;;  %v2880_v63 = vmul.f32 %v10415_v34, %v12535_v30  ;;  %v12542_v12 = vmax.f32 %v10552_v61, 0.0  ;;  %vm2923_vm8 = vcmask 257024   ;;  %v12875_v1 = vmax.f32 %v10539_v27, 0.0 }
 0x315   : > { %v2989_v7 = vadd.f32 %v2988_v14, %v2987_v49  ;;  %v2915_v58 = vadd.f32 %v2914_v20, %v2879_v4  ;;  %v2955_v33 = vmul.f32 %v2879_v4, %v2879_v4  ;;  %v2881_v59 = vmul.f32 %v10452_v62, %v12537_v5 }
 0x316   : > { %v2916_v15 = vsel %vm2885_vm13, %v2880_v63, 0.0  ;;  %v2956_v19 = vmul.f32 %v2880_v63, %v2880_v63  ;;  %v2882_v30 = vmul.f32 %v10468_v45, %v12542_v12  ;;  %v2762_v0 = vpop.f32.mrb[56].mxu0  ;;  %v3527_v20 = vmul.f32 %v10088_v28, %v12875_v1 }
 0x317   : > { %v2990_v49 = vadd.f32 %v2989_v7, %v2955_v33  ;;  %v2917_v4 = vadd.f32 %v2916_v15, %v2915_v58  ;;  %v2793_v14 = vadd.f32 %v2762_v0, %v10018_v13  ;;  %v2764_v5 = vpop.f32.mrb[57].mxu0  ;;  %v12876_v36 = vmax.f32 %v10533_v31, 0.0  ;;  %v12939_v31 = vld [vmem:[#allocation44_spill] sm:$0xff] }
 0x318   : > { %v2991_v63 = vsel %vm2885_vm13, %v2956_v19, 0.0  ;;  %v2957_v26 = vmul.f32 %v2881_v59, %v2881_v59  ;;  %v2958_v61 = vmul.f32 %v2882_v30, %v2882_v30  ;;  %v2794_v12 = vadd.f32 %v2764_v5, %v10034_v52  ;;  %v2766_v46 = vpop.f32.mrb[58].mxu0 }
 0x319   : > { %v3526_v32 = vmul.f32 %v10080_v60, %v12876_v36  ;;  %v2992_v44 = vadd.f32 %v2991_v63, %v2990_v49  ;;  %v2918_v27 = vadd.f32 %v2917_v4, %v2881_v59  ;;  %v10586_v1 = vadd.f32 %v10054_v23, %v2793_v14  ;;  %v2767_v7 = vpop.f32.mrb[59].mxu0 }
 0x31a   : > { %v3552_v13 = vsel %vm2885_vm13, %v3527_v20, 0.0  ;;  %v10590_v0 = vadd.f32 %v10062_v25, %v2794_v12  ;;  %v2919_v36 = vsel %vm2885_vm13, %v2882_v30, 0.0  ;;  %v3601_v19 = vmul.f32 %v3527_v20, %v3527_v20 }
 0x31b   : > { %12877 = vst [vmem:[#allocation63_spill] sm:$0xff] %v10586_v1  ;;  %v3600_v58 = vmul.f32 %v3526_v32, %v3526_v32  ;;  %v2993_v33 = vadd.f32 %v2992_v44, %v2957_v26  ;;  %v12558_v15 = vmax.f32 %v10586_v1, 0.0  ;;  %v2994_v52 = vsel %vm2885_vm13, %v2958_v61, 0.0 }
 0x31c   : > { %12878 = vst [vmem:[#allocation64_spill] sm:$0xff] %v10590_v0  ;;  %v10597_v46 = vadd.f32 %v10521_v10, %v10487_v42  ;;  %v12557_v23 = vmax.f32 %v10590_v0, 0.0  ;;  %v3553_v5 = vadd.f32 %v3552_v13, %v3526_v32  ;;  %v3626_v59 = vsel %vm2885_vm13, %v3601_v19, 0.0 }
 0x31d   : > { %v10603_v25 = vadd.f32 %v10526_v21, %v10507_v6  ;;  %v2883_v44 = vmul.f32 %v10481_v56, %v12558_v15  ;;  %v2920_v26 = vadd.f32 %v2919_v36, %v2918_v27  ;;  %v10610_v61 = vadd.f32 %v3443_v43, %v10487_v42 }
 0x31e   : > { %12879 = vst [vmem:[#allocation65_spill] sm:$0xff] %v10597_v46  ;;  %v12554_v30 = vmax.f32 %v10597_v46, 0.0  ;;  %v2884_v32 = vmul.f32 %v10519_v54, %v12557_v23  ;;  %v2995_v10 = vadd.f32 %v2994_v52, %v2993_v33  ;;  %v3627_v12 = vadd.f32 %v3626_v59, %v3600_v58  ;;  %v12937_v46 = vld [vmem:[#allocation42_spill] sm:$0xff] }
 0x31f   : > { %12880 = vst [vmem:[#allocation66_spill] sm:$0xff] %v10603_v25  ;;  %12881 = vst [vmem:[#allocation67_spill] sm:$0xff] %v10610_v61  ;;  %v12546_v20 = vmax.f32 %v10603_v25, 0.0  ;;  %v2921_v21 = vsel %vm12882_vm4, %v2883_v44, 0.0  ;;  %v2959_v49 = vmul.f32 %v2883_v44, %v2883_v44  ;;  %v10621_v4 = vadd.f32 %v3445_v24, %v10507_v6  ;;  %v12935_v25 = vld [vmem:[#allocation41_spill] sm:$0xff] }
 0x320   : > { %v3528_v27 = vmul.f32 %v10096_v29, %v12554_v30  ;;  %v2922_v43 = vadd.f32 %v2921_v21, %v2920_v26  ;;  %v2924_v14 = vsel %vm2923_vm8, %v2884_v32, 0.0  ;;  %v2960_v63 = vmul.f32 %v2884_v32, %v2884_v32 }
 0x321   : > { %12883 = vst [vmem:[#allocation68_spill] sm:$0xff] %v10621_v4  ;;  %v3529_v7 = vmul.f32 %v10112_v17, %v12546_v20  ;;  %v2996_v13 = vsel %vm12884_vm15, %v2959_v49, 0.0  ;;  %v12553_v19 = vmax.f32 %v10610_v61, 0.0  ;;  %v12551_v32 = vmax.f32 %v10621_v4, 0.0  ;;  %v12931_v4 = vld [vmem:[#allocation39_spill] sm:$0xff]  ;;  %v12933_v61 = vld [vmem:[#allocation40_spill] sm:$0xff] }
 0x322   : > { %v3554_v36 = vadd.f32 %v3553_v5, %v3528_v27  ;;  %v3602_v58 = vmul.f32 %v3528_v27, %v3528_v27  ;;  %v2925_v33 = vadd.f32 %v2924_v14, %v2922_v43  ;;  %v2997_v52 = vadd.f32 %v2996_v13, %v2995_v10 }
 0x323   : > { %v3555_v59 = vsel %vm2885_vm13, %v3529_v7, 0.0  ;;  %v2998_v24 = vsel %vm2923_vm8, %v2960_v63, 0.0  ;;  %v3603_v26 = vmul.f32 %v3529_v7, %v3529_v7  ;;  %v3530_v5 = vmul.f32 %v10120_v9, %v12553_v19 }
 0x324   : > { %v3628_v44 = vadd.f32 %v3627_v12, %v3602_v58  ;;  %2926 = vadd.xlane.f32.xlu0 %v2925_v33  ;;  %v3556_v21 = vadd.f32 %v3555_v59, %v3554_v36  ;;  %v10638_v49 = vadd.f32 %v10565_v3, %v10487_v42  ;;  %v2999_v10 = vadd.f32 %v2998_v24, %v2997_v52 }
 0x325   : > { %v3629_v20 = vsel %vm2885_vm13, %v3603_v26, 0.0  ;;  %v3531_v12 = vmul.f32 %v10128_v35, %v12551_v32  ;;  %v10645_v27 = vadd.f32 %v10570_v50, %v10507_v6  ;;  %v3604_v14 = vmul.f32 %v3530_v5, %v3530_v5 }
 0x326   : > { %12885 = vst [vmem:[#allocation69_spill] sm:$0xff] %v10638_v49  ;;  %v3630_v43 = vadd.f32 %v3629_v20, %v3628_v44  ;;  %v3557_v7 = vadd.f32 %v3556_v21, %v3530_v5  ;;  %v12549_v13 = vmax.f32 %v10638_v49, 0.0  ;;  %v3453_v5 = vpop.f32.mrb[8].mxu1  ;;  %vm3275_vm0 = vcmask 259076   ;;  %v12929_v49 = vld [vmem:[#allocation38_spill] sm:$0xff] }
 0x327   : > { %12886 = vst [vmem:[#allocation70_spill] sm:$0xff] %v10645_v27  ;;  %v3605_v63 = vmul.f32 %v3531_v12, %v3531_v12  ;;  %v3558_v36 = vsel %vm2885_vm13, %v3531_v12, 0.0  ;;  %v12548_v3 = vmax.f32 %v10645_v27, 0.0  ;;  %v10659_v12 = vadd.f32 %v3453_v5, %v10487_v42  ;;  %vm10826_vm14 = vmor %vm3275_vm0, %vm3274_vm12  ;;  %v12927_v27 = vld [vmem:[#allocation37_spill] sm:$0xff] }
 0x328   : > { %3000 = vadd.xlane.f32.xlu0 %v2999_v10  ;;  %v3631_v58 = vadd.f32 %v3630_v43, %v3604_v14  ;;  %v3559_v52 = vadd.f32 %v3558_v36, %v3557_v7  ;;  %v3532_v50 = vmul.f32 %v10140_v38, %v12549_v13  ;;  %v3455_v43 = vpop.f32.mrb[9].mxu1  ;;  %vm12960_vm10 = vcmask 1044480  }
 0x329   : > { %v3632_v33 = vsel %vm2885_vm13, %v3605_v63, 0.0  ;;  %v3533_v20 = vmul.f32 %v10148_v39, %v12548_v3  ;;  %12887 = vst [vmem:[#allocation71_spill] sm:$0xff] %v10659_v12  ;;  %v10663_v63 = vadd.f32 %v3455_v43, %v10507_v6  ;;  %v12547_v36 = vmax.f32 %v10659_v12, 0.0  ;;  %vm12962_vm5 = vmmov %vm12960_vm10 }
 0x32a   : > { %v3633_v59 = vadd.f32 %v3632_v33, %v3631_v58  ;;  %v3606_v24 = vmul.f32 %v3532_v50, %v3532_v50  ;;  %v3560_v26 = vadd.f32 %v3559_v52, %v3532_v50  ;;  %v3457_v33 = vpop.f32.mrb[10].mxu1  ;;  %vm12963_vm7 = vmmov %vm12962_vm5  ;;  %vm12975_vm15 = vsmask.f32 6400 }
 0x32b   : > { %v3607_v44 = vmul.f32 %v3533_v20, %v3533_v20  ;;  %v3561_v21 = vsel %vm2885_vm13, %v3533_v20, 0.0  ;;  %12888 = vst [vmem:[#allocation72_spill] sm:$0xff] %v10663_v63  ;;  %v12550_v58 = vmax.f32 %v10663_v63, 0.0  ;;  %v3534_v50 = vmul.f32 %v10156_v40, %v12547_v36  ;;  %vm12969_vm3 = vmmov %vm12962_vm5 }
 0x32c   : > { %v3634_v10 = vadd.f32 %v3633_v59, %v3606_v24  ;;  %v3562_v7 = vadd.f32 %v3561_v21, %v3560_v26  ;;  %v10671_v20 = vadd.f32 %v3457_v33, %v10487_v42  ;;  %v3459_v59 = vpop.f32.mrb[11].mxu1  ;;  %vm12974_vm4 = vmmov %vm12969_vm3 }
 0x32d   : > { %v3635_v14 = vsel %vm2885_vm13, %v3607_v44, 0.0  ;;  %v3535_v24 = vmul.f32 %v10177_v11, %v12550_v58  ;;  %v10677_v44 = vadd.f32 %v3459_v59, %v10507_v6  ;;  %v3608_v21 = vmul.f32 %v3534_v50, %v3534_v50  ;;  %v3463_v36 = vpop.f32.mrb[12].mxu1  ;;  %vm12983_vm1 = vmmov %vm12969_vm3 }
 0x32e   : > { %v3636_v52 = vadd.f32 %v3635_v14, %v3634_v10  ;;  %12889 = vst [vmem:[#allocation73_spill] sm:$0xff] %v10671_v20  ;;  %v3563_v26 = vadd.f32 %v3562_v7, %v3534_v50  ;;  %v12552_v5 = vmax.f32 %v10671_v20, 0.0  ;;  %v10686_v58 = vadd.f32 %v3463_v36, %v10487_v42  ;;  %v3465_v59 = vpop.f32.mrb[13].mxu1  ;;  %vm12987_vm2 = vmmov %vm12983_vm1 }
 0x32f   : > { %12890 = vst [vmem:[#allocation74_spill] sm:$0xff] %v10677_v44  ;;  %v3564_v10 = vsel %vm2885_vm13, %v3535_v24, 0.0  ;;  %v3609_v43 = vmul.f32 %v3535_v24, %v3535_v24  ;;  %v12555_v14 = vmax.f32 %v10677_v44, 0.0  ;;  %v10693_v24 = vadd.f32 %v3465_v59, %v10507_v6  ;;  %v3467_v19 = vpop.f32.mrb[14].mxu1 }
 0x330   : > { %v3637_v33 = vadd.f32 %v3636_v52, %v3608_v21  ;;  %v3565_v3 = vadd.f32 %v3564_v10, %v3563_v26  ;;  %v3536_v13 = vmul.f32 %v10185_v22, %v12552_v5  ;;  %12891 = vst [vmem:[#allocation75_spill] sm:$0xff] %v10686_v58  ;;  %v12556_v21 = vmax.f32 %v10686_v58, 0.0 }
 0x331   : > { %v3638_v7 = vsel %vm2885_vm13, %v3609_v43, 0.0  ;;  %v3537_v50 = vmul.f32 %v10200_v51, %v12555_v14  ;;  %12892 = vst [vmem:[#allocation76_spill] sm:$0xff] %v10693_v24  ;;  %v12559_v36 = vmax.f32 %v10693_v24, 0.0  ;;  %v10702_v59 = vadd.f32 %v3467_v19, %v10487_v42 }
 0x332   : > { %v3639_v32 = vadd.f32 %v3638_v7, %v3637_v33  ;;  %v3566_v52 = vadd.f32 %v3565_v3, %v3536_v13  ;;  %v3610_v26 = vmul.f32 %v3536_v13, %v3536_v13  ;;  %v3538_v14 = vmul.f32 %v10208_v53, %v12556_v21  ;;  %v3469_v33 = vpop.f32.mrb[15].mxu1 }
 0x333   : > { %v3567_v10 = vsel %vm2885_vm13, %v3537_v50, 0.0  ;;  %v3611_v5 = vmul.f32 %v3537_v50, %v3537_v50  ;;  %12893 = vst [vmem:[#allocation77_spill] sm:$0xff] %v10702_v59  ;;  %v3539_v3 = vmul.f32 %v10216_v55, %v12559_v36  ;;  %v10709_v7 = vadd.f32 %v3469_v33, %v10507_v6  ;;  %v3473_v23 = vpop.f32.mrb[16].mxu1 }
 0x334   : > { %v3640_v30 = vadd.f32 %v3639_v32, %v3610_v26  ;;  %v3568_v43 = vadd.f32 %v3567_v10, %v3566_v52  ;;  %v3612_v52 = vmul.f32 %v3538_v14, %v3538_v14  ;;  %v12560_v26 = vmax.f32 %v10702_v59, 0.0 }
 0x335   : > { %v3641_v13 = vsel %vm2885_vm13, %v3611_v5, 0.0  ;;  %12894 = vst [vmem:[#allocation78_spill] sm:$0xff] %v10709_v7  ;;  %v3570_v10 = vsel %vm2885_vm13, %v3539_v3, 0.0  ;;  %v3613_v21 = vmul.f32 %v3539_v3, %v3539_v3  ;;  %v12564_v19 = vmax.f32 %v10709_v7, 0.0 }
 0x336   : > { %v3642_v50 = vadd.f32 %v3641_v13, %v3640_v30  ;;  %v3569_v32 = vadd.f32 %v3568_v43, %v3538_v14  ;;  %v3540_v36 = vmul.f32 %v10232_v2, %v12560_v26  ;;  %v10718_v33 = vadd.f32 %v3473_v23, %v10487_v42  ;;  %v3475_v30 = vpop.f32.mrb[17].mxu1 }
 0x337   : > { %v3644_v14 = vsel %vm2885_vm13, %v3613_v21, 0.0  ;;  %v3541_v43 = vmul.f32 %v10249_v37, %v12564_v19  ;;  %v10725_v13 = vadd.f32 %v3475_v30, %v10507_v6  ;;  %v3477_v3 = vpop.f32.mrb[18].mxu1 }
 0x338   : > { %v3643_v15 = vadd.f32 %v3642_v50, %v3612_v52  ;;  %v3571_v5 = vadd.f32 %v3570_v10, %v3569_v32  ;;  %12895 = vst [vmem:[#allocation79_spill] sm:$0xff] %v10718_v33  ;;  %v3614_v52 = vmul.f32 %v3540_v36, %v3540_v36  ;;  %v12566_v10 = vmax.f32 %v10718_v33, 0.0  ;;  %v3479_v26 = vpop.f32.mrb[19].mxu1 }
 0x339   : > { %12896 = vst [vmem:[#allocation80_spill] sm:$0xff] %v10725_v13  ;;  %v3573_v23 = vsel %vm2885_vm13, %v3541_v43, 0.0  ;;  %v3615_v59 = vmul.f32 %v3541_v43, %v3541_v43  ;;  %v12567_v24 = vmax.f32 %v10725_v13, 0.0  ;;  %v10731_v21 = vadd.f32 %v3477_v3, %v10487_v42 }
 0x33a   : > { %v3645_v50 = vadd.f32 %v3644_v14, %v3643_v15  ;;  %v3572_v32 = vadd.f32 %v3571_v5, %v3540_v36  ;;  %v3542_v30 = vmul.f32 %v10266_v41, %v12566_v10  ;;  %v10737_v15 = vadd.f32 %v3479_v26, %v10507_v6 }
 0x33b   : > { %12897 = vst [vmem:[#allocation81_spill] sm:$0xff] %v10731_v21  ;;  %v3647_v36 = vsel %vm2885_vm13, %v3615_v59, 0.0  ;;  %v3543_v5 = vmul.f32 %v10278_v48, %v12567_v24  ;;  %v12570_v14 = vmax.f32 %v10731_v21, 0.0 }
 0x33c   : > { %v3646_v7 = vadd.f32 %v3645_v50, %v3614_v52  ;;  %v3574_v19 = vadd.f32 %v3573_v23, %v3572_v32  ;;  %12898 = vst [vmem:[#allocation82_spill] sm:$0xff] %v10737_v15  ;;  %v3616_v58 = vmul.f32 %v3542_v30, %v3542_v30  ;;  %v12572_v50 = vmax.f32 %v10737_v15, 0.0  ;;  %v3483_v32 = vpop.f32.mrb[20].mxu1 }
 0x33d   : > { %v3576_v52 = vsel %vm2885_vm13, %v3543_v5, 0.0  ;;  %v3617_v23 = vmul.f32 %v3543_v5, %v3543_v5  ;;  %v3544_v26 = vmul.f32 %v10281_v8, %v12570_v14  ;;  %v10750_v59 = vadd.f32 %v3483_v32, %v10487_v42  ;;  %v3485_v10 = vpop.f32.mrb[21].mxu1 }
 0x33e   : > { %v3648_v43 = vadd.f32 %v3647_v36, %v3646_v7  ;;  %v3575_v3 = vadd.f32 %v3574_v19, %v3542_v30  ;;  %v3545_v7 = vmul.f32 %v10287_v18, %v12572_v50  ;;  %v10756_v19 = vadd.f32 %v3485_v10, %v10507_v6  ;;  %v3487_v30 = vpop.f32.mrb[22].mxu1 }
 0x33f   : > { %12899 = vst [vmem:[#allocation83_spill] sm:$0xff] %v10750_v59  ;;  %v3650_v36 = vsel %vm2885_vm13, %v3617_v23, 0.0  ;;  %v3618_v5 = vmul.f32 %v3544_v26, %v3544_v26  ;;  %v12575_v21 = vmax.f32 %v10750_v59, 0.0  ;;  %v10761_v14 = vadd.f32 %v3487_v30, %v10487_v42  ;;  %v3489_v32 = vpop.f32.mrb[23].mxu1 }
 0x340   : > { %v3649_v24 = vadd.f32 %v3648_v43, %v3616_v58  ;;  %v3577_v13 = vadd.f32 %v3576_v52, %v3575_v3  ;;  %12900 = vst [vmem:[#allocation84_spill] sm:$0xff] %v10756_v19  ;;  %v3579_v43 = vsel %vm2885_vm13, %v3545_v7, 0.0  ;;  %v3619_v3 = vmul.f32 %v3545_v7, %v3545_v7  ;;  %v3493_v59 = vpop.f32.mrb[24].mxu1 }
 0x341   : > { %12901 = vst [vmem:[#allocation85_spill] sm:$0xff] %v10761_v14  ;;  %v3546_v10 = vmul.f32 %v10404_v16, %v12575_v21  ;;  %v12577_v52 = vmax.f32 %v10756_v19, 0.0  ;;  %v12579_v23 = vmax.f32 %v10761_v14, 0.0  ;;  %v10770_v50 = vadd.f32 %v3489_v32, %v10507_v6 }
 0x342   : > { %v3651_v33 = vadd.f32 %v3650_v36, %v3649_v24  ;;  %v3578_v58 = vadd.f32 %v3577_v13, %v3544_v26  ;;  %v3653_v44 = vsel %vm2885_vm13, %v3619_v3, 0.0  ;;  %v10785_v14 = vadd.f32 %v3493_v59, %v10487_v42 }
 0x343   : > { %12902 = vst [vmem:[#allocation86_spill] sm:$0xff] %v10770_v50  ;;  %v3620_v24 = vmul.f32 %v3546_v10, %v3546_v10  ;;  %v3547_v13 = vmul.f32 %v10415_v34, %v12577_v52  ;;  %v3548_v26 = vmul.f32 %v10452_v62, %v12579_v23  ;;  %v12582_v7 = vmax.f32 %v10770_v50, 0.0 }
 0x344   : > { %v3652_v15 = vadd.f32 %v3651_v33, %v3618_v5  ;;  %v3580_v30 = vadd.f32 %v3579_v43, %v3578_v58  ;;  %v3495_v43 = vpop.f32.mrb[25].mxu1  ;;  %12903 = vst [vmem:[#allocation87_spill] sm:$0xff] %v10785_v14 }
 0x345   : > { %v3582_v32 = vsel %vm2885_vm13, %v3547_v13, 0.0  ;;  %v3621_v33 = vmul.f32 %v3547_v13, %v3547_v13  ;;  %v3622_v5 = vmul.f32 %v3548_v26, %v3548_v26  ;;  %v3549_v58 = vmul.f32 %v10468_v45, %v12582_v7 }
 0x346   : > { %v3654_v36 = vadd.f32 %v3653_v44, %v3652_v15  ;;  %v3581_v21 = vadd.f32 %v3580_v30, %v3546_v10  ;;  %v10788_v23 = vadd.f32 %v3495_v43, %v10507_v6  ;;  %v3497_v44 = vpop.f32.mrb[26].mxu1  ;;  %v12584_v7 = vmax.f32 %v10785_v14, 0.0  ;;  %v12921_v14 = vld [vmem:[#allocation29_spill] sm:$0xff] }
 0x347   : > { %v3656_v15 = vsel %vm2885_vm13, %v3621_v33, 0.0  ;;  %v3623_v10 = vmul.f32 %v3549_v58, %v3549_v58  ;;  %v3585_v30 = vsel %vm2885_vm13, %v3549_v58, 0.0  ;;  %v3498_v13 = vpop.f32.mrb[27].mxu1  ;;  %v12922_v20 = vmax.f32 %v12921_v14, 0.0 }
 0x348   : > { %v3655_v3 = vadd.f32 %v3654_v36, %v3620_v24  ;;  %v3583_v52 = vadd.f32 %v3582_v32, %v3581_v21  ;;  %12904 = vst [vmem:[#allocation88_spill] sm:$0xff] %v10788_v23  ;;  %v12583_v24 = vmax.f32 %v10788_v23, 0.0  ;;  %v3550_v6 = vmul.f32 %v10481_v56, %v12584_v7  ;;  %v8804_v13 = vld [vmem:[#allocation5 + $0xa4] ss:$8 sps:$4 sm:$0xff]  }
 0x349   : > { %v3659_v21 = vsel %vm2885_vm13, %v3623_v10, 0.0  ;;  %v8802_v10 = vld [vmem:[#allocation5 + $0xa0] ss:$8 sps:$4 sm:$0xff]   ;;  %4083 = vmatprep.subr.bf16.mxu1 %v8804_v13  ;;  %v12932_v14 = vmax.f32 %v12931_v4, 0.0 }
 0x34a   : > { %v3657_v19 = vadd.f32 %v3656_v15, %v3655_v3  ;;  %v3584_v50 = vadd.f32 %v3583_v52, %v3548_v26  ;;  %v3551_v59 = vmul.f32 %v10519_v54, %v12583_v24  ;;  %v3624_v32 = vmul.f32 %v3550_v6, %v3550_v6  ;;  %4084 = vmatpush1.bf16.msra.mxu1 %v8802_v10  ;;  %v8816_v24 = vld [vmem:[#allocation5 + $0x504] ss:$8 sps:$4 sm:$0xff]  }
 0x34b   : > { %v3587_v33 = vsel %vm12905_vm11, %v3550_v6, 0.0  ;;  %v8805_v6 = vld [vmem:[#allocation5 + $0xb0] ss:$8 sps:$4 sm:$0xff]   ;;  %7033 = vmatprep.subr.bf16.mxu0 %v8816_v24  ;;  %v8825_v24 = vld [vmem:[#allocation5 + $0xf4] ss:$8 sps:$4 sm:$0xff]   ;;  %v12941_v4 = vld [vmem:[#allocation46_spill] sm:$0xff] }
 0x34c   : > { %v3658_v42 = vadd.f32 %v3657_v19, %v3622_v5  ;;  %v3586_v36 = vadd.f32 %v3585_v30, %v3584_v50  ;;  %v3589_v52 = vsel %vm2923_vm8, %v3551_v59, 0.0  ;;  %v3625_v26 = vmul.f32 %v3551_v59, %v3551_v59  ;;  %v8807_v50 = vld [vmem:[#allocation5 + $0xb4] ss:$8 sps:$4 sm:$0xff]   ;;  %v8814_v30 = vld [vmem:[#allocation5 + $0x500] ss:$8 sps:$4 sm:$0xff]   ;;  %vm12976_vm11 = vmmov %vm12975_vm15 }
 0x34d   : > { %v3661_v3 = vsel %vm12906_vm6, %v3624_v32, 0.0  ;;  %4085 = vmatprep.subr.bf16.mxu1 %v8807_v50  ;;  %v8810_v59 = vld [vmem:[#allocation5 + $0xc4] ss:$8 sps:$4 sm:$0xff]   ;;  %7034 = vmatpush1.bf16.msra.mxu0 %v8814_v30  ;;  %vm12981_vm6 = vmmov %vm12976_vm11 }
 0x34e   : > { %v3588_v58 = vadd.f32 %v3587_v33, %v3586_v36  ;;  %v3660_v43 = vadd.f32 %v3659_v21, %v3658_v42  ;;  %v3663_v19 = vsel %vm2923_vm8, %v3625_v26, 0.0  ;;  %v8822_v21 = vld [vmem:[#allocation5 + $0x514] ss:$8 sps:$4 sm:$0xff]   ;;  %v8820_v42 = vld [vmem:[#allocation5 + $0x510] ss:$8 sps:$4 sm:$0xff]   ;;  %4086 = vmatpush1.bf16.msra.mxu1 %v8805_v6  ;;  %vm12988_vm12 = vmmov %vm12981_vm6 }
 0x34f   : > { %v8808_v36 = vld [vmem:[#allocation5 + $0xc0] ss:$8 sps:$4 sm:$0xff]   ;;  %7035 = vmatprep.subr.bf16.mxu0 %v8822_v21  ;;  %v8828_v32 = vld [vmem:[#allocation5 + $0x524] ss:$8 sps:$4 sm:$0xff]   ;;  %4087 = vmatprep.subr.bf16.mxu1 %v8810_v59  ;;  %v8813_v33 = vld [vmem:[#allocation5 + $0xd4] ss:$8 sps:$4 sm:$0xff]  }
 0x350   : > { %v3590_v5 = vadd.f32 %v3589_v52, %v3588_v58  ;;  %v3662_v44 = vadd.f32 %v3661_v3, %v3660_v43  ;;  %v8826_v52 = vld [vmem:[#allocation5 + $0x520] ss:$8 sps:$4 sm:$0xff]   ;;  %v8811_v26 = vld [vmem:[#allocation5 + $0xd0] ss:$8 sps:$4 sm:$0xff]   ;;  %v8819_v58 = vld [vmem:[#allocation5 + $0xe4] ss:$8 sps:$4 sm:$0xff]  }
 0x351   : > { %7036 = vmatpush1.bf16.msra.mxu0 %v8820_v42  ;;  %v8817_v43 = vld [vmem:[#allocation5 + $0xe0] ss:$8 sps:$4 sm:$0xff]   ;;  %v8823_v3 = vld [vmem:[#allocation5 + $0xf0] ss:$8 sps:$4 sm:$0xff]   ;;  %v8831_v6 = vld [vmem:[#allocation5 + $0x534] ss:$8 sps:$4 sm:$0xff]  }
 0x352   : > { %3591 = vadd.xlane.f32.xlu1 %v3590_v5  ;;  %v3664_v15 = vadd.f32 %v3663_v19, %v3662_v44  ;;  %4088 = vmatpush1.bf16.msra.mxu1 %v8808_v36  ;;  %v8829_v59 = vld [vmem:[#allocation5 + $0x530] ss:$8 sps:$4 sm:$0xff]   ;;  %v8832_v21 = vld [vmem:[#allocation5 + $0x100] ss:$8 sps:$4 sm:$0xff]   ;;  %v8834_v42 = vld [vmem:[#allocation5 + $0x104] ss:$8 sps:$4 sm:$0xff]  }
 0x353   : > { %7037 = vmatprep.subr.bf16.mxu0 %v8828_v32  ;;  %4089 = vmatprep.subr.bf16.mxu1 %v8813_v33  ;;  %v8837_v33 = vld [vmem:[#allocation5 + $0x544] ss:$8 sps:$4 sm:$0xff]   ;;  %vm12992_vm0 = vmmov %vm12981_vm6 }
 0x355   : > { %7038 = vmatpush1.bf16.msra.mxu0 %v8826_v52  ;;  %v8835_v52 = vld [vmem:[#allocation5 + $0x540] ss:$8 sps:$4 sm:$0xff]  }
 0x356   : > { %3665 = vadd.xlane.f32.xlu1 %v3664_v15  ;;  %4090 = vmatpush1.bf16.msra.mxu1 %v8811_v26  ;;  %v8840_v26 = vld [vmem:[#allocation5 + $0x114] ss:$8 sps:$4 sm:$0xff]  }
 0x357   : > { %4091 = vmatprep.subr.bf16.mxu1 %v8819_v58  ;;  %7039 = vmatprep.subr.bf16.mxu0 %v8831_v6  ;;  %v8855_v6 = vld [vmem:[#allocation5 + $0x134] ss:$8 sps:$4 sm:$0xff]  }
 0x359   : > { %7040 = vmatpush1.bf16.msra.mxu0 %v8829_v59  ;;  %v8844_v59 = vld [vmem:[#allocation5 + $0x560] ss:$8 sps:$4 sm:$0xff]  }
 0x35a   : > { %4092 = vmatpush1.bf16.msra.mxu1 %v8817_v43  ;;  %7041 = vmatprep.subr.bf16.mxu0 %v8837_v33  ;;  %v8856_v33 = vld [vmem:[#allocation5 + $0x580] ss:$8 sps:$4 sm:$0xff]  }
 0x35b   : > { %4093 = vmatprep.subr.bf16.mxu1 %v8825_v24  ;;  %v8838_v24 = vld [vmem:[#allocation5 + $0x110] ss:$8 sps:$4 sm:$0xff]  }
 0x35d   : > { %7042 = vmatpush1.bf16.msra.mxu0 %v8835_v52  ;;  %v8869_v52 = vld [vmem:[#allocation5 + $0x594] ss:$8 sps:$4 sm:$0xff]  }
 0x35e   : > { %4094 = vmatpush1.bf16.msra.mxu1 %v8823_v3  ;;  %v8843_v3 = vld [vmem:[#allocation5 + $0x554] ss:$8 sps:$4 sm:$0xff]  }
 0x35f   : > { %4095 = vmatprep.subr.bf16.mxu1 %v8834_v42  ;;  %7043 = vmatprep.subr.bf16.mxu0 %v8843_v3  ;;  %v8853_v42 = vld [vmem:[#allocation5 + $0x130] ss:$8 sps:$4 sm:$0xff]  }
 0x362   : > { %4096 = vmatpush1.bf16.msra.mxu1 %v8832_v21  ;;  %v8852_v21 = vld [vmem:[#allocation5 + $0x574] ss:$8 sps:$4 sm:$0xff]  }
 0x363   : > { %4097 = vmatprep.subr.bf16.mxu1 %v8840_v26  ;;  %v8866_v26 = vld [vmem:[#allocation5 + $0x4] ss:$8 sps:$4 sm:$0xff]  }
 0x366   : > { %4098 = vmatpush1.bf16.msra.mxu1 %v8838_v24 }
 0x3b1   : > { %v2927_v19 = vpop.xlane.xlu0 %2926 }
 0x3b2   : > { %v2928_v5 = vrot.slane %v2927_v19, 4 }
 0x3b4   : > { %v2929_v44 = vadd.f32 %v2928_v5, %v2927_v19  ;;  %v8849_v19 = vld [vmem:[#allocation5 + $0x124] ss:$8 sps:$4 sm:$0xff]  }
 0x3b5   : > { %v3001_v15 = vpop.xlane.xlu0 %3000  ;;  %4099 = vmatprep.subr.bf16.mxu1 %v8849_v19 }
 0x3b6   : > { %v2930_v10 = vrot.slane %v2929_v44, 2  ;;  %v3002_v13 = vrot.slane %v3001_v15, 4 }
 0x3b8   : > { %v3003_v50 = vadd.f32 %v3002_v13, %v3001_v15  ;;  %v2931_v30 = vadd.f32 %v2930_v10, %v2929_v44  ;;  %v8841_v44 = vld [vmem:[#allocation5 + $0x550] ss:$8 sps:$4 sm:$0xff]   ;;  %v8846_v10 = vld [vmem:[#allocation5 + $0x564] ss:$8 sps:$4 sm:$0xff]   ;;  %v8847_v13 = vld [vmem:[#allocation5 + $0x120] ss:$8 sps:$4 sm:$0xff]  }
 0x3b9   : > { %7044 = vmatpush1.bf16.msra.mxu0 %v8841_v44  ;;  %4100 = vmatpush1.bf16.msra.mxu1 %v8847_v13 }
 0x3ba   : > { %v3004_v36 = vrot.slane %v3003_v50, 2  ;;  %v2932_v32 = vrot.slane %v2931_v30, 1  ;;  %7045 = vmatprep.subr.bf16.mxu0 %v8846_v10  ;;  %4101 = vmatprep.subr.bf16.mxu1 %v8855_v6 }
 0x3bc   : > { %v2933_v58 = vadd.f32 %v2932_v32, %v2931_v30  ;;  %v3005_v43 = vadd.f32 %v3004_v36, %v3003_v50  ;;  %v12910_v30 = vmov 0   ;;  %v8850_v36 = vld [vmem:[#allocation5 + $0x570] ss:$8 sps:$4 sm:$0xff]   ;;  %v8858_v32 = vld [vmem:[#allocation5 + $0x584] ss:$8 sps:$4 sm:$0xff]  }
 0x3bd   : > { %3180 = vst.msk [vmem:[#allocation2] sm:$0xff] %vm10806_vm9, %v12910_v30  ;;  %3181 = vst.msk [vmem:[#allocation2 + $0x8] sm:$0xff] %vm10806_vm9, %v12910_v30  ;;  %7046 = vmatpush1.bf16.msra.mxu0 %v8844_v59  ;;  %4102 = vmatpush1.bf16.msra.mxu1 %v8853_v42 }
 0x3be   : > { %8630 = vpush %v2933_v58  ;;  %v3006_v5 = vrot.slane %v3005_v43, 1  ;;  %7047 = vmatprep.subr.bf16.mxu0 %v8852_v21  ;;  %v8867_v58 = vld [vmem:[#allocation5 + $0x590] ss:$8 sps:$4 sm:$0xff]   ;;  %4441 = vmatprep.subr.bf16.mxu1 %v8866_v26 }
 0x3bf   : > { %3282 = vst.msk [vmem:[#allocation2 + $0x78] sm:$0xff] %vm10806_vm9, %v12910_v30 }
 0x3c0   : > { %v3007_v15 = vadd.f32 %v3006_v5, %v3005_v43 }
 0x3c1   : > { %7048 = vmatpush1.bf16.msra.mxu0 %v8850_v36 }
 0x3c2   : > { %8632 = vpush %v3007_v15  ;;  %7049 = vmatprep.subr.bf16.mxu0 %v8858_v32 }
 0x3c4   : > { %v3851_v26 = vld [vmem:[#allocation2] sm:$0x88] }
 0x3c5   : > { %7050 = vmatpush1.bf16.msra.mxu0 %v8856_v33 }
 0x3c6   : > { %7051 = vmatprep.subr.bf16.mxu0 %v8869_v52  ;;  %v10824_v52 = vld [vmem:[#allocation2 + $0x8] sm:$0xff] }
 0x3c7   : > { %12911 = vst [vmem:[#allocation89_spill] sm:$0xff] %v10824_v52 }
 0x3c9   : > { %7052 = vmatpush1.bf16.msra.mxu0 %v8867_v58  ;;  %v12912_v58 = vmov 0 }
 0x3ca   : > { %v12913_v58 = vsel %vm10826_vm14, 4294967295, %v12912_v58 }
 0x3cb   : > { %12914 = vst [vmem:[#allocation90_spill] sm:$0xff] %v12913_v58 }
 0x3df   : > { %v3592_v43 = vpop.xlane.xlu1 %3591 }
 0x3e0   : > { %v3593_v24 = vrot.slane %v3592_v43, 4 }
 0x3e2   : > { %v3594_v3 = vadd.f32 %v3593_v24, %v3592_v43  ;;  %v3076_v43 = vld [vmem:[%s12471_s3] sm:$0x3] }
 0x3e3   : > { %v3666_v19 = vpop.xlane.xlu1 %3665  ;;  %v3114_v24 = vld [vmem:[%s12472_s4] sm:$0x3] }
 0x3e4   : > { %v3595_v5 = vrot.slane %v3594_v3, 2  ;;  %v3667_v44 = vrot.slane %v3666_v19, 4 }
 0x3e6   : > { %v3668_v15 = vadd.f32 %v3667_v44, %v3666_v19  ;;  %v3596_v6 = vadd.f32 %v3595_v5, %v3594_v3  ;;  %v10837_v3 = vcombine.low %v3851_v26, %v10824_v52  ;;  %v10840_v19 = vcombine.high %v3851_v26, %v10824_v52 }
 0x3e7   : > { %v10846_v44 = vrot.slane %v3076_v43, %v10011_v47 }
 0x3e8   : > { %v3669_v13 = vrot.slane %v3668_v15, 2  ;;  %v3597_v21 = vrot.slane %v3596_v6, 1 }
 0x3ea   : > { %v3670_v59 = vadd.f32 %v3669_v13, %v3668_v15  ;;  %v3598_v36 = vadd.f32 %v3597_v21, %v3596_v6  ;;  %v10849_v15 = vrot.slane %v3076_v43, %v10024_v57  ;;  %v12915_v13 = vld [vmem:[#allocation20_spill] sm:$0xff]  ;;  %v10858_v21 = vrot.slane %v3114_v24, %v10024_v57  ;;  %v12919_v43 = vld [vmem:[#allocation27_spill] sm:$0xff] }
 0x3eb   : > { %v12916_v6 = vmax.f32 %v12915_v13, 0.0  ;;  %v12920_v7 = vmax.f32 %v12919_v43, 0.0  ;;  %v12930_v43 = vmax.f32 %v12929_v49, 0.0  ;;  %v12940_v49 = vmax.f32 %v12939_v31, 0.0 }
 0x3ec   : > { %v3671_v42 = vrot.slane %v3670_v59, 1 }
 0x3ee   : > { %v3672_v32 = vadd.f32 %v3671_v42, %v3670_v59  ;;  %v12925_v42 = vld [vmem:[#allocation36_spill] sm:$0xff] }
 0x3ef   : > { %s8631_s24 = spop %8630  ;;  %v12926_v12 = vmax.f32 %v12925_v42, 0.0  ;;  %v12936_v42 = vmax.f32 %v12935_v25, 0.0  ;;  %v12945_v25 = vld [vmem:[#allocation48_spill] sm:$0xff] }
 0x3f0   : > { %s10819_s27 = smul.f32 0.00012207031, %s8631_s24 }
 0x3f2   : > { %s3015_s17 = smul.f32 %s10819_s27, %s10819_s27  ;;  %v10843_v5 = vstv %s10819_s27 }
 0x3f3   : > { %s8633_s18 = spop %8632  ;;  %v3019_v59 = vsub.f32 %v12916_v6, %v10843_v5  ;;  %v3021_v23 = vsub.f32 %v12920_v7, %v10843_v5  ;;  %v3022_v13 = vsub.f32 %v12922_v20, %v10843_v5  ;;  %v12923_v6 = vld [vmem:[#allocation35_spill] sm:$0xff]  ;;  %v3026_v7 = vsub.f32 %v12930_v43, %v10843_v5 }
 0x3f4   : > { %s3014_s19 = smul.f32 0.00012207031, %s8633_s18  ;;  %v3027_v20 = vsub.f32 %v12932_v14, %v10843_v5  ;;  %v3031_v43 = vsub.f32 %v12940_v49, %v10843_v5  ;;  %v12942_v14 = vmax.f32 %v12941_v4, 0.0  ;;  %v12949_v49 = vld [vmem:[#allocation53_spill] sm:$0xff] }
 0x3f5   : > { %v12950_v54 = vmax.f32 %v12949_v49, 0.0 }
 0x3f6   : > { %s3016_s20 = ssub.f32 %s3014_s19, %s3015_s17 }
 0x3f7   : > { %v3036_v4 = vsub.f32 %v12950_v54, %v10843_v5 }
 0x3f8   : > { %s3017_s22 = smax.f32 %s9214_s21, %s3016_s20 }
 0x3f9   : > { %s3045_s23 = sadd.f32 1e-05, %s3017_s22 }
 0x3fb   : > { %v3046_v10 = vstv %s3045_s23 }
 0x3fc   : > { %9108 = vrsqrt.f32 %v3046_v10  ;;  %v10852_v10 = vrot.slane %v3114_v24, %v10011_v47  ;;  %v12924_v24 = vmax.f32 %v12923_v6, 0.0  ;;  %v12934_v6 = vmax.f32 %v12933_v61, 0.0  ;;  %v12943_v61 = vld [vmem:[#allocation47_spill] sm:$0xff] }
 0x3fd   : > { %v3032_v47 = vsub.f32 %v12942_v14, %v10843_v5  ;;  %v12951_v14 = vld [vmem:[#allocation54_spill] sm:$0xff] }
 0x3fe   : > { %v3023_v63 = vsub.f32 %v12924_v24, %v10843_v5  ;;  %v3028_v24 = vsub.f32 %v12934_v6, %v10843_v5  ;;  %v12944_v6 = vmax.f32 %v12943_v61, 0.0  ;;  %v12952_v56 = vmax.f32 %v12951_v14, 0.0 }
 0x400   : > { %v3033_v57 = vsub.f32 %v12944_v6, %v10843_v5  ;;  %v10920_v61 = vsub.f32 %v12952_v56, %v10843_v5  ;;  %v12953_v6 = vld [vmem:[#allocation55_spill] sm:$0xff] }
 0x406   : > { %v9109_v33 = vpop.eup %9108 }
 0x407   : > { %8634 = vpush %v9109_v33 }
 0x408   : > { %8636 = vpush %v3598_v36  ;;  %v3024_v36 = vsub.f32 %v12926_v12, %v10843_v5  ;;  %v3029_v12 = vsub.f32 %v12936_v42, %v10843_v5  ;;  %v12946_v42 = vmax.f32 %v12945_v25, 0.0  ;;  %v12954_v25 = vmax.f32 %v12953_v6, 0.0 }
 0x409   : > { %8638 = vpush %v3672_v32  ;;  %v12917_v32 = vld [vmem:[#allocation23_spill] sm:$0xff] }
 0x40a   : > { %v12918_v33 = vmax.f32 %v12917_v32, 0.0  ;;  %v12928_v32 = vmax.f32 %v12927_v27, 0.0  ;;  %v12938_v27 = vmax.f32 %v12937_v46, 0.0  ;;  %v3034_v30 = vsub.f32 %v12946_v42, %v10843_v5  ;;  %v12947_v46 = vld [vmem:[#allocation52_spill] sm:$0xff] }
 0x40b   : > { %v10925_v42 = vsub.f32 %v12954_v25, %v10843_v5 }
 0x40c   : > { %v3020_v26 = vsub.f32 %v12918_v33, %v10843_v5  ;;  %v3025_v33 = vsub.f32 %v12928_v32, %v10843_v5  ;;  %v3030_v32 = vsub.f32 %v12938_v27, %v10843_v5  ;;  %v12948_v27 = vmax.f32 %v12947_v46, 0.0 }
 0x40e   : > { %v10910_v58 = vsub.f32 %v12948_v27, %v10843_v5 }
 0x438   : > { %s8635_s14 = spop %8634 }
 0x439   : > { %v10912_v31 = vstv %s8635_s14  ;;  %s8637_s15 = spop %8636 }
 0x43a   : > { %v3050_v46 = vmul.f32 %v10912_v31, %v3019_v59  ;;  %v3051_v27 = vmul.f32 %v10912_v31, %v3020_v26  ;;  %v3052_v0 = vmul.f32 %v10912_v31, %v3021_v23  ;;  %v3053_v1 = vmul.f32 %v10912_v31, %v3022_v13  ;;  %s11188_s24 = smul.f32 0.00012207031, %s8637_s15  ;;  %s11190_s27 = spop %8638 }
 0x43b   : > { %v3054_v54 = vmul.f32 %v10912_v31, %v3023_v63  ;;  %v3055_v49 = vmul.f32 %v10912_v31, %v3024_v36  ;;  %v3056_v56 = vmul.f32 %v10912_v31, %v3025_v33  ;;  %v3057_v14 = vmul.f32 %v10912_v31, %v3026_v7  ;;  %s3679_s17 = smul.f32 0.00012207031, %s11190_s27 }
 0x43c   : > { %v3088_v6 = vmul.f32 %v10846_v44, %v3050_v46  ;;  %v3089_v25 = vmul.f32 %v10849_v15, %v3051_v27  ;;  %v3090_v59 = vmul.f32 %v10846_v44, %v3052_v0  ;;  %v3091_v26 = vmul.f32 %v10849_v15, %v3053_v1  ;;  %s3680_s18 = smul.f32 %s11188_s24, %s11188_s24 }
 0x43d   : > { %v3092_v23 = vmul.f32 %v10846_v44, %v3054_v54  ;;  %v3093_v13 = vmul.f32 %v10849_v15, %v3055_v49  ;;  %v3094_v63 = vmul.f32 %v10846_v44, %v3056_v56  ;;  %v3095_v36 = vmul.f32 %v10849_v15, %v3057_v14 }
 0x43e   : > { %v3126_v33 = vadd.f32 %v10852_v10, %v3088_v6  ;;  %v3127_v7 = vadd.f32 %v10858_v21, %v3089_v25  ;;  %v3128_v46 = vadd.f32 %v10852_v10, %v3090_v59  ;;  %v3129_v27 = vadd.f32 %v10858_v21, %v3091_v26  ;;  %s3681_s19 = ssub.f32 %s3679_s17, %s3680_s18 }
 0x43f   : > { %v3130_v0 = vadd.f32 %v10852_v10, %v3092_v23  ;;  %v3131_v1 = vadd.f32 %v10858_v21, %v3093_v13  ;;  %v3132_v54 = vadd.f32 %v10852_v10, %v3094_v63  ;;  %v3133_v49 = vadd.f32 %v10858_v21, %v3095_v36 }
 0x440   : > { %v3152_v56 = vmul.f32 %v10080_v60, %v3126_v33  ;;  %v3153_v14 = vmul.f32 %v10088_v28, %v3127_v7  ;;  %v3154_v6 = vmul.f32 %v10096_v29, %v3128_v46  ;;  %v3155_v25 = vmul.f32 %v10112_v17, %v3129_v27  ;;  %s3682_s20 = smax.f32 %s9214_s21, %s3681_s19 }
 0x441   : > { %v3156_v59 = vmul.f32 %v10120_v9, %v3130_v0  ;;  %v3157_v26 = vmul.f32 %v10128_v35, %v3131_v1  ;;  %v3158_v23 = vmul.f32 %v10140_v38, %v3132_v54  ;;  %v3159_v13 = vmul.f32 %v10148_v39, %v3133_v49  ;;  %s3710_s22 = sadd.f32 1e-05, %s3682_s20  ;;  %v8936_v9 = vld [vmem:[#allocation5 + $0x1e4] ss:$8 sps:$4 sm:$0xff]  }
 0x442   : > { %v8211_v52 = vpack.c.bf16 %v3153_v14, %v3152_v56  ;;  %v8212_v63 = vpack.c.bf16 %v3155_v25, %v3154_v6  ;;  %v3058_v36 = vmul.f32 %v10912_v31, %v3027_v20  ;;  %v3059_v33 = vmul.f32 %v10912_v31, %v3028_v24 }
 0x443   : > { %v8213_v60 = vpack.c.bf16 %v3157_v26, %v3156_v59  ;;  %v8214_v7 = vpack.c.bf16 %v3159_v13, %v3158_v23  ;;  %v3060_v46 = vmul.f32 %v10912_v31, %v3029_v12  ;;  %v3061_v27 = vmul.f32 %v10912_v31, %v3030_v32 }
 0x444   : > { %3262 = vst.msk [vmem:[#allocation2 + $0x10] sm:$0xff] %vm10806_vm9, %v8211_v52  ;;  %3263 = vst.msk [vmem:[#allocation2 + $0x18] sm:$0xff] %vm10806_vm9, %v8212_v63  ;;  %v3096_v0 = vmul.f32 %v10846_v44, %v3058_v36  ;;  %v3097_v1 = vmul.f32 %v10849_v15, %v3059_v33  ;;  %v3062_v20 = vmul.f32 %v10912_v31, %v3031_v43 }
 0x445   : > { %v3063_v24 = vmul.f32 %v10912_v31, %v3032_v47  ;;  %3264 = vst.msk [vmem:[#allocation2 + $0x20] sm:$0xff] %vm10806_vm9, %v8213_v60  ;;  %3265 = vst.msk [vmem:[#allocation2 + $0x28] sm:$0xff] %vm10806_vm9, %v8214_v7  ;;  %v3098_v12 = vmul.f32 %v10846_v44, %v3060_v46  ;;  %v3099_v52 = vmul.f32 %v10849_v15, %v3061_v27 }
 0x446   : > { %v3064_v32 = vmul.f32 %v10912_v31, %v3033_v57  ;;  %v3065_v54 = vmul.f32 %v10912_v31, %v3034_v30  ;;  %v3134_v49 = vadd.f32 %v10852_v10, %v3096_v0  ;;  %v3135_v43 = vadd.f32 %v10858_v21, %v3097_v1 }
 0x447   : > { %v3100_v47 = vmul.f32 %v10846_v44, %v3062_v20  ;;  %v3101_v56 = vmul.f32 %v10849_v15, %v3063_v24  ;;  %v3136_v60 = vadd.f32 %v10852_v10, %v3098_v12  ;;  %v3137_v14 = vadd.f32 %v10858_v21, %v3099_v52 }
 0x448   : > { %v3066_v6 = vmul.f32 %v10912_v31, %v10910_v58  ;;  %v3067_v25 = vmul.f32 %v10912_v31, %v3036_v4  ;;  %v3160_v57 = vmul.f32 %v10156_v40, %v3134_v49  ;;  %v3161_v30 = vmul.f32 %v10177_v11, %v3135_v43  ;;  %v12955_v43 = vld [vmem:[#allocation58_spill] sm:$0xff] }
 0x449   : > { %v3138_v59 = vadd.f32 %v10852_v10, %v3100_v47  ;;  %v3139_v26 = vadd.f32 %v10858_v21, %v3101_v56  ;;  %v3162_v23 = vmul.f32 %v10185_v22, %v3136_v60  ;;  %v3163_v13 = vmul.f32 %v10200_v51, %v3137_v14 }
 0x44a   : > { %v3102_v63 = vmul.f32 %v10846_v44, %v3064_v32  ;;  %v3103_v36 = vmul.f32 %v10849_v15, %v3065_v54  ;;  %v8215_v33 = vpack.c.bf16 %v3161_v30, %v3160_v57  ;;  %v3104_v7 = vmul.f32 %v10846_v44, %v3066_v6 }
 0x44b   : > { %v3164_v58 = vmul.f32 %v10208_v53, %v3138_v59  ;;  %v3165_v4 = vmul.f32 %v10216_v55, %v3139_v26  ;;  %v10999_v46 = vld [vmem:[#allocation2 + $0x10] ss:$8 sps:$4 sm:$0xff]   ;;  %v8216_v27 = vpack.c.bf16 %v3163_v13, %v3162_v23  ;;  %v3105_v0 = vmul.f32 %v10849_v15, %v3067_v25  ;;  %v11004_v24 = vld [vmem:[#allocation2 + $0x14] ss:$8 sps:$4 sm:$0xff]  }
 0x44c   : > { %v3140_v1 = vadd.f32 %v10852_v10, %v3102_v63  ;;  %v3141_v20 = vadd.f32 %v10858_v21, %v3103_v36  ;;  %v3821_v12 = vld [vmem:[#allocation2 + $0x20] sm:$0xff]  ;;  %v3822_v52 = vld [vmem:[#allocation2 + $0x28] sm:$0xff]  ;;  %3266 = vst.msk [vmem:[#allocation2 + $0x30] sm:$0xff] %vm10806_vm9, %v8215_v33  ;;  %v3142_v54 = vadd.f32 %v10852_v10, %v3104_v7  ;;  %v3068_v49 = vmul.f32 %v10912_v31, %v10920_v61  ;;  %v6496_v6 = vld [vmem:[#allocation2 + $0x18] sm:$0xee] }
 0x44d   : > { %v8217_v32 = vpack.c.bf16 %v3165_v4, %v3164_v58  ;;  %v12956_v47 = vmax.f32 %v12955_v43, 0.0  ;;  %v3930_v60 = vrot.slane %v10999_v46, 3  ;;  %v11017_v14 = vcombine.high %v3821_v12, %v3822_v52  ;;  %3267 = vst.msk [vmem:[#allocation2 + $0x38] sm:$0xff] %vm10806_vm9, %v8216_v27  ;;  %v8864_v63 = vld [vmem:[#allocation5] ss:$8 sps:$4 sm:$0xff]  }
 0x44e   : > { %v11021_v25 = vcombine.low %v3821_v12, %v3822_v52  ;;  %v3143_v57 = vadd.f32 %v10858_v21, %v3105_v0  ;;  %v3933_v30 = vrot.slane %v11004_v24, 3  ;;  %v11025_v61 = vcombine.low %v6496_v6, %v3821_v12 }
 0x44f   : > { %v11014_v56 = vsub.f32 %v12956_v47, %v10843_v5  ;;  %v11027_v59 = vcombine.high %v6496_v6, %v3821_v12  ;;  %3268 = vst.msk [vmem:[#allocation2 + $0x40] sm:$0xff] %vm10806_vm9, %v8217_v32  ;;  %v3166_v26 = vmul.f32 %v10232_v2, %v3140_v1  ;;  %v12959_v23 = vrot.slane %v10837_v3, 3  ;;  %v8874_v12 = vld [vmem:[#allocation5 + $0x14] ss:$8 sps:$4 sm:$0xff]   ;;  %v8872_v2 = vld [vmem:[#allocation5 + $0x10] ss:$8 sps:$4 sm:$0xff]  }
 0x450   : > { %12957 = vst [vmem:[#allocation20_spill] sm:$0xff] %v11025_v61  ;;  %v12617_v36 = vrot.slane %v11017_v14, 3  ;;  %v3167_v58 = vmul.f32 %v10249_v37, %v3141_v20  ;;  %v12961_v4 = vrot.slane %v10840_v19, 3  ;;  %v6832_v1 = vshrl.u32 %v11025_v61, 16 }
 0x451   : > { %12958 = vst [vmem:[#allocation23_spill] sm:$0xff] %v11027_v59  ;;  %v3931_v13 = vsel %vm12960_vm10, %v12959_v23, %v3930_v60  ;;  %v6844_v27 = vshrl.u32 %v11027_v59, 16  ;;  %v6847_v0 = vshll.u32 %v11027_v59, 16  ;;  %v6835_v43 = vshll.u32 %v11025_v61, 16  ;;  %vm12993_vm10 = vmmov %vm12983_vm1 }
 0x452   : > { %v3934_v7 = vsel %vm12962_vm5, %v12961_v4, %v3933_v30  ;;  %v3938_v32 = vsel %vm12963_vm7, %v3933_v30, %v12617_v36  ;;  %v3168_v20 = vmul.f32 %v10266_v41, %v3142_v54  ;;  %v3069_v47 = vmul.f32 %v10912_v31, %v10925_v42  ;;  %v12964_v54 = vld [vmem:[#allocation60_spill] sm:$0xff]  ;;  %vm12995_vm5 = vmmov %vm12992_vm0 }
 0x453   : > { %7934 = vmatprep.mubr.msk.bf16.mxu1 %vm2885_vm13, %v3934_v7  ;;  %v6846_v6 = vrot.slane %v6844_v27, 1  ;;  %v6849_v23 = vrot.slane %v6847_v0, 2  ;;  %v6834_v4 = vrot.slane %v6832_v1, 1  ;;  %v3169_v33 = vmul.f32 %v10278_v48, %v3143_v57  ;;  %v6047_v7 = vld [vmem:[#allocation2 + $0x30] sm:$0xff]  ;;  %vm12997_vm7 = vmmov %vm12983_vm1 }
 0x454   : > { %4116 = vmatmul.mubr.bf16.vlgmr.msra.gmra.mrb[28].mxu1 %v3931_v13  ;;  %v6837_v37 = vrot.slane %v6835_v43, 2  ;;  %v8218_v30 = vpack.c.bf16 %v3167_v58, %v3166_v26  ;;  %v3106_v36 = vmul.f32 %v10846_v44, %v3068_v49  ;;  %v12965_v41 = vmax.f32 %v12964_v54, 0.0  ;;  %v6048_v27 = vld [vmem:[#allocation2 + $0x38] sm:$0xff] }
 0x455   : > { %7935 = vmatprep.mubr.msk.bf16.mxu1 %vm2885_vm13, %v3938_v32  ;;  %4442 = vmatpush1.bf16.msra.mxu1 %v8864_v63  ;;  %v11060_v42 = vcombine.low %v3822_v52, %v6047_v7  ;;  %v11062_v13 = vcombine.high %v3822_v52, %v6047_v7  ;;  %v12968_v57 = vrot.slane %v11021_v25, 3  ;;  %v8877_v0 = vld [vmem:[#allocation5 + $0x24] ss:$8 sps:$4 sm:$0xff]   ;;  %v8219_v1 = vpack.c.bf16 %v3169_v33, %v3168_v20  ;;  %v8875_v20 = vld [vmem:[#allocation5 + $0x20] ss:$8 sps:$4 sm:$0xff]  }
 0x456   : > { %v11058_v55 = vsub.f32 %v12965_v41, %v10843_v5  ;;  %4443 = vmatprep.subr.bf16.mxu1 %v8874_v12  ;;  %v6850_v26 = vor.u32 %v6849_v23, %v6846_v6  ;;  %v6838_v58 = vor.u32 %v6837_v37, %v6834_v4  ;;  %v6049_v49 = vld [vmem:[#allocation2 + $0x40] sm:$0xff]  ;;  %v11067_v32 = vcombine.high %v6047_v7, %v6048_v27 }
 0x457   : > { %12966 = vst [vmem:[#allocation27_spill] sm:$0xff] %v11060_v42  ;;  %12967 = vst [vmem:[#allocation29_spill] sm:$0xff] %v11062_v13  ;;  %v3936_v63 = vsel %vm12969_vm3, %v3930_v60, %v12968_v57  ;;  %v3107_v41 = vmul.f32 %v10849_v15, %v3069_v47  ;;  %v12625_v52 = vshll.u32 %v11062_v13, 16  ;;  %v12622_v12 = vshrl.u32 %v11062_v13, 16 }
 0x458   : > { %3269 = vst.msk [vmem:[#allocation2 + $0x48] sm:$0xff] %vm10806_vm9, %v8218_v30  ;;  %v12629_v43 = vshll.u32 %v11060_v42, 16  ;;  %v12626_v60 = vshrl.u32 %v11060_v42, 16  ;;  %3270 = vst.msk [vmem:[#allocation2 + $0x50] sm:$0xff] %vm10806_vm9, %v8219_v1  ;;  %v11078_v37 = vcombine.high %v6048_v27, %v6049_v49  ;;  %v11081_v6 = vcombine.low %v6048_v27, %v6049_v49 }
 0x459   : > { %4444 = vmatpush1.bf16.msra.mxu1 %v8872_v2  ;;  %v3144_v47 = vadd.f32 %v10852_v10, %v3106_v36  ;;  %v6851_v23 = vrot.slane %v12622_v12, 1  ;;  %v6852_v4 = vrot.slane %v12625_v52, 2  ;;  %v8882_v2 = vld [vmem:[#allocation5 + $0x34] ss:$8 sps:$4 sm:$0xff]   ;;  %v11095_v33 = vcombine.low %v6047_v7, %v6048_v27  ;;  %v8880_v27 = vld [vmem:[#allocation5 + $0x30] ss:$8 sps:$4 sm:$0xff]   ;;  %vm12998_vm3 = vmmov %vm12983_vm1 }
 0x45a   : > { %12970 = vst [vmem:[#allocation35_spill] sm:$0xff] %v11078_v37  ;;  %12971 = vst [vmem:[#allocation36_spill] sm:$0xff] %v11081_v6  ;;  %v6839_v30 = vrot.slane %v12626_v60, 1  ;;  %v6840_v54 = vrot.slane %v12629_v43, 2  ;;  %4445 = vmatprep.subr.bf16.mxu1 %v8877_v0  ;;  %v12635_v57 = vshll.u32 %v11078_v37, 16  ;;  %v12634_v1 = vshrl.u32 %v11078_v37, 16 }
 0x45b   : > { %v12632_v36 = vshll.u32 %v11081_v6, 16  ;;  %v6853_v12 = vor.u32 %v6852_v4, %v6851_v23  ;;  %v12972_v52 = vrot.slane %v11067_v32, 3  ;;  %v12973_v60 = vrot.slane %v11017_v14, 3 }
 0x45c   : > { %v6841_v48 = vor.u32 %v6840_v54, %v6839_v30  ;;  %4126 = vmatmul.mubr.bf16.gmra.mrb[32].mxu1 %v3936_v63  ;;  %v12633_v0 = vshrl.u32 %v11081_v6, 16  ;;  %v6859_v43 = vrot.slane %v12634_v1, 1  ;;  %v6860_v51 = vrot.slane %v12635_v57, 2  ;;  %v8886_v30 = vld [vmem:[#allocation5 + $0x44] ss:$8 sps:$4 sm:$0xff]  }
 0x45d   : > { %v3942_v53 = vsel %vm12974_vm4, %v12973_v60, %v12972_v52  ;;  %v6856_v7 = vrot.slane %v12632_v36, 2  ;;  %4446 = vmatpush1.bf16.msra.mxu1 %v8875_v20  ;;  %v3145_v63 = vadd.f32 %v10858_v21, %v3107_v41  ;;  %v6854_v23 = vsel %vm12975_vm15, %v6850_v26, %v6853_v12  ;;  %v8884_v57 = vld [vmem:[#allocation5 + $0x40] ss:$8 sps:$4 sm:$0xff]   ;;  %vm13001_vm4 = vmmov %vm12983_vm1 }
 0x45e   : > { %7936 = vmatprep.mubr.msk.bf16.mxu1 %vm2885_vm13, %v3942_v53  ;;  %v6842_v52 = vsel %vm12976_vm11, %v6838_v58, %v6841_v48  ;;  %v6855_v60 = vrot.slane %v12633_v0, 1  ;;  %4447 = vmatprep.subr.bf16.mxu1 %v8882_v2  ;;  %v3170_v54 = vmul.f32 %v10281_v8, %v3144_v47  ;;  %v6861_v53 = vor.u32 %v6860_v51, %v6859_v43  ;;  %v12979_v47 = vld [vmem:[#allocation61_spill] sm:$0xff] }
 0x45f   : > { %v6050_v4 = vld [vmem:[#allocation2 + $0x48] sm:$0xff]  ;;  %8202 = vmatprep.mubr.msk.bf16.mxu0 %vm2885_vm13, %v6854_v23  ;;  %v11117_v36 = vld [vmem:[#allocation2 + $0x50] sm:$0xff]  ;;  %v3939_v20 = vrot.slane %v11095_v33, 3  ;;  %v3171_v26 = vmul.f32 %v10287_v18, %v3145_v63  ;;  %v12980_v51 = vmax.f32 %v12979_v47, 0.0  ;;  %vm13002_vm15 = vsmask.f32 5376 }
 0x460   : > { %v11120_v41 = vcombine.high %v6049_v49, %v6050_v4  ;;  %7066 = vmatmul.mubr.bf16.vlgmr.msra.gmra.mrb[60].mxu0 %v6842_v52  ;;  %v11124_v58 = vcombine.high %v6050_v4, %v11117_v36  ;;  %v11127_v2 = vcombine.low %v6050_v4, %v11117_v36  ;;  %v11129_v0 = vcombine.low %v6049_v49, %v6050_v4  ;;  %vm13003_vm11 = vmmov %vm13002_vm15 }
 0x461   : > { %v3041_v43 = vsub.f32 %v12980_v51, %v10843_v5  ;;  %v6862_v23 = vsel %vm12981_vm6, %v6853_v12, %v6861_v53  ;;  %4448 = vmatpush1.bf16.msra.mxu1 %v8880_v27  ;;  %v8220_v63 = vpack.c.bf16 %v3171_v26, %v3170_v54  ;;  %v3070_v52 = vmul.f32 %v10912_v31, %v11014_v56  ;;  %v8889_v12 = vld [vmem:[#allocation5 + $0x54] ss:$8 sps:$4 sm:$0xff]   ;;  %v12984_v56 = vld [vmem:[#allocation62_spill] sm:$0xff]  ;;  %vm13004_vm6 = vmmov %vm13003_vm11 }
 0x462   : > { %12977 = vst [vmem:[#allocation37_spill] sm:$0xff] %v11124_v58  ;;  %12978 = vst [vmem:[#allocation38_spill] sm:$0xff] %v11127_v2  ;;  %v12640_v1 = vrot.slane %v11120_v41, 3  ;;  %8203 = vmatprep.mubr.msk.bf16.mxu0 %vm2885_vm13, %v6862_v23  ;;  %v11139_v18 = vor.u32 %v6856_v7, %v6855_v60  ;;  %v12639_v49 = vshll.u32 %v11124_v58, 16  ;;  %v12638_v4 = vshrl.u32 %v11124_v58, 16  ;;  %4449 = vmatprep.subr.bf16.mxu1 %v8886_v30 }
 0x463   : > { %v12982_v51 = vrot.slane %v11021_v25, 3  ;;  %3271 = vst.msk [vmem:[#allocation2 + $0x58] sm:$0xff] %vm10806_vm9, %v8220_v63  ;;  %v12985_v7 = vmax.f32 %v12984_v56, 0.0  ;;  %v3071_v26 = vmul.f32 %v10912_v31, %v11058_v55  ;;  %v3072_v54 = vmul.f32 %v10912_v31, %v3041_v43  ;;  %v8887_v55 = vld [vmem:[#allocation5 + $0x50] ss:$8 sps:$4 sm:$0xff]  }
 0x464   : > { %v6867_v30 = vrot.slane %v12638_v4, 1  ;;  %v6868_v23 = vrot.slane %v12639_v49, 2  ;;  %v3943_v56 = vrot.slane %v11129_v0, 3  ;;  %v3108_v4 = vmul.f32 %v10846_v44, %v3070_v52 }
 0x465   : > { %v3940_v27 = vsel %vm12983_vm1, %v12982_v51, %v3939_v20  ;;  %v3042_v60 = vsub.f32 %v12985_v7, %v10843_v5  ;;  %v12986_v51 = vrot.slane %v11067_v32, 3  ;;  %4450 = vmatpush1.bf16.msra.mxu1 %v8884_v57  ;;  %v6858_v49 = vsel %vm12988_vm12, %v6841_v48, %v11139_v18 }
 0x466   : > { %4136 = vmatmul.mubr.bf16.gmra.mrb[36].mxu1 %v3940_v27  ;;  %v3109_v27 = vmul.f32 %v10849_v15, %v3071_v26  ;;  %v11172_v47 = vor.u32 %v6868_v23, %v6867_v30  ;;  %4451 = vmatprep.subr.bf16.mxu1 %v8889_v12  ;;  %v12991_v57 = vshrl.u32 %v11127_v2, 16  ;;  %v3146_v26 = vadd.f32 %v10852_v10, %v3108_v4  ;;  %v8891_v23 = vld [vmem:[#allocation5 + $0x60] ss:$8 sps:$4 sm:$0xff]  }
 0x467   : > { %v3946_v63 = vsel %vm12987_vm2, %v12986_v51, %v12640_v1  ;;  %v3073_v7 = vmul.f32 %v10912_v31, %v3042_v60  ;;  %v12990_v51 = vshll.u32 %v11127_v2, 16  ;;  %v8893_v1 = vld [vmem:[#allocation5 + $0x64] ss:$8 sps:$4 sm:$0xff]   ;;  %v13019_v38 = vshrl.u32 %v11004_v24, 16 }
 0x468   : > { %7937 = vmatprep.mubr.msk.bf16.mxu1 %vm2885_vm13, %v3946_v63  ;;  %12989 = vst [vmem:[#allocation39_spill] sm:$0xff] %v11172_v47  ;;  %v3110_v63 = vmul.f32 %v10846_v44, %v3072_v54  ;;  %v6863_v60 = vrot.slane %v12991_v57, 1  ;;  %v3147_v8 = vadd.f32 %v10858_v21, %v3109_v27  ;;  %7076 = vmatmul.mubr.bf16.gmra.mrb[64].mxu0 %v6858_v49 }
 0x469   : > { %v6864_v43 = vrot.slane %v12990_v51, 2  ;;  %v3111_v52 = vmul.f32 %v10849_v15, %v3073_v7  ;;  %v6870_v48 = vsel %vm12992_vm0, %v6861_v53, %v11172_v47  ;;  %4452 = vmatpush1.bf16.msra.mxu1 %v8887_v55  ;;  %v3172_v54 = vmul.f32 %v10404_v16, %v3146_v26  ;;  %v8897_v55 = vld [vmem:[#allocation5 + $0x74] ss:$8 sps:$4 sm:$0xff]   ;;  %v8895_v26 = vld [vmem:[#allocation5 + $0x70] ss:$8 sps:$4 sm:$0xff]  }
 0x46a   : > { %v3148_v30 = vadd.f32 %v10852_v10, %v3110_v63  ;;  %8204 = vmatprep.mubr.msk.bf16.mxu0 %vm2885_vm13, %v6870_v48  ;;  %v3944_v49 = vsel %vm12993_vm10, %v3939_v20, %v3943_v56  ;;  %v3828_v4 = vld [vmem:[#allocation2 + $0x58] sm:$0xff]  ;;  %v3173_v53 = vmul.f32 %v10415_v34, %v3147_v8  ;;  %4453 = vmatprep.subr.bf16.mxu1 %v8893_v1  ;;  %v13017_v16 = vld [vmem:[#allocation56_spill] sm:$0xff]  ;;  %v4589_v35 = vrot.slane %v13019_v38, 3 }
 0x46b   : > { %v3149_v12 = vadd.f32 %v10858_v21, %v3111_v52  ;;  %v11195_v27 = vor.u32 %v6864_v43, %v6863_v60  ;;  %v11198_v51 = vcombine.high %v11117_v36, %v3828_v4  ;;  %v11201_v63 = vcombine.low %v11117_v36, %v3828_v4  ;;  %v8900_v1 = vld [vmem:[#allocation5 + $0x84] ss:$8 sps:$4 sm:$0xff]  }
 0x46c   : > { %v3174_v7 = vmul.f32 %v10452_v62, %v3148_v30  ;;  %v8221_v20 = vpack.c.bf16 %v3173_v53, %v3172_v54  ;;  %v12996_v43 = vrot.slane %v11120_v41, 3  ;;  %v8898_v30 = vld [vmem:[#allocation5 + $0x80] ss:$8 sps:$4 sm:$0xff]   ;;  %v8903_v54 = vld [vmem:[#allocation5 + $0x94] ss:$8 sps:$4 sm:$0xff]  }
 0x46d   : > { %12994 = vst [vmem:[#allocation40_spill] sm:$0xff] %v11195_v27  ;;  %v3175_v57 = vmul.f32 %v10468_v45, %v3149_v12  ;;  %v3949_v52 = vrot.slane %v11198_v51, 3  ;;  %4454 = vmatpush1.bf16.msra.mxu1 %v8891_v23  ;;  %v6866_v36 = vsel %vm12995_vm5, %v11139_v18, %v11195_v27  ;;  %v3947_v48 = vrot.slane %v11201_v63, 3  ;;  %v3817_v12 = vld [vmem:[#allocation2] sm:$0xcc]  ;;  %v12999_v23 = vld [vmem:[#allocation89_spill] sm:$0xff] }
 0x46e   : > { %4146 = vmatmul.mubr.bf16.gmra.mrb[40].mxu1 %v3944_v49  ;;  %3272 = vst.msk [vmem:[#allocation2 + $0x60] sm:$0xff] %vm10806_vm9, %v8221_v20  ;;  %4455 = vmatprep.subr.bf16.mxu1 %v8897_v55  ;;  %v7942_v49 = vcombine.high %v3817_v12, %v12999_v23  ;;  %v8901_v53 = vld [vmem:[#allocation5 + $0x90] ss:$8 sps:$4 sm:$0xff]  }
 0x46f   : > { %v8222_v8 = vpack.c.bf16 %v3175_v57, %v3174_v7  ;;  %v3950_v60 = vsel %vm12997_vm7, %v12996_v43, %v3949_v52  ;;  %v3948_v18 = vsel %vm12998_vm3, %v3943_v56, %v3947_v48  ;;  %v8906_v7 = vld [vmem:[#allocation5 + $0x144] ss:$8 sps:$4 sm:$0xff]  }
 0x470   : > { %7086 = vmatmul.mubr.bf16.gmra.mrb[68].mxu0 %v6866_v36  ;;  %7938 = vmatprep.mubr.msk.bf16.mxu1 %vm2885_vm13, %v3950_v60  ;;  %v4207_v20 = vshrl.u32 %v7942_v49, 16  ;;  %v4210_v56 = vshll.u32 %v7942_v49, 16  ;;  %v12645_v36 = vshll.u32 %v11004_v24, 16 }
 0x471   : > { %3273 = vst.msk [vmem:[#allocation2 + $0x68] sm:$0xff] %vm10806_vm9, %v8222_v8  ;;  %4456 = vmatpush1.bf16.msra.mxu1 %v8895_v26  ;;  %vm13000_vm9 = vmmov %vm12983_vm1 }
 0x472   : > { %4457 = vmatprep.subr.bf16.mxu1 %v8900_v1  ;;  %v12649_v1 = vshrl.u32 %v11004_v24, 16  ;;  %v4212_v49 = vrot.slane %v4210_v56, 3  ;;  %v4220_v45 = vrot.slane %v12645_v36, 3  ;;  %v12662_v56 = vshll.u32 %v11017_v14, 16  ;;  %vm13005_vm1 = vmmov %vm13004_vm6 }
 0x473   : > { %vm13006_vm2 = vmmov %vm13005_vm1 }
 0x474   : > { %vm13007_vm12 = vmmov %vm13005_vm1 }
 0x475   : > { %v11222_v4 = vld [vmem:[#allocation2 + $0x60] sm:$0xff]  ;;  %4458 = vmatpush1.bf16.msra.mxu1 %v8898_v30  ;;  %v7941_v30 = vcombine.low %v3817_v12, %v12999_v23  ;;  %vm13008_vm0 = vmmov %vm13005_vm1 }
 0x476   : > { %4156 = vmatmul.mubr.bf16.gmra.mrb[44].mxu1 %v3948_v18  ;;  %4459 = vmatprep.subr.bf16.mxu1 %v8903_v54  ;;  %v4209_v54 = vrot.slane %v4207_v20, 2  ;;  %v3711_v18 = vstv %s3710_s22  ;;  %v12648_v20 = vshrl.u32 %v11017_v14, 16  ;;  %vm13009_vm10 = vmmov %vm13008_vm0 }
 0x477   : > { %9110 = vrsqrt.f32 %v3711_v18  ;;  %vm13014_vm5 = vmmov %vm13008_vm0 }
 0x478   : > { %v3830_v50 = vld [vmem:[#allocation2 + $0x68] sm:$0x11]  ;;  %v4213_v12 = vor.u32 %v4212_v49, %v4209_v54  ;;  %v4235_v18 = vrot.slane %v12648_v20, 2  ;;  %vm13015_vm7 = vmmov %vm13008_vm0 }
 0x479   : > { %v11226_v55 = vcombine.high %v11222_v4, %v3830_v50  ;;  %v11229_v57 = vcombine.low %v11222_v4, %v3830_v50  ;;  %4460 = vmatpush1.bf16.msra.mxu1 %v8901_v53  ;;  %v4217_v50 = vrot.slane %v12649_v1, 2  ;;  %v4193_v53 = vshll.u32 %v7941_v30, 16  ;;  %v8909_v20 = vld [vmem:[#allocation5 + $0x154] ss:$8 sps:$4 sm:$0xff]   ;;  %vm13018_vm3 = vmmov %vm13008_vm0 }
 0x47a   : > { %4771 = vmatprep.subr.bf16.mxu1 %v8906_v7  ;;  %v12647_v7 = vshrl.u32 %v10999_v46, 16  ;;  %v11368_v11 = vld [vmem:[#allocation2 + $0x68] sm:$0xff] }
 0x47b   : > { %v3953_v8 = vrot.slane %v11226_v55, 3  ;;  %v3951_v26 = vrot.slane %v11229_v57, 3  ;;  %v4221_v23 = vor.u32 %v4220_v45, %v4217_v50  ;;  %v4238_v45 = vrot.slane %v12662_v56, 3  ;;  %v13010_v56 = vld [vmem:[#allocation63_spill] sm:$0xff] }
 0x47c   : > { %v4200_v36 = vrot.slane %v12647_v7, 2  ;;  %v8904_v7 = vld [vmem:[#allocation5 + $0x140] ss:$8 sps:$4 sm:$0xff]  }
 0x47d   : > { %v3954_v43 = vsel %vm13000_vm9, %v3949_v52, %v3953_v8  ;;  %v3952_v60 = vsel %vm13001_vm4, %v3947_v48, %v3951_v26  ;;  %v4190_v52 = vshrl.u32 %v7941_v30, 16  ;;  %v12646_v48 = vshll.u32 %v10999_v46, 16 }
 0x47e   : > { %7939 = vmatprep.mubr.msk.bf16.mxu1 %vm2885_vm13, %v3954_v43  ;;  %v4222_v30 = vsel %vm13002_vm15, %v4213_v12, %v4221_v23  ;;  %v12653_v12 = vshll.u32 %v11067_v32, 16  ;;  %vm13023_vm9 = vsmask.f32 7424 }
 0x47f   : > { %4166 = vmatmul.mubr.bf16.gmra.mrb[48].mxu1 %v3952_v60  ;;  %v4192_v43 = vrot.slane %v4190_v52, 2  ;;  %v4195_v60 = vrot.slane %v4193_v53, 3  ;;  %v12651_v52 = vshrl.u32 %v11021_v25, 16  ;;  %v12650_v53 = vshll.u32 %v11021_v25, 16  ;;  %vm13024_vm4 = vmmov %vm13023_vm9 }
 0x480   : > { %7940 = vmatprep.mubr.msk.bf16.mxu1 %vm2885_vm13, %v3953_v8  ;;  %v4203_v8 = vrot.slane %v12646_v48, 3  ;;  %v4239_v48 = vor.u32 %v4238_v45, %v4235_v18  ;;  %v8907_v18 = vld [vmem:[#allocation5 + $0x150] ss:$8 sps:$4 sm:$0xff]   ;;  %v8912_v45 = vld [vmem:[#allocation5 + $0x164] ss:$8 sps:$4 sm:$0xff]   ;;  %vm13025_vm15 = vmmov %vm13024_vm4 }
 0x481   : > { %v9111_v54 = vpop.eup %9110  ;;  %v4196_v49 = vor.u32 %v4195_v60, %v4192_v43 }
 0x482   : > { %v4204_v50 = vor.u32 %v4203_v8, %v4200_v36  ;;  %8640 = vpush %v9111_v54  ;;  %v4229_v36 = vrot.slane %v12650_v53, 3  ;;  %v4240_v43 = vsel %vm13004_vm6, %v4221_v23, %v4239_v48  ;;  %v4256_v8 = vrot.slane %v12653_v12, 3  ;;  %v8915_v12 = vld [vmem:[#allocation5 + $0x174] ss:$8 sps:$4 sm:$0xff]   ;;  %vm13027_vm6 = vmmov %vm13024_vm4 }
 0x483   : > { %v12654_v53 = vshll.u32 %v11095_v33, 16  ;;  %v12656_v23 = vshrl.u32 %v11120_v41, 16 }
 0x484   : > { %v4205_v1 = vsel %vm13003_vm11, %v4196_v49, %v4204_v50  ;;  %v12655_v49 = vshrl.u32 %v11095_v33, 16  ;;  %vm13026_vm11 = vmmov %vm13024_vm4 }
 0x487   : > { %4176 = vmatmul.mubr.bf16.gmra.mrb[52].mxu1 %v3951_v26  ;;  %v12652_v26 = vshrl.u32 %v11067_v32, 16 }
 0x488   : > { %7963 = vmatprep.mubr.msk.bf16.mxu1 %vm2885_vm13, %v4222_v30  ;;  %v4226_v30 = vrot.slane %v12651_v52, 2  ;;  %v12657_v52 = vshll.u32 %v11120_v41, 16 }
 0x489   : > { %v4253_v60 = vrot.slane %v12652_v26, 2  ;;  %v8910_v26 = vld [vmem:[#allocation5 + $0x160] ss:$8 sps:$4 sm:$0xff]  }
 0x48a   : > { %v4230_v54 = vor.u32 %v4229_v36, %v4226_v30  ;;  %v4271_v36 = vrot.slane %v12656_v23, 2  ;;  %v8916_v23 = vld [vmem:[#allocation5 + $0x180] ss:$8 sps:$4 sm:$0xff]  }
 0x48f   : > { %4474 = vmatmul.mubr.bf16.vlgmr.msra.gmra.mrb[28].mxu1 %v4205_v1  ;;  %v4257_v1 = vor.u32 %v4256_v8, %v4253_v60  ;;  %v4274_v60 = vrot.slane %v12657_v52, 3  ;;  %v8913_v8 = vld [vmem:[#allocation5 + $0x170] ss:$8 sps:$4 sm:$0xff]   ;;  %v8921_v52 = vld [vmem:[#allocation5 + $0x194] ss:$8 sps:$4 sm:$0xff]  }
 0x490   : > { %7964 = vmatprep.mubr.msk.bf16.mxu1 %vm2885_vm13, %v4240_v43  ;;  %4772 = vmatpush1.bf16.msra.mxu1 %v8904_v7  ;;  %v4231_v43 = vsel %vm13005_vm1, %v4204_v50, %v4230_v54  ;;  %v4244_v7 = vrot.slane %v12655_v49, 2  ;;  %v8918_v50 = vld [vmem:[#allocation5 + $0x184] ss:$8 sps:$4 sm:$0xff]   ;;  %v12661_v49 = vshll.u32 %v11198_v51, 16  ;;  %vm13030_vm1 = vsmask.f32 4352 }
 0x491   : > { %4773 = vmatprep.subr.bf16.mxu1 %v8909_v20  ;;  %v4247_v20 = vrot.slane %v12654_v53, 3  ;;  %v4258_v30 = vsel %vm13006_vm2, %v4239_v48, %v4257_v1  ;;  %v12658_v53 = vshll.u32 %v11129_v0, 16  ;;  %v12660_v48 = vshrl.u32 %v11198_v51, 16  ;;  %vm13033_vm2 = vmmov %vm13030_vm1 }
 0x494   : > { %4774 = vmatpush1.bf16.msra.mxu1 %v8907_v18  ;;  %v4248_v18 = vor.u32 %v4247_v20, %v4244_v7  ;;  %v4289_v20 = vrot.slane %v12660_v48, 2  ;;  %v8922_v48 = vld [vmem:[#allocation5 + $0x1a0] ss:$8 sps:$4 sm:$0xff]  }
 0x495   : > { %4775 = vmatprep.subr.bf16.mxu1 %v8912_v45  ;;  %v12659_v45 = vshrl.u32 %v11129_v0, 16 }
 0x497   : > { %4484 = vmatmul.mubr.bf16.gmra.mrb[32].mxu1 %v4231_v43  ;;  %v4275_v43 = vor.u32 %v4274_v60, %v4271_v36  ;;  %v4292_v36 = vrot.slane %v12661_v49, 3  ;;  %v8919_v60 = vld [vmem:[#allocation5 + $0x190] ss:$8 sps:$4 sm:$0xff]  }
 0x498   : > { %7965 = vmatprep.mubr.msk.bf16.mxu1 %vm2885_vm13, %v4258_v30  ;;  %4776 = vmatpush1.bf16.msra.mxu1 %v8910_v26  ;;  %v4249_v30 = vsel %vm13007_vm12, %v4230_v54, %v4248_v18  ;;  %v4262_v26 = vrot.slane %v12659_v45, 2  ;;  %v12665_v54 = vshrl.u32 %v11201_v63, 16  ;;  %v4308_v45 = vshll.u32 %v11226_v55, 16  ;;  %vm13036_vm12 = vmmov %vm13030_vm1 }
 0x499   : > { %4777 = vmatprep.subr.bf16.mxu1 %v8915_v12  ;;  %v4265_v12 = vrot.slane %v12658_v53, 3  ;;  %v4276_v7 = vsel %vm13008_vm0, %v4257_v1, %v4275_v43  ;;  %v4305_v1 = vshrl.u32 %v11226_v55, 16 }
 0x49a   : > { %v4280_v49 = vrot.slane %v12665_v54, 2  ;;  %v4310_v54 = vrot.slane %v4308_v45, 3  ;;  %v11330_v45 = vld [vmem:[#allocation2 + $0x20] sm:$0xff] }
 0x49b   : > { %v4266_v53 = vor.u32 %v4265_v12, %v4262_v26  ;;  %v13011_v26 = vmax.f32 %v13010_v56, 0.0  ;;  %v4307_v62 = vrot.slane %v4305_v1, 2  ;;  %v4296_v56 = vshrl.u32 %v11229_v57, 16 }
 0x49c   : > { %4778 = vmatpush1.bf16.msra.mxu1 %v8913_v8  ;;  %v12666_v8 = vshll.u32 %v11201_v63, 16 }
 0x49d   : > { %4779 = vmatprep.subr.bf16.mxu1 %v8918_v50  ;;  %v8924_v50 = vld [vmem:[#allocation5 + $0x1a4] ss:$8 sps:$4 sm:$0xff]   ;;  %v3043_v12 = vsub.f32 %v13011_v26, %v10843_v5  ;;  %v4299_v26 = vshll.u32 %v11229_v57, 16 }
 0x49e   : > { %v11341_v57 = vld [vmem:[#allocation2 + $0x38] sm:$0xff] }
 0x49f   : > { %4494 = vmatmul.mubr.bf16.gmra.mrb[36].mxu1 %v4249_v30  ;;  %v4293_v30 = vor.u32 %v4292_v36, %v4289_v20  ;;  %v13012_v20 = vld [vmem:[#allocation64_spill] sm:$0xff] }
 0x4a0   : > { %7966 = vmatprep.mubr.msk.bf16.mxu1 %vm2885_vm13, %v4276_v7  ;;  %4780 = vmatpush1.bf16.msra.mxu1 %v8916_v23  ;;  %v4283_v23 = vrot.slane %v12666_v8, 3  ;;  %v4267_v7 = vsel %vm13009_vm10, %v4248_v18, %v4266_v53  ;;  %v13013_v36 = vmax.f32 %v13012_v20, 0.0  ;;  %v3074_v8 = vmul.f32 %v10912_v31, %v3043_v12  ;;  %v11339_v12 = vld [vmem:[#allocation2 + $0x30] sm:$0xff] }
 0x4a1   : > { %4781 = vmatprep.subr.bf16.mxu1 %v8921_v52  ;;  %v8927_v52 = vld [vmem:[#allocation5 + $0x1b4] ss:$8 sps:$4 sm:$0xff]   ;;  %v4585_v20 = vshll.u32 %v10840_v19, 16 }
 0x4a2   : > { %v3044_v55 = vsub.f32 %v13013_v36, %v10843_v5  ;;  %v11322_v34 = vor.u32 %v4283_v23, %v4280_v49  ;;  %v8930_v5 = vld [vmem:[#allocation5 + $0x1c4] ss:$8 sps:$4 sm:$0xff]   ;;  %v3112_v1 = vmul.f32 %v10846_v44, %v3074_v8  ;;  %v11336_v49 = vor.u32 %v4310_v54, %v4307_v62  ;;  %v11344_v36 = vld [vmem:[#allocation2 + $0x40] sm:$0xff] }
 0x4a3   : > { %v4582_v23 = vshrl.u32 %v10840_v19, 16  ;;  %v4298_v8 = vrot.slane %v4296_v56, 2  ;;  %v11356_v19 = vld [vmem:[#allocation2 + $0x50] sm:$0xff]  ;;  %v11376_v56 = vcombine.low %v11339_v12, %v11341_v57  ;;  %v4587_v39 = vrot.slane %v4585_v20, 4 }
 0x4a4   : > { %4782 = vmatpush1.bf16.msra.mxu1 %v8919_v60  ;;  %v4294_v60 = vsel %vm13014_vm5, %v4275_v43, %v4293_v30  ;;  %v3075_v18 = vmul.f32 %v10912_v31, %v3044_v55  ;;  %v11328_v43 = vld [vmem:[#allocation2 + $0x18] sm:$0xff]  ;;  %v11346_v55 = vld [vmem:[#allocation2 + $0x48] sm:$0xff]  ;;  %v3150_v44 = vadd.f32 %v10852_v10, %v3112_v1  ;;  %v4285_v54 = vsel %vm13015_vm7, %v4266_v53, %v11322_v34  ;;  %v13016_v1 = vld [vmem:[#allocation51_spill] sm:$0xff] }
 0x4a5   : > { %4783 = vmatprep.subr.bf16.mxu1 %v8924_v50  ;;  %v8925_v50 = vld [vmem:[#allocation5 + $0x1b0] ss:$8 sps:$4 sm:$0xff]   ;;  %v5711_v28 = vshll.u32 %v11376_v56, 16  ;;  %vm13045_vm5 = vmmov %vm13024_vm4  ;;  %vm3278_vm7 = vcmask 1043458  }
 0x4a6   : > { %v3113_v31 = vmul.f32 %v10849_v15, %v3075_v18  ;;  %v11358_v18 = vld [vmem:[#allocation2 + $0x58] sm:$0xff] }
 0x4a7   : > { %4504 = vmatmul.mubr.bf16.gmra.mrb[40].mxu1 %v4267_v7  ;;  %v11326_v7 = vld [vmem:[#allocation2 + $0x10] sm:$0xff]  ;;  %v5713_v27 = vrot.slane %v5711_v28, 1 }
 0x4a8   : > { %7967 = vmatprep.mubr.msk.bf16.mxu1 %vm2885_vm13, %v4294_v60  ;;  %4784 = vmatpush1.bf16.msra.mxu1 %v8922_v48  ;;  %v11332_v48 = vld [vmem:[#allocation2 + $0x28] sm:$0xff]  ;;  %v3151_v15 = vadd.f32 %v10858_v21, %v3113_v31  ;;  %v11352_v62 = vcombine.low %v11326_v7, %v11328_v43  ;;  %v4301_v60 = vrot.slane %v4299_v26, 3  ;;  %v11364_v21 = vld [vmem:[#allocation2 + $0x60] sm:$0xff]  ;;  %v3176_v31 = vmul.f32 %v13016_v1, %v3150_v44 }
 0x4a9   : > { %4785 = vmatprep.subr.bf16.mxu1 %v8927_v52  ;;  %v8928_v52 = vld [vmem:[#allocation5 + $0x1c0] ss:$8 sps:$4 sm:$0xff]   ;;  %v11362_v10 = vcombine.low %v11330_v45, %v11332_v48  ;;  %v11372_v53 = vcombine.high %v11330_v45, %v11332_v48  ;;  %v4312_v26 = vsel %vm13018_vm3, %v4293_v30, %v11336_v49  ;;  %v11383_v44 = vcombine.high %v11339_v12, %v11341_v57  ;;  %v8931_v1 = vld [vmem:[#allocation5 + $0x1d0] ss:$8 sps:$4 sm:$0xff]  }
 0x4aa   : > { %v3177_v22 = vmul.f32 %v13017_v16, %v3151_v15  ;;  %v11387_v15 = vcombine.low %v11344_v36, %v11346_v55  ;;  %v4584_v16 = vrot.slane %v4582_v23, 3  ;;  %v11396_v30 = vcombine.low %v11356_v19, %v11358_v18 }
 0x4ab   : > { %v11402_v23 = vcombine.low %v11364_v21, %v11368_v11  ;;  %v5703_v29 = vshll.u32 %v11372_v53, 16  ;;  %v5688_v20 = vshll.u32 %v11352_v62, 16  ;;  %v5686_v38 = vshrl.u32 %v11352_v62, 16 }
 0x4ac   : > { %4786 = vmatpush1.bf16.msra.mxu1 %v8925_v50  ;;  %v8933_v50 = vld [vmem:[#allocation5 + $0x1d4] ss:$8 sps:$4 sm:$0xff]   ;;  %v8223_v40 = vpack.c.bf16 %v3177_v22, %v3176_v31  ;;  %v4302_v22 = vor.u32 %v4301_v60, %v4298_v8  ;;  %v5715_v60 = vshrl.u32 %v11372_v53, 16  ;;  %v5730_v47 = vshrl.u32 %v11383_v44, 16 }
 0x4ad   : > { %4787 = vmatprep.subr.bf16.mxu1 %v8930_v5  ;;  %v5693_v5 = vshll.u32 %v11362_v10, 16  ;;  %v11414_v8 = vrot.slane %v5703_v29, 1  ;;  %v5722_v29 = vshrl.u32 %v11376_v56, 16  ;;  %vm3279_vm3 = vcmask 261126  }
 0x4ae   : > { %3277 = vst.msk [vmem:[#allocation2 + $0x70] sm:$0x33] %vm10826_vm14, %v8223_v40  ;;  %vm13022_vm14 = vmmov %vm13008_vm0 }
 0x4af   : > { %4514 = vmatmul.mubr.bf16.gmra.mrb[44].mxu1 %v4285_v54  ;;  %v11392_v54 = vcombine.high %v11344_v36, %v11346_v55  ;;  %v5695_v17 = vrot.slane %v5693_v5, 1  ;;  %v5707_v5 = vshrl.u32 %v11362_v10, 16  ;;  %v4303_v61 = vsel %vm13022_vm14, %v11322_v34, %v4302_v22  ;;  %vm13041_vm0 = vmmov %vm13030_vm1 }
 0x4b0   : > { %7968 = vmatprep.mubr.msk.bf16.mxu1 %vm2885_vm13, %v4312_v26  ;;  %4788 = vmatpush1.bf16.msra.mxu1 %v8928_v52  ;;  %v13020_v52 = vshll.u32 %v11004_v24, 16  ;;  %v5690_v24 = vrot.slane %v5688_v20, 1  ;;  %v5717_v2 = vor.u32 %v5715_v60, %v11414_v8  ;;  %vm13044_vm10 = vmmov %vm13041_vm0 }
 0x4b1   : > { %4789 = vmatprep.subr.bf16.mxu1 %v8933_v50  ;;  %v5718_v50 = vshll.u32 %v11383_v44, 16  ;;  %v5733_v40 = vshll.u32 %v11392_v54, 16  ;;  %v5709_v26 = vor.u32 %v5707_v5, %v5695_v17  ;;  %v4570_v5 = vshrl.u32 %v10837_v3, 16  ;;  %vm3280_vm14 = vmor %vm3279_vm3, %vm3278_vm7 }
 0x4b2   : > { %v4590_v31 = vrot.slane %v13020_v52, 4  ;;  %v5691_v59 = vor.u32 %v5690_v24, %v5686_v38  ;;  %v5724_v38 = vor.u32 %v5722_v29, %v5713_v27  ;;  %v4588_v24 = vor.u32 %v4587_v39, %v4584_v16  ;;  %vm13071_vm3 = vmmov %vm13041_vm0 }
 0x4b3   : > { %v5720_v52 = vrot.slane %v5718_v50, 1  ;;  %v5735_v58 = vrot.slane %v5733_v40, 1  ;;  %v13031_v29 = vshrl.u32 %v11017_v14, 16  ;;  %v13032_v39 = vshll.u32 %v11017_v14, 16  ;;  %s12092_s30 = spop %8640 }
 0x4b4   : > { %4790 = vmatpush1.bf16.msra.mxu1 %v8931_v1  ;;  %v11424_v1 = vsel %vm13023_vm9, %v5709_v26, %v5713_v27  ;;  %v11430_v28 = vsel %vm13024_vm4, %v5691_v59, %v5695_v17  ;;  %v4591_v60 = vor.u32 %v4590_v31, %v4589_v35  ;;  %v13028_v59 = vshrl.u32 %v10999_v46, 16  ;;  %vm13047_vm9 = vmmov %vm13024_vm4 }
 0x4b5   : > { %5241 = vmatprep.subr.bf16.mxu1 %v8936_v9  ;;  %v5732_v20 = vor.u32 %v5730_v47, %v5720_v52  ;;  %v5726_v9 = vshll.u32 %v11387_v15, 16  ;;  %v11433_v34 = vsel %vm13025_vm15, %v5717_v2, %v5720_v52  ;;  %v4573_v47 = vshll.u32 %v10837_v3, 16  ;;  %vm13050_vm4 = vmmov %vm13041_vm0 }
 0x4b6   : > { %v4577_v2 = vrot.slane %v13028_v59, 3  ;;  %v13029_v27 = vshll.u32 %v10999_v46, 16  ;;  %v4592_v26 = vsel %vm13030_vm1, %v4588_v24, %v4591_v60  ;;  %v4598_v35 = vrot.slane %v13032_v39, 4  ;;  %v8940_v39 = vld [vmem:[#allocation5 + $0x200] ss:$8 sps:$4 sm:$0xff]   ;;  %vm13053_vm15 = vmmov %vm13045_vm5 }
 0x4b7   : > { %4524 = vmatmul.mubr.bf16.gmra.mrb[48].mxu1 %v4303_v61  ;;  %v11436_v50 = vsel %vm13026_vm11, %v5732_v20, %v5735_v58  ;;  %v5728_v61 = vrot.slane %v5726_v9, 1  ;;  %v4575_v17 = vrot.slane %v4573_v47, 4  ;;  %v4597_v20 = vrot.slane %v13031_v29, 3  ;;  %v8934_v9 = vld [vmem:[#allocation5 + $0x1e0] ss:$8 sps:$4 sm:$0xff]   ;;  %vm13054_vm11 = vmmov %vm13041_vm0 }
 0x4b8   : > { %7969 = vmatprep.mubr.msk.bf16.mxu1 %vm2885_vm13, %v11336_v49  ;;  %v4572_v49 = vrot.slane %v4570_v5, 3  ;;  %v4578_v52 = vrot.slane %v13029_v27, 4  ;;  %v13034_v46 = vshrl.u32 %v11021_v25, 16  ;;  %v13035_v47 = vshll.u32 %v11021_v25, 16  ;;  %v8942_v25 = vld [vmem:[#allocation5 + $0x204] ss:$8 sps:$4 sm:$0xff]   ;;  %vm13058_vm1 = vmmov %vm13041_vm0 }
 0x4b9   : > { %v11441_v40 = vsel %vm13027_vm6, %v5724_v38, %v5728_v61  ;;  %v4599_v31 = vor.u32 %v4598_v35, %v4597_v20  ;;  %v8939_v38 = vld [vmem:[#allocation5 + $0x1f4] ss:$8 sps:$4 sm:$0xff]   ;;  %v13037_v14 = vshrl.u32 %v11067_v32, 16  ;;  %vm13056_vm6 = vmmov %vm13045_vm5  ;;  %vm13070_vm7 = vsmask.f32 6400 }
 0x4ba   : > { %v4576_v16 = vor.u32 %v4575_v17, %v4572_v49  ;;  %v4579_v3 = vor.u32 %v4578_v52, %v4577_v2  ;;  %v4594_v24 = vrot.slane %v13035_v47, 4  ;;  %v13038_v49 = vshll.u32 %v11067_v32, 16  ;;  %v8937_v52 = vld [vmem:[#allocation5 + $0x1f0] ss:$8 sps:$4 sm:$0xff]  }
 0x4bb   : > { %v4600_v59 = vsel %vm13036_vm12, %v4591_v60, %v4599_v31  ;;  %v4605_v27 = vrot.slane %v13037_v14, 3  ;;  %v11465_v2 = vcombine.high %v11356_v19, %v11358_v18  ;;  %v5745_v60 = vshrl.u32 %v11392_v54, 16  ;;  %vm13062_vm12 = vmmov %vm13041_vm0 }
 0x4bc   : > { %v4580_v5 = vsel %vm13033_vm2, %v4576_v16, %v4579_v3  ;;  %v4606_v17 = vrot.slane %v13038_v49, 4  ;;  %v13039_v32 = vshrl.u32 %v11095_v33, 16  ;;  %v13040_v16 = vshll.u32 %v11095_v33, 16  ;;  %vm13061_vm2 = vmmov %vm13041_vm0 }
 0x4bd   : > { %v5748_v20 = vshll.u32 %v11465_v2, 16  ;;  %v11481_v14 = vcombine.high %v11364_v21, %v11368_v11  ;;  %v5737_v33 = vshrl.u32 %v11387_v15, 16 }
 0x4be   : > { %v4607_v29 = vor.u32 %v4606_v17, %v4605_v27  ;;  %v4601_v35 = vrot.slane %v13039_v32, 3 }
 0x4bf   : > { %4534 = vmatmul.mubr.bf16.gmra.mrb[56].mxu1 %v4302_v22  ;;  %v4593_v22 = vrot.slane %v13034_v46, 3  ;;  %v8945_v46 = vld [vmem:[#allocation5 + $0x214] ss:$8 sps:$4 sm:$0xff]   ;;  %v5750_v49 = vrot.slane %v5748_v20, 1  ;;  %v5763_v20 = vshll.u32 %v11481_v14, 16 }
 0x4c0   : > { %7992 = vmatprep.mubr.msk.bf16.mxu1 %vm2885_vm13, %v4592_v26  ;;  %v4608_v27 = vsel %vm13044_vm10, %v4599_v31, %v4607_v29  ;;  %v5760_v31 = vshrl.u32 %v11465_v2, 16  ;;  %vm13064_vm10 = vmmov %vm13045_vm5 }
 0x4c1   : > { %v4595_v26 = vor.u32 %v4594_v24, %v4593_v22  ;;  %v13042_v22 = vshrl.u32 %v11120_v41, 16  ;;  %v13043_v24 = vshll.u32 %v11120_v41, 16  ;;  %v5739_v41 = vor.u32 %v5737_v33, %v5728_v61 }
 0x4c2   : > { %v11494_v61 = vrot.slane %v5763_v20, 1  ;;  %v13055_v20 = vshll.u32 %v11198_v51, 16 }
 0x4c3   : > { %v4613_v47 = vrot.slane %v13042_v22, 3  ;;  %v8951_v22 = vld [vmem:[#allocation5 + $0x234] ss:$8 sps:$4 sm:$0xff]  }
 0x4c7   : > { %4804 = vmatmul.mubr.bf16.vlgmr.msra.gmra.mrb[28].mxu1 %v4580_v5  ;;  %v4602_v5 = vrot.slane %v13040_v16, 4  ;;  %v5752_v16 = vshrl.u32 %v11396_v30, 16 }
 0x4c8   : > { %7993 = vmatprep.mubr.msk.bf16.mxu1 %vm2885_vm13, %v4600_v59  ;;  %5242 = vmatpush1.bf16.msra.mxu1 %v8934_v9  ;;  %v5747_v9 = vor.u32 %v5745_v60, %v5735_v58  ;;  %v4614_v59 = vrot.slane %v13043_v24, 4  ;;  %v8943_v58 = vld [vmem:[#allocation5 + $0x210] ss:$8 sps:$4 sm:$0xff]  }
 0x4c9   : > { %5243 = vmatprep.subr.bf16.mxu1 %v8939_v38  ;;  %v4596_v38 = vsel %vm13041_vm0, %v4579_v3, %v4595_v26  ;;  %v8948_v3 = vld [vmem:[#allocation5 + $0x224] ss:$8 sps:$4 sm:$0xff]  }
 0x4ca   : > { %v11487_v17 = vsel %vm13045_vm5, %v5747_v9, %v5750_v49  ;;  %v4615_v60 = vor.u32 %v4614_v59, %v4613_v47  ;;  %v4542_v9 = vld [vmem:[#allocation2 + $0x68] sm:$0x33]  ;;  %vm13066_vm5 = vmmov %vm13041_vm0 }
 0x4cc   : > { %5244 = vmatpush1.bf16.msra.mxu1 %v8937_v52  ;;  %v5741_v52 = vshll.u32 %v11396_v30, 16 }
 0x4cd   : > { %5245 = vmatprep.subr.bf16.mxu1 %v8942_v25  ;;  %v4603_v25 = vor.u32 %v4602_v5, %v4601_v35  ;;  %v13046_v35 = vshrl.u32 %v11129_v0, 16 }
 0x4ce   : > { %v5743_v32 = vrot.slane %v5741_v52, 1  ;;  %v13052_v52 = vshrl.u32 %v11198_v51, 16 }
 0x4cf   : > { %4814 = vmatmul.mubr.bf16.gmra.mrb[32].mxu1 %v4596_v38  ;;  %v5762_v38 = vor.u32 %v5760_v31, %v5750_v49  ;;  %v4609_v5 = vrot.slane %v13046_v35, 3  ;;  %v4604_v33 = vsel %vm13050_vm4, %v4595_v26, %v4603_v25  ;;  %v13051_v49 = vshll.u32 %v11129_v0, 16  ;;  %v8949_v0 = vld [vmem:[#allocation5 + $0x230] ss:$8 sps:$4 sm:$0xff]   ;;  %vm13074_vm4 = vmmov %vm13041_vm0 }
 0x4d0   : > { %7994 = vmatprep.mubr.msk.bf16.mxu1 %vm2885_vm13, %v4608_v27  ;;  %5246 = vmatpush1.bf16.msra.mxu1 %v8940_v39  ;;  %v5756_v39 = vshll.u32 %v11402_v23, 16  ;;  %v11499_v47 = vsel %vm13047_vm9, %v5739_v41, %v5743_v32  ;;  %v5754_v24 = vor.u32 %v5752_v16, %v5743_v32  ;;  %v13049_v27 = vmov 0   ;;  %vm13073_vm9 = vmmov %vm13041_vm0 }
 0x4d1   : > { %5247 = vmatprep.subr.bf16.mxu1 %v8945_v46  ;;  %v8946_v46 = vld [vmem:[#allocation5 + $0x220] ss:$8 sps:$4 sm:$0xff]   ;;  %3281 = vst.msk [vmem:[#allocation2 + $0x70] sm:$0xcc] %vm3280_vm14, %v13049_v27  ;;  %v11511_v31 = vsel %vm13053_vm15, %v5762_v38, %v11494_v61  ;;  %v4616_v41 = vsel %vm13054_vm11, %v4607_v29, %v4615_v60  ;;  %v4622_v32 = vrot.slane %v13055_v20, 4  ;;  %v7971_v16 = vcombine.high %v11222_v4, %v4542_v9  ;;  %vm13072_vm14 = vmmov %vm13041_vm0 }
 0x4d2   : > { %v11501_v59 = vrot.slane %v5756_v39, 1  ;;  %v8955_v39 = vld [vmem:[#allocation5 + $0x244] ss:$8 sps:$4 sm:$0xff]   ;;  %v11524_v38 = vcombine.low %v11358_v18, %v11364_v21  ;;  %v13060_v20 = vshll.u32 %v11201_v63, 16  ;;  %vm13075_vm15 = vmmov %vm13041_vm0 }
 0x4d3   : > { %v4635_v51 = vshrl.u32 %v7971_v16, 16  ;;  %v4638_v27 = vshll.u32 %v7971_v16, 16  ;;  %vm13076_vm11 = vmmov %vm13041_vm0 }
 0x4d4   : > { %5248 = vmatpush1.bf16.msra.mxu1 %v8943_v58  ;;  %13048 = vst [vmem:[#allocation41_spill] sm:$0xff] %v11501_v59  ;;  %v4610_v58 = vrot.slane %v13051_v49, 4  ;;  %v11519_v26 = vsel %vm13056_vm6, %v5754_v24, %v11501_v59  ;;  %13057 = vst [vmem:[#allocation42_spill] sm:$0xff] %v11524_v38  ;;  %v7970_v24 = vcombine.low %v11222_v4, %v4542_v9  ;;  %v8959_v49 = vld [vmem:[#allocation5 + $0x254] ss:$8 sps:$4 sm:$0xff]  }
 0x4d5   : > { %5249 = vmatprep.subr.bf16.mxu1 %v8948_v3  ;;  %v4621_v3 = vrot.slane %v13052_v52, 3  ;;  %v11528_v52 = vshll.u32 %v11524_v38, 16  ;;  %v8957_v4 = vld [vmem:[#allocation5 + $0x250] ss:$8 sps:$4 sm:$0xff]   ;;  %vm13077_vm6 = vmmov %vm13041_vm0 }
 0x4d6   : > { %v4611_v29 = vor.u32 %v4610_v58, %v4609_v5  ;;  %v4618_v5 = vrot.slane %v13060_v20, 4  ;;  %v4626_v9 = vshrl.u32 %v7970_v24, 16 }
 0x4d7   : > { %4824 = vmatmul.mubr.bf16.gmra.mrb[36].mxu1 %v4604_v33  ;;  %v4623_v35 = vor.u32 %v4622_v32, %v4621_v3  ;;  %v8953_v33 = vld [vmem:[#allocation5 + $0x240] ss:$8 sps:$4 sm:$0xff]   ;;  %v4637_v3 = vrot.slane %v4635_v51, 3  ;;  %v4640_v32 = vrot.slane %v4638_v27, 4  ;;  %v4898_v51 = vld [vmem:[#allocation2 + $0x8] sm:$0x88] }
 0x4d8   : > { %7995 = vmatprep.mubr.msk.bf16.mxu1 %vm2885_vm13, %v4616_v41  ;;  %5250 = vmatpush1.bf16.msra.mxu1 %v8946_v46  ;;  %v4612_v46 = vsel %vm13058_vm1, %v4603_v25, %v4611_v29  ;;  %v6055_v16 = vld [vmem:[#allocation2 + $0x70] sm:$0xff]  ;;  %vm13078_vm1 = vmmov %vm13041_vm0 }
 0x4d9   : > { %5251 = vmatprep.subr.bf16.mxu1 %v8951_v22  ;;  %v13059_v22 = vshrl.u32 %v11201_v63, 16  ;;  %v4624_v58 = vsel %vm13061_vm2, %v4615_v60, %v4623_v35  ;;  %v8962_v25 = vld [vmem:[#allocation5 + $0x264] ss:$8 sps:$4 sm:$0xff]   ;;  %v11539_v63 = vshrl.u32 %v11524_v38, 16  ;;  %v4641_v60 = vor.u32 %v4640_v32, %v4637_v3  ;;  %v8960_v27 = vld [vmem:[#allocation5 + $0x260] ss:$8 sps:$4 sm:$0xff]   ;;  %vm13079_vm2 = vmmov %vm13041_vm0 }
 0x4da   : > { %v8002_v32 = vcombine.high %v11328_v43, %v11330_v45 }
 0x4db   : > { %v4617_v41 = vrot.slane %v13059_v22, 3  ;;  %v4642_v3 = vsel %vm13041_vm0, %v4623_v35, %v4641_v60  ;;  %v6872_v35 = vrot.slane %v11528_v52, 2  ;;  %v6871_v6 = vrot.slane %v11539_v63, 1 }
 0x4dc   : > { %5252 = vmatpush1.bf16.msra.mxu1 %v8949_v0  ;;  %v4629_v0 = vshll.u32 %v7970_v24, 16  ;;  %v5015_v37 = vshrl.u32 %v8002_v32, 16 }
 0x4dd   : > { %5253 = vmatprep.subr.bf16.mxu1 %v8955_v39  ;;  %v12700_v39 = vrot.slane %v11528_v52, 1  ;;  %v4619_v22 = vor.u32 %v4618_v5, %v4617_v41  ;;  %v8968_v41 = vld [vmem:[#allocation5 + $0x274] ss:$8 sps:$4 sm:$0xff]  }
 0x4de   : > { %v4631_v20 = vrot.slane %v4629_v0, 4 }
 0x4df   : > { %4834 = vmatmul.mubr.bf16.gmra.mrb[40].mxu1 %v4612_v46  ;;  %v11542_v46 = vcombine.low %v11368_v11, %v6055_v16  ;;  %v4620_v5 = vsel %vm13062_vm12, %v4611_v29, %v4619_v22  ;;  %vm13080_vm12 = vmmov %vm13041_vm0 }
 0x4e0   : > { %7996 = vmatprep.mubr.msk.bf16.mxu1 %vm2885_vm13, %v4624_v58  ;;  %5254 = vmatpush1.bf16.msra.mxu1 %v8953_v33  ;;  %v6205_v33 = vor.u32 %v12700_v39, %v11539_v63  ;;  %v8000_v58 = vcombine.high %v4898_v51, %v11326_v7 }
 0x4e1   : > { %5255 = vmatprep.subr.bf16.mxu1 %v8959_v49  ;;  %v6207_v24 = vshll.u32 %v11542_v46, 16  ;;  %v4628_v49 = vrot.slane %v4626_v9, 3  ;;  %v8966_v9 = vld [vmem:[#allocation5 + $0x270] ss:$8 sps:$4 sm:$0xff]  }
 0x4e2   : > { %v5010_v39 = vshll.u32 %v8000_v58, 16 }
 0x4e3   : > { %v11550_v38 = vrot.slane %v6207_v24, 1  ;;  %v4632_v0 = vor.u32 %v4631_v20, %v4628_v49  ;;  %v7999_v49 = vcombine.low %v4898_v51, %v11326_v7 }
 0x4e4   : > { %5256 = vmatpush1.bf16.msra.mxu1 %v8957_v4  ;;  %v11556_v4 = vcombine.high %v11368_v11, %v6055_v16  ;;  %v5018_v16 = vshll.u32 %v8002_v32, 16  ;;  %v5017_v32 = vrot.slane %v5015_v37, 3 }
 0x4e5   : > { %5257 = vmatprep.subr.bf16.mxu1 %v8962_v25  ;;  %13063 = vst [vmem:[#allocation44_spill] sm:$0xff] %v11550_v38  ;;  %v11561_v29 = vsel %vm13064_vm10, %v6205_v33, %v11550_v38  ;;  %v8972_v25 = vld [vmem:[#allocation5 + $0x284] ss:$8 sps:$4 sm:$0xff]   ;;  %v4633_v33 = vsel %vm13066_vm5, %v4619_v22, %v4632_v0  ;;  %v11572_v38 = vor.u32 %v6872_v35, %v6871_v6  ;;  %v4993_v6 = vshll.u32 %v7999_v49, 16  ;;  %vm13081_vm10 = vmmov %vm13041_vm0 }
 0x4e6   : > { %13065 = vst [vmem:[#allocation46_spill] sm:$0xff] %v11561_v29  ;;  %v5020_v42 = vrot.slane %v5018_v16, 4  ;;  %v13068_v22 = vshll.u32 %v11556_v4, 16  ;;  %vm13082_vm5 = vsmask.f32 7424 }
 0x4e7   : > { %4844 = vmatmul.mubr.bf16.gmra.mrb[44].mxu1 %v4620_v5  ;;  %v5007_v5 = vshrl.u32 %v8000_v58, 16  ;;  %v8001_v58 = vcombine.low %v11328_v43, %v11330_v45  ;;  %v4990_v45 = vshrl.u32 %v7999_v49, 16 }
 0x4e8   : > { %7997 = vmatprep.mubr.msk.bf16.mxu1 %vm2885_vm13, %v4642_v3  ;;  %5258 = vmatpush1.bf16.msra.mxu1 %v8960_v27  ;;  %v13067_v3 = vshrl.u32 %v11556_v4, 16  ;;  %v6884_v51 = vrot.slane %v13068_v22, 2  ;;  %v5021_v29 = vor.u32 %v5020_v42, %v5017_v32  ;;  %v8006_v32 = vcombine.high %v11341_v57, %v11344_v36 }
 0x4e9   : > { %5259 = vmatprep.subr.bf16.mxu1 %v8968_v41  ;;  %v5009_v20 = vrot.slane %v5007_v5, 3  ;;  %v5012_v41 = vrot.slane %v5010_v39, 4  ;;  %v13069_v39 = vshrl.u32 %v11542_v46, 16  ;;  %v6880_v5 = vrot.slane %v6207_v24, 2 }
 0x4ea   : > { %v6883_v27 = vrot.slane %v13067_v3, 1  ;;  %v4998_v37 = vshrl.u32 %v8001_v58, 16  ;;  %v5001_v16 = vshll.u32 %v8001_v58, 16  ;;  %v4992_v49 = vrot.slane %v4990_v45, 3 }
 0x4eb   : > { %v5013_v35 = vor.u32 %v5012_v41, %v5009_v20  ;;  %v4995_v24 = vrot.slane %v4993_v6, 4  ;;  %v5054_v45 = vshll.u32 %v8006_v32, 16  ;;  %v8970_v6 = vld [vmem:[#allocation5 + $0x280] ss:$8 sps:$4 sm:$0xff]  }
 0x4ec   : > { %5260 = vmatpush1.bf16.msra.mxu1 %v8966_v9  ;;  %v8004_v9 = vcombine.high %v11332_v48, %v11339_v12  ;;  %v5000_v20 = vrot.slane %v4998_v37, 3  ;;  %v5003_v41 = vrot.slane %v5001_v16, 4 }
 0x4ed   : > { %5531 = vmatprep.subr.bf16.mxu1 %v8972_v25  ;;  %v6879_v25 = vrot.slane %v13069_v39, 1 }
 0x4ee   : > { %v5033_v13 = vshrl.u32 %v8004_v9, 16  ;;  %v5036_v59 = vshll.u32 %v8004_v9, 16 }
 0x4ef   : > { %4854 = vmatmul.mubr.bf16.gmra.mrb[48].mxu1 %v4633_v33  ;;  %v11583_v33 = vor.u32 %v6884_v51, %v6883_v27  ;;  %v11585_v3 = vor.u32 %v6880_v5, %v6879_v25  ;;  %v5022_v27 = vsel %vm13071_vm3, %v5013_v35, %v5021_v29  ;;  %v5051_v25 = vshrl.u32 %v8006_v32, 16  ;;  %v8976_v5 = vld [vmem:[#allocation5 + $0x294] ss:$8 sps:$4 sm:$0xff]   ;;  %vm13085_vm3 = vmmov %vm13082_vm5 }
 0x4f0   : > { %7998 = vmatprep.mubr.msk.bf16.mxu1 %vm2885_vm13, %v4641_v60  ;;  %v8003_v60 = vcombine.low %v11332_v48, %v11339_v12  ;;  %v5035_v42 = vrot.slane %v5033_v13, 3  ;;  %v5038_v58 = vrot.slane %v5036_v59, 4  ;;  %v4996_v48 = vor.u32 %v4995_v24, %v4992_v49  ;;  %v8974_v24 = vld [vmem:[#allocation5 + $0x290] ss:$8 sps:$4 sm:$0xff]  }
 0x4f1   : > { %v11592_v22 = vsel %vm13070_vm7, %v11572_v38, %v11585_v3  ;;  %v5004_v12 = vor.u32 %v5003_v41, %v5000_v20  ;;  %v8005_v13 = vcombine.low %v11341_v57, %v11344_v36  ;;  %v5053_v16 = vrot.slane %v5051_v25, 3  ;;  %v8981_v20 = vld [vmem:[#allocation5 + $0x2a4] ss:$8 sps:$4 sm:$0xff]   ;;  %v8979_v36 = vld [vmem:[#allocation5 + $0x2a0] ss:$8 sps:$4 sm:$0xff]   ;;  %vm13083_vm7 = vmmov %vm13082_vm5 }
 0x4f2   : > { %v5024_v9 = vshrl.u32 %v8003_v60, 16  ;;  %v5027_v51 = vshll.u32 %v8003_v60, 16  ;;  %v5039_v39 = vor.u32 %v5038_v58, %v5035_v42  ;;  %v5056_v49 = vrot.slane %v5054_v45, 4 }
 0x4f3   : > { %v8008_v60 = vcombine.high %v11346_v55, %v11356_v19  ;;  %v5045_v42 = vshll.u32 %v8005_v13, 16  ;;  %v8007_v25 = vcombine.low %v11346_v55, %v11356_v19 }
 0x4f4   : > { %v5026_v37 = vrot.slane %v5024_v9, 3  ;;  %v5029_v35 = vrot.slane %v5027_v51, 4  ;;  %v5040_v59 = vsel %vm13073_vm9, %v5021_v29, %v5039_v39  ;;  %v5057_v58 = vor.u32 %v5056_v49, %v5053_v16  ;;  %v8986_v29 = vld [vmem:[#allocation5 + $0x2b4] ss:$8 sps:$4 sm:$0xff]   ;;  %vm13094_vm9 = vmmov %vm13085_vm3 }
 0x4f5   : > { %v5069_v32 = vshrl.u32 %v8008_v60, 16  ;;  %v5072_v57 = vshll.u32 %v8008_v60, 16  ;;  %v5047_v51 = vrot.slane %v5045_v42, 4 }
 0x4f6   : > { %v5030_v41 = vor.u32 %v5029_v35, %v5026_v37  ;;  %v5058_v45 = vsel %vm13075_vm15, %v5039_v39, %v5057_v58  ;;  %v8984_v37 = vld [vmem:[#allocation5 + $0x2b0] ss:$8 sps:$4 sm:$0xff]   ;;  %v8987_v39 = vld [vmem:[#allocation5 + $0x2c0] ss:$8 sps:$4 sm:$0xff]   ;;  %vm13102_vm15 = vmmov %vm13085_vm3 }
 0x4f7   : > { %4864 = vmatmul.mubr.bf16.gmra.mrb[60].mxu1 %v4632_v0  ;;  %v5005_v0 = vsel %vm13072_vm14, %v4996_v48, %v5004_v12  ;;  %vm13088_vm14 = vmmov %vm13085_vm3 }
 0x4f8   : > { %8033 = vmatprep.mubr.msk.bf16.mxu1 %vm2885_vm13, %v5022_v27  ;;  %v5042_v27 = vshrl.u32 %v8005_v13, 16  ;;  %v5031_v48 = vsel %vm13074_vm4, %v5004_v12, %v5030_v41  ;;  %v8989_v12 = vld [vmem:[#allocation5 + $0x2c4] ss:$8 sps:$4 sm:$0xff]   ;;  %v5060_v13 = vshrl.u32 %v8007_v25, 16  ;;  %vm13095_vm4 = vmmov %vm13085_vm3 }
 0x4fa   : > { %v5044_v9 = vrot.slane %v5042_v27, 3  ;;  %v5062_v60 = vrot.slane %v5060_v13, 3 }
 0x4fc   : > { %v5048_v35 = vor.u32 %v5047_v51, %v5044_v9  ;;  %v8997_v51 = vld [vmem:[#allocation5 + $0x2e0] ss:$8 sps:$4 sm:$0xff]  }
 0x4fe   : > { %v5049_v49 = vsel %vm13076_vm11, %v5030_v41, %v5048_v35  ;;  %vm13103_vm11 = vmmov %vm13085_vm3 }
 0x4ff   : > { %5274 = vmatmul.mubr.bf16.vlgmr.msra.gmra.mrb[28].mxu1 %v5005_v0  ;;  %v11611_v0 = vcombine.high %v11358_v18, %v11364_v21  ;;  %v11620_v18 = vld [vmem:[#allocation2 + $0x70] sm:$0x33]  ;;  %v8994_v21 = vld [vmem:[#allocation5 + $0x2d4] ss:$8 sps:$4 sm:$0xff]  }
 0x500   : > { %8034 = vmatprep.mubr.msk.bf16.mxu1 %vm2885_vm13, %v5040_v59  ;;  %5532 = vmatpush1.bf16.msra.mxu1 %v8970_v6  ;;  %v5071_v6 = vrot.slane %v5069_v32, 3  ;;  %v5063_v59 = vshll.u32 %v8007_v25, 16  ;;  %v8012_v32 = vcombine.high %v11368_v11, %v11620_v18 }
 0x501   : > { %5533 = vmatprep.subr.bf16.mxu1 %v8976_v5  ;;  %v5074_v5 = vrot.slane %v5072_v57, 4  ;;  %v11615_v55 = vshrl.u32 %v11611_v0, 16  ;;  %v11618_v19 = vshll.u32 %v11611_v0, 16  ;;  %v8992_v57 = vld [vmem:[#allocation5 + $0x2d0] ss:$8 sps:$4 sm:$0xff]  }
 0x502   : > { %v5108_v9 = vshll.u32 %v8012_v32, 16 }
 0x503   : > { %v5075_v16 = vor.u32 %v5074_v5, %v5071_v6  ;;  %v5089_v27 = vrot.slane %v11615_v55, 3  ;;  %v5092_v42 = vrot.slane %v11618_v19, 4  ;;  %v5083_v6 = vrot.slane %v11528_v52, 4 }
 0x504   : > { %5534 = vmatpush1.bf16.msra.mxu1 %v8974_v24  ;;  %v5065_v24 = vrot.slane %v5063_v59, 4  ;;  %v8011_v5 = vcombine.low %v11368_v11, %v11620_v18  ;;  %v5110_v13 = vrot.slane %v5108_v9, 4  ;;  %v9001_v59 = vld [vmem:[#allocation5 + $0x2f0] ss:$8 sps:$4 sm:$0xff]   ;;  %v9015_v9 = vld [vmem:[#allocation5 + $0x334] ss:$8 sps:$4 sm:$0xff]  }
 0x505   : > { %5535 = vmatprep.subr.bf16.mxu1 %v8981_v20  ;;  %v5076_v20 = vsel %vm13077_vm6, %v5057_v58, %v5075_v16  ;;  %v5093_v41 = vor.u32 %v5092_v42, %v5089_v27  ;;  %v9003_v58 = vld [vmem:[#allocation5 + $0x2f4] ss:$8 sps:$4 sm:$0xff]   ;;  %v9007_v42 = vld [vmem:[#allocation5 + $0x310] ss:$8 sps:$4 sm:$0xff]   ;;  %vm13108_vm6 = vmmov %vm13085_vm3 }
 0x507   : > { %5284 = vmatmul.mubr.bf16.gmra.mrb[32].mxu1 %v5031_v48  ;;  %v5105_v48 = vshrl.u32 %v8012_v32, 16  ;;  %v9012_v32 = vld [vmem:[#allocation5 + $0x324] ss:$8 sps:$4 sm:$0xff]  }
 0x508   : > { %8035 = vmatprep.mubr.msk.bf16.mxu1 %vm2885_vm13, %v5058_v45  ;;  %5536 = vmatpush1.bf16.msra.mxu1 %v8979_v36  ;;  %v8999_v36 = vld [vmem:[#allocation5 + $0x2e4] ss:$8 sps:$4 sm:$0xff]   ;;  %v5080_v45 = vrot.slane %v11539_v63, 3 }
 0x509   : > { %5537 = vmatprep.subr.bf16.mxu1 %v8986_v29  ;;  %v5066_v29 = vor.u32 %v5065_v24, %v5062_v60  ;;  %v9004_v60 = vld [vmem:[#allocation5 + $0x300] ss:$8 sps:$4 sm:$0xff]   ;;  %v9009_v24 = vld [vmem:[#allocation5 + $0x314] ss:$8 sps:$4 sm:$0xff]  }
 0x50b   : > { %v5067_v25 = vsel %vm13078_vm1, %v5048_v35, %v5066_v29  ;;  %v5096_v35 = vshrl.u32 %v8011_v5, 16  ;;  %vm13109_vm1 = vmmov %vm13085_vm3 }
 0x50c   : > { %5538 = vmatpush1.bf16.msra.mxu1 %v8984_v37  ;;  %v5094_v37 = vsel %vm13079_vm2, %v5075_v16, %v5093_v41  ;;  %vm13113_vm2 = vmmov %vm13109_vm1 }
 0x50d   : > { %5539 = vmatprep.subr.bf16.mxu1 %v8989_v12  ;;  %v5107_v12 = vrot.slane %v5105_v48, 3 }
 0x50f   : > { %5294 = vmatmul.mubr.bf16.gmra.mrb[36].mxu1 %v5049_v49  ;;  %v5099_v49 = vshll.u32 %v8011_v5, 16  ;;  %v5111_v63 = vor.u32 %v5110_v13, %v5107_v12  ;;  %v9021_v5 = vld [vmem:[#allocation5 + $0x354] ss:$8 sps:$4 sm:$0xff]   ;;  %v9024_v13 = vld [vmem:[#allocation5 + $0x364] ss:$8 sps:$4 sm:$0xff]  }
 0x510   : > { %8036 = vmatprep.mubr.msk.bf16.mxu1 %vm2885_vm13, %v5076_v20  ;;  %5540 = vmatpush1.bf16.msra.mxu1 %v8987_v39  ;;  %v9006_v39 = vld [vmem:[#allocation5 + $0x304] ss:$8 sps:$4 sm:$0xff]   ;;  %v5098_v20 = vrot.slane %v5096_v35, 3 }
 0x511   : > { %5541 = vmatprep.subr.bf16.mxu1 %v8994_v21  ;;  %v5084_v21 = vor.u32 %v5083_v6, %v5080_v45  ;;  %v5101_v16 = vrot.slane %v5099_v49, 4  ;;  %v5112_v27 = vsel %vm13041_vm0, %v5093_v41, %v5111_v63  ;;  %v9010_v41 = vld [vmem:[#allocation5 + $0x320] ss:$8 sps:$4 sm:$0xff]   ;;  %vm13117_vm0 = vmmov %vm13109_vm1 }
 0x512   : > { %v9016_v45 = vld [vmem:[#allocation5 + $0x340] ss:$8 sps:$4 sm:$0xff]  }
 0x513   : > { %v5085_v11 = vsel %vm13080_vm12, %v5066_v29, %v5084_v21  ;;  %v11643_v29 = vcombine.high %v11326_v7, %v11328_v43  ;;  %v9013_v7 = vld [vmem:[#allocation5 + $0x330] ss:$8 sps:$4 sm:$0xff]   ;;  %v9018_v43 = vld [vmem:[#allocation5 + $0x344] ss:$8 sps:$4 sm:$0xff]   ;;  %vm13114_vm12 = vmmov %vm13109_vm1 }
 0x514   : > { %5542 = vmatpush1.bf16.msra.mxu1 %v8992_v57  ;;  %v5102_v57 = vor.u32 %v5101_v16, %v5098_v20  ;;  %v9035_v20 = vld [vmem:[#allocation5 + $0x3a0] ss:$8 sps:$4 sm:$0xff]   ;;  %v9039_v16 = vld [vmem:[#allocation5 + $0x3b0] ss:$8 sps:$4 sm:$0xff]  }
 0x515   : > { %5543 = vmatprep.subr.bf16.mxu1 %v8999_v36 }
 0x516   : > { %v5103_v36 = vsel %vm13081_vm10, %v5084_v21, %v5102_v57  ;;  %v9027_v21 = vld [vmem:[#allocation5 + $0x374] ss:$8 sps:$4 sm:$0xff]   ;;  %vm13120_vm10 = vmmov %vm13117_vm0 }
 0x517   : > { %5304 = vmatmul.mubr.bf16.gmra.mrb[40].mxu1 %v5067_v25 }
 0x518   : > { %8037 = vmatprep.mubr.msk.bf16.mxu1 %vm2885_vm13, %v5094_v37  ;;  %5544 = vmatpush1.bf16.msra.mxu1 %v8997_v51 }
 0x519   : > { %5545 = vmatprep.subr.bf16.mxu1 %v9003_v58 }
 0x51c   : > { %5546 = vmatpush1.bf16.msra.mxu1 %v9001_v59  ;;  %v9022_v59 = vld [vmem:[#allocation5 + $0x360] ss:$8 sps:$4 sm:$0xff]  }
 0x51d   : > { %5547 = vmatprep.subr.bf16.mxu1 %v9006_v39 }
 0x51f   : > { %5314 = vmatmul.mubr.bf16.gmra.mrb[44].mxu1 %v5085_v11  ;;  %v9037_v11 = vld [vmem:[#allocation5 + $0x3a4] ss:$8 sps:$4 sm:$0xff]  }
 0x520   : > { %8038 = vmatprep.mubr.msk.bf16.mxu1 %vm2885_vm13, %v5112_v27  ;;  %5548 = vmatpush1.bf16.msra.mxu1 %v9004_v60  ;;  %v9028_v60 = vld [vmem:[#allocation5 + $0x380] ss:$8 sps:$4 sm:$0xff]  }
 0x521   : > { %5549 = vmatprep.subr.bf16.mxu1 %v9009_v24  ;;  %v9033_v24 = vld [vmem:[#allocation5 + $0x394] ss:$8 sps:$4 sm:$0xff]  }
 0x524   : > { %5550 = vmatpush1.bf16.msra.mxu1 %v9007_v42  ;;  %v5699_v42 = vshll.u32 %v11643_v29, 16 }
 0x525   : > { %5917 = vmatprep.subr.bf16.mxu1 %v9012_v32 }
 0x527   : > { %5324 = vmatmul.mubr.bf16.gmra.mrb[48].mxu1 %v5103_v36  ;;  %v5701_v36 = vrot.slane %v5699_v42, 1  ;;  %v9115_v42 = vld [vmem:[#allocation2 + $0x18] sm:$0xff] }
 0x528   : > { %8039 = vmatprep.mubr.msk.bf16.mxu1 %vm2885_vm13, %v5111_v63  ;;  %v9030_v63 = vld [vmem:[#allocation5 + $0x384] ss:$8 sps:$4 sm:$0xff]  }
 0x52f   : > { %5334 = vmatmul.mubr.bf16.gmra.mrb[64].mxu1 %v5102_v57 }
 0x530   : > { %8074 = vmatprep.mubr.msk.bf16.mxu1 %vm2885_vm13, %v11643_v29 }
 0x533   : > { %v11647_v48 = vpop.f32.mrb[60].mxu0 }
 0x534   : > { %v11649_v51 = vpop.f32.mrb[61].mxu0 }
 0x535   : > { %v11651_v58 = vpop.f32.mrb[62].mxu0 }
 0x536   : > { %v11654_v25 = vpop.f32.mrb[63].mxu0 }
 0x537   : > { %5564 = vmatmul.mubr.bf16.vlgmr.msra.gmra.mrb[28].mxu1 %v11352_v62 }
 0x538   : > { %8075 = vmatprep.mubr.msk.bf16.mxu1 %vm2885_vm13, %v11372_v53  ;;  %5918 = vmatpush1.bf16.msra.mxu1 %v9010_v41  ;;  %v9019_v53 = vld [vmem:[#allocation5 + $0x350] ss:$8 sps:$4 sm:$0xff]   ;;  %v5697_v41 = vshrl.u32 %v11643_v29, 16  ;;  %v9050_v29 = vld [vmem:[#allocation5 + $0x3e4] ss:$8 sps:$4 sm:$0xff]  }
 0x539   : > { %5919 = vmatprep.subr.bf16.mxu1 %v9015_v9 }
 0x53a   : > { %v5702_v9 = vor.u32 %v5701_v36, %v5697_v41  ;;  %v13084_v41 = vld [vmem:[#allocation41_spill] sm:$0xff] }
 0x53b   : > { %v11658_v6 = vpop.f32.mrb[64].mxu0 }
 0x53c   : > { %5920 = vmatpush1.bf16.msra.mxu1 %v9013_v7  ;;  %v11660_v37 = vpop.f32.mrb[65].mxu0  ;;  %v8052_v7 = vcombine.low %v11620_v18, %v11620_v18 }
 0x53d   : > { %5921 = vmatprep.subr.bf16.mxu1 %v9018_v43  ;;  %v11662_v12 = vpop.f32.mrb[66].mxu0  ;;  %v5706_v43 = vsel %vm13082_vm5, %v5702_v9, %v11414_v8  ;;  %v9051_v8 = vld [vmem:[#allocation5 + $0x3f0] ss:$8 sps:$4 sm:$0xff]   ;;  %vm13122_vm5 = vcmask 1046528  }
 0x53e   : > { %v11665_v62 = vpop.f32.mrb[67].mxu0 }
 0x53f   : > { %5574 = vmatmul.mubr.bf16.gmra.mrb[32].mxu1 %v11362_v10 }
 0x540   : > { %8076 = vmatprep.mubr.msk.bf16.mxu1 %vm2885_vm13, %v11383_v44  ;;  %5922 = vmatpush1.bf16.msra.mxu1 %v9016_v45  ;;  %v9025_v44 = vld [vmem:[#allocation5 + $0x370] ss:$8 sps:$4 sm:$0xff]   ;;  %v9042_v45 = vld [vmem:[#allocation5 + $0x3c0] ss:$8 sps:$4 sm:$0xff]  }
 0x541   : > { %5923 = vmatprep.subr.bf16.mxu1 %v9021_v5  ;;  %v9047_v5 = vld [vmem:[#allocation5 + $0x3d4] ss:$8 sps:$4 sm:$0xff]  }
 0x543   : > { %v11669_v39 = vpop.f32.mrb[68].mxu0 }
 0x544   : > { %5924 = vmatpush1.bf16.msra.mxu1 %v9019_v53  ;;  %v11671_v35 = vpop.f32.mrb[69].mxu0  ;;  %v9045_v53 = vld [vmem:[#allocation5 + $0x3d0] ss:$8 sps:$4 sm:$0xff]  }
 0x545   : > { %5925 = vmatprep.subr.bf16.mxu1 %v9024_v13  ;;  %v11673_v49 = vpop.f32.mrb[70].mxu0  ;;  %v9048_v13 = vld [vmem:[#allocation5 + $0x3e0] ss:$8 sps:$4 sm:$0xff]  }
 0x546   : > { %v11676_v10 = vpop.f32.mrb[71].mxu0 }
 0x547   : > { %5584 = vmatmul.mubr.bf16.gmra.mrb[36].mxu1 %v11376_v56  ;;  %v9031_v56 = vld [vmem:[#allocation5 + $0x390] ss:$8 sps:$4 sm:$0xff]  }
 0x548   : > { %8077 = vmatprep.mubr.msk.bf16.mxu1 %vm2885_vm13, %v11392_v54  ;;  %5926 = vmatpush1.bf16.msra.mxu1 %v9022_v59  ;;  %v9041_v54 = vld [vmem:[#allocation5 + $0x3b4] ss:$8 sps:$4 sm:$0xff]   ;;  %v9054_v59 = vld [vmem:[#allocation5 + $0x400] ss:$8 sps:$4 sm:$0xff]  }
 0x549   : > { %5927 = vmatprep.subr.bf16.mxu1 %v9027_v21  ;;  %v9057_v21 = vld [vmem:[#allocation5 + $0x410] ss:$8 sps:$4 sm:$0xff]  }
 0x54c   : > { %5928 = vmatpush1.bf16.msra.mxu1 %v9025_v44  ;;  %v5658_v44 = vld [vmem:[#allocation2 + $0x70] sm:$0x77] }
 0x54d   : > { %5929 = vmatprep.subr.bf16.mxu1 %v9030_v63  ;;  %v8082_v63 = vcombine.high %v5658_v44, %v5658_v44 }
 0x54f   : > { %5594 = vmatmul.mubr.bf16.gmra.mrb[40].mxu1 %v11387_v15  ;;  %v9044_v15 = vld [vmem:[#allocation5 + $0x3c4] ss:$8 sps:$4 sm:$0xff]  }
 0x550   : > { %8078 = vmatprep.mubr.msk.bf16.mxu1 %vm2885_vm13, %v11465_v2  ;;  %5930 = vmatpush1.bf16.msra.mxu1 %v9028_v60  ;;  %v9067_v60 = vld [vmem:[#allocation5 + $0x434] ss:$8 sps:$4 sm:$0xff]  }
 0x551   : > { %5931 = vmatprep.subr.bf16.mxu1 %v9033_v24  ;;  %v5775_v24 = vshrl.u32 %v11481_v14, 16 }
 0x554   : > { %5932 = vmatpush1.bf16.msra.mxu1 %v9031_v56  ;;  %v9070_v56 = vld [vmem:[#allocation5 + $0x444] ss:$8 sps:$4 sm:$0xff]  }
 0x555   : > { %5933 = vmatprep.subr.bf16.mxu1 %v9037_v11  ;;  %v5777_v11 = vor.u32 %v5775_v24, %v11494_v61  ;;  %v9071_v61 = vld [vmem:[#allocation5 + $0x450] ss:$8 sps:$4 sm:$0xff]  }
 0x557   : > { %5604 = vmatmul.mubr.bf16.gmra.mrb[44].mxu1 %v11396_v30  ;;  %v8053_v30 = vcombine.high %v11620_v18, %v11620_v18  ;;  %v9053_v18 = vld [vmem:[#allocation5 + $0x3f4] ss:$8 sps:$4 sm:$0xff]  }
 0x558   : > { %8079 = vmatprep.mubr.msk.bf16.mxu1 %vm2885_vm13, %v11481_v14  ;;  %5934 = vmatpush1.bf16.msra.mxu1 %v9035_v20  ;;  %v8081_v20 = vcombine.low %v5658_v44, %v5658_v44  ;;  %v5767_v14 = vshrl.u32 %v11402_v23, 16 }
 0x559   : > { %5935 = vmatprep.subr.bf16.mxu1 %v9041_v54  ;;  %v9068_v54 = vld [vmem:[#allocation5 + $0x440] ss:$8 sps:$4 sm:$0xff]  }
 0x55a   : > { %v11686_v27 = vpop.f32.mrb[52].mxu1  ;;  %v5769_v9 = vor.u32 %v5767_v14, %v13084_v41 }
 0x55b   : > { %v11688_v2 = vpop.f32.mrb[53].mxu1 }
 0x55c   : > { %v4181_v32 = vpop.f32.mrb[54].mxu1  ;;  %5936 = vmatpush1.bf16.msra.mxu1 %v9039_v16 }
 0x55d   : > { %v4182_v57 = vpop.f32.mrb[55].mxu1  ;;  %6369 = vmatprep.subr.bf16.mxu1 %v9044_v15  ;;  %v9073_v15 = vld [vmem:[#allocation5 + $0x454] ss:$8 sps:$4 sm:$0xff]  }
 0x55e   : > { %v5771_v57 = vshll.u32 %v8081_v20, 16 }
 0x55f   : > { %5614 = vmatmul.mubr.bf16.gmra.mrb[48].mxu1 %v11402_v23 }
 0x560   : > { %8080 = vmatprep.mubr.msk.bf16.mxu1 %vm2885_vm13, %v8053_v30  ;;  %v9076_v30 = vld [vmem:[#allocation5 + $0x464] ss:$8 sps:$4 sm:$0xff]  }
 0x567   : > { %5624 = vmatmul.mubr.bf16.gmra.mrb[68].mxu1 %v8052_v7 }
 0x568   : > { %8103 = vmatprep.mubr.msk.bf16.mxu1 %vm2885_vm13, %v5706_v43 }
 0x56f   : > { %5950 = vmatmul.mubr.bf16.vlgmr.msra.gmra.mrb[28].mxu1 %v11430_v28  ;;  %v9056_v28 = vld [vmem:[#allocation5 + $0x404] ss:$8 sps:$4 sm:$0xff]  }
 0x570   : > { %8104 = vmatprep.mubr.msk.bf16.mxu1 %vm2885_vm13, %v11433_v34  ;;  %6370 = vmatpush1.bf16.msra.mxu1 %v9042_v45  ;;  %v9059_v34 = vld [vmem:[#allocation5 + $0x414] ss:$8 sps:$4 sm:$0xff]  }
 0x571   : > { %6371 = vmatprep.subr.bf16.mxu1 %v9047_v5 }
 0x574   : > { %6372 = vmatpush1.bf16.msra.mxu1 %v9045_v53  ;;  %v5773_v53 = vrot.slane %v5771_v57, 1  ;;  %v9077_v57 = vld [vmem:[#allocation5 + $0x470] ss:$8 sps:$4 sm:$0xff]  }
 0x575   : > { %6373 = vmatprep.subr.bf16.mxu1 %v9050_v29  ;;  %v5786_v29 = vshrl.u32 %v8082_v63, 16 }
 0x577   : > { %5960 = vmatmul.mubr.bf16.gmra.mrb[32].mxu1 %v11424_v1  ;;  %v9063_v1 = vld [vmem:[#allocation5 + $0x424] ss:$8 sps:$4 sm:$0xff]  }
 0x578   : > { %8105 = vmatprep.mubr.msk.bf16.mxu1 %vm2885_vm13, %v11436_v50  ;;  %6374 = vmatpush1.bf16.msra.mxu1 %v9048_v13  ;;  %v9061_v50 = vld [vmem:[#allocation5 + $0x420] ss:$8 sps:$4 sm:$0xff]   ;;  %v5774_v13 = vsel %vm13085_vm3, %v5769_v9, %v5773_v53  ;;  %vm13125_vm3 = vmmov %vm13122_vm5 }
 0x579   : > { %6375 = vmatprep.subr.bf16.mxu1 %v9053_v18 }
 0x57c   : > { %6376 = vmatpush1.bf16.msra.mxu1 %v9051_v8 }
 0x57d   : > { %6377 = vmatprep.subr.bf16.mxu1 %v9056_v28 }
 0x57f   : > { %5970 = vmatmul.mubr.bf16.gmra.mrb[36].mxu1 %v11441_v40  ;;  %v9065_v40 = vld [vmem:[#allocation5 + $0x430] ss:$8 sps:$4 sm:$0xff]  }
 0x580   : > { %8106 = vmatprep.mubr.msk.bf16.mxu1 %vm2885_vm13, %v11487_v17  ;;  %6378 = vmatpush1.bf16.msra.mxu1 %v9054_v59  ;;  %v5779_v17 = vshll.u32 %v8082_v63, 16 }
 0x581   : > { %6379 = vmatprep.subr.bf16.mxu1 %v9059_v34  ;;  %v5783_v34 = vshrl.u32 %v8081_v20, 16  ;;  %v9074_v20 = vld [vmem:[#allocation5 + $0x460] ss:$8 sps:$4 sm:$0xff]  }
 0x582   : > { %v5781_v16 = vrot.slane %v5779_v17, 1 }
 0x584   : > { %6380 = vmatpush1.bf16.msra.mxu1 %v9057_v21  ;;  %v5788_v18 = vor.u32 %v5786_v29, %v5781_v16  ;;  %v13100_v29 = vld [vmem:[#allocation37_spill] sm:$0xff] }
 0x585   : > { %6381 = vmatprep.subr.bf16.mxu1 %v9063_v1  ;;  %v13086_v1 = vld [vmem:[#allocation29_spill] sm:$0xff] }
 0x586   : > { %v13087_v44 = vshll.u32 %v13086_v1, 16  ;;  %v13089_v17 = vshrl.u32 %v13086_v1, 16 }
 0x587   : > { %5980 = vmatmul.mubr.bf16.gmra.mrb[40].mxu1 %v11499_v47  ;;  %v5782_v47 = vsel %vm13083_vm7, %v5777_v11, %v5781_v16  ;;  %v13090_v11 = vld [vmem:[#allocation27_spill] sm:$0xff]  ;;  %vm13124_vm7 = vmmov %vm13122_vm5 }
 0x588   : > { %8107 = vmatprep.mubr.msk.bf16.mxu1 %vm2885_vm13, %v11511_v31  ;;  %6382 = vmatpush1.bf16.msra.mxu1 %v9061_v50  ;;  %v9114_v31 = vld [vmem:[#allocation2 + $0x20] sm:$0xff]  ;;  %v6153_v50 = vrot.slane %v13087_v44, 1 }
 0x589   : > { %6383 = vmatprep.subr.bf16.mxu1 %v9067_v60  ;;  %v8111_v32 = vcombine.high %v9115_v42, %v9114_v31  ;;  %v8110_v8 = vcombine.low %v9115_v42, %v9114_v31  ;;  %v9079_v42 = vld [vmem:[#allocation5 + $0x474] ss:$8 sps:$4 sm:$0xff]  }
 0x58b   : > { %v6146_v43 = vshll.u32 %v8111_v32, 16  ;;  %v6134_v59 = vshll.u32 %v8110_v8, 16 }
 0x58c   : > { %6384 = vmatpush1.bf16.msra.mxu1 %v9065_v40  ;;  %v6132_v40 = vshrl.u32 %v8110_v8, 16 }
 0x58d   : > { %6385 = vmatprep.subr.bf16.mxu1 %v9070_v56  ;;  %v6148_v28 = vrot.slane %v6146_v43, 1  ;;  %v6136_v63 = vrot.slane %v6134_v59, 1  ;;  %v6165_v56 = vor.u32 %v13089_v17, %v6153_v50  ;;  %v9088_v59 = vld [vmem:[#allocation5 + $0x4a4] ss:$8 sps:$4 sm:$0xff]   ;;  %v9091_v17 = vld [vmem:[#allocation5 + $0x4b4] ss:$8 sps:$4 sm:$0xff]  }
 0x58f   : > { %5990 = vmatmul.mubr.bf16.gmra.mrb[44].mxu1 %v11519_v26  ;;  %v6137_v24 = vor.u32 %v6136_v63, %v6132_v40  ;;  %v9086_v40 = vld [vmem:[#allocation5 + $0x4a0] ss:$8 sps:$4 sm:$0xff]  }
 0x590   : > { %8108 = vmatprep.mubr.msk.bf16.mxu1 %vm2885_vm13, %v5782_v47  ;;  %6386 = vmatpush1.bf16.msra.mxu1 %v9068_v54  ;;  %v13091_v54 = vshll.u32 %v13090_v11, 16 }
 0x591   : > { %6387 = vmatprep.subr.bf16.mxu1 %v9073_v15  ;;  %v13092_v15 = vld [vmem:[#allocation35_spill] sm:$0xff] }
 0x592   : > { %v4535_v36 = vpop.f32.mrb[56].mxu1  ;;  %v6141_v16 = vrot.slane %v13091_v54, 1  ;;  %v13093_v47 = vshll.u32 %v13092_v15, 16  ;;  %v13097_v41 = vshrl.u32 %v13092_v15, 16 }
 0x593   : > { %v11721_v7 = vadd.f32 %v4535_v36, %v11686_v27  ;;  %v4537_v26 = vpop.f32.mrb[57].mxu1  ;;  %v6144_v27 = vshrl.u32 %v8111_v32, 16 }
 0x594   : > { %v11724_v45 = vadd.f32 %v4537_v26, %v11688_v2  ;;  %v4539_v5 = vpop.f32.mrb[58].mxu1  ;;  %6388 = vmatpush1.bf16.msra.mxu1 %v9071_v61  ;;  %v5785_v2 = vor.u32 %v5783_v34, %v5773_v53  ;;  %v6169_v31 = vrot.slane %v13093_v47, 1  ;;  %v6142_v32 = vsel %vm13094_vm9, %v6137_v24, %v6141_v16  ;;  %v9082_v61 = vld [vmem:[#allocation5 + $0x484] ss:$8 sps:$4 sm:$0xff]   ;;  %v13098_v26 = vld [vmem:[#allocation36_spill] sm:$0xff]  ;;  %vm13127_vm9 = vmmov %vm13125_vm3 }
 0x595   : > { %v4540_v23 = vpop.f32.mrb[59].mxu1  ;;  %6677 = vmatprep.subr.bf16.mxu1 %v9076_v30  ;;  %v6149_v21 = vor.u32 %v6148_v28, %v6144_v27  ;;  %v13096_v30 = vshrl.u32 %v13090_v11, 16  ;;  %v13099_v43 = vshll.u32 %v13098_v26, 16  ;;  %v9080_v53 = vld [vmem:[#allocation5 + $0x480] ss:$8 sps:$4 sm:$0xff]   ;;  %v13104_v34 = vshrl.u32 %v13098_v26, 16 }
 0x596   : > { %v6170_v14 = vsel %vm13095_vm4, %v6165_v56, %v6169_v31  ;;  %v6181_v9 = vor.u32 %v13097_v41, %v6169_v31  ;;  %v13101_v23 = vshll.u32 %v13100_v29, 16  ;;  %v9083_v27 = vld [vmem:[#allocation5 + $0x490] ss:$8 sps:$4 sm:$0xff]   ;;  %v6201_v24 = vrot.slane %v11618_v19, 1  ;;  %vm13128_vm4 = vmmov %vm13125_vm3 }
 0x597   : > { %6000 = vmatmul.mubr.bf16.gmra.mrb[48].mxu1 %v5774_v13  ;;  %v6154_v60 = vsel %vm13088_vm14, %v6149_v21, %v6153_v50  ;;  %v6157_v36 = vor.u32 %v13096_v30, %v6141_v16  ;;  %v6161_v5 = vrot.slane %v13099_v43, 1  ;;  %v13106_v50 = vld [vmem:[#allocation38_spill] sm:$0xff]  ;;  %v9089_v16 = vld [vmem:[#allocation5 + $0x4b0] ss:$8 sps:$4 sm:$0xff]   ;;  %v13112_v41 = vrot.slane %v11528_v52, 1  ;;  %vm13126_vm14 = vmmov %vm13125_vm3 }
 0x598   : > { %8109 = vmatprep.mubr.msk.bf16.mxu1 %vm2885_vm13, %v5788_v18  ;;  %v6185_v13 = vrot.slane %v13101_v23, 1  ;;  %v9085_v18 = vld [vmem:[#allocation5 + $0x494] ss:$8 sps:$4 sm:$0xff]   ;;  %v13107_v63 = vshll.u32 %v13106_v50, 16  ;;  %v13110_v47 = vshrl.u32 %v13106_v50, 16 }
 0x599   : > { %v6162_v8 = vsel %vm13102_vm15, %v6157_v36, %v6161_v5  ;;  %v6173_v21 = vor.u32 %v13104_v34, %v6161_v5  ;;  %v9099_v36 = vld [vmem:[#allocation5 + $0x4d4] ss:$8 sps:$4 sm:$0xff]   ;;  %v9102_v23 = vld [vmem:[#allocation5 + $0x4e4] ss:$8 sps:$4 sm:$0xff]   ;;  %v9100_v52 = vld [vmem:[#allocation5 + $0x4e0] ss:$8 sps:$4 sm:$0xff]  }
 0x59a   : > { %v6186_v28 = vsel %vm13103_vm11, %v6181_v9, %v6185_v13  ;;  %v13116_v34 = vld [vmem:[#allocation46_spill] sm:$0xff]  ;;  %vm13129_vm15 = vmmov %vm13125_vm3 }
 0x59b   : > { %vm13131_vm11 = vmmov %vm13125_vm3 }
 0x59f   : > { %6010 = vmatmul.mubr.bf16.gmra.mrb[72].mxu1 %v5785_v2  ;;  %v13105_v2 = vshrl.u32 %v13100_v29, 16 }
 0x5a0   : > { %8144 = vmatprep.mubr.msk.bf16.mxu1 %vm2885_vm13, %v6154_v60  ;;  %v6177_v60 = vrot.slane %v13107_v63, 1 }
 0x5a1   : > { %v6197_v44 = vor.u32 %v13105_v2, %v6185_v13  ;;  %v13115_v13 = vshrl.u32 %v11556_v4, 16 }
 0x5a2   : > { %v6178_v56 = vsel %vm13108_vm6, %v6173_v21, %v6177_v60  ;;  %v6189_v31 = vor.u32 %v13110_v47, %v6177_v60  ;;  %v13118_v60 = vld [vmem:[#allocation44_spill] sm:$0xff]  ;;  %vm13132_vm6 = vmmov %vm13125_vm3 }
 0x5a3   : > { %v6202_v54 = vsel %vm13109_vm1, %v6197_v44, %v6201_v24  ;;  %v9103_v44 = vld [vmem:[#allocation5 + $0x4f0] ss:$8 sps:$4 sm:$0xff]   ;;  %vm13133_vm1 = vmmov %vm13125_vm3 }
 0x5a4   : > { %v6194_v9 = vsel %vm13113_vm2, %v6189_v31, %v13112_v41  ;;  %v13123_v41 = vld [vmem:[#allocation20_spill] sm:$0xff]  ;;  %vm13134_vm2 = vmmov %vm13133_vm1 }
 0x5a7   : > { %6402 = vmatmul.mubr.bf16.vlgmr.msra.gmra.mrb[28].mxu1 %v6142_v32  ;;  %v6213_v32 = vor.u32 %v6201_v24, %v11615_v55 }
 0x5a8   : > { %8145 = vmatprep.mubr.msk.bf16.mxu1 %vm2885_vm13, %v6170_v14  ;;  %6678 = vmatpush1.bf16.msra.mxu1 %v9074_v20  ;;  %v9095_v20 = vld [vmem:[#allocation5 + $0x4c4] ss:$8 sps:$4 sm:$0xff]   ;;  %v9093_v14 = vld [vmem:[#allocation5 + $0x4c0] ss:$8 sps:$4 sm:$0xff]  }
 0x5a9   : > { %6679 = vmatprep.subr.bf16.mxu1 %v9079_v42  ;;  %v6056_v42 = vld [vmem:[#allocation2 + $0x78] sm:$0x77] }
 0x5aa   : > { %v11767_v30 = vcombine.high %v6056_v42, %v6056_v42 }
 0x5ac   : > { %6680 = vmatpush1.bf16.msra.mxu1 %v9077_v57  ;;  %v13111_v57 = vshll.u32 %v11556_v4, 16  ;;  %v6231_v5 = vshll.u32 %v11767_v30, 16  ;;  %v6238_v2 = vshrl.u32 %v11767_v30, 16 }
 0x5ad   : > { %6681 = vmatprep.subr.bf16.mxu1 %v9082_v61 }
 0x5ae   : > { %v6217_v61 = vrot.slane %v13111_v57, 1 }
 0x5af   : > { %6412 = vmatmul.mubr.bf16.gmra.mrb[32].mxu1 %v6162_v8  ;;  %v6233_v8 = vrot.slane %v6231_v5, 1  ;;  %v6531_v5 = vrot.slane %v13092_v15, 1 }
 0x5b0   : > { %8146 = vmatprep.mubr.msk.bf16.mxu1 %vm2885_vm13, %v6186_v28  ;;  %6682 = vmatpush1.bf16.msra.mxu1 %v9080_v53  ;;  %v6218_v43 = vsel %vm13114_vm12, %v6213_v32, %v6217_v61  ;;  %v9097_v53 = vld [vmem:[#allocation5 + $0x4d0] ss:$8 sps:$4 sm:$0xff]   ;;  %v11777_v28 = vcombine.low %v6056_v42, %v6056_v42  ;;  %v9116_v42 = vld [vmem:[#allocation5 + $0x504] ss:$8 sps:$4 sm:$0xff]   ;;  %vm13135_vm12 = vmmov %vm13133_vm1 }
 0x5b1   : > { %6683 = vmatprep.subr.bf16.mxu1 %v9085_v18  ;;  %v6229_v18 = vor.u32 %v13115_v13, %v6217_v61  ;;  %v6240_v47 = vor.u32 %v6238_v2, %v6233_v8  ;;  %v9117_v13 = vld [vmem:[#allocation5 + $0x500] ss:$8 sps:$4 sm:$0xff]   ;;  %v9124_v2 = vld [vmem:[#allocation5 + $0x544] ss:$8 sps:$4 sm:$0xff]  }
 0x5b3   : > { %v6234_v21 = vsel %vm13117_vm0, %v6229_v18, %v6233_v8  ;;  %v6529_v18 = vrot.slane %v13098_v26, 1  ;;  %v6535_v8 = vrot.slane %v13100_v29, 1  ;;  %v6539_v26 = vrot.slane %v11611_v0, 1  ;;  %v9123_v29 = vld [vmem:[#allocation5 + $0x530] ss:$8 sps:$4 sm:$0xff]  }
 0x5b4   : > { %6684 = vmatpush1.bf16.msra.mxu1 %v9083_v27  ;;  %v9105_v27 = vld [vmem:[#allocation5 + $0x4f4] ss:$8 sps:$4 sm:$0xff]   ;;  %v9127_v0 = vld [vmem:[#allocation5 + $0x550] ss:$8 sps:$4 sm:$0xff]   ;;  %vm13137_vm0 = vsmask.f32 6400 }
 0x5b5   : > { %6685 = vmatprep.subr.bf16.mxu1 %v9088_v59  ;;  %v6223_v59 = vshll.u32 %v11777_v28, 16 }
 0x5b7   : > { %6422 = vmatmul.mubr.bf16.gmra.mrb[36].mxu1 %v6178_v56 }
 0x5b8   : > { %8147 = vmatprep.mubr.msk.bf16.mxu1 %vm2885_vm13, %v6202_v54  ;;  %6686 = vmatpush1.bf16.msra.mxu1 %v9086_v40  ;;  %v13119_v40 = vshrl.u32 %v11542_v46, 16 }
 0x5b9   : > { %6687 = vmatprep.subr.bf16.mxu1 %v9091_v17  ;;  %v6225_v17 = vrot.slane %v6223_v59, 1  ;;  %v9121_v59 = vld [vmem:[#allocation5 + $0x520] ss:$8 sps:$4 sm:$0xff]  }
 0x5ba   : > { %v6221_v24 = vor.u32 %v13119_v40, %v13118_v60  ;;  %v9125_v60 = vld [vmem:[#allocation5 + $0x540] ss:$8 sps:$4 sm:$0xff]   ;;  %v9126_v40 = vld [vmem:[#allocation5 + $0x554] ss:$8 sps:$4 sm:$0xff]  }
 0x5bc   : > { %6688 = vmatpush1.bf16.msra.mxu1 %v9089_v16  ;;  %v6226_v32 = vsel %vm13120_vm10, %v6221_v24, %v6225_v17  ;;  %v13130_v24 = vld [vmem:[#allocation42_spill] sm:$0xff]  ;;  %vm13139_vm10 = vmmov %vm13137_vm0 }
 0x5bd   : > { %6689 = vmatprep.subr.bf16.mxu1 %v9095_v20 }
 0x5bf   : > { %6432 = vmatmul.mubr.bf16.gmra.mrb[40].mxu1 %v6194_v9  ;;  %v6523_v9 = vrot.slane %v13123_v41, 1 }
 0x5c0   : > { %8148 = vmatprep.mubr.msk.bf16.mxu1 %vm2885_vm13, %v6218_v43  ;;  %6690 = vmatpush1.bf16.msra.mxu1 %v9093_v14  ;;  %v6235_v14 = vshrl.u32 %v11777_v28, 16  ;;  %v6524_v43 = vrot.slane %v13090_v11, 1  ;;  %v9120_v11 = vld [vmem:[#allocation5 + $0x524] ss:$8 sps:$4 sm:$0xff]  }
 0x5c1   : > { %6691 = vmatprep.subr.bf16.mxu1 %v9099_v36  ;;  %v6527_v36 = vrot.slane %v13086_v1, 1  ;;  %v9118_v1 = vld [vmem:[#allocation5 + $0x514] ss:$8 sps:$4 sm:$0xff]  }
 0x5c2   : > { %v6237_v57 = vor.u32 %v6235_v14, %v6225_v17  ;;  %v6530_v15 = vsel %vm13126_vm14, %v6524_v43, %v6529_v18  ;;  %v6537_v17 = vrot.slane %v13130_v24, 1  ;;  %v6547_v14 = vrot.slane %v11767_v30, 1 }
 0x5c3   : > { %vm13186_vm14 = vcmask 1043456  }
 0x5c4   : > { %6692 = vmatpush1.bf16.msra.mxu1 %v9097_v53  ;;  %v6525_v53 = vsel %vm13124_vm7, %v6523_v9, %v6524_v43  ;;  %vm13141_vm7 = vmmov %vm13137_vm0 }
 0x5c5   : > { %6693 = vmatprep.subr.bf16.mxu1 %v9102_v23  ;;  %v6532_v23 = vsel %vm13125_vm3, %v6527_v36, %v6531_v5  ;;  %vm13142_vm3 = vmmov %vm13137_vm0 }
 0x5c7   : > { %6442 = vmatmul.mubr.bf16.gmra.mrb[44].mxu1 %v13116_v34  ;;  %v9122_v34 = vld [vmem:[#allocation5 + $0x534] ss:$8 sps:$4 sm:$0xff]  }
 0x5c8   : > { %8149 = vmatprep.mubr.msk.bf16.mxu1 %vm2885_vm13, %v6234_v21  ;;  %6694 = vmatpush1.bf16.msra.mxu1 %v9100_v52  ;;  %v9119_v52 = vld [vmem:[#allocation5 + $0x510] ss:$8 sps:$4 sm:$0xff]   ;;  %v6533_v21 = vrot.slane %v13106_v50, 1  ;;  %v6543_v50 = vrot.slane %v11556_v4, 1 }
 0x5c9   : > { %6695 = vmatprep.subr.bf16.mxu1 %v9105_v27  ;;  %v6536_v27 = vsel %vm13127_vm9, %v6531_v5, %v6535_v8  ;;  %v9131_v4 = vld [vmem:[#allocation5 + $0x570] ss:$8 sps:$4 sm:$0xff]   ;;  %vm13187_vm9 = vmmov %vm13186_vm14 }
 0x5ca   : > { %v4865_v63 = vpop.f32.mrb[60].mxu1 }
 0x5cb   : > { %v11788_v56 = vadd.f32 %v4865_v63, %v11721_v7  ;;  %v4867_v54 = vpop.f32.mrb[61].mxu1  ;;  %v13121_v7 = vld [vmem:[#allocation23_spill] sm:$0xff]  ;;  %v6540_v63 = vsel %vm13129_vm15, %v6535_v8, %v6539_v26 }
 0x5cc   : > { %v11791_v16 = vadd.f32 %v4867_v54, %v11724_v45  ;;  %v4869_v20 = vpop.f32.mrb[62].mxu1  ;;  %6696 = vmatpush1.bf16.msra.mxu1 %v9103_v44  ;;  %v6526_v61 = vrot.slane %v13121_v7, 1  ;;  %v6534_v44 = vsel %vm13128_vm4, %v6529_v18, %v6533_v21  ;;  %v9128_v54 = vld [vmem:[#allocation5 + $0x564] ss:$8 sps:$4 sm:$0xff]   ;;  %v6876_v18 = vrot.slane %v11618_v19, 2 }
 0x5cd   : > { %v4870_v31 = vpop.f32.mrb[63].mxu1  ;;  %8224 = vmatprep.subr.bf16.mxu1 %v9116_v42  ;;  %v6538_v20 = vsel %vm13131_vm11, %v6533_v21, %v6537_v17  ;;  %v9130_v42 = vld [vmem:[#allocation5 + $0x574] ss:$8 sps:$4 sm:$0xff]  }
 0x5ce   : > { %v6528_v45 = vsel %vm13122_vm5, %v6526_v61, %v6527_v36  ;;  %v9129_v31 = vld [vmem:[#allocation5 + $0x560] ss:$8 sps:$4 sm:$0xff]   ;;  %v6548_v61 = vsel %vm13134_vm2, %v6543_v50, %v6547_v14  ;;  %vm13140_vm5 = vmmov %vm13137_vm0 }
 0x5cf   : > { %6452 = vmatmul.mubr.bf16.gmra.mrb[48].mxu1 %v6226_v32  ;;  %v6541_v32 = vrot.slane %v11542_v46, 1  ;;  %v9133_v36 = vld [vmem:[#allocation5 + $0x580] ss:$8 sps:$4 sm:$0xff]   ;;  %v6545_v46 = vrot.slane %v11777_v28, 1 }
 0x5d0   : > { %8150 = vmatprep.mubr.msk.bf16.mxu1 %vm2885_vm13, %v6240_v47  ;;  %v6544_v47 = vsel %vm13132_vm6, %v6539_v26, %v6543_v50  ;;  %v6804_v28 = vld [vmem:[#allocation2 + $0x78] sm:$0xff] }
 0x5d1   : > { %v6542_v7 = vsel %vm13133_vm1, %v6537_v17, %v6541_v32 }
 0x5d7   : > { %6462 = vmatmul.mubr.bf16.gmra.mrb[76].mxu1 %v6237_v57  ;;  %v9132_v57 = vld [vmem:[#allocation5 + $0x584] ss:$8 sps:$4 sm:$0xff]  }
 0x5d8   : > { %8173 = vmatprep.mubr.msk.bf16.mxu1 %vm2885_vm13, %v6528_v45  ;;  %v9134_v45 = vld [vmem:[#allocation5 + $0x594] ss:$8 sps:$4 sm:$0xff]  }
 0x5df   : > { %6710 = vmatmul.mubr.bf16.vlgmr.msra.gmra.mrb[28].mxu1 %v6525_v53  ;;  %v9135_v53 = vld [vmem:[#allocation5 + $0x590] ss:$8 sps:$4 sm:$0xff]  }
 0x5e0   : > { %8174 = vmatprep.mubr.msk.bf16.mxu1 %vm2885_vm13, %v6532_v23  ;;  %8234 = vmatpush1.bf16.msra.mxu1 %v9117_v13  ;;  %v6546_v13 = vsel %vm13135_vm12, %v6541_v32, %v6545_v46 }
 0x5e1   : > { %8225 = vmatprep.subr.bf16.mxu1 %v9118_v1  ;;  %v6875_v1 = vrot.slane %v11615_v55, 1  ;;  %v8180_v55 = vcombine.low %v6804_v28, %v6804_v28 }
 0x5e3   : > { %v6877_v8 = vor.u32 %v6876_v18, %v6875_v1  ;;  %v6888_v26 = vshrl.u32 %v8180_v55, 16  ;;  %v13144_v18 = vld [vmem:[#allocation9_spill] sm:$0xff] }
 0x5e4   : > { %8235 = vmatpush1.bf16.msra.mxu1 %v9119_v52 }
 0x5e5   : > { %8226 = vmatprep.subr.bf16.mxu1 %v9120_v11  ;;  %v6886_v19 = vsel %vm13140_vm5, %v6877_v8, %v11583_v33 }
 0x5e7   : > { %6720 = vmatmul.mubr.bf16.gmra.mrb[32].mxu1 %v6530_v15 }
 0x5e8   : > { %8175 = vmatprep.mubr.msk.bf16.mxu1 %vm2885_vm13, %v6536_v27  ;;  %8236 = vmatpush1.bf16.msra.mxu1 %v9121_v59  ;;  %v13138_v27 = vld [vmem:[#allocation40_spill] sm:$0xff] }
 0x5e9   : > { %8227 = vmatprep.subr.bf16.mxu1 %v9122_v34  ;;  %v6874_v59 = vsel %vm13139_vm10, %v13138_v27, %v11572_v38 }
 0x5ec   : > { %8237 = vmatpush1.bf16.msra.mxu1 %v9123_v29  ;;  %v6891_v29 = vshll.u32 %v8180_v55, 16 }
 0x5ed   : > { %8228 = vmatprep.subr.bf16.mxu1 %v9124_v2 }
 0x5ef   : > { %6730 = vmatmul.mubr.bf16.gmra.mrb[36].mxu1 %v6534_v44  ;;  %v6890_v44 = vrot.slane %v6888_v26, 1 }
 0x5f0   : > { %8176 = vmatprep.mubr.msk.bf16.mxu1 %vm2885_vm13, %v6540_v63  ;;  %8238 = vmatpush1.bf16.msra.mxu1 %v9125_v60  ;;  %v6893_v63 = vrot.slane %v6891_v29, 2 }
 0x5f1   : > { %8229 = vmatprep.subr.bf16.mxu1 %v9126_v40 }
 0x5f2   : > { %v6894_v38 = vor.u32 %v6893_v63, %v6890_v44 }
 0x5f4   : > { %8239 = vmatpush1.bf16.msra.mxu1 %v9127_v0  ;;  %v6895_v40 = vsel %vm13142_vm3, %v11585_v3, %v6894_v38 }
 0x5f5   : > { %8230 = vmatprep.subr.bf16.mxu1 %v9128_v54 }
 0x5f7   : > { %6740 = vmatmul.mubr.bf16.gmra.mrb[40].mxu1 %v6538_v20 }
 0x5f8   : > { %8177 = vmatprep.mubr.msk.bf16.mxu1 %vm2885_vm13, %v6544_v47  ;;  %8240 = vmatpush1.bf16.msra.mxu1 %v9129_v31 }
 0x5f9   : > { %8231 = vmatprep.subr.bf16.mxu1 %v9130_v42 }
 0x5fc   : > { %8241 = vmatpush1.bf16.msra.mxu1 %v9131_v4 }
 0x5fd   : > { %8232 = vmatprep.subr.bf16.mxu1 %v9132_v57 }
 0x5ff   : > { %6750 = vmatmul.mubr.bf16.gmra.mrb[44].mxu1 %v6542_v7 }
 0x600   : > { %8178 = vmatprep.mubr.msk.bf16.mxu1 %vm2885_vm13, %v6548_v61  ;;  %8242 = vmatpush1.bf16.msra.mxu1 %v9133_v36  ;;  %v7160_v36 = vld [vmem:[%s12474_s6] sm:$0x3] }
 0x601   : > { %8233 = vmatprep.subr.bf16.mxu1 %v9134_v45 }
 0x602   : > { %v5335_v41 = vpop.f32.mrb[64].mxu1 }
 0x603   : > { %v5366_v30 = vadd.f32 %v5335_v41, %v11788_v56  ;;  %v5337_v9 = vpop.f32.mrb[65].mxu1  ;;  %v13136_v56 = vld [vmem:[#allocation39_spill] sm:$0xff]  ;;  %v13143_v41 = vld [vmem:[#allocation10_spill] sm:$0xff] }
 0x604   : > { %v5367_v43 = vadd.f32 %v5337_v9, %v11791_v16  ;;  %v5339_v5 = vpop.f32.mrb[66].mxu1  ;;  %8243 = vmatpush1.bf16.msra.mxu1 %v9135_v53  ;;  %v6878_v52 = vsel %vm13137_vm0, %v13136_v56, %v6877_v8  ;;  %v8181_v16 = vcombine.high %v6804_v28, %v6804_v28  ;;  %v11867_v8 = vrot.slane %v7160_v36, %v13144_v18 }
 0x605   : > { %v5340_v23 = vpop.f32.mrb[67].mxu1 }
 0x606   : > { %v6897_v11 = vshrl.u32 %v8181_v16, 16  ;;  %v6900_v15 = vshll.u32 %v8181_v16, 16 }
 0x607   : > { %6760 = vmatmul.mubr.bf16.gmra.mrb[48].mxu1 %v6546_v13 }
 0x608   : > { %8179 = vmatprep.mubr.msk.bf16.mxu1 %vm2885_vm13, %v6547_v14  ;;  %v6899_v34 = vrot.slane %v6897_v11, 1  ;;  %v6902_v21 = vrot.slane %v6900_v15, 2 }
 0x60a   : > { %v6903_v2 = vor.u32 %v6902_v21, %v6899_v34 }
 0x60c   : > { %v6904_v60 = vsel %vm13141_vm7, %v11583_v33, %v6903_v2 }
 0x60f   : > { %6770 = vmatmul.mubr.bf16.gmra.mrb[80].mxu1 %v6545_v46  ;;  %v11857_v46 = vrot.slane %v7160_v36, %v13143_v41 }
 0x610   : > { %8205 = vmatprep.mubr.msk.bf16.mxu1 %vm2885_vm13, %v6878_v52 }
 0x617   : > { %7096 = vmatmul.mubr.bf16.vlgmr.msra.gmra.mrb[40].mxu1 %v6874_v59 }
 0x618   : > { %8206 = vmatprep.mubr.msk.bf16.mxu1 %vm2885_vm13, %v6886_v19 }
 0x61f   : > { %7106 = vmatmul.mubr.bf16.gmra.mrb[44].mxu1 %v11592_v22 }
 0x620   : > { %8207 = vmatprep.mubr.msk.bf16.mxu1 %vm2885_vm13, %v6904_v60 }
 0x627   : > { %7116 = vmatmul.mubr.bf16.gmra.mrb[48].mxu1 %v6895_v40 }
 0x628   : > { %8208 = vmatprep.mubr.msk.bf16.mxu1 %vm2885_vm13, %v6903_v2 }
 0x62f   : > { %7126 = vmatmul.mubr.bf16.gmra.mrb[84].mxu1 %v6894_v38 }
 0x63a   : > { %v5625_v24 = vpop.f32.mrb[68].mxu1 }
 0x63b   : > { %v5656_v17 = vadd.f32 %v5625_v24, %v5366_v30  ;;  %v5627_v50 = vpop.f32.mrb[69].mxu1 }
 0x63c   : > { %v5657_v0 = vadd.f32 %v5627_v50, %v5367_v43  ;;  %v5629_v54 = vpop.f32.mrb[70].mxu1 }
 0x63d   : > { %v5630_v20 = vpop.f32.mrb[71].mxu1 }
 0x63e   : > { %v13147_v20 = vld [vmem:[#allocation13_spill] sm:$0xff] }
 0x672   : > { %v6011_v22 = vpop.f32.mrb[72].mxu1 }
 0x673   : > { %v6042_v47 = vadd.f32 %v6011_v22, %v5656_v17  ;;  %v6013_v31 = vpop.f32.mrb[73].mxu1 }
 0x674   : > { %v6043_v33 = vadd.f32 %v6013_v31, %v5657_v0  ;;  %v6015_v42 = vpop.f32.mrb[74].mxu1 }
 0x675   : > { %v6016_v32 = vpop.f32.mrb[75].mxu1 }
 0x6aa   : > { %v6463_v14 = vpop.f32.mrb[76].mxu1 }
 0x6ab   : > { %v11849_v4 = vadd.f32 %v6463_v14, %v6042_v47  ;;  %v6465_v3 = vpop.f32.mrb[77].mxu1  ;;  %v13148_v47 = vld [vmem:[#allocation14_spill] sm:$0xff] }
 0x6ac   : > { %v11851_v57 = vadd.f32 %v6465_v3, %v6043_v33  ;;  %v6467_v7 = vpop.f32.mrb[78].mxu1 }
 0x6ad   : > { %v6468_v61 = vpop.f32.mrb[79].mxu1  ;;  %v13149_v7 = vld [vmem:[#allocation15_spill] sm:$0xff] }
 0x6b2   : > { %v6711_v45 = vpop.f32.mrb[28].mxu1 }
 0x6b3   : > { %v8244_v30 = vadd.f32 %v11647_v48, %v6711_v45  ;;  %v6713_v9 = vpop.f32.mrb[29].mxu1 }
 0x6b4   : > { %v8245_v43 = vadd.f32 %v11649_v51, %v6713_v9  ;;  %v6715_v5 = vpop.f32.mrb[30].mxu1 }
 0x6b5   : > { %v8246_v53 = vadd.f32 %v11651_v58, %v6715_v5  ;;  %v6717_v23 = vpop.f32.mrb[31].mxu1  ;;  %v11871_v48 = vadd.f32 %v8244_v30, %v11867_v8 }
 0x6b6   : > { %v11863_v13 = vadd.f32 %v8245_v43, %v11857_v46  ;;  %v8247_v1 = vadd.f32 %v11654_v25, %v6717_v23  ;;  %v13145_v25 = vld [vmem:[#allocation12_spill] sm:$0xff] }
 0x6b7   : > { %v12727_v59 = vmax.f32 %v11871_v48, 0.0  ;;  %v11881_v55 = vadd.f32 %v8246_v53, %v11867_v8 }
 0x6b8   : > { %v12726_v28 = vmax.f32 %v11863_v13, 0.0  ;;  %v11884_v19 = vadd.f32 %v8247_v1, %v11857_v46 }
 0x6b9   : > { %v12725_v26 = vmax.f32 %v11881_v55, 0.0 }
 0x6ba   : > { %v6721_v56 = vpop.f32.mrb[32].mxu1  ;;  %v7225_v27 = vmul.f32 %v13145_v25, %v12726_v28  ;;  %v12723_v44 = vmax.f32 %v11884_v19, 0.0 }
 0x6bb   : > { %v8248_v51 = vadd.f32 %v11658_v6, %v6721_v56  ;;  %v6723_v52 = vpop.f32.mrb[33].mxu1 }
 0x6bc   : > { %v8249_v58 = vadd.f32 %v11660_v37, %v6723_v52  ;;  %v6725_v16 = vpop.f32.mrb[34].mxu1  ;;  %v7299_v34 = vmul.f32 %v7225_v27, %v7225_v27  ;;  %v7250_v2 = vsel %vm2885_vm13, %v7225_v27, 0.0 }
 0x6bd   : > { %v8250_v11 = vadd.f32 %v11662_v12, %v6725_v16  ;;  %v6727_v15 = vpop.f32.mrb[35].mxu1  ;;  %v13146_v12 = vld [vmem:[#allocation11_spill] sm:$0xff]  ;;  %v11895_v38 = vadd.f32 %v8248_v51, %v11867_v8 }
 0x6be   : > { %v8251_v6 = vadd.f32 %v11665_v62, %v6727_v15  ;;  %v7224_v21 = vmul.f32 %v13146_v12, %v12727_v59  ;;  %v7324_v24 = vsel %vm2885_vm13, %v7299_v34, 0.0  ;;  %v11900_v17 = vadd.f32 %v8249_v58, %v11857_v46  ;;  %v13151_v34 = vld [vmem:[#allocation17_spill] sm:$0xff] }
 0x6bf   : > { %v12722_v33 = vmax.f32 %v11895_v38, 0.0  ;;  %v11920_v9 = vadd.f32 %v8250_v11, %v11867_v8 }
 0x6c0   : > { %v7298_v0 = vmul.f32 %v7224_v21, %v7224_v21  ;;  %v7251_v54 = vadd.f32 %v7250_v2, %v7224_v21  ;;  %v12720_v42 = vmax.f32 %v11900_v17, 0.0  ;;  %v11924_v5 = vadd.f32 %v8251_v6, %v11857_v46  ;;  %v13152_v21 = vld [vmem:[#allocation18_spill] sm:$0xff] }
 0x6c1   : > { %v7228_v61 = vmul.f32 %v13149_v7, %v12722_v33  ;;  %v12719_v51 = vmax.f32 %v11920_v9, 0.0 }
 0x6c2   : > { %v6731_v37 = vpop.f32.mrb[36].mxu1  ;;  %v7325_v31 = vadd.f32 %v7324_v24, %v7298_v0  ;;  %v12718_v58 = vmax.f32 %v11924_v5, 0.0 }
 0x6c3   : > { %v6733_v29 = vpop.f32.mrb[37].mxu1  ;;  %v8252_v63 = vadd.f32 %v11669_v39, %v6731_v37  ;;  %v7226_v39 = vmul.f32 %v13147_v20, %v12725_v26  ;;  %v7302_v23 = vmul.f32 %v7228_v61, %v7228_v61  ;;  %v7230_v37 = vmul.f32 %v13151_v34, %v12719_v51  ;;  %v13230_v20 = vld [vmem:[#allocation84_spill] sm:$0xff] }
 0x6c4   : > { %v6735_v60 = vpop.f32.mrb[38].mxu1  ;;  %v8253_v62 = vadd.f32 %v11671_v35, %v6733_v29  ;;  %v7227_v35 = vmul.f32 %v13148_v47, %v12723_v44  ;;  %v7231_v29 = vmul.f32 %v13152_v21, %v12718_v58  ;;  %v13231_v25 = vmax.f32 %v13230_v20, 0.0 }
 0x6c5   : > { %v6737_v40 = vpop.f32.mrb[39].mxu1  ;;  %v8254_v50 = vadd.f32 %v11673_v49, %v6735_v60  ;;  %v7252_v32 = vadd.f32 %v7251_v54, %v7226_v39  ;;  %v7300_v14 = vmul.f32 %v7226_v39, %v7226_v39  ;;  %v11930_v15 = vadd.f32 %v8252_v63, %v11867_v8 }
 0x6c6   : > { %v8255_v22 = vadd.f32 %v11676_v10, %v6737_v40  ;;  %v7301_v49 = vmul.f32 %v7227_v35, %v7227_v35  ;;  %v7253_v36 = vsel %vm2885_vm13, %v7227_v35, 0.0  ;;  %v13150_v10 = vld [vmem:[#allocation16_spill] sm:$0xff]  ;;  %v11934_v27 = vadd.f32 %v8253_v62, %v11857_v46  ;;  %v13153_v62 = vld [vmem:[#allocation19_spill] sm:$0xff] }
 0x6c7   : > { %v7326_v3 = vadd.f32 %v7325_v31, %v7300_v14  ;;  %v7229_v45 = vmul.f32 %v13150_v10, %v12720_v42  ;;  %v7254_v30 = vadd.f32 %v7253_v36, %v7252_v32  ;;  %v12715_v60 = vmax.f32 %v11930_v15, 0.0  ;;  %v13154_v31 = vld [vmem:[#allocation21_spill] sm:$0xff] }
 0x6c8   : > { %v7327_v43 = vsel %vm2885_vm13, %v7301_v49, 0.0  ;;  %v12714_v63 = vmax.f32 %v11934_v27, 0.0  ;;  %v7304_v24 = vmul.f32 %v7230_v37, %v7230_v37  ;;  %v7305_v0 = vmul.f32 %v7231_v29, %v7231_v29 }
 0x6c9   : > { %v7328_v53 = vadd.f32 %v7327_v43, %v7326_v3  ;;  %v7303_v1 = vmul.f32 %v7229_v45, %v7229_v45  ;;  %v7255_v56 = vadd.f32 %v7254_v30, %v7228_v61  ;;  %v7256_v52 = vsel %vm2885_vm13, %v7229_v45, 0.0 }
 0x6ca   : > { %v7232_v39 = vmul.f32 %v13153_v62, %v12715_v60  ;;  %v7259_v35 = vsel %vm2885_vm13, %v7231_v29, 0.0  ;;  %v7233_v32 = vmul.f32 %v13154_v31, %v12714_v63  ;;  %v11952_v49 = vadd.f32 %v8254_v50, %v11867_v8  ;;  %v13214_v62 = vld [vmem:[#allocation76_spill] sm:$0xff] }
 0x6cb   : > { %v7329_v16 = vadd.f32 %v7328_v53, %v7302_v23  ;;  %v7330_v11 = vsel %vm2885_vm13, %v7303_v1, 0.0  ;;  %v7257_v6 = vadd.f32 %v7256_v52, %v7255_v56  ;;  %v7333_v3 = vsel %vm2885_vm13, %v7305_v0, 0.0 }
 0x6cc   : > { %v11956_v61 = vadd.f32 %v8255_v22, %v11857_v46  ;;  %v7306_v45 = vmul.f32 %v7232_v39, %v7232_v39  ;;  %v7307_v30 = vmul.f32 %v7233_v32, %v7233_v32  ;;  %v12713_v23 = vmax.f32 %v11952_v49, 0.0 }
 0x6cd   : > { %v7331_v2 = vadd.f32 %v7330_v11, %v7329_v16  ;;  %v7258_v40 = vadd.f32 %v7257_v6, %v7230_v37  ;;  %v7262_v52 = vsel %vm2885_vm13, %v7233_v32, 0.0 }
 0x6ce   : > { %13155 = vst [vmem:[#allocation47_spill] sm:$0xff] %v11956_v61  ;;  %v12711_v50 = vmax.f32 %v11956_v61, 0.0  ;;  %v7336_v37 = vsel %vm2885_vm13, %v7307_v30, 0.0 }
 0x6cf   : > { %v7332_v54 = vadd.f32 %v7331_v2, %v7304_v24  ;;  %v7260_v14 = vadd.f32 %v7259_v35, %v7258_v40  ;;  %v13156_v2 = vld [vmem:[#allocation22_spill] sm:$0xff] }
 0x6d0   : > { %v7234_v40 = vmul.f32 %v13156_v2, %v12713_v23 }
 0x6d1   : > { %v7334_v36 = vadd.f32 %v7333_v3, %v7332_v54  ;;  %v7261_v53 = vadd.f32 %v7260_v14, %v7232_v39 }
 0x6d2   : > { %v7308_v35 = vmul.f32 %v7234_v40, %v7234_v40 }
 0x6d3   : > { %v7335_v11 = vadd.f32 %v7334_v36, %v7306_v45  ;;  %v7263_v29 = vadd.f32 %v7262_v52, %v7261_v53 }
 0x6d5   : > { %v7337_v0 = vadd.f32 %v7336_v37, %v7335_v11  ;;  %v7264_v39 = vadd.f32 %v7263_v29, %v7234_v40  ;;  %v13162_v11 = vld [vmem:[#allocation25_spill] sm:$0xff] }
 0x6d7   : > { %v7338_v45 = vadd.f32 %v7337_v0, %v7308_v35  ;;  %v13163_v0 = vld [vmem:[#allocation26_spill] sm:$0xff] }
 0x6e2   : > { %v6771_v43 = vpop.f32.mrb[80].mxu1 }
 0x6e3   : > { %v11960_v1 = vadd.f32 %v6771_v43, %v11849_v4  ;;  %v6773_v56 = vpop.f32.mrb[81].mxu1  ;;  %v13157_v4 = vld [vmem:[#allocation24_spill] sm:$0xff] }
 0x6e4   : > { %v11965_v16 = vadd.f32 %v6773_v56, %v11851_v57  ;;  %v6775_v22 = vpop.f32.mrb[82].mxu1  ;;  %v7235_v24 = vmul.f32 %v13157_v4, %v12711_v50 }
 0x6e5   : > { %v6776_v6 = vpop.f32.mrb[83].mxu1 }
 0x6e6   : > { %v7309_v14 = vmul.f32 %v7235_v24, %v7235_v24  ;;  %v7265_v56 = vsel %vm2885_vm13, %v7235_v24, 0.0 }
 0x6e7   : > { %v7266_v37 = vadd.f32 %v7265_v56, %v7264_v39  ;;  %v13165_v56 = vld [vmem:[#allocation30_spill] sm:$0xff] }
 0x6e8   : > { %v7339_v40 = vsel %vm2885_vm13, %v7309_v14, 0.0 }
 0x6ea   : > { %v7097_v54 = vpop.f32.mrb[40].mxu1 }
 0x6eb   : > { %v11975_v57 = vadd.f32 %v11867_v8, %v7097_v54  ;;  %v7099_v32 = vpop.f32.mrb[41].mxu1 }
 0x6ec   : > { %v11978_v3 = vadd.f32 %v11857_v46, %v7099_v32  ;;  %v7101_v36 = vpop.f32.mrb[42].mxu1 }
 0x6ed   : > { %13158 = vst [vmem:[#allocation48_spill] sm:$0xff] %v11975_v57  ;;  %v12712_v30 = vmax.f32 %v11975_v57, 0.0  ;;  %v11982_v43 = vadd.f32 %v11867_v8, %v7101_v36  ;;  %v7103_v53 = vpop.f32.mrb[43].mxu1  ;;  %v7340_v36 = vadd.f32 %v7339_v40, %v7338_v45 }
 0x6ee   : > { %13159 = vst [vmem:[#allocation52_spill] sm:$0xff] %v11978_v3  ;;  %v12716_v52 = vmax.f32 %v11978_v3, 0.0  ;;  %v11987_v22 = vadd.f32 %v11857_v46, %v7103_v53  ;;  %v13164_v53 = vld [vmem:[#allocation28_spill] sm:$0xff] }
 0x6ef   : > { %13160 = vst [vmem:[#allocation53_spill] sm:$0xff] %v11982_v43  ;;  %v7236_v6 = vmul.f32 %v13162_v11, %v12712_v30  ;;  %v12717_v29 = vmax.f32 %v11982_v43, 0.0 }
 0x6f0   : > { %13161 = vst [vmem:[#allocation54_spill] sm:$0xff] %v11987_v22  ;;  %v7237_v54 = vmul.f32 %v13163_v0, %v12716_v52  ;;  %v12721_v24 = vmax.f32 %v11987_v22, 0.0 }
 0x6f1   : > { %v7267_v35 = vadd.f32 %v7266_v37, %v7236_v6  ;;  %v7310_v32 = vmul.f32 %v7236_v6, %v7236_v6  ;;  %v7238_v50 = vmul.f32 %v13164_v53, %v12717_v29 }
 0x6f2   : > { %v7268_v30 = vsel %vm2885_vm13, %v7237_v54, 0.0  ;;  %v7311_v39 = vmul.f32 %v7237_v54, %v7237_v54  ;;  %v7239_v14 = vmul.f32 %v13165_v56, %v12721_v24  ;;  %v7107_v23 = vpop.f32.mrb[44].mxu1 }
 0x6f3   : > { %v7341_v63 = vadd.f32 %v7340_v36, %v7310_v32  ;;  %v7269_v60 = vadd.f32 %v7268_v30, %v7267_v35  ;;  %v12006_v52 = vadd.f32 %v11867_v8, %v7107_v23  ;;  %v7109_v37 = vpop.f32.mrb[45].mxu1  ;;  %v7312_v6 = vmul.f32 %v7238_v50, %v7238_v50 }
 0x6f4   : > { %v7342_v45 = vsel %vm2885_vm13, %v7311_v39, 0.0  ;;  %v7313_v40 = vmul.f32 %v7239_v14, %v7239_v14  ;;  %v12010_v29 = vadd.f32 %v11857_v46, %v7109_v37  ;;  %v7111_v58 = vpop.f32.mrb[46].mxu1  ;;  %v7271_v23 = vsel %vm2885_vm13, %v7239_v14, 0.0  ;;  %v13170_v37 = vld [vmem:[#allocation31_spill] sm:$0xff] }
 0x6f5   : > { %13166 = vst [vmem:[#allocation55_spill] sm:$0xff] %v12006_v52  ;;  %v7343_v54 = vadd.f32 %v7342_v45, %v7341_v63  ;;  %v7270_v51 = vadd.f32 %v7269_v60, %v7238_v50  ;;  %v12724_v42 = vmax.f32 %v12006_v52, 0.0  ;;  %v12014_v24 = vadd.f32 %v11867_v8, %v7111_v58  ;;  %v7113_v30 = vpop.f32.mrb[47].mxu1  ;;  %v13171_v58 = vld [vmem:[#allocation32_spill] sm:$0xff] }
 0x6f6   : > { %13167 = vst [vmem:[#allocation58_spill] sm:$0xff] %v12010_v29  ;;  %v12728_v35 = vmax.f32 %v12010_v29, 0.0  ;;  %v12019_v32 = vadd.f32 %v11857_v46, %v7113_v30  ;;  %v7345_v50 = vsel %vm2885_vm13, %v7313_v40, 0.0 }
 0x6f7   : > { %13168 = vst [vmem:[#allocation60_spill] sm:$0xff] %v12014_v24  ;;  %v7344_v36 = vadd.f32 %v7343_v54, %v7312_v6  ;;  %v7272_v39 = vadd.f32 %v7271_v23, %v7270_v51  ;;  %v7240_v63 = vmul.f32 %v13170_v37, %v12724_v42  ;;  %v12729_v60 = vmax.f32 %v12014_v24, 0.0  ;;  %v13172_v51 = vld [vmem:[#allocation33_spill] sm:$0xff]  ;;  %v13173_v42 = vld [vmem:[#allocation34_spill] sm:$0xff] }
 0x6f8   : > { %13169 = vst [vmem:[#allocation61_spill] sm:$0xff] %v12019_v32  ;;  %v7241_v45 = vmul.f32 %v13171_v58, %v12728_v35  ;;  %v12730_v14 = vmax.f32 %v12019_v32, 0.0 }
 0x6f9   : > { %v7346_v33 = vadd.f32 %v7345_v50, %v7344_v36  ;;  %v7273_v44 = vadd.f32 %v7272_v39, %v7240_v63  ;;  %v7314_v30 = vmul.f32 %v7240_v63, %v7240_v63  ;;  %v7242_v6 = vmul.f32 %v13172_v51, %v12729_v60 }
 0x6fa   : > { %v7274_v54 = vsel %vm2885_vm13, %v7241_v45, 0.0  ;;  %v7315_v23 = vmul.f32 %v7241_v45, %v7241_v45  ;;  %v7243_v40 = vmul.f32 %v13173_v42, %v12730_v14  ;;  %v7117_v26 = vpop.f32.mrb[48].mxu1 }
 0x6fb   : > { %v7347_v28 = vadd.f32 %v7346_v33, %v7314_v30  ;;  %v7275_v59 = vadd.f32 %v7274_v54, %v7273_v44  ;;  %v12038_v35 = vadd.f32 %v11867_v8, %v7117_v26  ;;  %v7119_v36 = vpop.f32.mrb[49].mxu1  ;;  %v7316_v63 = vmul.f32 %v7242_v6, %v7242_v6 }
 0x6fc   : > { %v7348_v39 = vsel %vm2885_vm13, %v7315_v23, 0.0  ;;  %v7317_v50 = vmul.f32 %v7243_v40, %v7243_v40  ;;  %v12042_v60 = vadd.f32 %v11857_v46, %v7119_v36  ;;  %v7121_v51 = vpop.f32.mrb[50].mxu1  ;;  %v7277_v26 = vsel %vm2885_vm13, %v7243_v40, 0.0  ;;  %v13178_v36 = vld [vmem:[#allocation43_spill] sm:$0xff] }
 0x6fd   : > { %13174 = vst [vmem:[#allocation62_spill] sm:$0xff] %v12038_v35  ;;  %v7349_v45 = vadd.f32 %v7348_v39, %v7347_v28  ;;  %v7276_v58 = vadd.f32 %v7275_v59, %v7242_v6  ;;  %v12731_v37 = vmax.f32 %v12038_v35, 0.0  ;;  %v12046_v14 = vadd.f32 %v11867_v8, %v7121_v51  ;;  %v7123_v44 = vpop.f32.mrb[51].mxu1  ;;  %v13179_v51 = vld [vmem:[#allocation45_spill] sm:$0xff] }
 0x6fe   : > { %13175 = vst [vmem:[#allocation89_spill] sm:$0xff] %v12042_v60  ;;  %v12732_v33 = vmax.f32 %v12042_v60, 0.0  ;;  %v12051_v30 = vadd.f32 %v11857_v46, %v7123_v44  ;;  %v7351_v6 = vsel %vm2885_vm13, %v7317_v50, 0.0  ;;  %v13181_v50 = vld [vmem:[#allocation50_spill] sm:$0xff] }
 0x6ff   : > { %13176 = vst [vmem:[#allocation63_spill] sm:$0xff] %v12046_v14  ;;  %v7350_v54 = vadd.f32 %v7349_v45, %v7316_v63  ;;  %v7278_v23 = vadd.f32 %v7277_v26, %v7276_v58  ;;  %v7244_v28 = vmul.f32 %v13178_v36, %v12731_v37  ;;  %v12733_v59 = vmax.f32 %v12046_v14, 0.0  ;;  %v13180_v45 = vld [vmem:[#allocation49_spill] sm:$0xff]  ;;  %v13238_v14 = vld [vmem:[#allocation88_spill] sm:$0xff] }
 0x700   : > { %13177 = vst [vmem:[#allocation64_spill] sm:$0xff] %v12051_v30  ;;  %v7245_v39 = vmul.f32 %v13179_v51, %v12732_v33  ;;  %v12735_v40 = vmax.f32 %v12051_v30, 0.0  ;;  %v13236_v30 = vld [vmem:[#allocation87_spill] sm:$0xff]  ;;  %v13239_v60 = vmax.f32 %v13238_v14, 0.0 }
 0x701   : > { %v7352_v42 = vadd.f32 %v7351_v6, %v7350_v54  ;;  %v7279_v56 = vadd.f32 %v7278_v23, %v7244_v28  ;;  %v7318_v44 = vmul.f32 %v7244_v28, %v7244_v28  ;;  %v7246_v26 = vmul.f32 %v13180_v45, %v12733_v59 }
 0x702   : > { %v7280_v63 = vsel %vm2885_vm13, %v7245_v39, 0.0  ;;  %v7319_v58 = vmul.f32 %v7245_v39, %v7245_v39  ;;  %v7127_v37 = vpop.f32.mrb[84].mxu1  ;;  %v7247_v0 = vmul.f32 %v13181_v50, %v12735_v40 }
 0x703   : > { %v7353_v36 = vadd.f32 %v7352_v42, %v7318_v44  ;;  %v7281_v53 = vadd.f32 %v7280_v63, %v7279_v56  ;;  %v7158_v33 = vadd.f32 %v7127_v37, %v11960_v1  ;;  %v7129_v51 = vpop.f32.mrb[85].mxu1  ;;  %v7320_v42 = vmul.f32 %v7246_v26, %v7246_v26 }
 0x704   : > { %v7354_v54 = vsel %vm2885_vm13, %v7319_v58, 0.0  ;;  %v7159_v23 = vadd.f32 %v7129_v51, %v11965_v16  ;;  %v7131_v28 = vpop.f32.mrb[86].mxu1  ;;  %v7321_v44 = vmul.f32 %v7247_v0, %v7247_v0  ;;  %v7283_v58 = vsel %vm2885_vm13, %v7247_v0, 0.0  ;;  %v13184_v16 = vld [vmem:[#allocation51_spill] sm:$0xff] }
 0x705   : > { %v7355_v6 = vadd.f32 %v7354_v54, %v7353_v36  ;;  %v12073_v39 = vadd.f32 %v11867_v8, %v7158_v33  ;;  %v7132_v59 = vpop.f32.mrb[87].mxu1  ;;  %v7282_v45 = vadd.f32 %v7281_v53, %v7246_v26  ;;  %v13185_v8 = vld [vmem:[#allocation56_spill] sm:$0xff] }
 0x706   : > { %v12076_v56 = vadd.f32 %v11857_v46, %v7159_v23  ;;  %v7357_v51 = vsel %vm2885_vm13, %v7321_v44, 0.0 }
 0x707   : > { %13182 = vst [vmem:[#allocation90_spill] sm:$0xff] %v12073_v39  ;;  %v12734_v63 = vmax.f32 %v12073_v39, 0.0  ;;  %v7356_v1 = vadd.f32 %v7355_v6, %v7320_v42  ;;  %v7284_v33 = vadd.f32 %v7283_v58, %v7282_v45  ;;  %v13234_v39 = vld [vmem:[#allocation86_spill] sm:$0xff] }
 0x708   : > { %13183 = vst [vmem:[#allocation41_spill] sm:$0xff] %v12076_v56  ;;  %v12736_v37 = vmax.f32 %v12076_v56, 0.0  ;;  %v13232_v56 = vld [vmem:[#allocation85_spill] sm:$0xff] }
 0x709   : > { %v7248_v36 = vmul.f32 %v13184_v16, %v12734_v63  ;;  %v7358_v28 = vadd.f32 %v7357_v51, %v7356_v1 }
 0x70a   : > { %v7249_v53 = vmul.f32 %v13185_v8, %v12736_v37 }
 0x70b   : > { %v7285_v46 = vsel %vm13186_vm14, %v7248_v36, 0.0  ;;  %v7322_v59 = vmul.f32 %v7248_v36, %v7248_v36 }
 0x70c   : > { %v7286_v26 = vadd.f32 %v7285_v46, %v7284_v33  ;;  %v7287_v54 = vsel %vm2923_vm8, %v7249_v53, 0.0  ;;  %v7323_v23 = vmul.f32 %v7249_v53, %v7249_v53 }
 0x70d   : > { %v7359_v0 = vsel %vm13187_vm9, %v7322_v59, 0.0 }
 0x70e   : > { %v7288_v6 = vadd.f32 %v7287_v54, %v7286_v26  ;;  %v7360_v42 = vadd.f32 %v7359_v0, %v7358_v28  ;;  %v7361_v63 = vsel %vm2923_vm8, %v7323_v23, 0.0  ;;  %v13190_v23 = vld [vmem:[#allocation59_spill] sm:$0xff] }
 0x70f   : > { %v13191_v28 = vmax.f32 %v13190_v23, 0.0 }
 0x710   : > { %7289 = vadd.xlane.f32.xlu0 %v7288_v6  ;;  %v7362_v40 = vadd.f32 %v7361_v63, %v7360_v42  ;;  %v13192_v6 = vld [vmem:[#allocation65_spill] sm:$0xff] }
 0x711   : > { %v13193_v42 = vmax.f32 %v13192_v6, 0.0 }
 0x712   : > { %7363 = vadd.xlane.f32.xlu1 %v7362_v40 }
 0x79d   : > { %v7290_v45 = vpop.xlane.xlu0 %7289 }
 0x79e   : > { %v7291_v58 = vrot.slane %v7290_v45, 4 }
 0x79f   : > { %v7364_v37 = vpop.xlane.xlu1 %7363 }
 0x7a0   : > { %v7292_v36 = vadd.f32 %v7291_v58, %v7290_v45  ;;  %v7365_v8 = vrot.slane %v7364_v37, 4  ;;  %v13194_v58 = vld [vmem:[#allocation66_spill] sm:$0xff] }
 0x7a2   : > { %v7293_v44 = vrot.slane %v7292_v36, 2  ;;  %v7366_v33 = vadd.f32 %v7365_v8, %v7364_v37  ;;  %v3683_v37 = vstv %s11188_s24 }
 0x7a3   : > { %v3685_v0 = vsub.f32 %v13191_v28, %v3683_v37  ;;  %v3686_v45 = vsub.f32 %v13193_v42, %v3683_v37  ;;  %v13204_v28 = vld [vmem:[#allocation71_spill] sm:$0xff]  ;;  %v13206_v42 = vld [vmem:[#allocation72_spill] sm:$0xff]  ;;  %v3705_v12 = vsub.f32 %v13231_v25, %v3683_v37  ;;  %v3709_v35 = vsub.f32 %v13239_v60, %v3683_v37 }
 0x7a4   : > { %v7294_v46 = vadd.f32 %v7293_v44, %v7292_v36  ;;  %v7367_v16 = vrot.slane %v7366_v33, 2  ;;  %v13195_v36 = vmax.f32 %v13194_v58, 0.0  ;;  %v13205_v50 = vmax.f32 %v13204_v28, 0.0  ;;  %v13218_v28 = vld [vmem:[#allocation78_spill] sm:$0xff] }
 0x7a5   : > { %v13207_v11 = vmax.f32 %v13206_v42, 0.0  ;;  %v13220_v42 = vld [vmem:[#allocation79_spill] sm:$0xff] }
 0x7a6   : > { %v7368_v53 = vadd.f32 %v7367_v16, %v7366_v33  ;;  %v7295_v1 = vrot.slane %v7294_v46, 1  ;;  %v13188_v16 = vld [vmem:[#allocation57_spill] sm:$0xff]  ;;  %v3687_v44 = vsub.f32 %v13195_v36, %v3683_v37  ;;  %v13196_v33 = vld [vmem:[#allocation67_spill] sm:$0xff]  ;;  %v3692_v6 = vsub.f32 %v13205_v50, %v3683_v37 }
 0x7a7   : > { %v13189_v8 = vmax.f32 %v13188_v16, 0.0  ;;  %v13202_v16 = vld [vmem:[#allocation70_spill] sm:$0xff]  ;;  %v3693_v58 = vsub.f32 %v13207_v11, %v3683_v37  ;;  %v13208_v36 = vld [vmem:[#allocation73_spill] sm:$0xff]  ;;  %v13219_v50 = vmax.f32 %v13218_v28, 0.0  ;;  %v13221_v11 = vmax.f32 %v13220_v42, 0.0 }
 0x7a8   : > { %v7296_v51 = vadd.f32 %v7295_v1, %v7294_v46  ;;  %v7369_v59 = vrot.slane %v7368_v53, 1  ;;  %v13197_v46 = vmax.f32 %v13196_v33, 0.0  ;;  %v13198_v1 = vld [vmem:[#allocation68_spill] sm:$0xff]  ;;  %v13209_v4 = vmax.f32 %v13208_v36, 0.0  ;;  %v3779_v28 = vld [vmem:[%s12480_s12] sm:$0x3] }
 0x7a9   : > { %v3684_v54 = vsub.f32 %v13189_v8, %v3683_v37  ;;  %v13203_v8 = vmax.f32 %v13202_v16, 0.0  ;;  %v13216_v16 = vld [vmem:[#allocation77_spill] sm:$0xff]  ;;  %v3699_v10 = vsub.f32 %v13219_v50, %v3683_v37  ;;  %v3700_v7 = vsub.f32 %v13221_v11, %v3683_v37  ;;  %v13228_v50 = vld [vmem:[#allocation83_spill] sm:$0xff] }
 0x7aa   : > { %8642 = vpush %v7296_v51  ;;  %v7370_v26 = vadd.f32 %v7369_v59, %v7368_v53  ;;  %v3688_v53 = vsub.f32 %v13197_v46, %v3683_v37  ;;  %v13199_v51 = vmax.f32 %v13198_v1, 0.0  ;;  %v3694_v33 = vsub.f32 %v13209_v4, %v3683_v37  ;;  %v13210_v46 = vld [vmem:[#allocation74_spill] sm:$0xff]  ;;  %v3741_v4 = vld [vmem:[%s12479_s11] sm:$0x3] }
 0x7ab   : > { %v3691_v23 = vsub.f32 %v13203_v8, %v3683_v37  ;;  %v13211_v2 = vmax.f32 %v13210_v46, 0.0  ;;  %v13217_v8 = vmax.f32 %v13216_v16, 0.0  ;;  %v13229_v42 = vmax.f32 %v13228_v50, 0.0 }
 0x7ac   : > { %8644 = vpush %v7370_v26  ;;  %v3689_v59 = vsub.f32 %v13199_v51, %v3683_v37  ;;  %v13200_v26 = vld [vmem:[#allocation69_spill] sm:$0xff]  ;;  %v13212_v51 = vld [vmem:[#allocation75_spill] sm:$0xff]  ;;  %v3746_v32 = vrot.slane %v3741_v4, %v13144_v18  ;;  %v3750_v50 = vrot.slane %v3741_v4, %v13143_v41  ;;  %v12162_v25 = vrot.slane %v3779_v28, %v13144_v18 }
 0x7ad   : > { %v3695_v1 = vsub.f32 %v13211_v2, %v3683_v37  ;;  %v13213_v31 = vmax.f32 %v13212_v51, 0.0  ;;  %v3698_v34 = vsub.f32 %v13217_v8, %v3683_v37  ;;  %v13222_v2 = vld [vmem:[#allocation80_spill] sm:$0xff]  ;;  %v3714_v8 = vstv %s12092_s30 }
 0x7ae   : > { %v13223_v36 = vmax.f32 %v13222_v2, 0.0  ;;  %v3704_v11 = vsub.f32 %v13229_v42, %v3683_v37  ;;  %v13233_v2 = vmax.f32 %v13232_v56, 0.0  ;;  %v3715_v42 = vmul.f32 %v3714_v8, %v3684_v54 }
 0x7af   : > { %v3716_v24 = vmul.f32 %v3714_v8, %v3685_v0  ;;  %v12165_v20 = vrot.slane %v3779_v28, %v13143_v41  ;;  %v3718_v56 = vmul.f32 %v3714_v8, %v3687_v44  ;;  %v3723_v14 = vmul.f32 %v3714_v8, %v3692_v6 }
 0x7b0   : > { %v3701_v46 = vsub.f32 %v13223_v36, %v3683_v37  ;;  %v3706_v36 = vsub.f32 %v13233_v2, %v3683_v37  ;;  %v3719_v2 = vmul.f32 %v3714_v8, %v3688_v53  ;;  %v3724_v60 = vmul.f32 %v3714_v8, %v3693_v58 }
 0x7b1   : > { %v3726_v29 = vmul.f32 %v3714_v8, %v3695_v1  ;;  %v3729_v54 = vmul.f32 %v3714_v8, %v3698_v34  ;;  %v3730_v0 = vmul.f32 %v3714_v8, %v3699_v10  ;;  %v3731_v22 = vmul.f32 %v3714_v8, %v3700_v7 }
 0x7b2   : > { %v3732_v43 = vmul.f32 %v3714_v8, %v3701_v46  ;;  %v3735_v28 = vmul.f32 %v3714_v8, %v3704_v11  ;;  %v3736_v61 = vmul.f32 %v3714_v8, %v3705_v12  ;;  %v3756_v58 = vmul.f32 %v3750_v50, %v3718_v56 }
 0x7b3   : > { %v3761_v34 = vmul.f32 %v3746_v32, %v3723_v14  ;;  %v3762_v10 = vmul.f32 %v3750_v50, %v3724_v60  ;;  %v3764_v46 = vmul.f32 %v3750_v50, %v3726_v29  ;;  %v3767_v11 = vmul.f32 %v3746_v32, %v3729_v54 }
 0x7b4   : > { %v3768_v12 = vmul.f32 %v3750_v50, %v3730_v0 }
 0x7b5   : > { %v12192_v29 = vadd.f32 %v12162_v25, %v3761_v34 }
 0x7db   : > { %s8643_s16 = spop %8642 }
 0x7dc   : > { %s12094_s29 = smul.f32 0.00012207031, %s8643_s16 }
 0x7dd   : > { %s8645_s14 = spop %8644 }
 0x7de   : > { %s7378_s15 = smul.f32 %s12094_s29, %s12094_s29 }
 0x7df   : > { %s7377_s27 = smul.f32 0.00012207031, %s8645_s14 }
 0x7e0   : > { %s8629_s14 = smul.u32 208, %s13334_s26 }
 0x7e1   : > { %s7379_s17 = ssub.f32 %s7377_s27, %s7378_s15 }
 0x7e2   : > { %s12394_s27 = scalar_lea.vmem %s12481_s13, %s8629_s14 }
 0x7e3   : > { %s7380_s18 = smax.f32 %s9214_s21, %s7379_s17 }
 0x7e4   : > { %s7408_s19 = sadd.f32 1e-05, %s7380_s18 }
 0x7e6   : > { %v7409_v40 = vstv %s7408_s19 }
 0x7e7   : > { %9112 = vrsqrt.f32 %v7409_v40  ;;  %v13201_v40 = vmax.f32 %v13200_v26, 0.0  ;;  %v3696_v26 = vsub.f32 %v13213_v31, %v3683_v37  ;;  %v13224_v31 = vld [vmem:[#allocation81_spill] sm:$0xff] }
 0x7e8   : > { %v13225_v51 = vmax.f32 %v13224_v31, 0.0  ;;  %v13235_v31 = vmax.f32 %v13234_v39, 0.0  ;;  %v3717_v39 = vmul.f32 %v3714_v8, %v3686_v45  ;;  %v3737_v45 = vmul.f32 %v3714_v8, %v3706_v36 }
 0x7e9   : > { %v3727_v52 = vmul.f32 %v3714_v8, %v3696_v26  ;;  %v3769_v36 = vmul.f32 %v3746_v32, %v3731_v22  ;;  %v12177_v22 = vadd.f32 %v12165_v20, %v3756_v58 }
 0x7ea   : > { %v3755_v6 = vmul.f32 %v3746_v32, %v3717_v39 }
 0x7eb   : > { %v12216_v54 = vadd.f32 %v12162_v25, %v3769_v36  ;;  %v13257_v36 = vmax.f32 %v11895_v38, 0.0  ;;  %v13264_v38 = vld [vmem:[#allocation47_spill] sm:$0xff] }
 0x7ed   : > { %13243 = vst [vmem:[#allocation36_spill] sm:$0xff] %v12216_v54 }
 0x7f1   : > { %v9113_v63 = vpop.eup %9112 }
 0x7f2   : > { %8646 = vpush %v9113_v63  ;;  %v3690_v63 = vsub.f32 %v13201_v40, %v3683_v37  ;;  %v13215_v40 = vmax.f32 %v13214_v62, 0.0  ;;  %v3702_v62 = vsub.f32 %v13225_v51, %v3683_v37  ;;  %v3707_v51 = vsub.f32 %v13235_v31, %v3683_v37 }
 0x7f4   : > { %v3697_v21 = vsub.f32 %v13215_v40, %v3683_v37  ;;  %v13226_v40 = vld [vmem:[#allocation82_spill] sm:$0xff]  ;;  %v3721_v31 = vmul.f32 %v3714_v8, %v3690_v63  ;;  %v3733_v3 = vmul.f32 %v3714_v8, %v3702_v62  ;;  %v3738_v44 = vmul.f32 %v3714_v8, %v3707_v51 }
 0x7f5   : > { %v13227_v47 = vmax.f32 %v13226_v40, 0.0  ;;  %v13237_v40 = vmax.f32 %v13236_v30, 0.0  ;;  %v3720_v30 = vmul.f32 %v3714_v8, %v3689_v59  ;;  %v3740_v59 = vmul.f32 %v3714_v8, %v3709_v35 }
 0x7f6   : > { %v3728_v4 = vmul.f32 %v3714_v8, %v3697_v21  ;;  %v3753_v63 = vmul.f32 %v3746_v32, %v3715_v42  ;;  %v3759_v26 = vmul.f32 %v3746_v32, %v3721_v31  ;;  %v3765_v62 = vmul.f32 %v3746_v32, %v3727_v52 }
 0x7f7   : > { %v3703_v16 = vsub.f32 %v13227_v47, %v3683_v37  ;;  %v3708_v47 = vsub.f32 %v13237_v40, %v3683_v37  ;;  %v3722_v40 = vmul.f32 %v3714_v8, %v3691_v23  ;;  %v3725_v37 = vmul.f32 %v3714_v8, %v3694_v33 }
 0x7f8   : > { %v3754_v23 = vmul.f32 %v3750_v50, %v3716_v24  ;;  %v3757_v33 = vmul.f32 %v3746_v32, %v3719_v2  ;;  %v3758_v1 = vmul.f32 %v3750_v50, %v3720_v30  ;;  %v3770_v51 = vmul.f32 %v3750_v50, %v3732_v43 }
 0x7f9   : > { %v3734_v57 = vmul.f32 %v3714_v8, %v3703_v16  ;;  %v3739_v53 = vmul.f32 %v3714_v8, %v3708_v47  ;;  %v3760_v21 = vmul.f32 %v3750_v50, %v3722_v40  ;;  %v3763_v7 = vmul.f32 %v3746_v32, %v3725_v37 }
 0x7fa   : > { %v3766_v16 = vmul.f32 %v3750_v50, %v3728_v4  ;;  %v3771_v47 = vmul.f32 %v3746_v32, %v3733_v3  ;;  %v3773_v8 = vmul.f32 %v3746_v32, %v3735_v28  ;;  %v3774_v24 = vmul.f32 %v3750_v50, %v3736_v61  ;;  %v7439_v28 = vld [vmem:[%s12475_s7] sm:$0x3] }
 0x7fb   : > { %v3772_v35 = vmul.f32 %v3750_v50, %v3734_v57  ;;  %v3775_v42 = vmul.f32 %v3746_v32, %v3737_v45  ;;  %v3776_v39 = vmul.f32 %v3750_v50, %v3738_v44  ;;  %v3777_v56 = vmul.f32 %v3746_v32, %v3739_v53  ;;  %v7477_v45 = vld [vmem:[%s12476_s8] sm:$0x3] }
 0x7fc   : > { %v3778_v2 = vmul.f32 %v3750_v50, %v3740_v59  ;;  %v12168_v30 = vadd.f32 %v12162_v25, %v3753_v63  ;;  %v12171_v31 = vadd.f32 %v12165_v20, %v3754_v23  ;;  %v12174_v52 = vadd.f32 %v12162_v25, %v3755_v6 }
 0x7fd   : > { %v12180_v57 = vadd.f32 %v12162_v25, %v3757_v33  ;;  %v12183_v61 = vadd.f32 %v12165_v20, %v3758_v1  ;;  %v12186_v3 = vadd.f32 %v12162_v25, %v3759_v26  ;;  %v12189_v43 = vadd.f32 %v12165_v20, %v3760_v21 }
 0x7fe   : > { %v12195_v32 = vadd.f32 %v12165_v20, %v3762_v10  ;;  %v12198_v50 = vadd.f32 %v12162_v25, %v3763_v7  ;;  %v12201_v40 = vadd.f32 %v12165_v20, %v3764_v46  ;;  %v12204_v14 = vadd.f32 %v12162_v25, %v3765_v62 }
 0x7ff   : > { %v12207_v60 = vadd.f32 %v12165_v20, %v3766_v16  ;;  %v12210_v37 = vadd.f32 %v12162_v25, %v3767_v11  ;;  %v12213_v4 = vadd.f32 %v12165_v20, %v3768_v12  ;;  %v12219_v0 = vadd.f32 %v12165_v20, %v3770_v51 }
 0x800   : > { %v12228_v44 = vadd.f32 %v12162_v25, %v3771_v47  ;;  %v12231_v53 = vadd.f32 %v12165_v20, %v3772_v35  ;;  %v12234_v59 = vadd.f32 %v12162_v25, %v3773_v8  ;;  %v7381_v63 = vstv %s12094_s29 }
 0x801   : > { %13240 = vst [vmem:[#allocation29_spill] sm:$0xff] %v12207_v60  ;;  %13241 = vst [vmem:[#allocation27_spill] sm:$0xff] %v12210_v37  ;;  %v12238_v23 = vadd.f32 %v12165_v20, %v3774_v24  ;;  %v12241_v6 = vadd.f32 %v12162_v25, %v3775_v42  ;;  %v12244_v58 = vadd.f32 %v12165_v20, %v3776_v39  ;;  %v13253_v10 = vmax.f32 %v11871_v48, 0.0 }
 0x802   : > { %13242 = vst [vmem:[#allocation35_spill] sm:$0xff] %v12213_v4  ;;  %13244 = vst [vmem:[#allocation37_spill] sm:$0xff] %v12219_v0  ;;  %v12247_v33 = vadd.f32 %v12162_v25, %v3777_v56  ;;  %v12250_v1 = vadd.f32 %v12165_v20, %v3778_v2  ;;  %v12253_v26 = vrot.slane %v7439_v28, %v13144_v18  ;;  %v13254_v46 = vmax.f32 %v11863_v13, 0.0 }
 0x803   : > { %13245 = vst [vmem:[#allocation38_spill] sm:$0xff] %v12228_v44  ;;  %13246 = vst [vmem:[#allocation46_spill] sm:$0xff] %v12231_v53  ;;  %v12256_v21 = vrot.slane %v7439_v28, %v13143_v41  ;;  %v12259_v34 = vrot.slane %v7477_v45, %v13144_v18  ;;  %v7382_v7 = vsub.f32 %v13253_v10, %v7381_v63  ;;  %v13255_v25 = vmax.f32 %v11881_v55, 0.0 }
 0x804   : > { %13247 = vst [vmem:[#allocation44_spill] sm:$0xff] %v12234_v59  ;;  %13248 = vst [vmem:[#allocation23_spill] sm:$0xff] %v12238_v23  ;;  %v7383_v62 = vsub.f32 %v13254_v46, %v7381_v63  ;;  %v12268_v20 = vrot.slane %v7477_v45, %v13143_v41  ;;  %v13256_v11 = vmax.f32 %v11884_v19, 0.0  ;;  %v7386_v51 = vsub.f32 %v13257_v36, %v7381_v63 }
 0x805   : > { %13249 = vst [vmem:[#allocation20_spill] sm:$0xff] %v12241_v6  ;;  %13250 = vst [vmem:[#allocation42_spill] sm:$0xff] %v12244_v58  ;;  %v7384_v16 = vsub.f32 %v13255_v25, %v7381_v63  ;;  %v13258_v18 = vmax.f32 %v11900_v17, 0.0  ;;  %v13259_v48 = vmax.f32 %v11920_v9, 0.0  ;;  %v13260_v13 = vmax.f32 %v11924_v5, 0.0  ;;  %v13266_v17 = vld [vmem:[#allocation48_spill] sm:$0xff] }
 0x806   : > { %13251 = vst [vmem:[#allocation39_spill] sm:$0xff] %v12247_v33  ;;  %13252 = vst [vmem:[#allocation40_spill] sm:$0xff] %v12250_v1  ;;  %v7385_v12 = vsub.f32 %v13256_v11, %v7381_v63  ;;  %v13261_v55 = vmax.f32 %v11930_v15, 0.0  ;;  %v13262_v41 = vmax.f32 %v11934_v27, 0.0  ;;  %v13263_v19 = vmax.f32 %v11952_v49, 0.0  ;;  %v13268_v9 = vld [vmem:[#allocation52_spill] sm:$0xff] }
 0x807   : > { %v7387_v47 = vsub.f32 %v13258_v18, %v7381_v63  ;;  %v7388_v35 = vsub.f32 %v13259_v48, %v7381_v63  ;;  %v7389_v8 = vsub.f32 %v13260_v13, %v7381_v63  ;;  %v13265_v56 = vmax.f32 %v13264_v38, 0.0  ;;  %v13270_v5 = vld [vmem:[#allocation53_spill] sm:$0xff]  ;;  %v13272_v15 = vld [vmem:[#allocation54_spill] sm:$0xff]  ;;  %v13274_v27 = vld [vmem:[#allocation55_spill] sm:$0xff] }
 0x808   : > { %v7390_v24 = vsub.f32 %v13261_v55, %v7381_v63  ;;  %v7391_v42 = vsub.f32 %v13262_v41, %v7381_v63  ;;  %v7392_v39 = vsub.f32 %v13263_v19, %v7381_v63  ;;  %v13267_v28 = vmax.f32 %v13266_v17, 0.0  ;;  %v13276_v49 = vld [vmem:[#allocation58_spill] sm:$0xff]  ;;  %v13278_v19 = vld [vmem:[#allocation60_spill] sm:$0xff]  ;;  %v13280_v17 = vld [vmem:[#allocation61_spill] sm:$0xff] }
 0x809   : > { %v7393_v2 = vsub.f32 %v13265_v56, %v7381_v63  ;;  %v13269_v10 = vmax.f32 %v13268_v9, 0.0  ;;  %v13271_v25 = vmax.f32 %v13270_v5, 0.0  ;;  %v13273_v36 = vmax.f32 %v13272_v15, 0.0  ;;  %v13282_v9 = vld [vmem:[#allocation62_spill] sm:$0xff]  ;;  %v13284_v5 = vld [vmem:[#allocation89_spill] sm:$0xff]  ;;  %v13286_v15 = vld [vmem:[#allocation63_spill] sm:$0xff] }
 0x80a   : > { %v7394_v45 = vsub.f32 %v13267_v28, %v7381_v63  ;;  %v13275_v48 = vmax.f32 %v13274_v27, 0.0  ;;  %v13277_v55 = vmax.f32 %v13276_v49, 0.0  ;;  %v13279_v38 = vmax.f32 %v13278_v19, 0.0  ;;  %v13288_v27 = vld [vmem:[#allocation64_spill] sm:$0xff] }
 0x80b   : > { %v7395_v46 = vsub.f32 %v13269_v10, %v7381_v63  ;;  %v7396_v11 = vsub.f32 %v13271_v25, %v7381_v63  ;;  %v7397_v18 = vsub.f32 %v13273_v36, %v7381_v63  ;;  %v13281_v28 = vmax.f32 %v13280_v17, 0.0 }
 0x80c   : > { %v7398_v13 = vsub.f32 %v13275_v48, %v7381_v63  ;;  %v7399_v41 = vsub.f32 %v13277_v55, %v7381_v63  ;;  %v7400_v56 = vsub.f32 %v13279_v38, %v7381_v63  ;;  %v13283_v10 = vmax.f32 %v13282_v9, 0.0  ;;  %v13290_v55 = vld [vmem:[#allocation90_spill] sm:$0xff]  ;;  %v13292_v38 = vld [vmem:[#allocation41_spill] sm:$0xff] }
 0x80d   : > { %v7401_v1 = vsub.f32 %v13281_v28, %v7381_v63  ;;  %v13285_v25 = vmax.f32 %v13284_v5, 0.0  ;;  %v13287_v36 = vmax.f32 %v13286_v15, 0.0  ;;  %v13289_v48 = vmax.f32 %v13288_v27, 0.0 }
 0x80e   : > { %v7402_v33 = vsub.f32 %v13283_v10, %v7381_v63  ;;  %v13291_v23 = vmax.f32 %v13290_v55, 0.0  ;;  %v13293_v59 = vmax.f32 %v13292_v38, 0.0 }
 0x80f   : > { %v7403_v58 = vsub.f32 %v13285_v25, %v7381_v63  ;;  %v7404_v6 = vsub.f32 %v13287_v36, %v7381_v63  ;;  %v7405_v49 = vsub.f32 %v13289_v48, %v7381_v63 }
 0x810   : > { %v7406_v19 = vsub.f32 %v13291_v23, %v7381_v63  ;;  %v7407_v17 = vsub.f32 %v13293_v59, %v7381_v63 }
 0x823   : > { %s8647_s29 = spop %8646 }
 0x824   : > { %v7412_v28 = vstv %s8647_s29 }
 0x825   : > { %v7413_v53 = vmul.f32 %v7412_v28, %v7382_v7  ;;  %v7414_v9 = vmul.f32 %v7412_v28, %v7383_v62  ;;  %v7415_v10 = vmul.f32 %v7412_v28, %v7384_v16  ;;  %v7416_v44 = vmul.f32 %v7412_v28, %v7385_v12 }
 0x826   : > { %v7417_v5 = vmul.f32 %v7412_v28, %v7386_v51  ;;  %v7418_v25 = vmul.f32 %v7412_v28, %v7387_v47  ;;  %v7419_v0 = vmul.f32 %v7412_v28, %v7388_v35  ;;  %v7420_v15 = vmul.f32 %v7412_v28, %v7389_v8 }
 0x827   : > { %v7421_v36 = vmul.f32 %v7412_v28, %v7390_v24  ;;  %v7422_v54 = vmul.f32 %v7412_v28, %v7391_v42  ;;  %v7423_v4 = vmul.f32 %v7412_v28, %v7392_v39  ;;  %v7424_v27 = vmul.f32 %v7412_v28, %v7393_v2 }
 0x828   : > { %v7425_v48 = vmul.f32 %v7412_v28, %v7394_v45  ;;  %v7426_v37 = vmul.f32 %v7412_v28, %v7395_v46  ;;  %v7427_v55 = vmul.f32 %v7412_v28, %v7396_v11  ;;  %v7428_v23 = vmul.f32 %v7412_v28, %v7397_v18 }
 0x829   : > { %v7429_v60 = vmul.f32 %v7412_v28, %v7398_v13  ;;  %v7430_v38 = vmul.f32 %v7412_v28, %v7399_v41  ;;  %v7431_v59 = vmul.f32 %v7412_v28, %v7400_v56  ;;  %v7432_v63 = vmul.f32 %v7412_v28, %v7401_v1 }
 0x82a   : > { %v7433_v7 = vmul.f32 %v7412_v28, %v7402_v33  ;;  %v7434_v62 = vmul.f32 %v7412_v28, %v7403_v58  ;;  %v7435_v16 = vmul.f32 %v7412_v28, %v7404_v6  ;;  %v7436_v12 = vmul.f32 %v7412_v28, %v7405_v49 }
 0x82b   : > { %v7437_v51 = vmul.f32 %v7412_v28, %v7406_v19  ;;  %v7438_v47 = vmul.f32 %v7412_v28, %v7407_v17  ;;  %v7451_v35 = vmul.f32 %v12253_v26, %v7413_v53  ;;  %v7452_v8 = vmul.f32 %v12256_v21, %v7414_v9 }
 0x82c   : > { %v7453_v24 = vmul.f32 %v12253_v26, %v7415_v10  ;;  %v7454_v42 = vmul.f32 %v12256_v21, %v7416_v44  ;;  %v7455_v39 = vmul.f32 %v12253_v26, %v7417_v5  ;;  %v7456_v2 = vmul.f32 %v12256_v21, %v7418_v25 }
 0x82d   : > { %v7457_v1 = vmul.f32 %v12253_v26, %v7419_v0  ;;  %v7458_v58 = vmul.f32 %v12256_v21, %v7420_v15  ;;  %v7459_v6 = vmul.f32 %v12253_v26, %v7421_v36  ;;  %v7460_v33 = vmul.f32 %v12256_v21, %v7422_v54 }
 0x82e   : > { %v7461_v53 = vmul.f32 %v12253_v26, %v7423_v4  ;;  %v7462_v45 = vmul.f32 %v12256_v21, %v7424_v27  ;;  %v7463_v46 = vmul.f32 %v12253_v26, %v7425_v48  ;;  %v7464_v44 = vmul.f32 %v12256_v21, %v7426_v37 }
 0x82f   : > { %v7465_v11 = vmul.f32 %v12253_v26, %v7427_v55  ;;  %v7466_v18 = vmul.f32 %v12256_v21, %v7428_v23  ;;  %v7467_v0 = vmul.f32 %v12253_v26, %v7429_v60  ;;  %v7468_v13 = vmul.f32 %v12256_v21, %v7430_v38 }
 0x830   : > { %v7469_v41 = vmul.f32 %v12253_v26, %v7431_v59  ;;  %v7470_v54 = vmul.f32 %v12256_v21, %v7432_v63  ;;  %v7471_v4 = vmul.f32 %v12253_v26, %v7433_v7  ;;  %v7472_v56 = vmul.f32 %v12256_v21, %v7434_v62 }
 0x831   : > { %v7473_v49 = vmul.f32 %v12253_v26, %v7435_v16  ;;  %v7474_v37 = vmul.f32 %v12256_v21, %v7436_v12  ;;  %v7475_v19 = vmul.f32 %v12253_v26, %v7437_v51  ;;  %v7476_v17 = vmul.f32 %v12256_v21, %v7438_v47 }
 0x832   : > { %v7489_v60 = vadd.f32 %v12259_v34, %v7451_v35  ;;  %v7490_v28 = vadd.f32 %v12268_v20, %v7452_v8  ;;  %v7491_v9 = vadd.f32 %v12259_v34, %v7453_v24  ;;  %v7492_v10 = vadd.f32 %v12268_v20, %v7454_v42 }
 0x833   : > { %v7493_v5 = vadd.f32 %v12259_v34, %v7455_v39  ;;  %v7494_v25 = vadd.f32 %v12268_v20, %v7456_v2  ;;  %v7495_v15 = vadd.f32 %v12259_v34, %v7457_v1  ;;  %v7496_v36 = vadd.f32 %v12268_v20, %v7458_v58 }
 0x834   : > { %v7497_v26 = vadd.f32 %v12259_v34, %v7459_v6  ;;  %v7498_v21 = vadd.f32 %v12268_v20, %v7460_v33  ;;  %v7499_v27 = vadd.f32 %v12259_v34, %v7461_v53  ;;  %v7500_v48 = vadd.f32 %v12268_v20, %v7462_v45 }
 0x835   : > { %v7501_v55 = vadd.f32 %v12259_v34, %v7463_v46  ;;  %v7502_v23 = vadd.f32 %v12268_v20, %v7464_v44  ;;  %v7503_v38 = vadd.f32 %v12259_v34, %v7465_v11  ;;  %v7504_v59 = vadd.f32 %v12268_v20, %v7466_v18  ;;  %v13297_v11 = vld [vmem:[#allocation36_spill] sm:$0xff]  ;;  %v13298_v18 = vld [vmem:[#allocation37_spill] sm:$0xff] }
 0x836   : > { %v7505_v63 = vadd.f32 %v12259_v34, %v7467_v0  ;;  %v7506_v7 = vadd.f32 %v12268_v20, %v7468_v13  ;;  %v7507_v62 = vadd.f32 %v12259_v34, %v7469_v41  ;;  %v7508_v16 = vadd.f32 %v12268_v20, %v7470_v54  ;;  %v13299_v0 = vld [vmem:[#allocation38_spill] sm:$0xff]  ;;  %v13301_v41 = vld [vmem:[#allocation44_spill] sm:$0xff]  ;;  %v13302_v54 = vld [vmem:[#allocation23_spill] sm:$0xff] }
 0x837   : > { %v7509_v12 = vadd.f32 %v12259_v34, %v7471_v4  ;;  %v7510_v51 = vadd.f32 %v12268_v20, %v7472_v56  ;;  %v7511_v47 = vadd.f32 %v12259_v34, %v7473_v49  ;;  %v7512_v35 = vadd.f32 %v12268_v20, %v7474_v37  ;;  %v13300_v13 = vld [vmem:[#allocation46_spill] sm:$0xff]  ;;  %v13305_v37 = vld [vmem:[#allocation39_spill] sm:$0xff] }
 0x838   : > { %v7513_v8 = vadd.f32 %v12259_v34, %v7475_v19  ;;  %v7514_v24 = vadd.f32 %v12268_v20, %v7476_v17  ;;  %v7515_v42 = vadd.f32 %v7489_v60, %v12168_v30  ;;  %v7516_v39 = vadd.f32 %v7490_v28, %v12171_v31  ;;  %v13304_v56 = vld [vmem:[#allocation42_spill] sm:$0xff]  ;;  %v13306_v17 = vld [vmem:[#allocation40_spill] sm:$0xff]  ;;  %v13307_v28 = vld [vmem:[#allocation11_spill] sm:$0xff] }
 0x839   : > { %v7517_v2 = vadd.f32 %v7491_v9, %v12174_v52  ;;  %v7518_v1 = vadd.f32 %v7492_v10, %v12177_v22  ;;  %v7519_v58 = vadd.f32 %v7493_v5, %v12180_v57  ;;  %v7520_v6 = vadd.f32 %v7494_v25, %v12183_v61  ;;  %v13294_v22 = vld [vmem:[#allocation29_spill] sm:$0xff]  ;;  %v13295_v57 = vld [vmem:[#allocation27_spill] sm:$0xff]  ;;  %v13308_v10 = vld [vmem:[#allocation12_spill] sm:$0xff] }
 0x83a   : > { %v7521_v33 = vadd.f32 %v7495_v15, %v12186_v3  ;;  %v7522_v53 = vadd.f32 %v7496_v36, %v12189_v43  ;;  %v7523_v34 = vadd.f32 %v7497_v26, %v12192_v29  ;;  %v7524_v20 = vadd.f32 %v7498_v21, %v12195_v32  ;;  %v13296_v61 = vld [vmem:[#allocation35_spill] sm:$0xff]  ;;  %v13309_v25 = vld [vmem:[#allocation13_spill] sm:$0xff]  ;;  %v13310_v36 = vld [vmem:[#allocation14_spill] sm:$0xff] }
 0x83b   : > { %v7525_v30 = vadd.f32 %v7499_v27, %v12198_v50  ;;  %v7526_v31 = vadd.f32 %v7500_v48, %v12201_v40  ;;  %v7527_v52 = vadd.f32 %v7501_v55, %v12204_v14  ;;  %v7528_v45 = vadd.f32 %v7502_v23, %v13294_v22  ;;  %v13303_v14 = vld [vmem:[#allocation20_spill] sm:$0xff]  ;;  %v13311_v21 = vld [vmem:[#allocation15_spill] sm:$0xff]  ;;  %v13313_v23 = vld [vmem:[#allocation17_spill] sm:$0xff] }
 0x83c   : > { %v7529_v46 = vadd.f32 %v7503_v38, %v13295_v57  ;;  %v7530_v44 = vadd.f32 %v7504_v59, %v13296_v61  ;;  %v7531_v3 = vadd.f32 %v7505_v63, %v13297_v11  ;;  %v7532_v43 = vadd.f32 %v7506_v7, %v13298_v18  ;;  %v13312_v48 = vld [vmem:[#allocation16_spill] sm:$0xff]  ;;  %v13314_v59 = vld [vmem:[#allocation18_spill] sm:$0xff]  ;;  %v13315_v7 = vld [vmem:[#allocation19_spill] sm:$0xff] }
 0x83d   : > { %v7533_v29 = vadd.f32 %v7507_v62, %v13299_v0  ;;  %v7534_v32 = vadd.f32 %v7508_v16, %v13300_v13  ;;  %v7535_v50 = vadd.f32 %v7509_v12, %v13301_v41  ;;  %v7536_v40 = vadd.f32 %v7510_v51, %v13302_v54  ;;  %v13316_v16 = vld [vmem:[#allocation21_spill] sm:$0xff]  ;;  %v13317_v51 = vld [vmem:[#allocation22_spill] sm:$0xff]  ;;  %v13327_v57 = vld [vmem:[#allocation43_spill] sm:$0xff] }
 0x83e   : > { %v7537_v4 = vadd.f32 %v7511_v47, %v13303_v14  ;;  %v7538_v49 = vadd.f32 %v7512_v35, %v13304_v56  ;;  %v7539_v19 = vadd.f32 %v7513_v8, %v13305_v37  ;;  %v7540_v60 = vadd.f32 %v7514_v24, %v13306_v17  ;;  %v13318_v35 = vld [vmem:[#allocation24_spill] sm:$0xff]  ;;  %v13319_v24 = vld [vmem:[#allocation25_spill] sm:$0xff]  ;;  %v13326_v22 = vld [vmem:[#allocation34_spill] sm:$0xff] }
 0x83f   : > { %v7541_v9 = vmul.f32 %v13307_v28, %v7515_v42  ;;  %v7542_v5 = vmul.f32 %v13308_v10, %v7516_v39  ;;  %v7543_v15 = vmul.f32 %v13309_v25, %v7517_v2  ;;  %v7544_v26 = vmul.f32 %v13310_v36, %v7518_v1  ;;  %v13320_v39 = vld [vmem:[#allocation26_spill] sm:$0xff]  ;;  %v13321_v1 = vld [vmem:[#allocation28_spill] sm:$0xff]  ;;  %v13328_v61 = vld [vmem:[#allocation45_spill] sm:$0xff] }
 0x840   : > { %v7545_v27 = vmul.f32 %v13311_v21, %v7519_v58  ;;  %v7546_v55 = vmul.f32 %v13312_v48, %v7520_v6  ;;  %v7547_v38 = vmul.f32 %v13313_v23, %v7521_v33  ;;  %v7548_v63 = vmul.f32 %v13314_v59, %v7522_v53  ;;  %v13322_v6 = vld [vmem:[#allocation30_spill] sm:$0xff]  ;;  %v13323_v53 = vld [vmem:[#allocation31_spill] sm:$0xff]  ;;  %v13329_v11 = vld [vmem:[#allocation49_spill] sm:$0xff] }
 0x841   : > { %v7549_v62 = vmul.f32 %v13315_v7, %v7523_v34  ;;  %v7550_v12 = vmul.f32 %v13316_v16, %v7524_v20  ;;  %v7551_v47 = vmul.f32 %v13317_v51, %v7525_v30  ;;  %v7552_v8 = vmul.f32 %v13318_v35, %v7526_v31  ;;  %7567 = vst [vmem:[%s12394_s27] sm:$0xff] %v7541_v9  ;;  %v13324_v20 = vld [vmem:[#allocation32_spill] sm:$0xff]  ;;  %v13325_v31 = vld [vmem:[#allocation33_spill] sm:$0xff]  ;;  %v13330_v18 = vld [vmem:[#allocation50_spill] sm:$0xff] }
 0x842   : > { %7568 = vst.msk [vmem:[%s12394_s27 + $0x8] sm:$0xff] %vm2885_vm13, %v7542_v5  ;;  %7569 = vst [vmem:[%s12394_s27 + $0x10] sm:$0xff] %v7543_v15  ;;  %v7553_v42 = vmul.f32 %v13319_v24, %v7527_v52  ;;  %v7554_v2 = vmul.f32 %v13320_v39, %v7528_v45  ;;  %v7555_v58 = vmul.f32 %v13321_v1, %v7529_v46  ;;  %v13331_v0 = vld [vmem:[#allocation51_spill] sm:$0xff]  ;;  %v13332_v13 = vld [vmem:[#allocation56_spill] sm:$0xff] }
 0x843   : > { %7570 = vst.msk [vmem:[%s12394_s27 + $0x18] sm:$0xff] %vm2885_vm13, %v7544_v26  ;;  %v7556_v33 = vmul.f32 %v13322_v6, %v7530_v44  ;;  %7571 = vst [vmem:[%s12394_s27 + $0x20] sm:$0xff] %v7545_v27  ;;  %v7557_v34 = vmul.f32 %v13323_v53, %v7531_v3  ;;  %v7558_v30 = vmul.f32 %v13324_v20, %v7532_v43 }
 0x844   : > { %7572 = vst.msk [vmem:[%s12394_s27 + $0x28] sm:$0xff] %vm2885_vm13, %v7546_v55  ;;  %7573 = vst [vmem:[%s12394_s27 + $0x30] sm:$0xff] %v7547_v38  ;;  %v7559_v52 = vmul.f32 %v13325_v31, %v7533_v29  ;;  %v7560_v45 = vmul.f32 %v13326_v22, %v7534_v32  ;;  %v7561_v46 = vmul.f32 %v13327_v57, %v7535_v50 }
 0x845   : > { %7574 = vst.msk [vmem:[%s12394_s27 + $0x38] sm:$0xff] %vm2885_vm13, %v7548_v63  ;;  %7575 = vst [vmem:[%s12394_s27 + $0x40] sm:$0xff] %v7549_v62  ;;  %v7562_v44 = vmul.f32 %v13328_v61, %v7536_v40  ;;  %v7563_v3 = vmul.f32 %v13329_v11, %v7537_v4  ;;  %v7564_v43 = vmul.f32 %v13330_v18, %v7538_v49 }
 0x846   : > { %7576 = vst.msk [vmem:[%s12394_s27 + $0x48] sm:$0xff] %vm2885_vm13, %v7550_v12  ;;  %7577 = vst [vmem:[%s12394_s27 + $0x50] sm:$0xff] %v7551_v47  ;;  %v7565_v29 = vmul.f32 %v13331_v0, %v7539_v19  ;;  %v7566_v32 = vmul.f32 %v13332_v13, %v7540_v60 }
 0x847   : > { %7578 = vst.msk [vmem:[%s12394_s27 + $0x58] sm:$0xff] %vm2885_vm13, %v7552_v8  ;;  %7579 = vst [vmem:[%s12394_s27 + $0x60] sm:$0xff] %v7553_v42 }
 0x848   : > { %7580 = vst.msk [vmem:[%s12394_s27 + $0x68] sm:$0xff] %vm2885_vm13, %v7554_v2  ;;  %7581 = vst [vmem:[%s12394_s27 + $0x70] sm:$0xff] %v7555_v58 }
 0x849   : > { %7582 = vst.msk [vmem:[%s12394_s27 + $0x78] sm:$0xff] %vm2885_vm13, %v7556_v33  ;;  %7583 = vst [vmem:[%s12394_s27 + $0x80] sm:$0xff] %v7557_v34 }
 0x84a   : > { %7584 = vst.msk [vmem:[%s12394_s27 + $0x88] sm:$0xff] %vm2885_vm13, %v7558_v30  ;;  %7585 = vst [vmem:[%s12394_s27 + $0x90] sm:$0xff] %v7559_v52 }
 0x84b   : > { %7586 = vst.msk [vmem:[%s12394_s27 + $0x98] sm:$0xff] %vm2885_vm13, %v7560_v45  ;;  %7587 = vst [vmem:[%s12394_s27 + $0xa0] sm:$0xff] %v7561_v46 }
 0x84c   : > { %7588 = vst.msk [vmem:[%s12394_s27 + $0xa8] sm:$0xff] %vm2885_vm13, %v7562_v44  ;;  %7589 = vst [vmem:[%s12394_s27 + $0xb0] sm:$0xff] %v7563_v3 }
 0x84d   : > { %7590 = vst.msk [vmem:[%s12394_s27 + $0xb8] sm:$0xff] %vm2885_vm13, %v7564_v43  ;;  %7591 = vst [vmem:[%s12394_s27 + $0xc0] sm:$0xf] %v7565_v29 }
 0x84e   : > { %7592 = vst.msk [vmem:[%s12394_s27 + $0xc8] sm:$0xf] %vm2923_vm8, %v7566_v32 }
 0x84f PF: > { %s25_s25 = sadd.s32 1, %s9206_s25  }
 0x850   : > { %p22_p5 = scmp.ge.s32.totalorder %s25_s25, 4  }
 0x852   :  { %24 = sbr.rel (!%p22_p5) target bundleno = 2 (0x2), region = 127 }
 0x859   :  { %7614 = vsyncpa [#allocation4], 1 }
 0x85a   :  { %7616 = vsyncpa [#allocation4 + $0x1], 1 }
 0x85b   :  { %7617 = vsyncpa [#allocation6], 1 }

</bundles_post_ra>
